<compile_context>
chip_gen: v5e
topology: v5e:2x2
jax: 0.10.0
libtpu: 0.0.40
codegen_flags: <defaults>
</compile_context>

<pallas_src>
import numpy as np
import jax
import jax.numpy as jnp
from jax import lax
from jax.experimental import pallas as pl
from jax.experimental.pallas import tpu as pltpu


def _round_up(v, m):
    return ((v + m - 1) // m) * m


def _layer_dims(params, H, W):
    """Static per-layer geometry (flat, sublane-aligned padded planes)."""
    dims = []
    h, w = H, W
    for p in params:
        k = int(p["w"].shape[0])
        ci = int(p["w"].shape[2])
        co = int(p["w"].shape[3])
        pool = bool(p["pool"])
        pad = (k - 1) // 2
        hp = h + 2 * pad
        wp = _round_up(w + 2 * pad, 8)          # aligned row pitch
        ho, wo = (h // 2, w // 2) if pool else (h, w)
        dims.append(dict(H=h, W=w, K=k, Ci=ci, Co=co, Ho=ho, Wo=wo, pad=pad,
                         Hp=hp, Wp=wp, R=hp * wp, L=(h - 1) * wp + w, pool=pool))
        h, w = ho, wo
    return dims


def _make_encoder_kernel(dims, B):
    n = len(dims)
    d_last = dims[-1]
    assert dims[0]["pool"], "first block must pool (architecture invariant)"
    assert (not d_last["pool"]) and d_last["H"] == 1 and d_last["W"] == 1, (
        "fused kernel assumes the last conv sees a 1x1 map "
        "(true for the 16x16 inputs this encoder is used with)")

    def kernel(*refs):
        p0_ref = refs[0]
        w_refs = [refs[1 + 3 * i] for i in range(n)]
        sc_refs = [refs[2 + 3 * i] for i in range(n)]
        sf_refs = [refs[3 + 3 * i] for i in range(n)]
        out_ref = refs[1 + 3 * n]
        scr = list(refs[2 + 3 * n:])
        planes = scr[:n - 2]        # padded input planes for layers 1..n-2 (bf16)
        cols = scr[n - 2:]          # im2col staging buffers for layers 1..n-2 (bf16)

        # ============ Layer 0: wrapper-built im2col, one MXU matmul ============
        d0, d1 = dims[0], dims[1]
        HW0 = d0["H"] * d0["W"]
        P0 = d0["Ho"] * d0["Wo"]
        y0 = jnp.dot(p0_ref[...], w_refs[0][...],
                     preferred_element_type=jnp.float32)          # (B*HW0, Co0)
        y0 = jnp.maximum(y0 * sc_refs[0][...] + sf_refs[0][...], 0.0)

        # Patch rows are in quadrant order ((h%2,w%2) major, (h//2,w//2) minor):
        # 2x2 max-pool = 3 full-width maxes + Ho row stores per sample.
        planes[0][...] = jnp.zeros(planes[0].shape, planes[0].dtype)
        for b in range(B):
            yb = y0[b * HW0:(b + 1) * HW0, :]
            pooled = jnp.maximum(
                jnp.maximum(yb[0 * P0:1 * P0, :], yb[1 * P0:2 * P0, :]),
                jnp.maximum(yb[2 * P0:3 * P0, :], yb[3 * P0:4 * P0, :]),
            ).astype(planes[0].dtype)                              # (Ho0*Wo0, Co0)
            for ho in range(d0["Ho"]):
                dst = b * d1["R"] + (d1["pad"] + ho) * d1["Wp"] + d1["pad"]
                planes[0][dst:dst + d0["Wo"], :] = \
                    pooled[ho * d0["Wo"]:(ho + 1) * d0["Wo"], :]

        # ======= Layers 1..n-2: in-kernel im2col -> one matmul -> pool =======
        feat = [None] * B           # (1, 512) feature feeding the last conv
        for i in range(1, n - 1):
            d, dn = dims[i], dims[i + 1]
            K, Ci = d["K"], d["Ci"]
            W_, Wp, L, R = d["W"], d["Wp"], d["L"], d["R"]
            pln, col = planes[i - 1], cols[i - 1]

            # fold the K*K taps into the contraction dim: cols is (B*L, K*K*Ci)
            for b in range(B):
                for kh in range(K):
                    for kw in range(K):
                        t = kh * K + kw
                        src = b * R + kh * Wp + kw
                        col[b * L:(b + 1) * L, t * Ci:(t + 1) * Ci] = \
                            pln[src:src + L, :]
            y = jnp.dot(col[...], w_refs[i][...],
                        preferred_element_type=jnp.float32)        # (B*L, Co)
            y = jnp.maximum(y * sc_refs[i][...] + sf_refs[i][...], 0.0)

            last_pool = (i == n - 2)
            if not last_pool:
                # interior is fully rewritten by the pool stores; plane <= 24 KB
                planes[i][...] = jnp.zeros(planes[i].shape, planes[i].dtype)
            for b in range(B):
                for ho in range(d["Ho"]):
                    r0 = b * L + (2 * ho) * Wp
                    r1 = b * L + (2 * ho + 1) * Wp
                    m = jnp.maximum(y[r0:r0 + W_, :], y[r1:r1 + W_, :])  # (W, Co)
                    for wo in range(d["Wo"]):
                        px = jnp.maximum(m[2 * wo:2 * wo + 1, :],
                                         m[2 * wo + 1:2 * wo + 2, :])    # (1, Co)
                        if last_pool:
                            feat[b] = px
                        else:
                            dst = (b * dn["R"] + (dn["pad"] + ho) * dn["Wp"]
                                   + dn["pad"] + wo)
                            planes[i][dst:dst + 1, :] = px.astype(planes[i].dtype)

        # ==== Last layer: 1x1 map + 'same' 3x3 conv == center-tap matmul only ====
        for b in range(B):
            f = feat[b].astype(w_refs[-1].dtype)                   # (1, 512) bf16
            o = jnp.dot(f, w_refs[-1][...], preferred_element_type=jnp.float32)
            o = jnp.maximum(o * sc_refs[-1][...] + sf_refs[-1][...], 0.0)
            out_ref[b, 0, :, :] = o.astype(out_ref.dtype)

    return kernel


def encoder_cnn_pallas(x_nchw, params):
    """Fused 5-block encoder forward as a single pallas_call (grid over batch)."""
    x = jnp.transpose(x_nchw, (0, 2, 3, 1)).astype(jnp.float32)    # NCHW -> NHWC
    N, H, W, Cin = x.shape
    dims = _layer_dims(params, H, W)
    n = len(dims)
    Cout = dims[-1]["Co"]

    # Sub-batch B samples per grid step into the matmul M dimension, keeping
    # grid = N/B >= 2 so both v7x TensorCores get work.
    B = 1
    for cand in (8, 4, 2):
        if N % cand == 0 and N // cand >= 2:
            B = cand
            break

    # ---- layer-0 im2col in the wrapper (XLA side), quadrant row ordering, bf16
    d0 = dims[0]
    K0, pad0 = d0["K"], d0["pad"]
    KKC = K0 * K0 * Cin
    xp = jnp.pad(x, ((0, 0), (pad0, pad0), (pad0, pad0), (0, 0)))
    taps = [xp[:, kh:kh + H, kw:kw + W, :]
            for kh in range(K0) for kw in range(K0)]
    patches = jnp.concatenate(taps, axis=-1)                       # (N,H,W,K*K*Cin)
    patches = patches.reshape(N, H // 2, 2, W // 2, 2, KKC)
    patches = patches.transpose(0, 2, 4, 1, 3, 5)                  # (N,h%2,w%2,ho,wo,.)
    patches = patches.reshape(N * H * W, KKC).astype(jnp.bfloat16)

    inputs = [patches]
    in_specs = [pl.BlockSpec((B * H * W, KKC), lambda g: (g, 0))]
    for i, (p, d) in enumerate(zip(params, dims)):
        K, Ci, Co = d["K"], d["Ci"], d["Co"]
        if i == n - 1:
            wk = p["w"][K // 2, K // 2]            # 1x1 map: only center tap sees data
        else:
            wk = p["w"].reshape(K * K * Ci, Co)    # (kh, kw, ci) contraction order
        wk = wk.astype(jnp.bfloat16)               # bf16 MXU inputs, f32 accumulate
        inputs += [wk,
                   p["scale"].reshape(1, Co).astype(jnp.float32),
                   p["shift"].reshape(1, Co).astype(jnp.float32)]
        in_specs += [pl.BlockSpec(wk.shape, lambda g: (0, 0)),
                     pl.BlockSpec((1, Co), lambda g: (0, 0)),
                     pl.BlockSpec((1, Co), lambda g: (0, 0))]

    out_shape = jax.ShapeDtypeStruct((N, 1, 1, Cout), jnp.float32)
    out_spec = pl.BlockSpec((B, 1, 1, Cout), lambda g: (g, 0, 0, 0))

    # Padded activation planes + im2col column buffers for layers 1..n-2 (bf16).
    scratch = (
        [pltpu.VMEM((B * dims[i]["R"], dims[i]["Ci"]), jnp.bfloat16)
         for i in range(1, n - 1)] +
        [pltpu.VMEM((B * dims[i]["L"], dims[i]["K"] ** 2 * dims[i]["Ci"]),
                    jnp.bfloat16)
         for i in range(1, n - 1)])

    flops = 0
    for i, d in enumerate(dims):
        taps_i = 1 if i == n - 1 else d["K"] ** 2
        flops += 2 * N * d["H"] * d["W"] * taps_i * d["Ci"] * d["Co"]
    bytes_accessed = int(sum(int(np.prod(a.shape)) * a.dtype.itemsize
                             for a in inputs) + N * Cout * 4)

    out = pl.pallas_call(
        _make_encoder_kernel(dims, B),
        out_shape=out_shape,
        grid_spec=pltpu.PrefetchScalarGridSpec(
            num_scalar_prefetch=0,
            grid=(N // B,),
            in_specs=in_specs,
            out_specs=out_spec,
            scratch_shapes=scratch),
        compiler_params=pltpu.CompilerParams(
            dimension_semantics=("parallel",),
            vmem_limit_bytes=32 * 1024 * 1024),
        cost_estimate=pl.CostEstimate(flops=int(flops), transcendentals=0,
                                      bytes_accessed=bytes_accessed),
    )(*inputs)
    return jnp.transpose(out, (0, 3, 1, 2))                        # NHWC -> NCHW


def init_params(key, in_channels, out_channels):
    """Deterministic synthetic parameters matching the module's shapes."""
    channels = [in_channels, 64, 128, 256, 512, out_channels]
    ksizes = [5, 3, 3, 3, 3]
    eps = 1e-5
    params = []
    for i in range(len(channels) - 1):
        ci, co, k = channels[i], channels[i + 1], ksizes[i]
        key, kw_, kg, kb, km, kv = jax.random.split(key, 6)
        fan_in = ci * k * k
        w = jax.random.normal(kw_, (k, k, ci, co), jnp.float32) * np.sqrt(2.0 / fan_in)
        gamma = 1.0 + 0.1 * jax.random.normal(kg, (co,), jnp.float32)
        beta = 0.1 * jax.random.normal(kb, (co,), jnp.float32)
        rmean = 0.05 * jax.random.normal(km, (co,), jnp.float32)
        rvar = jax.random.uniform(kv, (co,), jnp.float32, minval=0.5, maxval=1.5)
        scale = gamma / jnp.sqrt(rvar + eps)
        shift = beta - rmean * scale
        params.append(dict(w=w, scale=scale, shift=shift, k=k,
                           pool=(i < len(channels) - 2)))
    return params


def encoder_cnn_ref(x_nchw, params):
    """Pure-JAX f32 reference (same eval-mode semantics) for validation."""
    x = jnp.transpose(x_nchw, (0, 2, 3, 1))
    for p in params:
        pad = (p["k"] - 1) // 2
        y = lax.conv_general_dilated(
            x, p["w"], window_strides=(1, 1),
            padding=((pad, pad), (pad, pad)),
            dimension_numbers=("NHWC", "HWIO", "NHWC"))
        y = jnp.maximum(y * p["scale"] + p["shift"], 0.0)
        if p["pool"]:
            y = lax.reduce_window(y, -jnp.inf, lax.max,
                                  (1, 2, 2, 1), (1, 2, 2, 1), "VALID")
        x = y
    return jnp.transpose(x, (0, 3, 1, 2))


if __name__ == "__main__":
    key = jax.random.PRNGKey(0)
    kx, kp = jax.random.split(key)

    N, in_channels, H, W = 2, 4, 16, 16
    out_channels = 32
    x = jax.random.normal(kx, (N, in_channels, H, W), jnp.float32)

    params = init_params(kp, in_channels, out_channels)

    out = encoder_cnn_pallas(x, params)
    out = jax.block_until_ready(out)

    ref = jax.block_until_ready(encoder_cnn_ref(x, params))
    assert out.shape == (N, out_channels, 1, 1), out.shape
    # bf16 MXU inputs with f32 accumulation: tolerance widened accordingly.
    assert np.allclose(np.asarray(out), np.asarray(ref), rtol=3e-2, atol=3e-2), (
        "mismatch vs reference")

    print("KERNEL_OK")
</pallas_src>

<mosaic_0001>
module attributes {stable_mosaic.version = 11 : i64} {
  func.func @kernel(%arg0: i32, %arg1: memref<256x100xbf16, #tpu.memory_space<vmem>>, %arg2: memref<100x64xbf16, #tpu.memory_space<vmem>>, %arg3: memref<1x64xf32, #tpu.memory_space<vmem>>, %arg4: memref<1x64xf32, #tpu.memory_space<vmem>>, %arg5: memref<576x128xbf16, #tpu.memory_space<vmem>>, %arg6: memref<1x128xf32, #tpu.memory_space<vmem>>, %arg7: memref<1x128xf32, #tpu.memory_space<vmem>>, %arg8: memref<1152x256xbf16, #tpu.memory_space<vmem>>, %arg9: memref<1x256xf32, #tpu.memory_space<vmem>>, %arg10: memref<1x256xf32, #tpu.memory_space<vmem>>, %arg11: memref<2304x512xbf16, #tpu.memory_space<vmem>>, %arg12: memref<1x512xf32, #tpu.memory_space<vmem>>, %arg13: memref<1x512xf32, #tpu.memory_space<vmem>>, %arg14: memref<512x32xbf16, #tpu.memory_space<vmem>>, %arg15: memref<1x32xf32, #tpu.memory_space<vmem>>, %arg16: memref<1x32xf32, #tpu.memory_space<vmem>>, %arg17: memref<1x1x1x32xf32, #tpu.memory_space<vmem>>, %arg18: memref<160x64xbf16, #tpu.memory_space<vmem>>, %arg19: memref<48x128xbf16, #tpu.memory_space<vmem>>, %arg20: memref<32x256xbf16, #tpu.memory_space<vmem>>, %arg21: memref<120x576xbf16, #tpu.memory_space<vmem>>, %arg22: memref<28x1152xbf16, #tpu.memory_space<vmem>>, %arg23: memref<10x2304xbf16, #tpu.memory_space<vmem>>) attributes {dimension_semantics = [#tpu.dimension_semantics<parallel>], iteration_bounds = array<i64: 2>, scalar_prefetch = 0 : i64, scratch_operands = 6 : i64, tpu.core_type = #tpu.core_type<tc>, window_params = [{transform_indices = @transform_0, window_bounds = array<i64: 256, 100>}, {pipeline_mode = #tpu.pipeline_mode<synchronous>, transform_indices = @transform_1, window_bounds = array<i64: 100, 64>}, {pipeline_mode = #tpu.pipeline_mode<synchronous>, transform_indices = @transform_2, window_bounds = array<i64: 1, 64>}, {pipeline_mode = #tpu.pipeline_mode<synchronous>, transform_indices = @transform_3, window_bounds = array<i64: 1, 64>}, {pipeline_mode = #tpu.pipeline_mode<synchronous>, transform_indices = @transform_4, window_bounds = array<i64: 576, 128>}, {pipeline_mode = #tpu.pipeline_mode<synchronous>, transform_indices = @transform_5, window_bounds = array<i64: 1, 128>}, {pipeline_mode = #tpu.pipeline_mode<synchronous>, transform_indices = @transform_6, window_bounds = array<i64: 1, 128>}, {pipeline_mode = #tpu.pipeline_mode<synchronous>, transform_indices = @transform_7, window_bounds = array<i64: 1152, 256>}, {pipeline_mode = #tpu.pipeline_mode<synchronous>, transform_indices = @transform_8, window_bounds = array<i64: 1, 256>}, {pipeline_mode = #tpu.pipeline_mode<synchronous>, transform_indices = @transform_9, window_bounds = array<i64: 1, 256>}, {pipeline_mode = #tpu.pipeline_mode<synchronous>, transform_indices = @transform_10, window_bounds = array<i64: 2304, 512>}, {pipeline_mode = #tpu.pipeline_mode<synchronous>, transform_indices = @transform_11, window_bounds = array<i64: 1, 512>}, {pipeline_mode = #tpu.pipeline_mode<synchronous>, transform_indices = @transform_12, window_bounds = array<i64: 1, 512>}, {pipeline_mode = #tpu.pipeline_mode<synchronous>, transform_indices = @transform_13, window_bounds = array<i64: 512, 32>}, {pipeline_mode = #tpu.pipeline_mode<synchronous>, transform_indices = @transform_14, window_bounds = array<i64: 1, 32>}, {pipeline_mode = #tpu.pipeline_mode<synchronous>, transform_indices = @transform_15, window_bounds = array<i64: 1, 32>}, {transform_indices = @transform_16, window_bounds = array<i64: 1, 1, 1, 32>}]} {
    %c0 = arith.constant 0 : index
    %c0_0 = arith.constant 0 : index
    %0 = vector.load %arg1[%c0, %c0_0] : memref<256x100xbf16, #tpu.memory_space<vmem>>, vector<256x100xbf16>
    %c0_1 = arith.constant 0 : index
    %c0_2 = arith.constant 0 : index
    %1 = vector.load %arg2[%c0_1, %c0_2] : memref<100x64xbf16, #tpu.memory_space<vmem>>, vector<100x64xbf16>
    %cst = arith.constant dense<0.000000e+00> : vector<256x64xf32>
    %2 = tpu.matmul %0, %1, %cst {dimension_numbers = #tpu.dot_dimension_numbers<[1], [0], [0], [1], [0, 0, 1, 1], [], []>} : vector<256x100xbf16>, vector<100x64xbf16>, vector<256x64xf32> -> vector<256x64xf32>
    %c0_3 = arith.constant 0 : index
    %c0_4 = arith.constant 0 : index
    %3 = vector.load %arg3[%c0_3, %c0_4] : memref<1x64xf32, #tpu.memory_space<vmem>>, vector<1x64xf32>
    %4 = vector.broadcast %3 : vector<1x64xf32> to vector<256x64xf32>
    %5 = arith.mulf %2, %4 : vector<256x64xf32>
    %c0_5 = arith.constant 0 : index
    %c0_6 = arith.constant 0 : index
    %6 = vector.load %arg4[%c0_5, %c0_6] : memref<1x64xf32, #tpu.memory_space<vmem>>, vector<1x64xf32>
    %7 = vector.broadcast %6 : vector<1x64xf32> to vector<256x64xf32>
    %8 = arith.addf %5, %7 : vector<256x64xf32>
    %cst_7 = arith.constant 0.000000e+00 : f32
    %9 = vector.broadcast %cst_7 : f32 to vector<256x64xf32>
    %10 = arith.maximumf %8, %9 : vector<256x64xf32>
    %cst_8 = arith.constant 0.000000e+00 : bf16
    %11 = vector.broadcast %cst_8 : bf16 to vector<160x64xbf16>
    %c0_9 = arith.constant 0 : index
    %c0_10 = arith.constant 0 : index
    %12 = vector.load %arg18[%c0_9, %c0_10] : memref<160x64xbf16, #tpu.memory_space<vmem>>, vector<160x64xbf16>
    tpu.vector_store %arg18[%c0_9, %c0_10], %11 {strides = array<i32>} : memref<160x64xbf16, #tpu.memory_space<vmem>>, vector<160x64xbf16>,
    %13 = vector.extract_strided_slice %10 {offsets = [0, 0], sizes = [64, 64], strides = [1, 1]} : vector<256x64xf32> to vector<64x64xf32>
    %14 = vector.extract_strided_slice %10 {offsets = [64, 0], sizes = [64, 64], strides = [1, 1]} : vector<256x64xf32> to vector<64x64xf32>
    %15 = arith.maximumf %13, %14 : vector<64x64xf32>
    %16 = vector.extract_strided_slice %10 {offsets = [128, 0], sizes = [64, 64], strides = [1, 1]} : vector<256x64xf32> to vector<64x64xf32>
    %17 = vector.extract_strided_slice %10 {offsets = [192, 0], sizes = [64, 64], strides = [1, 1]} : vector<256x64xf32> to vector<64x64xf32>
    %18 = arith.maximumf %16, %17 : vector<64x64xf32>
    %19 = arith.maximumf %15, %18 : vector<64x64xf32>
    %20 = arith.truncf %19 : vector<64x64xf32> to vector<64x64xbf16>
    %21 = vector.extract_strided_slice %20 {offsets = [0, 0], sizes = [8, 64], strides = [1, 1]} : vector<64x64xbf16> to vector<8x64xbf16>
    %c17 = arith.constant 17 : index
    %c0_11 = arith.constant 0 : index
    %22 = vector.load %arg18[%c17, %c0_11] : memref<160x64xbf16, #tpu.memory_space<vmem>>, vector<8x64xbf16>
    tpu.vector_store %arg18[%c17, %c0_11], %21 {strides = array<i32>} : memref<160x64xbf16, #tpu.memory_space<vmem>>, vector<8x64xbf16>,
    %23 = vector.extract_strided_slice %20 {offsets = [8, 0], sizes = [8, 64], strides = [1, 1]} : vector<64x64xbf16> to vector<8x64xbf16>
    %c33 = arith.constant 33 : index
    %c0_12 = arith.constant 0 : index
    %24 = vector.load %arg18[%c33, %c0_12] : memref<160x64xbf16, #tpu.memory_space<vmem>>, vector<8x64xbf16>
    tpu.vector_store %arg18[%c33, %c0_12], %23 {strides = array<i32>} : memref<160x64xbf16, #tpu.memory_space<vmem>>, vector<8x64xbf16>,
    %25 = vector.extract_strided_slice %20 {offsets = [16, 0], sizes = [8, 64], strides = [1, 1]} : vector<64x64xbf16> to vector<8x64xbf16>
    %c49 = arith.constant 49 : index
    %c0_13 = arith.constant 0 : index
    %26 = vector.load %arg18[%c49, %c0_13] : memref<160x64xbf16, #tpu.memory_space<vmem>>, vector<8x64xbf16>
    tpu.vector_store %arg18[%c49, %c0_13], %25 {strides = array<i32>} : memref<160x64xbf16, #tpu.memory_space<vmem>>, vector<8x64xbf16>,
    %27 = vector.extract_strided_slice %20 {offsets = [24, 0], sizes = [8, 64], strides = [1, 1]} : vector<64x64xbf16> to vector<8x64xbf16>
    %c65 = arith.constant 65 : index
    %c0_14 = arith.constant 0 : index
    %28 = vector.load %arg18[%c65, %c0_14] : memref<160x64xbf16, #tpu.memory_space<vmem>>, vector<8x64xbf16>
    tpu.vector_store %arg18[%c65, %c0_14], %27 {strides = array<i32>} : memref<160x64xbf16, #tpu.memory_space<vmem>>, vector<8x64xbf16>,
    %29 = vector.extract_strided_slice %20 {offsets = [32, 0], sizes = [8, 64], strides = [1, 1]} : vector<64x64xbf16> to vector<8x64xbf16>
    %c81 = arith.constant 81 : index
    %c0_15 = arith.constant 0 : index
    %30 = vector.load %arg18[%c81, %c0_15] : memref<160x64xbf16, #tpu.memory_space<vmem>>, vector<8x64xbf16>
    tpu.vector_store %arg18[%c81, %c0_15], %29 {strides = array<i32>} : memref<160x64xbf16, #tpu.memory_space<vmem>>, vector<8x64xbf16>,
    %31 = vector.extract_strided_slice %20 {offsets = [40, 0], sizes = [8, 64], strides = [1, 1]} : vector<64x64xbf16> to vector<8x64xbf16>
    %c97 = arith.constant 97 : index
    %c0_16 = arith.constant 0 : index
    %32 = vector.load %arg18[%c97, %c0_16] : memref<160x64xbf16, #tpu.memory_space<vmem>>, vector<8x64xbf16>
    tpu.vector_store %arg18[%c97, %c0_16], %31 {strides = array<i32>} : memref<160x64xbf16, #tpu.memory_space<vmem>>, vector<8x64xbf16>,
    %33 = vector.extract_strided_slice %20 {offsets = [48, 0], sizes = [8, 64], strides = [1, 1]} : vector<64x64xbf16> to vector<8x64xbf16>
    %c113 = arith.constant 113 : index
    %c0_17 = arith.constant 0 : index
    %34 = vector.load %arg18[%c113, %c0_17] : memref<160x64xbf16, #tpu.memory_space<vmem>>, vector<8x64xbf16>
    tpu.vector_store %arg18[%c113, %c0_17], %33 {strides = array<i32>} : memref<160x64xbf16, #tpu.memory_space<vmem>>, vector<8x64xbf16>,
    %35 = vector.extract_strided_slice %20 {offsets = [56, 0], sizes = [8, 64], strides = [1, 1]} : vector<64x64xbf16> to vector<8x64xbf16>
    %c129 = arith.constant 129 : index
    %c0_18 = arith.constant 0 : index
    %36 = vector.load %arg18[%c129, %c0_18] : memref<160x64xbf16, #tpu.memory_space<vmem>>, vector<8x64xbf16>
    tpu.vector_store %arg18[%c129, %c0_18], %35 {strides = array<i32>} : memref<160x64xbf16, #tpu.memory_space<vmem>>, vector<8x64xbf16>,
    %c0_19 = arith.constant 0 : index
    %c0_20 = arith.constant 0 : index
    %37 = vector.load %arg18[%c0_19, %c0_20] : memref<160x64xbf16, #tpu.memory_space<vmem>>, vector<120x64xbf16>
    %c0_21 = arith.constant 0 : index
    %c0_22 = arith.constant 0 : index
    %38 = vector.load %arg21[%c0_21, %c0_22] : memref<120x576xbf16, #tpu.memory_space<vmem>>, vector<120x64xbf16>
    tpu.vector_store %arg21[%c0_21, %c0_22], %37 {strides = array<i32>} : memref<120x576xbf16, #tpu.memory_space<vmem>>, vector<120x64xbf16>,
    %c1 = arith.constant 1 : index
    %c0_23 = arith.constant 0 : index
    %39 = vector.load %arg18[%c1, %c0_23] : memref<160x64xbf16, #tpu.memory_space<vmem>>, vector<120x64xbf16>
    %c0_24 = arith.constant 0 : index
    %c64 = arith.constant 64 : index
    %40 = vector.load %arg21[%c0_24, %c64] : memref<120x576xbf16, #tpu.memory_space<vmem>>, vector<120x64xbf16>
    tpu.vector_store %arg21[%c0_24, %c64], %39 {strides = array<i32>} : memref<120x576xbf16, #tpu.memory_space<vmem>>, vector<120x64xbf16>,
    %c2 = arith.constant 2 : index
    %c0_25 = arith.constant 0 : index
    %41 = vector.load %arg18[%c2, %c0_25] : memref<160x64xbf16, #tpu.memory_space<vmem>>, vector<120x64xbf16>
    %c0_26 = arith.constant 0 : index
    %c128 = arith.constant 128 : index
    %42 = vector.load %arg21[%c0_26, %c128] : memref<120x576xbf16, #tpu.memory_space<vmem>>, vector<120x64xbf16>
    tpu.vector_store %arg21[%c0_26, %c128], %41 {strides = array<i32>} : memref<120x576xbf16, #tpu.memory_space<vmem>>, vector<120x64xbf16>,
    %c16 = arith.constant 16 : index
    %c0_27 = arith.constant 0 : index
    %43 = vector.load %arg18[%c16, %c0_27] : memref<160x64xbf16, #tpu.memory_space<vmem>>, vector<120x64xbf16>
    %c0_28 = arith.constant 0 : index
    %c192 = arith.constant 192 : index
    %44 = vector.load %arg21[%c0_28, %c192] : memref<120x576xbf16, #tpu.memory_space<vmem>>, vector<120x64xbf16>
    tpu.vector_store %arg21[%c0_28, %c192], %43 {strides = array<i32>} : memref<120x576xbf16, #tpu.memory_space<vmem>>, vector<120x64xbf16>,
    %c17_29 = arith.constant 17 : index
    %c0_30 = arith.constant 0 : index
    %45 = vector.load %arg18[%c17_29, %c0_30] : memref<160x64xbf16, #tpu.memory_space<vmem>>, vector<120x64xbf16>
    %c0_31 = arith.constant 0 : index
    %c256 = arith.constant 256 : index
    %46 = vector.load %arg21[%c0_31, %c256] : memref<120x576xbf16, #tpu.memory_space<vmem>>, vector<120x64xbf16>
    tpu.vector_store %arg21[%c0_31, %c256], %45 {strides = array<i32>} : memref<120x576xbf16, #tpu.memory_space<vmem>>, vector<120x64xbf16>,
    %c18 = arith.constant 18 : index
    %c0_32 = arith.constant 0 : index
    %47 = vector.load %arg18[%c18, %c0_32] : memref<160x64xbf16, #tpu.memory_space<vmem>>, vector<120x64xbf16>
    %c0_33 = arith.constant 0 : index
    %c320 = arith.constant 320 : index
    %48 = vector.load %arg21[%c0_33, %c320] : memref<120x576xbf16, #tpu.memory_space<vmem>>, vector<120x64xbf16>
    tpu.vector_store %arg21[%c0_33, %c320], %47 {strides = array<i32>} : memref<120x576xbf16, #tpu.memory_space<vmem>>, vector<120x64xbf16>,
    %c32 = arith.constant 32 : index
    %c0_34 = arith.constant 0 : index
    %49 = vector.load %arg18[%c32, %c0_34] : memref<160x64xbf16, #tpu.memory_space<vmem>>, vector<120x64xbf16>
    %c0_35 = arith.constant 0 : index
    %c384 = arith.constant 384 : index
    %50 = vector.load %arg21[%c0_35, %c384] : memref<120x576xbf16, #tpu.memory_space<vmem>>, vector<120x64xbf16>
    tpu.vector_store %arg21[%c0_35, %c384], %49 {strides = array<i32>} : memref<120x576xbf16, #tpu.memory_space<vmem>>, vector<120x64xbf16>,
    %c33_36 = arith.constant 33 : index
    %c0_37 = arith.constant 0 : index
    %51 = vector.load %arg18[%c33_36, %c0_37] : memref<160x64xbf16, #tpu.memory_space<vmem>>, vector<120x64xbf16>
    %c0_38 = arith.constant 0 : index
    %c448 = arith.constant 448 : index
    %52 = vector.load %arg21[%c0_38, %c448] : memref<120x576xbf16, #tpu.memory_space<vmem>>, vector<120x64xbf16>
    tpu.vector_store %arg21[%c0_38, %c448], %51 {strides = array<i32>} : memref<120x576xbf16, #tpu.memory_space<vmem>>, vector<120x64xbf16>,
    %c34 = arith.constant 34 : index
    %c0_39 = arith.constant 0 : index
    %53 = vector.load %arg18[%c34, %c0_39] : memref<160x64xbf16, #tpu.memory_space<vmem>>, vector<120x64xbf16>
    %c0_40 = arith.constant 0 : index
    %c512 = arith.constant 512 : index
    %54 = vector.load %arg21[%c0_40, %c512] : memref<120x576xbf16, #tpu.memory_space<vmem>>, vector<120x64xbf16>
    tpu.vector_store %arg21[%c0_40, %c512], %53 {strides = array<i32>} : memref<120x576xbf16, #tpu.memory_space<vmem>>, vector<120x64xbf16>,
    %c0_41 = arith.constant 0 : index
    %c0_42 = arith.constant 0 : index
    %55 = vector.load %arg21[%c0_41, %c0_42] : memref<120x576xbf16, #tpu.memory_space<vmem>>, vector<120x576xbf16>
    %c0_43 = arith.constant 0 : index
    %c0_44 = arith.constant 0 : index
    %56 = vector.load %arg5[%c0_43, %c0_44] : memref<576x128xbf16, #tpu.memory_space<vmem>>, vector<576x128xbf16>
    %cst_45 = arith.constant dense<0.000000e+00> : vector<120x128xf32>
    %57 = tpu.matmul %55, %56, %cst_45 {dimension_numbers = #tpu.dot_dimension_numbers<[1], [0], [0], [1], [0, 0, 1, 1], [], []>} : vector<120x576xbf16>, vector<576x128xbf16>, vector<120x128xf32> -> vector<120x128xf32>
    %c0_46 = arith.constant 0 : index
    %c0_47 = arith.constant 0 : index
    %58 = vector.load %arg6[%c0_46, %c0_47] : memref<1x128xf32, #tpu.memory_space<vmem>>, vector<1x128xf32>
    %59 = vector.broadcast %58 : vector<1x128xf32> to vector<120x128xf32>
    %60 = arith.mulf %57, %59 : vector<120x128xf32>
    %c0_48 = arith.constant 0 : index
    %c0_49 = arith.constant 0 : index
    %61 = vector.load %arg7[%c0_48, %c0_49] : memref<1x128xf32, #tpu.memory_space<vmem>>, vector<1x128xf32>
    %62 = vector.broadcast %61 : vector<1x128xf32> to vector<120x128xf32>
    %63 = arith.addf %60, %62 : vector<120x128xf32>
    %cst_50 = arith.constant 0.000000e+00 : f32
    %64 = vector.broadcast %cst_50 : f32 to vector<120x128xf32>
    %65 = arith.maximumf %63, %64 : vector<120x128xf32>
    %cst_51 = arith.constant 0.000000e+00 : bf16
    %66 = vector.broadcast %cst_51 : bf16 to vector<48x128xbf16>
    %c0_52 = arith.constant 0 : index
    %c0_53 = arith.constant 0 : index
    %67 = vector.load %arg19[%c0_52, %c0_53] : memref<48x128xbf16, #tpu.memory_space<vmem>>, vector<48x128xbf16>
    tpu.vector_store %arg19[%c0_52, %c0_53], %66 {strides = array<i32>} : memref<48x128xbf16, #tpu.memory_space<vmem>>, vector<48x128xbf16>,
    %68 = vector.extract_strided_slice %65 {offsets = [0, 0], sizes = [8, 128], strides = [1, 1]} : vector<120x128xf32> to vector<8x128xf32>
    %69 = vector.extract_strided_slice %65 {offsets = [16, 0], sizes = [8, 128], strides = [1, 1]} : vector<120x128xf32> to vector<8x128xf32>
    %70 = arith.maximumf %68, %69 : vector<8x128xf32>
    %71 = vector.extract_strided_slice %70 {offsets = [0, 0], sizes = [1, 128], strides = [1, 1]} : vector<8x128xf32> to vector<1x128xf32>
    %72 = vector.extract_strided_slice %70 {offsets = [1, 0], sizes = [1, 128], strides = [1, 1]} : vector<8x128xf32> to vector<1x128xf32>
    %73 = arith.maximumf %71, %72 : vector<1x128xf32>
    %74 = arith.truncf %73 : vector<1x128xf32> to vector<1x128xbf16>
    %c9 = arith.constant 9 : index
    %c0_54 = arith.constant 0 : index
    %75 = vector.load %arg19[%c9, %c0_54] : memref<48x128xbf16, #tpu.memory_space<vmem>>, vector<1x128xbf16>
    tpu.vector_store %arg19[%c9, %c0_54], %74 {strides = array<i32>} : memref<48x128xbf16, #tpu.memory_space<vmem>>, vector<1x128xbf16>,
    %76 = vector.extract_strided_slice %70 {offsets = [2, 0], sizes = [1, 128], strides = [1, 1]} : vector<8x128xf32> to vector<1x128xf32>
    %77 = vector.extract_strided_slice %70 {offsets = [3, 0], sizes = [1, 128], strides = [1, 1]} : vector<8x128xf32> to vector<1x128xf32>
    %78 = arith.maximumf %76, %77 : vector<1x128xf32>
    %79 = arith.truncf %78 : vector<1x128xf32> to vector<1x128xbf16>
    %c10 = arith.constant 10 : index
    %c0_55 = arith.constant 0 : index
    %80 = vector.load %arg19[%c10, %c0_55] : memref<48x128xbf16, #tpu.memory_space<vmem>>, vector<1x128xbf16>
    tpu.vector_store %arg19[%c10, %c0_55], %79 {strides = array<i32>} : memref<48x128xbf16, #tpu.memory_space<vmem>>, vector<1x128xbf16>,
    %81 = vector.extract_strided_slice %70 {offsets = [4, 0], sizes = [1, 128], strides = [1, 1]} : vector<8x128xf32> to vector<1x128xf32>
    %82 = vector.extract_strided_slice %70 {offsets = [5, 0], sizes = [1, 128], strides = [1, 1]} : vector<8x128xf32> to vector<1x128xf32>
    %83 = arith.maximumf %81, %82 : vector<1x128xf32>
    %84 = arith.truncf %83 : vector<1x128xf32> to vector<1x128xbf16>
    %c11 = arith.constant 11 : index
    %c0_56 = arith.constant 0 : index
    %85 = vector.load %arg19[%c11, %c0_56] : memref<48x128xbf16, #tpu.memory_space<vmem>>, vector<1x128xbf16>
    tpu.vector_store %arg19[%c11, %c0_56], %84 {strides = array<i32>} : memref<48x128xbf16, #tpu.memory_space<vmem>>, vector<1x128xbf16>,
    %86 = vector.extract_strided_slice %70 {offsets = [6, 0], sizes = [1, 128], strides = [1, 1]} : vector<8x128xf32> to vector<1x128xf32>
    %87 = vector.extract_strided_slice %70 {offsets = [7, 0], sizes = [1, 128], strides = [1, 1]} : vector<8x128xf32> to vector<1x128xf32>
    %88 = arith.maximumf %86, %87 : vector<1x128xf32>
    %89 = arith.truncf %88 : vector<1x128xf32> to vector<1x128xbf16>
    %c12 = arith.constant 12 : index
    %c0_57 = arith.constant 0 : index
    %90 = vector.load %arg19[%c12, %c0_57] : memref<48x128xbf16, #tpu.memory_space<vmem>>, vector<1x128xbf16>
    tpu.vector_store %arg19[%c12, %c0_57], %89 {strides = array<i32>} : memref<48x128xbf16, #tpu.memory_space<vmem>>, vector<1x128xbf16>,
    %91 = vector.extract_strided_slice %65 {offsets = [32, 0], sizes = [8, 128], strides = [1, 1]} : vector<120x128xf32> to vector<8x128xf32>
    %92 = vector.extract_strided_slice %65 {offsets = [48, 0], sizes = [8, 128], strides = [1, 1]} : vector<120x128xf32> to vector<8x128xf32>
    %93 = arith.maximumf %91, %92 : vector<8x128xf32>
    %94 = vector.extract_strided_slice %93 {offsets = [0, 0], sizes = [1, 128], strides = [1, 1]} : vector<8x128xf32> to vector<1x128xf32>
    %95 = vector.extract_strided_slice %93 {offsets = [1, 0], sizes = [1, 128], strides = [1, 1]} : vector<8x128xf32> to vector<1x128xf32>
    %96 = arith.maximumf %94, %95 : vector<1x128xf32>
    %97 = arith.truncf %96 : vector<1x128xf32> to vector<1x128xbf16>
    %c17_58 = arith.constant 17 : index
    %c0_59 = arith.constant 0 : index
    %98 = vector.load %arg19[%c17_58, %c0_59] : memref<48x128xbf16, #tpu.memory_space<vmem>>, vector<1x128xbf16>
    tpu.vector_store %arg19[%c17_58, %c0_59], %97 {strides = array<i32>} : memref<48x128xbf16, #tpu.memory_space<vmem>>, vector<1x128xbf16>,
    %99 = vector.extract_strided_slice %93 {offsets = [2, 0], sizes = [1, 128], strides = [1, 1]} : vector<8x128xf32> to vector<1x128xf32>
    %100 = vector.extract_strided_slice %93 {offsets = [3, 0], sizes = [1, 128], strides = [1, 1]} : vector<8x128xf32> to vector<1x128xf32>
    %101 = arith.maximumf %99, %100 : vector<1x128xf32>
    %102 = arith.truncf %101 : vector<1x128xf32> to vector<1x128xbf16>
    %c18_60 = arith.constant 18 : index
    %c0_61 = arith.constant 0 : index
    %103 = vector.load %arg19[%c18_60, %c0_61] : memref<48x128xbf16, #tpu.memory_space<vmem>>, vector<1x128xbf16>
    tpu.vector_store %arg19[%c18_60, %c0_61], %102 {strides = array<i32>} : memref<48x128xbf16, #tpu.memory_space<vmem>>, vector<1x128xbf16>,
    %104 = vector.extract_strided_slice %93 {offsets = [4, 0], sizes = [1, 128], strides = [1, 1]} : vector<8x128xf32> to vector<1x128xf32>
    %105 = vector.extract_strided_slice %93 {offsets = [5, 0], sizes = [1, 128], strides = [1, 1]} : vector<8x128xf32> to vector<1x128xf32>
    %106 = arith.maximumf %104, %105 : vector<1x128xf32>
    %107 = arith.truncf %106 : vector<1x128xf32> to vector<1x128xbf16>
    %c19 = arith.constant 19 : index
    %c0_62 = arith.constant 0 : index
    %108 = vector.load %arg19[%c19, %c0_62] : memref<48x128xbf16, #tpu.memory_space<vmem>>, vector<1x128xbf16>
    tpu.vector_store %arg19[%c19, %c0_62], %107 {strides = array<i32>} : memref<48x128xbf16, #tpu.memory_space<vmem>>, vector<1x128xbf16>,
    %109 = vector.extract_strided_slice %93 {offsets = [6, 0], sizes = [1, 128], strides = [1, 1]} : vector<8x128xf32> to vector<1x128xf32>
    %110 = vector.extract_strided_slice %93 {offsets = [7, 0], sizes = [1, 128], strides = [1, 1]} : vector<8x128xf32> to vector<1x128xf32>
    %111 = arith.maximumf %109, %110 : vector<1x128xf32>
    %112 = arith.truncf %111 : vector<1x128xf32> to vector<1x128xbf16>
    %c20 = arith.constant 20 : index
    %c0_63 = arith.constant 0 : index
    %113 = vector.load %arg19[%c20, %c0_63] : memref<48x128xbf16, #tpu.memory_space<vmem>>, vector<1x128xbf16>
    tpu.vector_store %arg19[%c20, %c0_63], %112 {strides = array<i32>} : memref<48x128xbf16, #tpu.memory_space<vmem>>, vector<1x128xbf16>,
    %114 = vector.extract_strided_slice %65 {offsets = [64, 0], sizes = [8, 128], strides = [1, 1]} : vector<120x128xf32> to vector<8x128xf32>
    %115 = vector.extract_strided_slice %65 {offsets = [80, 0], sizes = [8, 128], strides = [1, 1]} : vector<120x128xf32> to vector<8x128xf32>
    %116 = arith.maximumf %114, %115 : vector<8x128xf32>
    %117 = vector.extract_strided_slice %116 {offsets = [0, 0], sizes = [1, 128], strides = [1, 1]} : vector<8x128xf32> to vector<1x128xf32>
    %118 = vector.extract_strided_slice %116 {offsets = [1, 0], sizes = [1, 128], strides = [1, 1]} : vector<8x128xf32> to vector<1x128xf32>
    %119 = arith.maximumf %117, %118 : vector<1x128xf32>
    %120 = arith.truncf %119 : vector<1x128xf32> to vector<1x128xbf16>
    %c25 = arith.constant 25 : index
    %c0_64 = arith.constant 0 : index
    %121 = vector.load %arg19[%c25, %c0_64] : memref<48x128xbf16, #tpu.memory_space<vmem>>, vector<1x128xbf16>
    tpu.vector_store %arg19[%c25, %c0_64], %120 {strides = array<i32>} : memref<48x128xbf16, #tpu.memory_space<vmem>>, vector<1x128xbf16>,
    %122 = vector.extract_strided_slice %116 {offsets = [2, 0], sizes = [1, 128], strides = [1, 1]} : vector<8x128xf32> to vector<1x128xf32>
    %123 = vector.extract_strided_slice %116 {offsets = [3, 0], sizes = [1, 128], strides = [1, 1]} : vector<8x128xf32> to vector<1x128xf32>
    %124 = arith.maximumf %122, %123 : vector<1x128xf32>
    %125 = arith.truncf %124 : vector<1x128xf32> to vector<1x128xbf16>
    %c26 = arith.constant 26 : index
    %c0_65 = arith.constant 0 : index
    %126 = vector.load %arg19[%c26, %c0_65] : memref<48x128xbf16, #tpu.memory_space<vmem>>, vector<1x128xbf16>
    tpu.vector_store %arg19[%c26, %c0_65], %125 {strides = array<i32>} : memref<48x128xbf16, #tpu.memory_space<vmem>>, vector<1x128xbf16>,
    %127 = vector.extract_strided_slice %116 {offsets = [4, 0], sizes = [1, 128], strides = [1, 1]} : vector<8x128xf32> to vector<1x128xf32>
    %128 = vector.extract_strided_slice %116 {offsets = [5, 0], sizes = [1, 128], strides = [1, 1]} : vector<8x128xf32> to vector<1x128xf32>
    %129 = arith.maximumf %127, %128 : vector<1x128xf32>
    %130 = arith.truncf %129 : vector<1x128xf32> to vector<1x128xbf16>
    %c27 = arith.constant 27 : index
    %c0_66 = arith.constant 0 : index
    %131 = vector.load %arg19[%c27, %c0_66] : memref<48x128xbf16, #tpu.memory_space<vmem>>, vector<1x128xbf16>
    tpu.vector_store %arg19[%c27, %c0_66], %130 {strides = array<i32>} : memref<48x128xbf16, #tpu.memory_space<vmem>>, vector<1x128xbf16>,
    %132 = vector.extract_strided_slice %116 {offsets = [6, 0], sizes = [1, 128], strides = [1, 1]} : vector<8x128xf32> to vector<1x128xf32>
    %133 = vector.extract_strided_slice %116 {offsets = [7, 0], sizes = [1, 128], strides = [1, 1]} : vector<8x128xf32> to vector<1x128xf32>
    %134 = arith.maximumf %132, %133 : vector<1x128xf32>
    %135 = arith.truncf %134 : vector<1x128xf32> to vector<1x128xbf16>
    %c28 = arith.constant 28 : index
    %c0_67 = arith.constant 0 : index
    %136 = vector.load %arg19[%c28, %c0_67] : memref<48x128xbf16, #tpu.memory_space<vmem>>, vector<1x128xbf16>
    tpu.vector_store %arg19[%c28, %c0_67], %135 {strides = array<i32>} : memref<48x128xbf16, #tpu.memory_space<vmem>>, vector<1x128xbf16>,
    %137 = vector.extract_strided_slice %65 {offsets = [96, 0], sizes = [8, 128], strides = [1, 1]} : vector<120x128xf32> to vector<8x128xf32>
    %138 = vector.extract_strided_slice %65 {offsets = [112, 0], sizes = [8, 128], strides = [1, 1]} : vector<120x128xf32> to vector<8x128xf32>
    %139 = arith.maximumf %137, %138 : vector<8x128xf32>
    %140 = vector.extract_strided_slice %139 {offsets = [0, 0], sizes = [1, 128], strides = [1, 1]} : vector<8x128xf32> to vector<1x128xf32>
    %141 = vector.extract_strided_slice %139 {offsets = [1, 0], sizes = [1, 128], strides = [1, 1]} : vector<8x128xf32> to vector<1x128xf32>
    %142 = arith.maximumf %140, %141 : vector<1x128xf32>
    %143 = arith.truncf %142 : vector<1x128xf32> to vector<1x128xbf16>
    %c33_68 = arith.constant 33 : index
    %c0_69 = arith.constant 0 : index
    %144 = vector.load %arg19[%c33_68, %c0_69] : memref<48x128xbf16, #tpu.memory_space<vmem>>, vector<1x128xbf16>
    tpu.vector_store %arg19[%c33_68, %c0_69], %143 {strides = array<i32>} : memref<48x128xbf16, #tpu.memory_space<vmem>>, vector<1x128xbf16>,
    %145 = vector.extract_strided_slice %139 {offsets = [2, 0], sizes = [1, 128], strides = [1, 1]} : vector<8x128xf32> to vector<1x128xf32>
    %146 = vector.extract_strided_slice %139 {offsets = [3, 0], sizes = [1, 128], strides = [1, 1]} : vector<8x128xf32> to vector<1x128xf32>
    %147 = arith.maximumf %145, %146 : vector<1x128xf32>
    %148 = arith.truncf %147 : vector<1x128xf32> to vector<1x128xbf16>
    %c34_70 = arith.constant 34 : index
    %c0_71 = arith.constant 0 : index
    %149 = vector.load %arg19[%c34_70, %c0_71] : memref<48x128xbf16, #tpu.memory_space<vmem>>, vector<1x128xbf16>
    tpu.vector_store %arg19[%c34_70, %c0_71], %148 {strides = array<i32>} : memref<48x128xbf16, #tpu.memory_space<vmem>>, vector<1x128xbf16>,
    %150 = vector.extract_strided_slice %139 {offsets = [4, 0], sizes = [1, 128], strides = [1, 1]} : vector<8x128xf32> to vector<1x128xf32>
    %151 = vector.extract_strided_slice %139 {offsets = [5, 0], sizes = [1, 128], strides = [1, 1]} : vector<8x128xf32> to vector<1x128xf32>
    %152 = arith.maximumf %150, %151 : vector<1x128xf32>
    %153 = arith.truncf %152 : vector<1x128xf32> to vector<1x128xbf16>
    %c35 = arith.constant 35 : index
    %c0_72 = arith.constant 0 : index
    %154 = vector.load %arg19[%c35, %c0_72] : memref<48x128xbf16, #tpu.memory_space<vmem>>, vector<1x128xbf16>
    tpu.vector_store %arg19[%c35, %c0_72], %153 {strides = array<i32>} : memref<48x128xbf16, #tpu.memory_space<vmem>>, vector<1x128xbf16>,
    %155 = vector.extract_strided_slice %139 {offsets = [6, 0], sizes = [1, 128], strides = [1, 1]} : vector<8x128xf32> to vector<1x128xf32>
    %156 = vector.extract_strided_slice %139 {offsets = [7, 0], sizes = [1, 128], strides = [1, 1]} : vector<8x128xf32> to vector<1x128xf32>
    %157 = arith.maximumf %155, %156 : vector<1x128xf32>
    %158 = arith.truncf %157 : vector<1x128xf32> to vector<1x128xbf16>
    %c36 = arith.constant 36 : index
    %c0_73 = arith.constant 0 : index
    %159 = vector.load %arg19[%c36, %c0_73] : memref<48x128xbf16, #tpu.memory_space<vmem>>, vector<1x128xbf16>
    tpu.vector_store %arg19[%c36, %c0_73], %158 {strides = array<i32>} : memref<48x128xbf16, #tpu.memory_space<vmem>>, vector<1x128xbf16>,
    %c0_74 = arith.constant 0 : index
    %c0_75 = arith.constant 0 : index
    %160 = vector.load %arg19[%c0_74, %c0_75] : memref<48x128xbf16, #tpu.memory_space<vmem>>, vector<28x128xbf16>
    %c0_76 = arith.constant 0 : index
    %c0_77 = arith.constant 0 : index
    %161 = vector.load %arg22[%c0_76, %c0_77] : memref<28x1152xbf16, #tpu.memory_space<vmem>>, vector<28x128xbf16>
    tpu.vector_store %arg22[%c0_76, %c0_77], %160 {strides = array<i32>} : memref<28x1152xbf16, #tpu.memory_space<vmem>>, vector<28x128xbf16>,
    %c1_78 = arith.constant 1 : index
    %c0_79 = arith.constant 0 : index
    %162 = vector.load %arg19[%c1_78, %c0_79] : memref<48x128xbf16, #tpu.memory_space<vmem>>, vector<28x128xbf16>
    %c0_80 = arith.constant 0 : index
    %c128_81 = arith.constant 128 : index
    %163 = vector.load %arg22[%c0_80, %c128_81] : memref<28x1152xbf16, #tpu.memory_space<vmem>>, vector<28x128xbf16>
    tpu.vector_store %arg22[%c0_80, %c128_81], %162 {strides = array<i32>} : memref<28x1152xbf16, #tpu.memory_space<vmem>>, vector<28x128xbf16>,
    %c2_82 = arith.constant 2 : index
    %c0_83 = arith.constant 0 : index
    %164 = vector.load %arg19[%c2_82, %c0_83] : memref<48x128xbf16, #tpu.memory_space<vmem>>, vector<28x128xbf16>
    %c0_84 = arith.constant 0 : index
    %c256_85 = arith.constant 256 : index
    %165 = vector.load %arg22[%c0_84, %c256_85] : memref<28x1152xbf16, #tpu.memory_space<vmem>>, vector<28x128xbf16>
    tpu.vector_store %arg22[%c0_84, %c256_85], %164 {strides = array<i32>} : memref<28x1152xbf16, #tpu.memory_space<vmem>>, vector<28x128xbf16>,
    %c8 = arith.constant 8 : index
    %c0_86 = arith.constant 0 : index
    %166 = vector.load %arg19[%c8, %c0_86] : memref<48x128xbf16, #tpu.memory_space<vmem>>, vector<28x128xbf16>
    %c0_87 = arith.constant 0 : index
    %c384_88 = arith.constant 384 : index
    %167 = vector.load %arg22[%c0_87, %c384_88] : memref<28x1152xbf16, #tpu.memory_space<vmem>>, vector<28x128xbf16>
    tpu.vector_store %arg22[%c0_87, %c384_88], %166 {strides = array<i32>} : memref<28x1152xbf16, #tpu.memory_space<vmem>>, vector<28x128xbf16>,
    %c9_89 = arith.constant 9 : index
    %c0_90 = arith.constant 0 : index
    %168 = vector.load %arg19[%c9_89, %c0_90] : memref<48x128xbf16, #tpu.memory_space<vmem>>, vector<28x128xbf16>
    %c0_91 = arith.constant 0 : index
    %c512_92 = arith.constant 512 : index
    %169 = vector.load %arg22[%c0_91, %c512_92] : memref<28x1152xbf16, #tpu.memory_space<vmem>>, vector<28x128xbf16>
    tpu.vector_store %arg22[%c0_91, %c512_92], %168 {strides = array<i32>} : memref<28x1152xbf16, #tpu.memory_space<vmem>>, vector<28x128xbf16>,
    %c10_93 = arith.constant 10 : index
    %c0_94 = arith.constant 0 : index
    %170 = vector.load %arg19[%c10_93, %c0_94] : memref<48x128xbf16, #tpu.memory_space<vmem>>, vector<28x128xbf16>
    %c0_95 = arith.constant 0 : index
    %c640 = arith.constant 640 : index
    %171 = vector.load %arg22[%c0_95, %c640] : memref<28x1152xbf16, #tpu.memory_space<vmem>>, vector<28x128xbf16>
    tpu.vector_store %arg22[%c0_95, %c640], %170 {strides = array<i32>} : memref<28x1152xbf16, #tpu.memory_space<vmem>>, vector<28x128xbf16>,
    %c16_96 = arith.constant 16 : index
    %c0_97 = arith.constant 0 : index
    %172 = vector.load %arg19[%c16_96, %c0_97] : memref<48x128xbf16, #tpu.memory_space<vmem>>, vector<28x128xbf16>
    %c0_98 = arith.constant 0 : index
    %c768 = arith.constant 768 : index
    %173 = vector.load %arg22[%c0_98, %c768] : memref<28x1152xbf16, #tpu.memory_space<vmem>>, vector<28x128xbf16>
    tpu.vector_store %arg22[%c0_98, %c768], %172 {strides = array<i32>} : memref<28x1152xbf16, #tpu.memory_space<vmem>>, vector<28x128xbf16>,
    %c17_99 = arith.constant 17 : index
    %c0_100 = arith.constant 0 : index
    %174 = vector.load %arg19[%c17_99, %c0_100] : memref<48x128xbf16, #tpu.memory_space<vmem>>, vector<28x128xbf16>
    %c0_101 = arith.constant 0 : index
    %c896 = arith.constant 896 : index
    %175 = vector.load %arg22[%c0_101, %c896] : memref<28x1152xbf16, #tpu.memory_space<vmem>>, vector<28x128xbf16>
    tpu.vector_store %arg22[%c0_101, %c896], %174 {strides = array<i32>} : memref<28x1152xbf16, #tpu.memory_space<vmem>>, vector<28x128xbf16>,
    %c18_102 = arith.constant 18 : index
    %c0_103 = arith.constant 0 : index
    %176 = vector.load %arg19[%c18_102, %c0_103] : memref<48x128xbf16, #tpu.memory_space<vmem>>, vector<28x128xbf16>
    %c0_104 = arith.constant 0 : index
    %c1024 = arith.constant 1024 : index
    %177 = vector.load %arg22[%c0_104, %c1024] : memref<28x1152xbf16, #tpu.memory_space<vmem>>, vector<28x128xbf16>
    tpu.vector_store %arg22[%c0_104, %c1024], %176 {strides = array<i32>} : memref<28x1152xbf16, #tpu.memory_space<vmem>>, vector<28x128xbf16>,
    %c0_105 = arith.constant 0 : index
    %c0_106 = arith.constant 0 : index
    %178 = vector.load %arg22[%c0_105, %c0_106] : memref<28x1152xbf16, #tpu.memory_space<vmem>>, vector<28x1152xbf16>
    %c0_107 = arith.constant 0 : index
    %c0_108 = arith.constant 0 : index
    %179 = vector.load %arg8[%c0_107, %c0_108] : memref<1152x256xbf16, #tpu.memory_space<vmem>>, vector<1152x256xbf16>
    %cst_109 = arith.constant dense<0.000000e+00> : vector<28x256xf32>
    %180 = tpu.matmul %178, %179, %cst_109 {dimension_numbers = #tpu.dot_dimension_numbers<[1], [0], [0], [1], [0, 0, 1, 1], [], []>} : vector<28x1152xbf16>, vector<1152x256xbf16>, vector<28x256xf32> -> vector<28x256xf32>
    %c0_110 = arith.constant 0 : index
    %c0_111 = arith.constant 0 : index
    %181 = vector.load %arg9[%c0_110, %c0_111] : memref<1x256xf32, #tpu.memory_space<vmem>>, vector<1x256xf32>
    %182 = vector.broadcast %181 : vector<1x256xf32> to vector<28x256xf32>
    %183 = arith.mulf %180, %182 : vector<28x256xf32>
    %c0_112 = arith.constant 0 : index
    %c0_113 = arith.constant 0 : index
    %184 = vector.load %arg10[%c0_112, %c0_113] : memref<1x256xf32, #tpu.memory_space<vmem>>, vector<1x256xf32>
    %185 = vector.broadcast %184 : vector<1x256xf32> to vector<28x256xf32>
    %186 = arith.addf %183, %185 : vector<28x256xf32>
    %cst_114 = arith.constant 0.000000e+00 : f32
    %187 = vector.broadcast %cst_114 : f32 to vector<28x256xf32>
    %188 = arith.maximumf %186, %187 : vector<28x256xf32>
    %cst_115 = arith.constant 0.000000e+00 : bf16
    %189 = vector.broadcast %cst_115 : bf16 to vector<32x256xbf16>
    %c0_116 = arith.constant 0 : index
    %c0_117 = arith.constant 0 : index
    %190 = vector.load %arg20[%c0_116, %c0_117] : memref<32x256xbf16, #tpu.memory_space<vmem>>, vector<32x256xbf16>
    tpu.vector_store %arg20[%c0_116, %c0_117], %189 {strides = array<i32>} : memref<32x256xbf16, #tpu.memory_space<vmem>>, vector<32x256xbf16>,
    %191 = vector.extract_strided_slice %188 {offsets = [0, 0], sizes = [4, 256], strides = [1, 1]} : vector<28x256xf32> to vector<4x256xf32>
    %192 = vector.extract_strided_slice %188 {offsets = [8, 0], sizes = [4, 256], strides = [1, 1]} : vector<28x256xf32> to vector<4x256xf32>
    %193 = arith.maximumf %191, %192 : vector<4x256xf32>
    %194 = vector.extract_strided_slice %193 {offsets = [0, 0], sizes = [1, 256], strides = [1, 1]} : vector<4x256xf32> to vector<1x256xf32>
    %195 = vector.extract_strided_slice %193 {offsets = [1, 0], sizes = [1, 256], strides = [1, 1]} : vector<4x256xf32> to vector<1x256xf32>
    %196 = arith.maximumf %194, %195 : vector<1x256xf32>
    %197 = arith.truncf %196 : vector<1x256xf32> to vector<1x256xbf16>
    %c9_118 = arith.constant 9 : index
    %c0_119 = arith.constant 0 : index
    %198 = vector.load %arg20[%c9_118, %c0_119] : memref<32x256xbf16, #tpu.memory_space<vmem>>, vector<1x256xbf16>
    tpu.vector_store %arg20[%c9_118, %c0_119], %197 {strides = array<i32>} : memref<32x256xbf16, #tpu.memory_space<vmem>>, vector<1x256xbf16>,
    %199 = vector.extract_strided_slice %193 {offsets = [2, 0], sizes = [1, 256], strides = [1, 1]} : vector<4x256xf32> to vector<1x256xf32>
    %200 = vector.extract_strided_slice %193 {offsets = [3, 0], sizes = [1, 256], strides = [1, 1]} : vector<4x256xf32> to vector<1x256xf32>
    %201 = arith.maximumf %199, %200 : vector<1x256xf32>
    %202 = arith.truncf %201 : vector<1x256xf32> to vector<1x256xbf16>
    %c10_120 = arith.constant 10 : index
    %c0_121 = arith.constant 0 : index
    %203 = vector.load %arg20[%c10_120, %c0_121] : memref<32x256xbf16, #tpu.memory_space<vmem>>, vector<1x256xbf16>
    tpu.vector_store %arg20[%c10_120, %c0_121], %202 {strides = array<i32>} : memref<32x256xbf16, #tpu.memory_space<vmem>>, vector<1x256xbf16>,
    %204 = vector.extract_strided_slice %188 {offsets = [16, 0], sizes = [4, 256], strides = [1, 1]} : vector<28x256xf32> to vector<4x256xf32>
    %205 = vector.extract_strided_slice %188 {offsets = [24, 0], sizes = [4, 256], strides = [1, 1]} : vector<28x256xf32> to vector<4x256xf32>
    %206 = arith.maximumf %204, %205 : vector<4x256xf32>
    %207 = vector.extract_strided_slice %206 {offsets = [0, 0], sizes = [1, 256], strides = [1, 1]} : vector<4x256xf32> to vector<1x256xf32>
    %208 = vector.extract_strided_slice %206 {offsets = [1, 0], sizes = [1, 256], strides = [1, 1]} : vector<4x256xf32> to vector<1x256xf32>
    %209 = arith.maximumf %207, %208 : vector<1x256xf32>
    %210 = arith.truncf %209 : vector<1x256xf32> to vector<1x256xbf16>
    %c17_122 = arith.constant 17 : index
    %c0_123 = arith.constant 0 : index
    %211 = vector.load %arg20[%c17_122, %c0_123] : memref<32x256xbf16, #tpu.memory_space<vmem>>, vector<1x256xbf16>
    tpu.vector_store %arg20[%c17_122, %c0_123], %210 {strides = array<i32>} : memref<32x256xbf16, #tpu.memory_space<vmem>>, vector<1x256xbf16>,
    %212 = vector.extract_strided_slice %206 {offsets = [2, 0], sizes = [1, 256], strides = [1, 1]} : vector<4x256xf32> to vector<1x256xf32>
    %213 = vector.extract_strided_slice %206 {offsets = [3, 0], sizes = [1, 256], strides = [1, 1]} : vector<4x256xf32> to vector<1x256xf32>
    %214 = arith.maximumf %212, %213 : vector<1x256xf32>
    %215 = arith.truncf %214 : vector<1x256xf32> to vector<1x256xbf16>
    %c18_124 = arith.constant 18 : index
    %c0_125 = arith.constant 0 : index
    %216 = vector.load %arg20[%c18_124, %c0_125] : memref<32x256xbf16, #tpu.memory_space<vmem>>, vector<1x256xbf16>
    tpu.vector_store %arg20[%c18_124, %c0_125], %215 {strides = array<i32>} : memref<32x256xbf16, #tpu.memory_space<vmem>>, vector<1x256xbf16>,
    %c0_126 = arith.constant 0 : index
    %c0_127 = arith.constant 0 : index
    %217 = vector.load %arg20[%c0_126, %c0_127] : memref<32x256xbf16, #tpu.memory_space<vmem>>, vector<10x256xbf16>
    %c0_128 = arith.constant 0 : index
    %c0_129 = arith.constant 0 : index
    %218 = vector.load %arg23[%c0_128, %c0_129] : memref<10x2304xbf16, #tpu.memory_space<vmem>>, vector<10x256xbf16>
    tpu.vector_store %arg23[%c0_128, %c0_129], %217 {strides = array<i32>} : memref<10x2304xbf16, #tpu.memory_space<vmem>>, vector<10x256xbf16>,
    %c1_130 = arith.constant 1 : index
    %c0_131 = arith.constant 0 : index
    %219 = vector.load %arg20[%c1_130, %c0_131] : memref<32x256xbf16, #tpu.memory_space<vmem>>, vector<10x256xbf16>
    %c0_132 = arith.constant 0 : index
    %c256_133 = arith.constant 256 : index
    %220 = vector.load %arg23[%c0_132, %c256_133] : memref<10x2304xbf16, #tpu.memory_space<vmem>>, vector<10x256xbf16>
    tpu.vector_store %arg23[%c0_132, %c256_133], %219 {strides = array<i32>} : memref<10x2304xbf16, #tpu.memory_space<vmem>>, vector<10x256xbf16>,
    %c2_134 = arith.constant 2 : index
    %c0_135 = arith.constant 0 : index
    %221 = vector.load %arg20[%c2_134, %c0_135] : memref<32x256xbf16, #tpu.memory_space<vmem>>, vector<10x256xbf16>
    %c0_136 = arith.constant 0 : index
    %c512_137 = arith.constant 512 : index
    %222 = vector.load %arg23[%c0_136, %c512_137] : memref<10x2304xbf16, #tpu.memory_space<vmem>>, vector<10x256xbf16>
    tpu.vector_store %arg23[%c0_136, %c512_137], %221 {strides = array<i32>} : memref<10x2304xbf16, #tpu.memory_space<vmem>>, vector<10x256xbf16>,
    %c8_138 = arith.constant 8 : index
    %c0_139 = arith.constant 0 : index
    %223 = vector.load %arg20[%c8_138, %c0_139] : memref<32x256xbf16, #tpu.memory_space<vmem>>, vector<10x256xbf16>
    %c0_140 = arith.constant 0 : index
    %c768_141 = arith.constant 768 : index
    %224 = vector.load %arg23[%c0_140, %c768_141] : memref<10x2304xbf16, #tpu.memory_space<vmem>>, vector<10x256xbf16>
    tpu.vector_store %arg23[%c0_140, %c768_141], %223 {strides = array<i32>} : memref<10x2304xbf16, #tpu.memory_space<vmem>>, vector<10x256xbf16>,
    %c9_142 = arith.constant 9 : index
    %c0_143 = arith.constant 0 : index
    %225 = vector.load %arg20[%c9_142, %c0_143] : memref<32x256xbf16, #tpu.memory_space<vmem>>, vector<10x256xbf16>
    %c0_144 = arith.constant 0 : index
    %c1024_145 = arith.constant 1024 : index
    %226 = vector.load %arg23[%c0_144, %c1024_145] : memref<10x2304xbf16, #tpu.memory_space<vmem>>, vector<10x256xbf16>
    tpu.vector_store %arg23[%c0_144, %c1024_145], %225 {strides = array<i32>} : memref<10x2304xbf16, #tpu.memory_space<vmem>>, vector<10x256xbf16>,
    %c10_146 = arith.constant 10 : index
    %c0_147 = arith.constant 0 : index
    %227 = vector.load %arg20[%c10_146, %c0_147] : memref<32x256xbf16, #tpu.memory_space<vmem>>, vector<10x256xbf16>
    %c0_148 = arith.constant 0 : index
    %c1280 = arith.constant 1280 : index
    %228 = vector.load %arg23[%c0_148, %c1280] : memref<10x2304xbf16, #tpu.memory_space<vmem>>, vector<10x256xbf16>
    tpu.vector_store %arg23[%c0_148, %c1280], %227 {strides = array<i32>} : memref<10x2304xbf16, #tpu.memory_space<vmem>>, vector<10x256xbf16>,
    %c16_149 = arith.constant 16 : index
    %c0_150 = arith.constant 0 : index
    %229 = vector.load %arg20[%c16_149, %c0_150] : memref<32x256xbf16, #tpu.memory_space<vmem>>, vector<10x256xbf16>
    %c0_151 = arith.constant 0 : index
    %c1536 = arith.constant 1536 : index
    %230 = vector.load %arg23[%c0_151, %c1536] : memref<10x2304xbf16, #tpu.memory_space<vmem>>, vector<10x256xbf16>
    tpu.vector_store %arg23[%c0_151, %c1536], %229 {strides = array<i32>} : memref<10x2304xbf16, #tpu.memory_space<vmem>>, vector<10x256xbf16>,
    %c17_152 = arith.constant 17 : index
    %c0_153 = arith.constant 0 : index
    %231 = vector.load %arg20[%c17_152, %c0_153] : memref<32x256xbf16, #tpu.memory_space<vmem>>, vector<10x256xbf16>
    %c0_154 = arith.constant 0 : index
    %c1792 = arith.constant 1792 : index
    %232 = vector.load %arg23[%c0_154, %c1792] : memref<10x2304xbf16, #tpu.memory_space<vmem>>, vector<10x256xbf16>
    tpu.vector_store %arg23[%c0_154, %c1792], %231 {strides = array<i32>} : memref<10x2304xbf16, #tpu.memory_space<vmem>>, vector<10x256xbf16>,
    %c18_155 = arith.constant 18 : index
    %c0_156 = arith.constant 0 : index
    %233 = vector.load %arg20[%c18_155, %c0_156] : memref<32x256xbf16, #tpu.memory_space<vmem>>, vector<10x256xbf16>
    %c0_157 = arith.constant 0 : index
    %c2048 = arith.constant 2048 : index
    %234 = vector.load %arg23[%c0_157, %c2048] : memref<10x2304xbf16, #tpu.memory_space<vmem>>, vector<10x256xbf16>
    tpu.vector_store %arg23[%c0_157, %c2048], %233 {strides = array<i32>} : memref<10x2304xbf16, #tpu.memory_space<vmem>>, vector<10x256xbf16>,
    %c0_158 = arith.constant 0 : index
    %c0_159 = arith.constant 0 : index
    %235 = vector.load %arg23[%c0_158, %c0_159] : memref<10x2304xbf16, #tpu.memory_space<vmem>>, vector<10x2304xbf16>
    %c0_160 = arith.constant 0 : index
    %c0_161 = arith.constant 0 : index
    %236 = vector.load %arg11[%c0_160, %c0_161] : memref<2304x512xbf16, #tpu.memory_space<vmem>>, vector<2304x512xbf16>
    %cst_162 = arith.constant dense<0.000000e+00> : vector<10x512xf32>
    %237 = tpu.matmul %235, %236, %cst_162 {dimension_numbers = #tpu.dot_dimension_numbers<[1], [0], [0], [1], [0, 0, 1, 1], [], []>} : vector<10x2304xbf16>, vector<2304x512xbf16>, vector<10x512xf32> -> vector<10x512xf32>
    %c0_163 = arith.constant 0 : index
    %c0_164 = arith.constant 0 : index
    %238 = vector.load %arg12[%c0_163, %c0_164] : memref<1x512xf32, #tpu.memory_space<vmem>>, vector<1x512xf32>
    %239 = vector.broadcast %238 : vector<1x512xf32> to vector<10x512xf32>
    %240 = arith.mulf %237, %239 : vector<10x512xf32>
    %c0_165 = arith.constant 0 : index
    %c0_166 = arith.constant 0 : index
    %241 = vector.load %arg13[%c0_165, %c0_166] : memref<1x512xf32, #tpu.memory_space<vmem>>, vector<1x512xf32>
    %242 = vector.broadcast %241 : vector<1x512xf32> to vector<10x512xf32>
    %243 = arith.addf %240, %242 : vector<10x512xf32>
    %cst_167 = arith.constant 0.000000e+00 : f32
    %244 = vector.broadcast %cst_167 : f32 to vector<10x512xf32>
    %245 = arith.maximumf %243, %244 : vector<10x512xf32>
    %246 = vector.extract_strided_slice %245 {offsets = [0, 0], sizes = [2, 512], strides = [1, 1]} : vector<10x512xf32> to vector<2x512xf32>
    %247 = vector.extract_strided_slice %245 {offsets = [8, 0], sizes = [2, 512], strides = [1, 1]} : vector<10x512xf32> to vector<2x512xf32>
    %248 = arith.maximumf %246, %247 : vector<2x512xf32>
    %249 = vector.extract_strided_slice %248 {offsets = [0, 0], sizes = [1, 512], strides = [1, 1]} : vector<2x512xf32> to vector<1x512xf32>
    %250 = vector.extract_strided_slice %248 {offsets = [1, 0], sizes = [1, 512], strides = [1, 1]} : vector<2x512xf32> to vector<1x512xf32>
    %251 = arith.maximumf %249, %250 : vector<1x512xf32>
    %252 = arith.truncf %251 : vector<1x512xf32> to vector<1x512xbf16>
    %c0_168 = arith.constant 0 : index
    %c0_169 = arith.constant 0 : index
    %253 = vector.load %arg14[%c0_168, %c0_169] : memref<512x32xbf16, #tpu.memory_space<vmem>>, vector<512x32xbf16>
    %cst_170 = arith.constant dense<0.000000e+00> : vector<1x32xf32>
    %254 = tpu.matmul %252, %253, %cst_170 {dimension_numbers = #tpu.dot_dimension_numbers<[1], [0], [0], [1], [0, 0, 1, 1], [], []>} : vector<1x512xbf16>, vector<512x32xbf16>, vector<1x32xf32> -> vector<1x32xf32>
    %c0_171 = arith.constant 0 : index
    %c0_172 = arith.constant 0 : index
    %255 = vector.load %arg15[%c0_171, %c0_172] : memref<1x32xf32, #tpu.memory_space<vmem>>, vector<1x32xf32>
    %256 = arith.mulf %254, %255 : vector<1x32xf32>
    %c0_173 = arith.constant 0 : index
    %c0_174 = arith.constant 0 : index
    %257 = vector.load %arg16[%c0_173, %c0_174] : memref<1x32xf32, #tpu.memory_space<vmem>>, vector<1x32xf32>
    %258 = arith.addf %256, %257 : vector<1x32xf32>
    %cst_175 = arith.constant 0.000000e+00 : f32
    %259 = vector.broadcast %cst_175 : f32 to vector<1x32xf32>
    %260 = arith.maximumf %258, %259 : vector<1x32xf32>
    %c0_176 = arith.constant 0 : index
    %c0_177 = arith.constant 0 : index
    %c0_178 = arith.constant 0 : index
    %c0_179 = arith.constant 0 : index
    %261 = vector.load %arg17[%c0_176, %c0_177, %c0_178, %c0_179] : memref<1x1x1x32xf32, #tpu.memory_space<vmem>>, vector<1x1x1x32xf32>
    %262 = vector.shape_cast %261 : vector<1x1x1x32xf32> to vector<1x32xf32>
    %263 = vector.shape_cast %260 : vector<1x32xf32> to vector<1x1x1x32xf32>
    tpu.vector_store %arg17[%c0_176, %c0_177, %c0_178, %c0_179], %263 {strides = array<i32>} : memref<1x1x1x32xf32, #tpu.memory_space<vmem>>, vector<1x1x1x32xf32>,
    return
  }
  func.func @transform_0(%arg0: i32) -> (i32, i32) {
    %c0_i32 = arith.constant 0 : i32
    %c0_i32_0 = arith.constant 0 : i32
    return %arg0, %c0_i32 : i32, i32
  }
  func.func @transform_1(%arg0: i32) -> (i32, i32) {
    %c0_i32 = arith.constant 0 : i32
    %c0_i32_0 = arith.constant 0 : i32
    %c0_i32_1 = arith.constant 0 : i32
    return %c0_i32, %c0_i32_0 : i32, i32
  }
  func.func @transform_2(%arg0: i32) -> (i32, i32) {
    %c0_i32 = arith.constant 0 : i32
    %c0_i32_0 = arith.constant 0 : i32
    %c0_i32_1 = arith.constant 0 : i32
    return %c0_i32, %c0_i32_0 : i32, i32
  }
  func.func @transform_3(%arg0: i32) -> (i32, i32) {
    %c0_i32 = arith.constant 0 : i32
    %c0_i32_0 = arith.constant 0 : i32
    %c0_i32_1 = arith.constant 0 : i32
    return %c0_i32, %c0_i32_0 : i32, i32
  }
  func.func @transform_4(%arg0: i32) -> (i32, i32) {
    %c0_i32 = arith.constant 0 : i32
    %c0_i32_0 = arith.constant 0 : i32
    %c0_i32_1 = arith.constant 0 : i32
    return %c0_i32, %c0_i32_0 : i32, i32
  }
  func.func @transform_5(%arg0: i32) -> (i32, i32) {
    %c0_i32 = arith.constant 0 : i32
    %c0_i32_0 = arith.constant 0 : i32
    %c0_i32_1 = arith.constant 0 : i32
    return %c0_i32, %c0_i32_0 : i32, i32
  }
  func.func @transform_6(%arg0: i32) -> (i32, i32) {
    %c0_i32 = arith.constant 0 : i32
    %c0_i32_0 = arith.constant 0 : i32
    %c0_i32_1 = arith.constant 0 : i32
    return %c0_i32, %c0_i32_0 : i32, i32
  }
  func.func @transform_7(%arg0: i32) -> (i32, i32) {
    %c0_i32 = arith.constant 0 : i32
    %c0_i32_0 = arith.constant 0 : i32
    %c0_i32_1 = arith.constant 0 : i32
    return %c0_i32, %c0_i32_0 : i32, i32
  }
  func.func @transform_8(%arg0: i32) -> (i32, i32) {
    %c0_i32 = arith.constant 0 : i32
    %c0_i32_0 = arith.constant 0 : i32
    %c0_i32_1 = arith.constant 0 : i32
    return %c0_i32, %c0_i32_0 : i32, i32
  }
  func.func @transform_9(%arg0: i32) -> (i32, i32) {
    %c0_i32 = arith.constant 0 : i32
    %c0_i32_0 = arith.constant 0 : i32
    %c0_i32_1 = arith.constant 0 : i32
    return %c0_i32, %c0_i32_0 : i32, i32
  }
  func.func @transform_10(%arg0: i32) -> (i32, i32) {
    %c0_i32 = arith.constant 0 : i32
    %c0_i32_0 = arith.constant 0 : i32
    %c0_i32_1 = arith.constant 0 : i32
    return %c0_i32, %c0_i32_0 : i32, i32
  }
  func.func @transform_11(%arg0: i32) -> (i32, i32) {
    %c0_i32 = arith.constant 0 : i32
    %c0_i32_0 = arith.constant 0 : i32
    %c0_i32_1 = arith.constant 0 : i32
    return %c0_i32, %c0_i32_0 : i32, i32
  }
  func.func @transform_12(%arg0: i32) -> (i32, i32) {
    %c0_i32 = arith.constant 0 : i32
    %c0_i32_0 = arith.constant 0 : i32
    %c0_i32_1 = arith.constant 0 : i32
    return %c0_i32, %c0_i32_0 : i32, i32
  }
  func.func @transform_13(%arg0: i32) -> (i32, i32) {
    %c0_i32 = arith.constant 0 : i32
    %c0_i32_0 = arith.constant 0 : i32
    %c0_i32_1 = arith.constant 0 : i32
    return %c0_i32, %c0_i32_0 : i32, i32
  }
  func.func @transform_14(%arg0: i32) -> (i32, i32) {
    %c0_i32 = arith.constant 0 : i32
    %c0_i32_0 = arith.constant 0 : i32
    %c0_i32_1 = arith.constant 0 : i32
    return %c0_i32, %c0_i32_0 : i32, i32
  }
  func.func @transform_15(%arg0: i32) -> (i32, i32) {
    %c0_i32 = arith.constant 0 : i32
    %c0_i32_0 = arith.constant 0 : i32
    %c0_i32_1 = arith.constant 0 : i32
    return %c0_i32, %c0_i32_0 : i32, i32
  }
  func.func @transform_16(%arg0: i32) -> (i32, i32, i32, i32) {
    %c0_i32 = arith.constant 0 : i32
    %c0_i32_0 = arith.constant 0 : i32
    %c0_i32_1 = arith.constant 0 : i32
    %c0_i32_2 = arith.constant 0 : i32
    return %arg0, %c0_i32, %c0_i32_0, %c0_i32_1 : i32, i32, i32, i32
  }
}

</mosaic_0001>

<bundles_post_ra>
// kernel: tpu_custom_call.1
= control target key start
LH: loop header
LB: loop body
LE: loop exit
PB: predicated region body
PF: predicated region fallthrough
CT: control target
= control target key end

     0   :  { %s17586_s0 = inlined_call_operand.vmem [shape: bf16[512,100], index: 0, kind: input, shape index: {}]   ;;  %s17587_s1 = inlined_call_operand.vmem [shape: bf16[100,64], index: 1, kind: input, shape index: {}]   ;;  %s17588_s2 = inlined_call_operand.hbm [shape: f32[1,64], index: 2, kind: input, shape index: {}]   ;;  %s17589_s3 = inlined_call_operand.hbm [shape: f32[1,64], index: 3, kind: input, shape index: {}]   ;;  %s17590_s4 = inlined_call_operand.hbm [shape: bf16[576,128], index: 4, kind: input, shape index: {}]   ;;  %s17591_s5 = inlined_call_operand.hbm [shape: f32[1,128], index: 5, kind: input, shape index: {}]   ;;  %s17592_s6 = inlined_call_operand.hbm [shape: f32[1,128], index: 6, kind: input, shape index: {}]   ;;  %s17593_s7 = inlined_call_operand.hbm [shape: bf16[1152,256], index: 7, kind: input, shape index: {}]   ;;  %s17594_s8 = inlined_call_operand.hbm [shape: f32[1,256], index: 8, kind: input, shape index: {}]   ;;  %s17595_s9 = inlined_call_operand.hbm [shape: f32[1,256], index: 9, kind: input, shape index: {}]   ;;  %s17596_s10 = inlined_call_operand.hbm [shape: bf16[2304,512], index: 10, kind: input, shape index: {}]   ;;  %s17597_s11 = inlined_call_operand.hbm [shape: f32[1,512], index: 11, kind: input, shape index: {}]   ;;  %s17598_s12 = inlined_call_operand.hbm [shape: f32[1,512], index: 12, kind: input, shape index: {}]   ;;  %s17599_s13 = inlined_call_operand.vmem [shape: bf16[512,32], index: 13, kind: input, shape index: {}]   ;;  %s17600_s14 = inlined_call_operand.hbm [shape: f32[1,32], index: 14, kind: input, shape index: {}]   ;;  %s17601_s15 = inlined_call_operand.hbm [shape: f32[1,32], index: 15, kind: input, shape index: {}]   ;;  %s17602_s16 = inlined_call_operand.hbm [shape: f32[2,1,1,32], index: 16, kind: output, shape index: {}]  }
   0x1   :  { %17614 = sst [smem:[#allocation56_spill]] %s17586_s0 }
   0x2   :  { %17615 = sst [smem:[#allocation57_spill]] %s17589_s3 }
   0x3   :  { %17616 = sst [smem:[#allocation58_spill]] %s17591_s5 }
   0x4   :  { %17617 = sst [smem:[#allocation59_spill]] %s17593_s7 }
   0x5   :  { %17618 = sst [smem:[#allocation60_spill]] %s17602_s16 }
   0x6   :  { %21 = vsyncpa [#allocation9], 0 }
   0x7   :  { %22 = vsyncpa [#allocation12], 0 }
   0x8   :  { %23 = vsyncpa [#allocation15], 0 }
   0x9   :  { %24 = vsyncpa [#allocation18], 0 }
   0xa   :  { %25 = vsyncpa [#allocation21], 0 }
   0xb   :  { %26 = vsyncpa [#allocation24], 0 }
   0xc   :  { %27 = vsyncpa [#allocation27], 0 }
   0xd   :  { %28 = vsyncpa [#allocation10], 0 }
   0xe   :  { %30 = vsyncpa [#allocation10 + $0x1], 0  ;;  %s15606_s21 = smov 0   ;;  %s15608_s22 = smov 0  }
   0xf   :  { %s15610_s23 = smov 0   ;;  %s15612_s24 = smov 0  }
  0x10 LB: > { %17619 = sst [smem:[#allocation38_spill]] %s15486_s21  ;;  %s15627_s25 = sadd.s32 4294967295, %s15498_s24   ;;  %s15498_s24 = sphi %s15612_s24, %s17683_s24   ;;  %s15494_s23 = sphi %s15610_s23, %s17685_s23   ;;  %s15490_s22 = sphi %s15608_s22, %s17687_s22   ;;  %s15486_s21 = sphi %s15606_s21, %s17686_s21  }
  0x11   : > { %17620 = sst [smem:[#allocation39_spill]] %s15494_s23  ;;  %s10345_s26 = sadd.s32 4294967294, %s15498_s24  }
  0x12   : > { %17621 = sst [smem:[#allocation40_spill]] %s15498_s24  ;;  %s15631_s27 = sadd.s32 1, %s15498_s24  }
  0x13   : > { %17622 = sst [smem:[#allocation41_spill]] %s15631_s27  ;;  %s384_s28 = sadd.s32 1, %s15494_s23 }
  0x14   : > { %s381_s29 = ssub.s32 %s15498_s24, %s15631_s27  ;;  %p394_p0 = scmp.ne.s32.totalorder %s15494_s23, %s15490_s22 }
  0x15   : > { %p382_p1 = scmp.eq.s32.totalorder %s381_s29, 0  ;;  %p395_p2 = scmp.eq.s32.totalorder %s15627_s25, 1 }
  0x16   : > { %p400_p3 = scmp.ne.s32.totalorder %s15490_s22, %s15486_s21  ;;  %p401_p4 = scmp.eq.s32.totalorder %s10345_s26, 1 }
  0x17   : > { %s15642_s30 = scalar_select %p382_p1, %s15494_s23, %s384_s28  }
  0x18   : > { %p15644_p5 = por %p395_p2, %p394_p0  ;;  %p15648_p6 = por %p401_p4, %p400_p3 }
  0x19   : > { %17623 = sst [smem:[#allocation42_spill]] %s15642_s30  ;;  %p10346_p7 = scmp.ge.s32.totalorder %s15498_s24, 1 }
  0x1a   : > { %s17624_s0 = scalar_select %p15644_p5, 1, 0 }
  0x1b   : > { %s17626_s17 = scalar_select %p15648_p6, 1, 0 }
  0x1c   : > { %17625 = sst [smem:[#allocation43_spill]] %s17624_s0  ;;  %p408_p8 = scmp.lt.s32.totalorder %s15498_s24, 3 }
  0x1d   : > { %17627 = sst [smem:[#allocation44_spill]] %s17626_s17  ;;  %p14931_p9 = scmp.eq.s32.totalorder %s15627_s25, 0 }
  0x1e   : > { %p15655_p10 = pnand %p10346_p7, %p408_p8  ;;  %s17629_s3 = sld [smem:[#allocation57_spill]] }
  0x1f   : > { %s15500_s28 = smov [#allocation11]   ;;  %s17630_s5 = sld [smem:[#allocation58_spill]] }
  0x20   : > { %p14887_p11 = pneg %p15655_p10  ;;  %s437_s29 = sshll.u32 %s15500_s28, 4  ;;  %s438_s29 = int_to_ptr.vmem [resolvable:$true] %s437_s29 }
  0x21   : > { %s17632_s7 = sld [smem:[#allocation59_spill]]  ;;  %s15501_s21 = smov [#allocation14]  }
  0x22   : > { %p15669_p12 = pnand %p14931_p9, %p14887_p11  ;;  %s463_s28 = sshll.u32 %s15501_s21, 4  ;;  %s464_s28 = int_to_ptr.vmem [resolvable:$true] %s463_s28 }
  0x23   : > { %s15502_s23 = smov [#allocation17]   ;;  %s511_s0 = sshll.u32 %s17595_s9, 4  ;;  %s512_s0 = int_to_ptr.hbm [resolvable:$true] %s511_s0 }
  0x24   : > { %s435_s26 = sshll.u32 %s17629_s3, 4  ;;  %s486_s30 = sshll.u32 %s15502_s23, 4  ;;  %s436_s26 = int_to_ptr.hbm [resolvable:$true] %s435_s26  ;;  %s487_s30 = int_to_ptr.vmem [resolvable:$true] %s486_s30 }
  0x25   : > { %s461_s27 = sshll.u32 %s17630_s5, 4  ;;  %s15503_s16 = smov 128   ;;  %s462_s27 = int_to_ptr.hbm [resolvable:$true] %s461_s27 }
  0x26   : > { %14893 = dma.hbm_to_vmem [thread:$0]  (!%p15669_p12), %s436_s26, 16, %s438_s29, [#allocation12]  }
  0x27   : > { %s484_s3 = sshll.u32 %s17632_s7, 4  ;;  %s15504_s19 = smov 8   ;;  %s485_s3 = int_to_ptr.hbm [resolvable:$true] %s484_s3 }
  0x28   : > { %14899 = dma.hbm_to_vmem [thread:$0]  (!%p15669_p12), %s462_s27, 16, %s464_s28, [#allocation15]  }
  0x29   : > { %14905 = dma.hbm_to_vmem [thread:$0]  (!%p15669_p12), %s485_s3, 18432, %s487_s30, [#allocation18], %s15503_s16, %s15503_s16, %s15504_s19  }
  0x2a   : > { %s15505_s21 = smov [#allocation20]   ;;  %s537_s27 = sshll.u32 %s17597_s11, 4  ;;  %s538_s27 = int_to_ptr.hbm [resolvable:$true] %s537_s27 }
  0x2b   : > { %s513_s26 = sshll.u32 %s15505_s21, 4  ;;  %s564_s24 = sshll.u32 %s17600_s14, 4  ;;  %s514_s26 = int_to_ptr.vmem [resolvable:$true] %s513_s26  ;;  %s565_s24 = int_to_ptr.hbm [resolvable:$true] %s564_s24 }
  0x2c   : > { %14911 = dma.hbm_to_vmem [thread:$0]  (!%p15669_p12), %s512_s0, 32, %s514_s26, [#allocation21]  }
  0x2d   : > { %s15506_s23 = smov [#allocation23]   ;;  %s15507_s3 = smov [#allocation26]  }
  0x2e   : > { %s539_s7 = sshll.u32 %s15506_s23, 4  ;;  %s566_s16 = sshll.u32 %s15507_s3, 4  ;;  %s540_s7 = int_to_ptr.vmem [resolvable:$true] %s539_s7  ;;  %s567_s16 = int_to_ptr.vmem [resolvable:$true] %s566_s16 }
  0x2f   : > { %14917 = dma.hbm_to_vmem [thread:$0]  (!%p15669_p12), %s538_s27, 64, %s540_s7, [#allocation24]  }
  0x30   : > { %s423_s21 = sshll.u32 %s17588_s2, 4  ;;  %s446_s29 = sshll.u32 %s17590_s4, 4  ;;  %s424_s21 = int_to_ptr.hbm [resolvable:$true] %s423_s21  ;;  %s447_s29 = int_to_ptr.hbm [resolvable:$true] %s446_s29 }
  0x31   : > { %14923 = dma.hbm_to_vmem [thread:$0]  (!%p15669_p12), %s565_s24, 16, %s567_s16, [#allocation27]  }
  0x32   : > { %s15508_s20 = smov [#allocation8]   ;;  %s15509_s7 = smov [#allocation13]  }
  0x33   : > { %s425_s28 = sshll.u32 %s15508_s20, 4  ;;  %s448_s27 = sshll.u32 %s15509_s7, 4  ;;  %s426_s28 = int_to_ptr.vmem [resolvable:$true] %s425_s28  ;;  %s449_s27 = int_to_ptr.vmem [resolvable:$true] %s448_s27 }
  0x34   : > { %14890 = dma.hbm_to_vmem [thread:$0]  (!%p15669_p12), %s424_s21, 16, %s426_s28, [#allocation9]  }
  0x35   : > { %s15510_s5 = smov 64   ;;  %s15511_s23 = smov 4  }
  0x36   : > { %14896 = dma.hbm_to_vmem [thread:$0]  (!%p15669_p12), %s447_s29, 4608, %s449_s27, [#allocation12], %s15510_s5, %s15510_s5, %s15511_s23  }
  0x37   : > { %s473_s16 = sshll.u32 %s17592_s6, 4  ;;  %s15512_s30 = smov [#allocation16]   ;;  %s474_s16 = int_to_ptr.hbm [resolvable:$true] %s473_s16 }
  0x38   : > { %s475_s19 = sshll.u32 %s15512_s30, 4  ;;  %s499_s21 = sshll.u32 %s17594_s8, 4  ;;  %s476_s19 = int_to_ptr.vmem [resolvable:$true] %s475_s19  ;;  %s500_s21 = int_to_ptr.hbm [resolvable:$true] %s499_s21 }
  0x39   : > { %14902 = dma.hbm_to_vmem [thread:$0]  (!%p15669_p12), %s474_s16, 16, %s476_s19, [#allocation15]  }
  0x3a   : > { %s15513_s20 = smov [#allocation19]   ;;  %s522_s27 = sshll.u32 %s17596_s10, 4  ;;  %s523_s27 = int_to_ptr.hbm [resolvable:$true] %s522_s27 }
  0x3b   : > { %s501_s28 = sshll.u32 %s15513_s20, 4  ;;  %s15514_s5 = smov [#allocation22]   ;;  %s502_s28 = int_to_ptr.vmem [resolvable:$true] %s501_s28 }
  0x3c   : > { %14908 = dma.hbm_to_vmem [thread:$0]  (!%p15669_p12), %s500_s21, 32, %s502_s28, [#allocation18]  }
  0x3d   : > { %s524_s23 = sshll.u32 %s15514_s5, 4  ;;  %s549_s16 = sshll.u32 %s17598_s12, 4  ;;  %s525_s23 = int_to_ptr.vmem [resolvable:$true] %s524_s23  ;;  %s550_s16 = int_to_ptr.hbm [resolvable:$true] %s549_s16 }
  0x3e   : > { %s15515_s30 = smov 256   ;;  %s15516_s19 = smov 16  }
  0x3f   : > { %14914 = dma.hbm_to_vmem [thread:$0]  (!%p15669_p12), %s523_s27, 73728, %s525_s23, [#allocation21], %s15515_s30, %s15515_s30, %s15516_s19  }
  0x40   : > { %s15517_s0 = smov [#allocation25]   ;;  %s576_s29 = sshll.u32 %s17601_s15, 4  ;;  %s577_s29 = int_to_ptr.hbm [resolvable:$true] %s576_s29 }
  0x41   : > { %s551_s26 = sshll.u32 %s15517_s0, 4  ;;  %s15518_s21 = smov [#allocation28]   ;;  %s552_s26 = int_to_ptr.vmem [resolvable:$true] %s551_s26 }
  0x42   : > { %14920 = dma.hbm_to_vmem [thread:$0]  (!%p15669_p12), %s550_s16, 64, %s552_s26, [#allocation24]  }
  0x43   : > { %s578_s28 = sshll.u32 %s15518_s21, 4  ;;  %600 = sbr.rel (%p15655_p10) target bundleno = 2171 (0x87b), region = 84  ;;  %s579_s28 = int_to_ptr.vmem [resolvable:$true] %s578_s28 }
  0x44   : > { %14926 = dma.hbm_to_vmem [thread:$0]  (!%p15669_p12), %s577_s29, 16, %s579_s28, [#allocation27]  }
  0x48   : > { %15453 = dma.done.wait (%p14931_p9), [#allocation9], 16  }
  0x49   : > { %15455 = vsyncadd (%p14931_p9), [#allocation9], 4294967280 }
  0x4a   : > { %15457 = dma.done.wait (%p14931_p9), [#allocation12], 4624  }
  0x4b   : > { %15459 = vsyncadd (%p14931_p9), [#allocation12], 4294962672 }
  0x4c   : > { %15461 = dma.done.wait (%p14931_p9), [#allocation15], 32  }
  0x4d   : > { %15463 = vsyncadd (%p14931_p9), [#allocation15], 4294967264 }
  0x4e   : > { %15465 = dma.done.wait (%p14931_p9), [#allocation18], 18464  }
  0x4f   : > { %15467 = vsyncadd (%p14931_p9), [#allocation18], 4294948832 }
  0x50   : > { %15469 = dma.done.wait (%p14931_p9), [#allocation21], 73760  }
  0x51   : > { %15471 = vsyncadd (%p14931_p9), [#allocation21], 4294893536 }
  0x52   : > { %15473 = dma.done.wait (%p14931_p9), [#allocation24], 128  }
  0x53   : > { %15475 = vsyncadd (%p14931_p9), [#allocation24], 4294967168 }
  0x54   : > { %15477 = dma.done.wait (%p14931_p9), [#allocation27], 32  }
  0x55   : > { %15479 = vsyncadd (%p14931_p9), [#allocation27], 4294967264  ;;  %v761_v0 = vld [vmem:[%s17587_s1 + $0x30] sm:$0x3]  ;;  %vm930_vm0 = vcmask 1041408   ;;  %v13965_v4 = vld [vmem:[%s17587_s1 + $0x28] sm:$0xff] }
  0x56   : > { %v867_v1 = vunpack.c.l.b16 %v761_v0  ;;  %v13964_v5 = vld [vmem:[%s17587_s1 + $0x20] sm:$0xff]  ;;  %s10375_s3 = sshll.u32 %s15627_s25, 5  ;;  %v13963_v6 = vld [vmem:[%s17587_s1 + $0x18] sm:$0xff]  ;;  %v13962_v7 = vld [vmem:[%s17587_s1 + $0x10] sm:$0xff]  ;;  %s17633_s18 = sld [smem:[#allocation56_spill]]  ;;  %vm881_vm1 = vcmask 818176  }
  0x57   : > { %p711_p13 = scmp.lt.s32.totalorder %s10375_s3, 63  ;;  %v13961_v8 = vld [vmem:[%s17587_s1 + $0x8] sm:$0xff]  ;;  %v13960_v9 = vld [vmem:[%s17587_s1] sm:$0xff]  ;;  %v15821_v30 = vld [vmem:[#allocation8] ss:$0 sm:$0xff]  ;;  %vm1127_vm2 = vcmask 519168  }
  0x58   : > { %v874_v2 = vpack.c.b16 %v867_v1, %v867_v1  ;;  %v15824_v32 = vld [vmem:[#allocation11] ss:$0 sm:$0xff]  ;;  %vm1360_vm3 = vsmask.f32 3328  ;;  %vm1361_vm4 = vsmask.f32 7440 }
  0x59   : > { %s17689_s3 = smov (!%p711_p13, %s10375_s3), 63  ;;  %vm15898_vm5 = vmor %vm1360_vm3, %vm1361_vm4  ;;  %s15520_s5 = smov 64   ;;  %vm1191_vm6 = vsmask.f32 7938  ;;  %vm1196_vm7 = vcmask 516096   ;;  %vm1610_vm11 = vcmask 1042432  }
  0x5a   : > { %v932_v3 = vsel %vm930_vm0, %v874_v2, 0  ;;  %s10376_s7 = sshll.u32 %s17689_s3, 2  ;;  %vm1197_vm8 = vsmask.f32 256  ;;  %vm15929_vm9 = vmand %vm1127_vm2, %vm1191_vm6  ;;  %vm1611_vm12 = vcmask 1046532   ;;  %vm1562_vm13 = vcmask 1043968  }
  0x5b   : > { %935 = vmatpush.bf16.msra.mxu0 %v932_v3  ;;  %vm15934_vm10 = vmand %vm1196_vm7, %vm1197_vm8  ;;  %vm3010_vm15 = vcmask 523264   ;;  %vm3293_vm0 = vcmask 1041409   ;;  %vm3311_vm3 = vcmask 1042434   ;;  %vm3312_vm4 = vsmask.f32 2304  ;;  %s708_s17 = sand.u32 1, %s15490_s22  }
  0x5c   : > { %s15787_s27 = scalar_lea.vmem %s17633_s18, %s10376_s7  ;;  %vm16163_vm14 = vmor %vm1610_vm11, %vm1611_vm12  ;;  %vm5035_vm11 = vcmask 1044484   ;;  %vm5036_vm12 = vsmask.f32 7954  ;;  %s709_s3 = scalar_lea.vmem [#allocation29], %s708_s17 }
  0x5d   : > { %v13944_v10 = vld [vmem:[%s15787_s27] sm:$0xff]  ;;  %v13945_v11 = vld [vmem:[%s15787_s27 + $0x8] sm:$0xff]  ;;  %v13946_v12 = vld [vmem:[%s15787_s27 + $0x10] sm:$0xff]  ;;  %s10162_s16 = sshll.u32 %s709_s3, 4  ;;  %s10152_s19 = scalar_lea.sflag [#allocation10], %s708_s17  ;;  %s10163_s16 = int_to_ptr.vmem [resolvable:$true] %s10162_s16 }
  0x5e   : > { %v13947_v13 = vld [vmem:[%s15787_s27 + $0x18] sm:$0xff]  ;;  %v13948_v14 = vld [vmem:[%s15787_s27 + $0x20] sm:$0xff]  ;;  %v13949_v15 = vld [vmem:[%s15787_s27 + $0x28] sm:$0xff] }
  0x5f   : > { %936 = vmatpush.bf16.msra.mxu0 %v13965_v4  ;;  %v13950_v16 = vld [vmem:[%s15787_s27 + $0x30] sm:$0xff]  ;;  %v13951_v17 = vld [vmem:[%s15787_s27 + $0x38] sm:$0xff]  ;;  %v13952_v18 = vld [vmem:[%s15787_s27 + $0x40] sm:$0xff] }
  0x60   : > { %v13953_v21 = vld [vmem:[%s15787_s27 + $0x48] sm:$0xff]  ;;  %v13954_v24 = vld [vmem:[%s15787_s27 + $0x50] sm:$0xff]  ;;  %v13955_v27 = vld [vmem:[%s15787_s27 + $0x58] sm:$0xff] }
  0x61   : > { %v13956_v33 = vld [vmem:[%s15787_s27 + $0x60] sm:$0xff]  ;;  %v13957_v43 = vld [vmem:[%s15787_s27 + $0x68] sm:$0xff]  ;;  %v13958_v53 = vld [vmem:[%s15787_s27 + $0x70] sm:$0xff] }
  0x62   : > { %v13959_v63 = vld [vmem:[%s15787_s27 + $0x78] sm:$0xff] }
  0x63   : > { %937 = vmatpush.bf16.msra.mxu0 %v13964_v5 }
  0x67   : > { %938 = vmatpush.bf16.msra.mxu0 %v13963_v6 }
  0x6b   : > { %939 = vmatpush.bf16.msra.mxu0 %v13962_v7 }
  0x6f   : > { %940 = vmatpush.bf16.msra.mxu0 %v13961_v8 }
  0x73   : > { %941 = vmatpush.bf16.msra.mxu0 %v13960_v9 }
  0x76   : > { %10465 = vmatmul.msk.bf16.vlgmr.msra.gmra.mxu0 %vm881_vm1, %v13944_v10 }
  0x86   : > { %10466 = vmatmul.msk.bf16.gmra.mxu0 %vm881_vm1, %v13945_v11 }
  0x96   : > { %10467 = vmatmul.msk.bf16.gmra.mxu0 %vm881_vm1, %v13946_v12 }
  0xa6   : > { %10468 = vmatmul.msk.bf16.gmra.mxu0 %vm881_vm1, %v13947_v13  ;;  %v15519_v13 = vmov 0  }
  0xa7   : > { %1130 = vst.msk [vmem:[#allocation2 + $0x8] sm:$0xf] %vm1127_vm2, %v15519_v13 }
  0xa8   : > { %1131 = vst.msk [vmem:[#allocation2 + $0xc] sm:$0xf] %vm1127_vm2, %v15519_v13 }
  0xa9   : > { %1128 = vst.msk [vmem:[#allocation2] sm:$0xf] %vm1127_vm2, %v15519_v13 }
  0xaa   : > { %1129 = vst.msk [vmem:[#allocation2 + $0x4] sm:$0xf] %vm1127_vm2, %v15519_v13 }
  0xab   : > { %1132 = vst.msk [vmem:[#allocation2 + $0x10] sm:$0xf] %vm1127_vm2, %v15519_v13 }
  0xac   : > { %1133 = vst.msk [vmem:[#allocation2 + $0x14] sm:$0xf] %vm1127_vm2, %v15519_v13 }
  0xad   : > { %1134 = vst.msk [vmem:[#allocation2 + $0x18] sm:$0xf] %vm1127_vm2, %v15519_v13 }
  0xae   : > { %1135 = vst.msk [vmem:[#allocation2 + $0x1c] sm:$0xf] %vm1127_vm2, %v15519_v13 }
  0xaf   : > { %1136 = vst.msk [vmem:[#allocation2 + $0x20] sm:$0xf] %vm1127_vm2, %v15519_v13 }
  0xb0   : > { %1137 = vst.msk [vmem:[#allocation2 + $0x24] sm:$0xf] %vm1127_vm2, %v15519_v13 }
  0xb1   : > { %1138 = vst.msk [vmem:[#allocation2 + $0x28] sm:$0xf] %vm1127_vm2, %v15519_v13 }
  0xb2   : > { %5016 = vst [vmem:[#allocation4 + $0x10] sm:$0xff] %v15519_v13 }
  0xb3   : > { %1139 = vst.msk [vmem:[#allocation2 + $0x2c] sm:$0xf] %vm1127_vm2, %v15519_v13 }
  0xb4   : > { %1140 = vst.msk [vmem:[#allocation2 + $0x30] sm:$0xf] %vm1127_vm2, %v15519_v13 }
  0xb5   : > { %1141 = vst.msk [vmem:[#allocation2 + $0x34] sm:$0xf] %vm1127_vm2, %v15519_v13 }
  0xb6   : > { %10469 = vmatmul.msk.bf16.gmra.mxu0 %vm881_vm1, %v13948_v14  ;;  %1142 = vst.msk [vmem:[#allocation2 + $0x38] sm:$0xf] %vm1127_vm2, %v15519_v13 }
  0xb7   : > { %1143 = vst.msk [vmem:[#allocation2 + $0x3c] sm:$0xf] %vm1127_vm2, %v15519_v13 }
  0xb8   : > { %1144 = vst.msk [vmem:[#allocation2 + $0x40] sm:$0xf] %vm1127_vm2, %v15519_v13 }
  0xb9   : > { %1145 = vst.msk [vmem:[#allocation2 + $0x44] sm:$0xf] %vm1127_vm2, %v15519_v13 }
  0xba   : > { %1146 = vst.msk [vmem:[#allocation2 + $0x48] sm:$0xf] %vm1127_vm2, %v15519_v13 }
  0xbb   : > { %1147 = vst.msk [vmem:[#allocation2 + $0x4c] sm:$0xf] %vm1127_vm2, %v15519_v13 }
  0xbc   : > { %3272 = vst [vmem:[#allocation3] sm:$0xf] %v15519_v13 }
  0xbd   : > { %3273 = vst [vmem:[#allocation3 + $0x4] sm:$0xf] %v15519_v13 }
  0xbe   : > { %3274 = vst [vmem:[#allocation3 + $0x8] sm:$0xf] %v15519_v13 }
  0xbf   : > { %3275 = vst [vmem:[#allocation3 + $0xc] sm:$0xf] %v15519_v13 }
  0xc0   : > { %3276 = vst [vmem:[#allocation3 + $0x10] sm:$0xf] %v15519_v13 }
  0xc1   : > { %3277 = vst [vmem:[#allocation3 + $0x14] sm:$0xf] %v15519_v13 }
  0xc2   : > { %5017 = vst [vmem:[#allocation4] sm:$0xff] %v15519_v13 }
  0xc3   : > { %5018 = vst [vmem:[#allocation4 + $0x18] sm:$0xff] %v15519_v13 }
  0xc4   : > { %5019 = vst [vmem:[#allocation4 + $0x8] sm:$0xff] %v15519_v13 }
  0xc5   : > { %5072 = vst [vmem:[#allocation7] sm:$0xff] %v15519_v13 }
  0xc6   : > { %10470 = vmatmul.msk.bf16.gmra.mxu0 %vm881_vm1, %v13949_v15 }
  0xd6   : > { %10471 = vmatmul.msk.bf16.gmra.mxu0 %vm881_vm1, %v13950_v16  ;;  %v1344_v16 = vld [vmem:[#allocation2] sm:$0xf] }
  0xe6   : > { %10472 = vmatmul.msk.bf16.gmra.mxu0 %vm881_vm1, %v13951_v17  ;;  %v1364_v17 = vshrl.u32 %v1344_v16, 16 }
  0xf3   : > { %v943_v19 = vpop.f32.mrf.mxu0 }
  0xf4   : > { %v1027_v31 = vmul.f32 %v15821_v30, %v943_v19  ;;  %v15889_v19 = vld [vmem:[#allocation2 + $0x4] sm:$0xf] }
  0xf5   : > { %v1377_v13 = vshrl.u32 %v15889_v19, 16 }
  0xf6   : > { %10473 = vmatmul.msk.bf16.gmra.mxu0 %vm881_vm1, %v13952_v18  ;;  %v1063_v35 = vadd.f32 %v15824_v32, %v1027_v31  ;;  %v1367_v18 = vshll.u32 %v1344_v16, 16 }
  0xf8   : > { %v1095_v38 = vmax.f32 %v1063_v35, 0.0 }
  0xfb   : > { %v15807_v20 = vpop.f32.mrf.mxu0 }
 0x103   : > { %v948_v22 = vpop.f32.mrf.mxu0 }
 0x104   : > { %v1029_v42 = vmul.f32 %v15821_v30, %v948_v22  ;;  %v1369_v22 = vrot.slane %v1367_v18, 5 }
 0x106   : > { %10474 = vmatmul.msk.bf16.gmra.mxu0 %vm881_vm1, %v13953_v21  ;;  %v1065_v45 = vadd.f32 %v15824_v32, %v1029_v42  ;;  %v1366_v21 = vrot.slane %v1364_v17, 4 }
 0x108   : > { %v1097_v48 = vmax.f32 %v1065_v45, 0.0 }
 0x10b   : > { %v15811_v23 = vpop.f32.mrf.mxu0 }
 0x113   : > { %v953_v25 = vpop.f32.mrf.mxu0 }
 0x114   : > { %v1031_v52 = vmul.f32 %v15821_v30, %v953_v25  ;;  %v1370_v25 = vor.u32 %v1369_v22, %v1366_v21 }
 0x116   : > { %10475 = vmatmul.msk.bf16.gmra.mxu0 %vm881_vm1, %v13954_v24  ;;  %v1067_v55 = vadd.f32 %v15824_v32, %v1031_v52  ;;  %v1373_v24 = vshll.u32 %v15889_v19, 16  ;;  %v1030_v19 = vmul.f32 %v15821_v30, %v15811_v23  ;;  %v1215_v23 = vld [vmem:[#allocation2 + $0x14] sm:$0x1] }
 0x118   : > { %v1099_v58 = vmax.f32 %v1067_v55, 0.0  ;;  %v15902_v31 = vrot.slane %v1373_v24, 5 }
 0x11b   : > { %v15815_v26 = vpop.f32.mrf.mxu0 }
 0x123   : > { %v958_v28 = vpop.f32.mrf.mxu0 }
 0x124   : > { %v1033_v62 = vmul.f32 %v15821_v30, %v958_v28  ;;  %v14739_v28 = vld [vmem:[#allocation22 + $0x104c] sm:$0xf0] }
 0x126   : > { %10476 = vmatmul.msk.bf16.gmra.mxu0 %vm881_vm1, %v13955_v27  ;;  %v1069_v1 = vadd.f32 %v15824_v32, %v1033_v62 }
 0x128   : > { %v1101_v4 = vmax.f32 %v1069_v1, 0.0 }
 0x12b   : > { %v15819_v29 = vpop.f32.mrf.mxu0 }
 0x133   : > { %v963_v34 = vpop.f32.mrf.mxu0 }
 0x134   : > { %v1035_v36 = vmul.f32 %v15821_v30, %v963_v34 }
 0x136   : > { %v1071_v37 = vadd.f32 %v15824_v32, %v1035_v36  ;;  %10477 = vmatmul.msk.bf16.gmra.mxu0 %vm881_vm1, %v13956_v33  ;;  %v1371_v33 = vrot.slane %v1370_v25, 4 }
 0x138   : > { %v1103_v39 = vmax.f32 %v1071_v37, 0.0  ;;  %v1376_v34 = vsel %vm15898_vm5, %v1371_v33, %v15902_v31 }
 0x139   : > { %1517 = vrot.lane.b32.xlu2 %v1376_v34, %s15520_s5 }
 0x13a   : > { %v15831_v40 = vmax.f32 %v1095_v38, %v1103_v39 }
 0x13b   : > { %v15833_v41 = vpop.f32.mrf.mxu0 }
 0x13c   : > { %v1036_v39 = vmul.f32 %v15821_v30, %v15833_v41 }
 0x143   : > { %v968_v44 = vpop.f32.mrf.mxu0 }
 0x144   : > { %v1037_v46 = vmul.f32 %v15821_v30, %v968_v44 }
 0x146   : > { %v1073_v47 = vadd.f32 %v15824_v32, %v1037_v46  ;;  %10478 = vmatmul.msk.bf16.gmra.mxu0 %vm881_vm1, %v13957_v43  ;;  %v1028_v43 = vmul.f32 %v15821_v30, %v15807_v20 }
 0x148   : > { %v1105_v49 = vmax.f32 %v1073_v47, 0.0  ;;  %v1072_v47 = vadd.f32 %v15824_v32, %v1036_v39 }
 0x14a   : > { %v15841_v50 = vmax.f32 %v1097_v48, %v1105_v49  ;;  %v1064_v49 = vadd.f32 %v15824_v32, %v1028_v43  ;;  %v1104_v55 = vmax.f32 %v1072_v47, 0.0  ;;  %v1212_v47 = vld [vmem:[#allocation2 + $0x10] sm:$0xf] }
 0x14b   : > { %v15843_v51 = vpop.f32.mrf.mxu0 }
 0x14c   : > { %v1038_v22 = vmul.f32 %v15821_v30, %v15843_v51 }
 0x14e   : > { %v1074_v39 = vadd.f32 %v15824_v32, %v1038_v22 }
 0x153   : > { %v973_v54 = vpop.f32.mrf.mxu0 }
 0x154   : > { %v1039_v56 = vmul.f32 %v15821_v30, %v973_v54 }
 0x156   : > { %v1075_v57 = vadd.f32 %v15824_v32, %v1039_v56  ;;  %10479 = vmatmul.msk.bf16.gmra.mxu0 %vm881_vm1, %v13958_v53 }
 0x158   : > { %v1107_v59 = vmax.f32 %v1075_v57, 0.0  ;;  %v1096_v57 = vmax.f32 %v1064_v49, 0.0 }
 0x15a   : > { %v15851_v60 = vmax.f32 %v1099_v58, %v1107_v59 }
 0x15b   : > { %v15853_v61 = vpop.f32.mrf.mxu0 }
 0x163   : > { %v978_v0 = vpop.f32.mrf.mxu0 }
 0x164   : > { %v1041_v2 = vmul.f32 %v15821_v30, %v978_v0  ;;  %v1149_v0 = vmax.f32 %v1096_v57, %v1104_v55 }
 0x166   : > { %v1077_v3 = vadd.f32 %v15824_v32, %v1041_v2  ;;  %10480 = vmatmul.msk.bf16.gmra.mxu0 %vm881_vm1, %v13959_v63  ;;  %vm3294_vm1 = vsmask.f32 1280 }
 0x167   : > { %vm16833_vm7 = vmand %vm3293_vm0, %vm3294_vm1 }
 0x168   : > { %v1109_v5 = vmax.f32 %v1077_v3, 0.0 }
 0x16a   : > { %v15861_v6 = vmax.f32 %v1101_v4, %v1109_v5  ;;  %v1193_v5 = vld [vmem:[#allocation2 + $0x8] sm:$0xf] }
 0x16b   : > { %v15863_v7 = vpop.f32.mrf.mxu0 }
 0x173   : > { %v983_v8 = vpop.f32.mrf.mxu0 }
 0x174   : > { %v1043_v35 = vmul.f32 %v15821_v30, %v983_v8 }
 0x176   : > { %v1079_v37 = vadd.f32 %v15824_v32, %v1043_v35 }
 0x178   : > { %v1111_v45 = vmax.f32 %v1079_v37, 0.0 }
 0x17b   : > { %v985_v9 = vpop.f32.mrf.mxu0 }
 0x17c   : > { %v1044_v44 = vmul.f32 %v15821_v30, %v985_v9  ;;  %v1199_v9 = vld [vmem:[#allocation2 + $0xc] sm:$0x1] }
 0x17e   : > { %v1080_v52 = vadd.f32 %v15824_v32, %v1044_v44 }
 0x180   : > { %v1112_v58 = vmax.f32 %v1080_v52, 0.0 }
 0x183   : > { %v15865_v10 = vpop.f32.mrf.mxu0 }
 0x184   : > { %v1045_v59 = vmul.f32 %v15821_v30, %v15865_v10 }
 0x186   : > { %v1081_v4 = vadd.f32 %v15824_v32, %v1045_v59 }
 0x188   : > { %v1113_v37 = vmax.f32 %v1081_v4, 0.0 }
 0x18b   : > { %v15867_v11 = vpop.f32.mrf.mxu0 }
 0x18c   : > { %v1046_v35 = vmul.f32 %v15821_v30, %v15867_v11 }
 0x193   : > { %v15869_v12 = vpop.f32.mrf.mxu0 }
 0x19b   : > { %v15873_v14 = vpop.f32.mrf.mxu0 }
 0x1a3   : > { %v15883_v15 = vpop.f32.mrf.mxu0 }
 0x1ab   : > { %v15895_v27 = vpop.f32.mrf.mxu0 }
 0x1b3   : > { %v1003_v36 = vpop.f32.mrf.mxu0 }
 0x1b4   : > { %v1051_v38 = vmul.f32 %v15821_v30, %v1003_v36  ;;  %v1379_v36 = vrot.slane %v1377_v13, 4 }
 0x1b6   : > { %v1087_v42 = vadd.f32 %v15824_v32, %v1051_v38  ;;  %v1380_v11 = vor.u32 %v1379_v36, %v15902_v31  ;;  %v1047_v31 = vmul.f32 %v15821_v30, %v15869_v12  ;;  %v1040_v36 = vmul.f32 %v15821_v30, %v15853_v61 }
 0x1b8   : > { %v1119_v46 = vmax.f32 %v1087_v42, 0.0  ;;  %v1083_v12 = vadd.f32 %v15824_v32, %v1047_v31 }
 0x1ba   : > { %v1156_v48 = vmax.f32 %v1111_v45, %v1119_v46  ;;  %v1066_v45 = vadd.f32 %v15824_v32, %v1030_v19  ;;  %v1082_v46 = vadd.f32 %v15824_v32, %v1046_v35 }
 0x1bb   : > { %v1005_v53 = vpop.f32.mrf.mxu0 }
 0x1bc   : > { %v1164_v41 = vmax.f32 %v15831_v40, %v1156_v48  ;;  %v1052_v54 = vmul.f32 %v15821_v30, %v1005_v53 }
 0x1be   : > { %v1172_v56 = vpack.c.bf16 %v1164_v41, %v1164_v41  ;;  %v1088_v20 = vadd.f32 %v15824_v32, %v1052_v54  ;;  %v1106_v54 = vmax.f32 %v1074_v39, 0.0 }
 0x1c0   : > { %v1181_v62 = vshrl.u32 %v1172_v56, 16  ;;  %v1120_v63 = vmax.f32 %v1088_v20, 0.0  ;;  %v1184_v2 = vshll.u32 %v1172_v56, 16 }
 0x1c2   : > { %v1183_v1 = vrot.slane %v1181_v62, 7  ;;  %v1157_v3 = vmax.f32 %v1112_v58, %v1120_v63 }
 0x1c3   : > { %v1008_v10 = vpop.f32.mrf.mxu0 }
 0x1c4   : > { %v1186_v16 = vor.u32 %v1184_v2, %v1183_v1  ;;  %v1187_v17 = vrot.slane %v1183_v1, 4  ;;  %v1165_v18 = vmax.f32 %v1149_v0, %v1157_v3  ;;  %v1053_v21 = vmul.f32 %v15821_v30, %v1008_v10 }
 0x1c5   : > { %v1098_v0 = vmax.f32 %v1066_v45, 0.0  ;;  %v1114_v1 = vmax.f32 %v1082_v46, 0.0  ;;  %v1032_v45 = vmul.f32 %v15821_v30, %v15815_v26  ;;  %v1048_v46 = vmul.f32 %v15821_v30, %v15873_v14 }
 0x1c6   : > { %v1194_v24 = vsel %vm15929_vm9, %v1186_v16, %v1193_v5  ;;  %v1200_v25 = vsel %vm15934_vm10, %v1187_v17, %v1199_v9  ;;  %v1173_v33 = vpack.c.bf16 %v1165_v18, %v1165_v18  ;;  %v1089_v34 = vadd.f32 %v15824_v32, %v1053_v21  ;;  %v1228_v18 = vld [vmem:[#allocation2 + $0x18] sm:$0xf]  ;;  %v1231_v21 = vld [vmem:[#allocation2 + $0x1c] sm:$0x1] }
 0x1c7   : > { %1195 = vst [vmem:[#allocation2 + $0x8] sm:$0xf] %v1194_v24  ;;  %v1151_v9 = vmax.f32 %v1098_v0, %v1106_v54  ;;  %v1068_v14 = vadd.f32 %v15824_v32, %v1032_v45 }
 0x1c8   : > { %1201 = vst [vmem:[#allocation2 + $0xc] sm:$0x1] %v1200_v25  ;;  %v1203_v51 = vshrl.u32 %v1173_v33, 16  ;;  %v1121_v38 = vmax.f32 %v1089_v34, 0.0  ;;  %v1206_v43 = vshll.u32 %v1173_v33, 16 }
 0x1ca   : > { %v1205_v42 = vrot.slane %v1203_v51, 7  ;;  %v1158_v44 = vmax.f32 %v1113_v37, %v1121_v38 }
 0x1cb   : > { %v1010_v48 = vpop.f32.mrf.mxu0 }
 0x1cc   : > { %v1208_v49 = vor.u32 %v1206_v43, %v1205_v42  ;;  %v1209_v52 = vrot.slane %v1205_v42, 4  ;;  %v1166_v53 = vmax.f32 %v15841_v50, %v1158_v44  ;;  %v1054_v41 = vmul.f32 %v15821_v30, %v1010_v48 }
 0x1cd   : > { %v1381_v50 = vrot.slane %v1380_v11, 4 }
 0x1ce   : > { %v1213_v55 = vsel %vm15929_vm9, %v1208_v49, %v1212_v47  ;;  %v1216_v56 = vsel %vm15934_vm10, %v1209_v52, %v1215_v23  ;;  %v1174_v20 = vpack.c.bf16 %v1166_v53, %v1166_v53  ;;  %v1090_v57 = vadd.f32 %v15824_v32, %v1054_v41  ;;  %v1689_v58 = vld [vmem:[#allocation2 + $0x8] sm:$0xf] }
 0x1cf   : > { %v1346_v59 = vld [vmem:[#allocation2 + $0x8] sm:$0xf]  ;;  %1214 = vst [vmem:[#allocation2 + $0x10] sm:$0xf] %v1213_v55  ;;  %1719 = vrot.lane.b32.xlu0 %v1689_v58, %s15520_s5  ;;  %v1347_v17 = vld [vmem:[#allocation2 + $0xc] sm:$0xf]  ;;  %v1076_v49 = vadd.f32 %v15824_v32, %v1040_v36  ;;  %v1084_v55 = vadd.f32 %v15824_v32, %v1048_v46 }
 0x1d0   : > { %v1383_v62 = vshll.u32 %v1346_v59, 16  ;;  %v1387_v63 = vshrl.u32 %v1346_v59, 16  ;;  %1217 = vst [vmem:[#allocation2 + $0x14] sm:$0x1] %v1216_v56  ;;  %v1219_v2 = vshrl.u32 %v1174_v20, 16  ;;  %v1122_v3 = vmax.f32 %v1090_v57, 0.0 }
 0x1d1   : > { %v1222_v13 = vshll.u32 %v1174_v20, 16  ;;  %v1393_v37 = vshll.u32 %v1347_v17, 16  ;;  %v1690_v43 = vld [vmem:[#allocation2 + $0xc] sm:$0xf]  ;;  %v1397_v47 = vshrl.u32 %v1347_v17, 16  ;;  %v1115_v23 = vmax.f32 %v1083_v12, 0.0 }
 0x1d2   : > { %v1385_v4 = vrot.slane %v1383_v62, 5  ;;  %v1389_v5 = vrot.slane %v1387_v63, 4  ;;  %v1221_v10 = vrot.slane %v1219_v2, 7  ;;  %v1159_v16 = vmax.f32 %v1114_v1, %v1122_v3  ;;  %v1244_v56 = vld [vmem:[#allocation2 + $0x20] sm:$0xf] }
 0x1d3   : > { %v1013_v22 = vpop.f32.mrf.mxu0  ;;  %v1395_v52 = vrot.slane %v1393_v37, 5  ;;  %v1247_v20 = vld [vmem:[#allocation2 + $0x24] sm:$0x1]  ;;  %v1399_v59 = vrot.slane %v1397_v47, 4  ;;  %v1316_v0 = vld [vmem:[#allocation2 + $0x8] sm:$0xf]  ;;  %v1049_v2 = vmul.f32 %v15821_v30, %v15883_v15  ;;  %v1034_v17 = vmul.f32 %v15821_v30, %v15819_v29 }
 0x1d4   : > { %v1386_v24 = vsel %vm15898_vm5, %v1381_v50, %v1385_v4  ;;  %v1390_v25 = vor.u32 %v1389_v5, %v1385_v4  ;;  %v1224_v33 = vor.u32 %v1222_v13, %v1221_v10  ;;  %v1225_v34 = vrot.slane %v1221_v10, 4  ;;  %1331 = vst.msk [vmem:[#allocation5 + $0x28] sm:$0xf] %vm1127_vm2, %v1316_v0 }
 0x1d5   : > { %v1167_v19 = vmax.f32 %v1151_v9, %v1159_v16  ;;  %v1055_v35 = vmul.f32 %v15821_v30, %v1013_v22  ;;  %1519 = vrot.lane.b32.xlu2 %v1386_v24, %s15520_s5  ;;  %v1108_v1 = vmax.f32 %v1076_v49, 0.0  ;;  %v1400_v15 = vor.u32 %v1399_v59, %v1395_v52 }
 0x1d6   : > { %v1229_v51 = vsel %vm15929_vm9, %v1224_v33, %v1228_v18  ;;  %v1232_v38 = vsel %vm15934_vm10, %v1225_v34, %v1231_v21  ;;  %v1691_v44 = vld [vmem:[#allocation2 + $0x10] sm:$0xf]  ;;  %v1391_v61 = vrot.slane %v1390_v25, 4  ;;  %v1100_v12 = vmax.f32 %v1068_v14, 0.0 }
 0x1d7   : > { %v1175_v39 = vpack.c.bf16 %v1167_v19, %v1167_v19  ;;  %v1091_v42 = vadd.f32 %v15824_v32, %v1055_v35  ;;  %1230 = vst [vmem:[#allocation2 + $0x18] sm:$0xf] %v1229_v51  ;;  %1721 = vrot.lane.b32.xlu0 %v1690_v43, %s15520_s5  ;;  %1723 = vrot.lane.b32.xlu1 %v1691_v44, %s15520_s5  ;;  %v1348_v54 = vld [vmem:[#allocation2 + $0x10] sm:$0xf]  ;;  %v1692_v13 = vld [vmem:[#allocation2 + $0x14] sm:$0xf] }
 0x1d8   : > { %1233 = vst [vmem:[#allocation2 + $0x1c] sm:$0x1] %v1232_v38  ;;  %v1396_v58 = vsel %vm15898_vm5, %v1391_v61, %v1395_v52  ;;  %v1403_v3 = vshll.u32 %v1348_v54, 16  ;;  %v1407_v4 = vshrl.u32 %v1348_v54, 16  ;;  %v1116_v18 = vmax.f32 %v1084_v55, 0.0 }
 0x1d9   : > { %v1235_v48 = vshrl.u32 %v1175_v39, 16  ;;  %v1123_v11 = vmax.f32 %v1091_v42, 0.0  ;;  %v1238_v41 = vshll.u32 %v1175_v39, 16  ;;  %v1042_v24 = vmul.f32 %v15821_v30, %v15863_v7  ;;  %v1260_v51 = vld [vmem:[#allocation2 + $0x28] sm:$0xf] }
 0x1da   : > { %v1085_v25 = vadd.f32 %v15824_v32, %v1049_v2  ;;  %v1405_v33 = vrot.slane %v1403_v3, 5  ;;  %v1409_v34 = vrot.slane %v1407_v4, 4  ;;  %v1153_v19 = vmax.f32 %v1100_v12, %v1108_v1  ;;  %v1263_v38 = vld [vmem:[#allocation2 + $0x2c] sm:$0x1]  ;;  %v1349_v46 = vld [vmem:[#allocation2 + $0x14] sm:$0xf] }
 0x1db   : > { %v1237_v53 = vrot.slane %v1235_v48, 7  ;;  %v1160_v26 = vmax.f32 %v1115_v23, %v1123_v11  ;;  %v1015_v57 = vpop.f32.mrf.mxu0  ;;  %v16007_v37 = vadd.f32 %v15824_v32, %v1034_v17  ;;  %v1401_v42 = vrot.slane %v1400_v15, 4  ;;  %v1276_v1 = vld [vmem:[#allocation2 + $0x30] sm:$0xf]  ;;  %v1279_v4 = vld [vmem:[#allocation2 + $0x34] sm:$0x1] }
 0x1dc   : > { %v1056_v63 = vmul.f32 %v15821_v30, %v1015_v57  ;;  %v16011_v61 = vadd.f32 %v15824_v32, %v1042_v24  ;;  %v1117_v47 = vmax.f32 %v1085_v25, 0.0  ;;  %v1410_v48 = vor.u32 %v1409_v34, %v1405_v33 }
 0x1dd   : > { %v1240_v31 = vor.u32 %v1238_v41, %v1237_v53  ;;  %v1241_v50 = vrot.slane %v1237_v53, 4  ;;  %v1168_v62 = vmax.f32 %v15851_v60, %v1160_v26  ;;  %1521 = vrot.lane.b32.xlu2 %v1396_v58, %s15520_s5  ;;  %v1406_v23 = vsel %vm15898_vm5, %v1401_v42, %v1405_v33 }
 0x1de   : > { %v1092_v10 = vadd.f32 %v15824_v32, %v1056_v63  ;;  %v1693_v16 = vld [vmem:[#allocation2 + $0x18] sm:$0xf]  ;;  %v1050_v54 = vmul.f32 %v15821_v30, %v15895_v27  ;;  %v1413_v55 = vshll.u32 %v1349_v46, 16  ;;  %v1102_v59 = vmax.f32 %v16007_v37, 0.0 }
 0x1df   : > { %v1245_v5 = vsel %vm15929_vm9, %v1240_v31, %v1244_v56  ;;  %v1248_v9 = vsel %vm15934_vm10, %v1241_v50, %v1247_v20  ;;  %v1176_v60 = vpack.c.bf16 %v1168_v62, %v1168_v62  ;;  %1725 = vrot.lane.b32.xlu1 %v1692_v13, %s15520_s5  ;;  %1727 = vrot.lane.b32.xlu0 %v1693_v16, %s15520_s5  ;;  %v1694_v41 = vld [vmem:[#allocation2 + $0x1c] sm:$0xf]  ;;  %v1417_v56 = vshrl.u32 %v1349_v46, 16  ;;  %v1350_v58 = vld [vmem:[#allocation2 + $0x18] sm:$0xf] }
 0x1e0   : > { %1246 = vst [vmem:[#allocation2 + $0x20] sm:$0xf] %v1245_v5  ;;  %v1124_v22 = vmax.f32 %v1092_v10, 0.0  ;;  %v1351_v26 = vld [vmem:[#allocation2 + $0x1c] sm:$0xf]  ;;  %v1411_v31 = vrot.slane %v1410_v48, 4  ;;  %v1086_v3 = vadd.f32 %v15824_v32, %v1050_v54 }
 0x1e1   : > { %1249 = vst [vmem:[#allocation2 + $0x24] sm:$0x1] %v1248_v9  ;;  %v1251_v21 = vshrl.u32 %v1176_v60, 16  ;;  %v1254_v35 = vshll.u32 %v1176_v60, 16  ;;  %v1433_v50 = vshll.u32 %v1351_v26, 16  ;;  %v1437_v62 = vshrl.u32 %v1351_v26, 16 }
 0x1e2   : > { %v1161_v36 = vmax.f32 %v1116_v18, %v1124_v22  ;;  %v1110_v27 = vmax.f32 %v16011_v61, 0.0  ;;  %v1415_v9 = vrot.slane %v1413_v55, 5  ;;  %v1419_v60 = vrot.slane %v1417_v56, 4  ;;  %v1292_v46 = vld [vmem:[#allocation2 + $0x38] sm:$0xf] }
 0x1e3   : > { %v1253_v29 = vrot.slane %v1251_v21, 7  ;;  %v1018_v39 = vpop.f32.mrf.mxu0  ;;  %v1423_v10 = vshll.u32 %v1350_v58, 16  ;;  %v1427_v21 = vshrl.u32 %v1350_v58, 16  ;;  %v16032_v22 = vrot.slane %v1433_v50, 5  ;;  %v2148_v54 = vld [vmem:[#allocation2 + $0x14] sm:$0xf] }
 0x1e4   : > { %v1169_v45 = vmax.f32 %v1153_v19, %v1161_v36  ;;  %v1057_v7 = vmul.f32 %v15821_v30, %v1018_v39  ;;  %v1416_v18 = vsel %vm15898_vm5, %v1411_v31, %v1415_v9  ;;  %v1439_v24 = vrot.slane %v1437_v62, 4  ;;  %v16049_v31 = vld [vmem:[#allocation2 + $0x8] sm:$0xe] }
 0x1e5   : > { %v1256_v43 = vor.u32 %v1254_v35, %v1253_v29  ;;  %v1257_v44 = vrot.slane %v1253_v29, 4  ;;  %v1420_v35 = vor.u32 %v1419_v60, %v1415_v9  ;;  %v1425_v42 = vrot.slane %v1423_v10, 5 }
 0x1e6   : > { %v1177_v52 = vpack.c.bf16 %v1169_v45, %v1169_v45  ;;  %v1093_v53 = vadd.f32 %v15824_v32, %v1057_v7  ;;  %v10482_v9 = vrot.slane %v16049_v31, 9 }
 0x1e7   : > { %v1261_v11 = vsel %vm15929_vm9, %v1256_v43, %v1260_v51  ;;  %v1264_v49 = vsel %vm15934_vm10, %v1257_v44, %v1263_v38  ;;  %1729 = vrot.lane.b32.xlu1 %v1694_v41, %s15520_s5  ;;  %1523 = vrot.lane.b32.xlu0 %v1406_v23, %s15520_s5  ;;  %v1352_v12 = vld [vmem:[#allocation2 + $0x20] sm:$0xf]  ;;  %v1429_v43 = vrot.slane %v1427_v21, 4  ;;  %v1155_v44 = vmax.f32 %v1102_v59, %v1110_v27  ;;  %v1317_v21 = vld [vmem:[#allocation2 + $0xc] sm:$0xf] }
 0x1e8   : > { %1262 = vst [vmem:[#allocation2 + $0x28] sm:$0xf] %v1261_v11  ;;  %v1696_v14 = vld [vmem:[#allocation2 + $0x24] sm:$0xf]  ;;  %v1267_v20 = vshrl.u32 %v1177_v52, 16  ;;  %v1125_v57 = vmax.f32 %v1093_v53, 0.0 }
 0x1e9   : > { %1265 = vst [vmem:[#allocation2 + $0x2c] sm:$0x1] %v1264_v49  ;;  %1733 = vrot.lane.b32.xlu2 %v1696_v14, %s15520_s5  ;;  %v1270_v0 = vshll.u32 %v1177_v52, 16  ;;  %v1443_v36 = vshll.u32 %v1352_v12, 16  ;;  %v1447_v37 = vshrl.u32 %v1352_v12, 16  ;;  %v1421_v23 = vrot.slane %v1420_v35, 4 }
 0x1ea   : > { %v1269_v63 = vrot.slane %v1267_v20, 7  ;;  %v1162_v2 = vmax.f32 %v1117_v47, %v1125_v57  ;;  %v1353_v39 = vld [vmem:[#allocation2 + $0x24] sm:$0xf]  ;;  %v1295_v47 = vld [vmem:[#allocation2 + $0x3c] sm:$0x1]  ;;  %v1430_v55 = vor.u32 %v1429_v43, %v1425_v42  ;;  %v2173_v27 = vshll.u32 %v2148_v54, 16 }
 0x1eb   : > { %v1020_v5 = vpop.f32.mrf.mxu0  ;;  %v1445_v48 = vrot.slane %v1443_v36, 5  ;;  %v1449_v11 = vrot.slane %v1447_v37, 4  ;;  %v1453_v49 = vshll.u32 %v1353_v39, 16  ;;  %v1457_v26 = vshrl.u32 %v1353_v39, 16  ;;  %v16066_v36 = vld [vmem:[#allocation2 + $0x48] sm:$0xf] }
 0x1ec   : > { %v1272_v13 = vor.u32 %v1270_v0, %v1269_v63  ;;  %v1273_v16 = vrot.slane %v1269_v63, 4  ;;  %v1170_v17 = vmax.f32 %v15861_v6, %v1162_v2  ;;  %v1058_v15 = vmul.f32 %v15821_v30, %v1020_v5  ;;  %v1695_v6 = vld [vmem:[#allocation2 + $0x20] sm:$0xf]  ;;  %v14008_v5 = vld [vmem:[#allocation13 + $0x38] sm:$0xff]  ;;  %1332 = vst.msk [vmem:[#allocation5 + $0x3c] sm:$0xf] %vm1127_vm2, %v1317_v21 }
 0x1ed   : > { %v1118_v30 = vmax.f32 %v1086_v3, 0.0  ;;  %v1426_v58 = vsel %vm15898_vm5, %v1421_v23, %v1425_v42  ;;  %v1450_v62 = vor.u32 %v1449_v11, %v1445_v48  ;;  %v1455_v0 = vrot.slane %v1453_v49, 5  ;;  %v1308_v3 = vld [vmem:[#allocation2 + $0x40] sm:$0xf]  ;;  %3035 = vmatpush.bf16.msra.mxu1 %v14008_v5  ;;  %v16073_v43 = vld [vmem:[#allocation2 + $0x10] sm:$0xf] }
 0x1ee   : > { %v1277_v25 = vsel %vm15929_vm9, %v1272_v13, %v1276_v1  ;;  %v1280_v33 = vsel %vm15934_vm10, %v1273_v16, %v1279_v4  ;;  %v1178_v34 = vpack.c.bf16 %v1170_v17, %v1170_v17  ;;  %v1094_v19 = vadd.f32 %v15824_v32, %v1058_v15  ;;  %v1311_v13 = vld [vmem:[#allocation2 + $0x44] sm:$0x1]  ;;  %v16057_v17 = vld [vmem:[#allocation2 + $0xc] sm:$0xf]  ;;  %v1314_v11 = vld [vmem:[#allocation2] sm:$0xf] }
 0x1ef   : > { %v1697_v29 = vld [vmem:[#allocation2 + $0x28] sm:$0xf]  ;;  %1278 = vst [vmem:[#allocation2 + $0x30] sm:$0xf] %v1277_v25  ;;  %1525 = vrot.lane.b32.xlu0 %v1416_v18, %s15520_s5  ;;  %1731 = vrot.lane.b32.xlu1 %v1695_v6, %s15520_s5  ;;  %v1440_v32 = vor.u32 %v1439_v24, %v16032_v22  ;;  %v1459_v1 = vrot.slane %v1457_v26, 4  ;;  %v2177_v2 = vshrl.u32 %v2148_v54, 16 }
 0x1f0   : > { %1281 = vst [vmem:[#allocation2 + $0x34] sm:$0x1] %v1280_v33  ;;  %v1283_v51 = vshrl.u32 %v1178_v34, 16  ;;  %v1126_v38 = vmax.f32 %v1094_v19, 0.0  ;;  %v1286_v7 = vshll.u32 %v1178_v34, 16  ;;  %v1431_v4 = vrot.slane %v1430_v55, 4 }
 0x1f1   : > { %1735 = vrot.lane.b32.xlu2 %v1697_v29, %s15520_s5  ;;  %v1441_v14 = vrot.slane %v1440_v32, 4  ;;  %v1698_v59 = vld [vmem:[#allocation2 + $0x2c] sm:$0xf]  ;;  %v1354_v16 = vld [vmem:[#allocation2 + $0x28] sm:$0xf]  ;;  %v1451_v15 = vrot.slane %v1450_v62, 4  ;;  %v1460_v33 = vor.u32 %v1459_v1, %v1455_v0 }
 0x1f2   : > { %v1285_v45 = vrot.slane %v1283_v51, 7  ;;  %v1163_v61 = vmax.f32 %v1118_v30, %v1126_v38  ;;  %v1355_v12 = vld [vmem:[#allocation2 + $0x2c] sm:$0xf]  ;;  %v16059_v18 = vrot.slane %v2173_v27, 5  ;;  %v16061_v19 = vld [vmem:[#allocation2 + $0x18] sm:$0xf]  ;;  %v1436_v29 = vsel %vm15898_vm5, %v1431_v4, %v16032_v22 }
 0x1f3   : > { %v1446_v50 = vsel %vm15898_vm5, %v1441_v14, %v1445_v48  ;;  %v14007_v34 = vld [vmem:[#allocation13 + $0x30] sm:$0xff]  ;;  %v2179_v6 = vrot.slane %v2177_v2, 4  ;;  %v1463_v30 = vshll.u32 %v1354_v16, 16  ;;  %v1467_v35 = vshrl.u32 %v1354_v16, 16  ;;  %v14006_v48 = vld [vmem:[#allocation13 + $0x28] sm:$0xff] }
 0x1f4   : > { %v1288_v52 = vor.u32 %v1286_v7, %v1285_v45  ;;  %v1289_v53 = vrot.slane %v1285_v45, 4  ;;  %v1171_v41 = vmax.f32 %v1155_v44, %v1163_v61  ;;  %v1473_v39 = vshll.u32 %v1355_v12, 16  ;;  %3036 = vmatpush.bf16.msra.mxu1 %v14007_v34  ;;  %1329 = vst.msk [vmem:[#allocation5] sm:$0xf] %vm1127_vm2, %v1314_v11  ;;  %v16099_v1 = vld [vmem:[#allocation2 + $0x10] sm:$0xf] }
 0x1f5   : > { %v1477_v42 = vshrl.u32 %v1355_v12, 16  ;;  %v1456_v22 = vsel %vm15898_vm5, %v1451_v15, %v1455_v0  ;;  %v2013_v40 = vrot.slane %v16057_v17, 5  ;;  %v2183_v8 = vshll.u32 %v16061_v19, 16  ;;  %v1315_v34 = vld [vmem:[#allocation2 + $0x4] sm:$0xf] }
 0x1f6   : > { %v1293_v56 = vsel %vm15929_vm9, %v1288_v52, %v1292_v46  ;;  %v1296_v20 = vsel %vm15934_vm10, %v1289_v53, %v1295_v47  ;;  %v1179_v57 = vpack.c.bf16 %v1171_v41, %v1171_v41  ;;  %v1699_v38 = vld [vmem:[#allocation2 + $0x30] sm:$0xf]  ;;  %v1461_v45 = vrot.slane %v1460_v33, 4  ;;  %1330 = vst.msk [vmem:[#allocation5 + $0x14] sm:$0xf] %vm1127_vm2, %v1315_v34 }
 0x1f7   : > { %1294 = vst [vmem:[#allocation2 + $0x38] sm:$0xf] %v1293_v56  ;;  %1527 = vrot.lane.b32.xlu1 %v1426_v58, %s15520_s5  ;;  %1737 = vrot.lane.b32.xlu0 %v1698_v59, %s15520_s5  ;;  %v1356_v44 = vld [vmem:[#allocation2 + $0x30] sm:$0xf]  ;;  %v2303_v61 = vshll.u32 %v16066_v36, 16  ;;  %v1465_v47 = vrot.slane %v1463_v30, 5  ;;  %v2180_v49 = vor.u32 %v2179_v6, %v16059_v18 }
 0x1f8   : > { %1297 = vst [vmem:[#allocation2 + $0x3c] sm:$0x1] %v1296_v20  ;;  %v1299_v63 = vshrl.u32 %v1179_v57, 16  ;;  %v1302_v10 = vshll.u32 %v1179_v57, 16  ;;  %v1357_v23 = vld [vmem:[#allocation2 + $0x34] sm:$0xf]  ;;  %3037 = vmatpush.bf16.msra.mxu1 %v14006_v48 }
 0x1f9   : > { %1531 = vrot.lane.b32.xlu2 %v1446_v50, %s15520_s5  ;;  %v1469_v52 = vrot.slane %v1467_v35, 4  ;;  %v16084_v53 = vrot.slane %v1473_v39, 5  ;;  %v1479_v41 = vrot.slane %v1477_v42, 4  ;;  %v1483_v26 = vshll.u32 %v1356_v44, 16  ;;  %v14005_v58 = vld [vmem:[#allocation13 + $0x20] sm:$0xff]  ;;  %v14004_v33 = vld [vmem:[#allocation13 + $0x18] sm:$0xff] }
 0x1fa   : > { %v1301_v60 = vrot.slane %v1299_v63, 7  ;;  %v1487_v55 = vshrl.u32 %v1356_v44, 16  ;;  %v2164_v56 = vshrl.u32 %v16073_v43, 16  ;;  %v1493_v20 = vshll.u32 %v1357_v23, 16  ;;  %v1321_v50 = vld [vmem:[#allocation2 + $0x1c] sm:$0xf] }
 0x1fb   : > { %v1497_v57 = vshrl.u32 %v1357_v23, 16  ;;  %v2167_v59 = vshll.u32 %v16073_v43, 16  ;;  %v1466_v62 = vsel %vm15898_vm5, %v1461_v45, %v1465_v47  ;;  %v16093_v27 = vrot.slane %v2303_v61, 5  ;;  %1336 = vst.msk [vmem:[#allocation5 + $0x8c] sm:$0xf] %vm1127_vm2, %v1321_v50 }
 0x1fc   : > { %v1304_v24 = vor.u32 %v1302_v10, %v1301_v60  ;;  %v1305_v25 = vrot.slane %v1301_v60, 4  ;;  %v16095_v63 = vrot.slane %v2180_v49, 4  ;;  %v16097_v0 = vrot.slane %v2183_v8, 5  ;;  %v1700_v2 = vld [vmem:[#allocation2 + $0x34] sm:$0xf]  ;;  %3038 = vmatpush.bf16.msra.mxu1 %v14005_v58 }
 0x1fd   : > { %v1480_v5 = vor.u32 %v1479_v41, %v16084_v53  ;;  %v16103_v60 = vrot.slane %v1483_v26, 5  ;;  %v2187_v10 = vshrl.u32 %v16061_v19, 16  ;;  %v1489_v12 = vrot.slane %v1487_v55, 4  ;;  %v16118_v35 = vld [vmem:[#allocation2 + $0x4] sm:$0xf] }
 0x1fe   : > { %v1309_v37 = vsel %vm15929_vm9, %v1304_v24, %v1308_v3  ;;  %v1312_v51 = vsel %vm15934_vm10, %v1305_v25, %v1311_v13  ;;  %v1358_v32 = vld [vmem:[#allocation2 + $0x38] sm:$0xf]  ;;  %v1470_v3 = vor.u32 %v1469_v52, %v1465_v47  ;;  %v16106_v13 = vld [vmem:[#allocation2 + $0x1c] sm:$0xf]  ;;  %v16111_v21 = vrot.slane %v2164_v56, 4  ;;  %vm16842_vm9 = vmand %vm3311_vm3, %vm3312_vm4 }
 0x1ff   : > { %1310 = vst [vmem:[#allocation2 + $0x40] sm:$0xf] %v1309_v37  ;;  %1529 = vrot.lane.b32.xlu1 %v1436_v29, %s15520_s5  ;;  %1739 = vrot.lane.b32.xlu0 %v1699_v38, %s15520_s5  ;;  %v1503_v7 = vshll.u32 %v1358_v32, 16  ;;  %v1507_v46 = vshrl.u32 %v1358_v32, 16  ;;  %v1359_v4 = vld [vmem:[#allocation2 + $0x3c] sm:$0x1]  ;;  %v1518_v29 = vpop.permute.xlu2 %1517 }
 0x200   : > { %1313 = vst [vmem:[#allocation2 + $0x44] sm:$0x1] %v1312_v51  ;;  %v1702_v16 = vld [vmem:[#allocation2 + $0x3c] sm:$0xf]  ;;  %v16114_v24 = vrot.slane %v1493_v20, 5  ;;  %v1499_v25 = vrot.slane %v1497_v57, 4  ;;  %3039 = vmatpush.bf16.msra.mxu1 %v14004_v33 }
 0x201   : > { %1533 = vrot.lane.b32.xlu2 %v1456_v22, %s15520_s5  ;;  %v16087_v54 = vrot.slane %v1503_v7, 5  ;;  %v1509_v14 = vrot.slane %v1507_v46, 4  ;;  %v2169_v19 = vrot.slane %v2167_v59, 5  ;;  %v1513_v6 = vshll.u32 %v1359_v4, 16  ;;  %v1318_v37 = vld [vmem:[#allocation2 + $0x10] sm:$0xf] }
 0x202   : > { %v2307_v30 = vshrl.u32 %v16066_v36, 16  ;;  %v1471_v51 = vrot.slane %v1470_v3, 4  ;;  %1563 = vst.msk [vmem:[#allocation5] sm:$0xf] %vm1562_vm13, %v1518_v29  ;;  %v16123_v38 = vrot.slane %v2013_v40, 4  ;;  %v2016_v39 = vrot.slane %v16099_v1, 5 }
 0x203   : > { %v1510_v15 = vor.u32 %v1509_v14, %v16087_v54  ;;  %v2189_v42 = vrot.slane %v2187_v10, 4  ;;  %v16126_v43 = vrot.slane %v1480_v5, 4  ;;  %v1490_v36 = vor.u32 %v1489_v12, %v16103_v60  ;;  %v14003_v22 = vld [vmem:[#allocation13 + $0x10] sm:$0xff]  ;;  %v16130_v8 = vld [vmem:[#allocation2 + $0x1c] sm:$0xf]  ;;  %v14002_v3 = vld [vmem:[#allocation13 + $0x8] sm:$0xff] }
 0x204   : > { %v2193_v44 = vshll.u32 %v16106_v13, 16  ;;  %v1701_v45 = vld [vmem:[#allocation2 + $0x38] sm:$0xf]  ;;  %v1500_v7 = vor.u32 %v1499_v25, %v16114_v24  ;;  %v1586_v46 = vld [vmem:[#allocation2 + $0x20] sm:$0xf]  ;;  %v1515_v47 = vrot.slane %v1513_v6, 5  ;;  %v2170_v48 = vor.u32 %v2169_v19, %v16111_v21  ;;  %3040 = vmatpush.bf16.msra.mxu1 %v14003_v22 }
 0x205   : > { %v1511_v32 = vrot.slane %v1510_v15, 4  ;;  %v1322_v61 = vld [vmem:[#allocation2 + $0x20] sm:$0xf]  ;;  %1333 = vst.msk [vmem:[#allocation5 + $0x50] sm:$0xf] %vm1127_vm2, %v1318_v37  ;;  %v2309_v23 = vrot.slane %v2307_v30, 4  ;;  %v1476_v52 = vsel %vm15898_vm5, %v1471_v51, %v16084_v53  ;;  %v2190_v26 = vor.u32 %v2189_v42, %v16097_v0 }
 0x206   : > { %v16135_v11 = vld [vmem:[#allocation2 + $0x14] sm:$0xf]  ;;  %1337 = vst.msk [vmem:[#allocation5 + $0xa0] sm:$0xf] %vm1127_vm2, %v1322_v61  ;;  %v2162_v41 = vld [vmem:[#allocation2 + $0x4c] sm:$0x1]  ;;  %v1486_v22 = vsel %vm15898_vm5, %v16126_v43, %v16103_v60 }
 0x207   : > { %1741 = vrot.lane.b32.xlu1 %v1700_v2, %s15520_s5  ;;  %1535 = vrot.lane.b32.xlu0 %v1466_v62, %s15520_s5  ;;  %v1319_v49 = vld [vmem:[#allocation2 + $0x14] sm:$0xf]  ;;  %v16142_v14 = vld [vmem:[#allocation2 + $0x18] sm:$0xf]  ;;  %v1615_v55 = vrot.slane %v16118_v35, 5  ;;  %v1633_v56 = vrot.slane %v16130_v8, 5  ;;  %v1516_v20 = vsel %vm15898_vm5, %v1511_v32, %v1515_v47 }
 0x208   : > { %1334 = vst.msk [vmem:[#allocation5 + $0x64] sm:$0xf] %vm1127_vm2, %v1319_v49  ;;  %v16151_v57 = vrot.slane %v1490_v36, 4  ;;  %v2197_v53 = vshrl.u32 %v16106_v13, 16  ;;  %v16154_v58 = vld [vmem:[#allocation2 + $0x1c] sm:$0xf]  ;;  %3041 = vmatpush.bf16.msra.mxu1 %v14002_v3 }
 0x209   : > { %1745 = vrot.lane.b32.xlu2 %v1702_v16, %s15520_s5  ;;  %v1636_v59 = vrot.slane %v1586_v46, 5  ;;  %v1580_v50 = vld [vmem:[#allocation2 + $0x8] sm:$0xf]  ;;  %v1501_v62 = vrot.slane %v1500_v7, 4  ;;  %v16157_v2 = vld [vmem:[#allocation2 + $0x40] sm:$0xf]  ;;  %v2310_v16 = vor.u32 %v2309_v23, %v16093_v27 }
 0x20a   : > { %v14016_v4 = vld [vmem:[#allocation13 + $0x78] sm:$0xff]  ;;  %v1635_v5 = vrot.slane %v1633_v56, 4  ;;  %v1581_v10 = vld [vmem:[#allocation2 + $0xc] sm:$0xf]  ;;  %v2313_v15 = vshll.u32 %v2162_v41, 16  ;;  %v16168_v12 = vrot.slane %v2170_v48, 4 }
 0x20b   : > { %v16170_v21 = vld [vmem:[#allocation2 + $0x20] sm:$0xf]  ;;  %v1617_v25 = vrot.slane %v1615_v55, 4  ;;  %v16174_v33 = vld [vmem:[#allocation2 + $0x24] sm:$0xf]  ;;  %v16176_v34 = vrot.slane %v2190_v26, 4  ;;  %3076 = vmatpush.bf16.msra.mxu2 %v14016_v4  ;;  %v1506_v3 = vsel %vm15898_vm5, %v1501_v62, %v16087_v54 }
 0x20c   : > { %v16178_v19 = vrot.slane %v2193_v44, 5  ;;  %v2019_v6 = vrot.slane %v16135_v11, 5  ;;  %v1637_v29 = vsel %vm16163_vm14, %v1635_v5, %v1636_v59  ;;  %v1320_v30 = vld [vmem:[#allocation2 + $0x18] sm:$0xf]  ;;  %v17612_v37 = vrot.slane %v16157_v2, 5 }
 0x20d   : > { %v16186_v51 = vrot.slane %v2016_v39, 4  ;;  %v2022_v42 = vrot.slane %v16142_v14, 5  ;;  %v2151_v32 = vld [vmem:[#allocation2 + $0x20] sm:$0xf]  ;;  %1681 = vst.msk [vmem:[#allocation5 + $0x90] sm:$0xf] %vm1127_vm2, %v1637_v29 }
 0x20e   : > { %v1618_v36 = vrot.slane %v1580_v50, 5  ;;  %v1703_v44 = vld [vmem:[#allocation2 + $0x40] sm:$0xf]  ;;  %v14001_v7 = vld [vmem:[#allocation13] sm:$0xff]  ;;  %v17613_v46 = vrot.slane %v16154_v58, 5  ;;  %v1638_v61 = vrot.slane %v1636_v59, 4 }
 0x20f   : > { %1537 = vrot.lane.b32.xlu0 %v1476_v52, %s15520_s5  ;;  %1743 = vrot.lane.b32.xlu1 %v1701_v45, %s15520_s5  ;;  %v1994_v45 = vld [vmem:[#allocation2 + $0x44] sm:$0x1]  ;;  %v1639_v47 = vrot.slane %v16174_v33, 5  ;;  %v1582_v23 = vld [vmem:[#allocation2 + $0x10] sm:$0xf]  ;;  %v16196_v48 = vrot.slane %v2310_v16, 4 }
 0x210   : > { %v16198_v49 = vrot.slane %v2313_v15, 5  ;;  %v16200_v52 = vld [vmem:[#allocation2 + $0x24] sm:$0xf]  ;;  %v1619_v41 = vsel %vm16163_vm14, %v1617_v25, %v1618_v36  ;;  %v1621_v60 = vrot.slane %v1581_v10, 5  ;;  %v1583_v43 = vld [vmem:[#allocation2 + $0x14] sm:$0xf]  ;;  %3042 = vmatpush.bf16.msra.mxu1 %v14001_v7 }
 0x211   : > { %1545 = vrot.lane.b32.xlu2 %v1516_v20, %s15520_s5  ;;  %1335 = vst.msk [vmem:[#allocation5 + $0x78] sm:$0xf] %vm1127_vm2, %v1320_v30  ;;  %v16207_v26 = vrot.slane %v2019_v6, 4  ;;  %v2028_v20 = vrot.slane %v16170_v21, 5  ;;  %v1620_v59 = vrot.slane %v1618_v36, 4  ;;  %v1640_v50 = vsel %vm16163_vm14, %v1638_v61, %v1639_v47  ;;  %v14015_v30 = vld [vmem:[#allocation13 + $0x70] sm:$0xff] }
 0x212   : > { %1675 = vst.msk [vmem:[#allocation5 + $0x18] sm:$0xf] %vm1127_vm2, %v1619_v41  ;;  %v2054_v4 = vrot.slane %v17612_v37, 4  ;;  %v2055_v5 = vrot.slane %v1994_v45, 5  ;;  %v1323_v10 = vld [vmem:[#allocation2 + $0x24] sm:$0xf]  ;;  %3077 = vmatpush.bf16.msra.mxu2 %v14015_v30  ;;  %v2316_v1 = vsel %vm15898_vm5, %v16196_v48, %v16198_v49 }
 0x213   : > { %1682 = vst.msk [vmem:[#allocation5 + $0xa4] sm:$0xf] %vm1127_vm2, %v1640_v50  ;;  %v16226_v16 = vrot.slane %v17613_v46, 4  ;;  %v16228_v15 = vrot.slane %v2197_v53, 4  ;;  %v2203_v25 = vshll.u32 %v2151_v32, 16  ;;  %v1622_v54 = vsel %vm16163_vm14, %v1620_v59, %v1621_v60 }
 0x214   : > { %v1584_v62 = vld [vmem:[#allocation2 + $0x18] sm:$0xf]  ;;  %v2207_v29 = vshrl.u32 %v2151_v32, 16  ;;  %v16232_v36 = vld [vmem:[#allocation2 + $0x24] sm:$0xf]  ;;  %v16237_v45 = vrot.slane %v2022_v42, 4  ;;  %v1496_v50 = vsel %vm15898_vm5, %v16151_v57, %v16114_v24 }
 0x215   : > { %1676 = vst.msk [vmem:[#allocation5 + $0x2c] sm:$0xf] %vm1127_vm2, %v1622_v54  ;;  %v16241_v53 = vrot.slane %v2028_v20, 4  ;;  %v2031_v7 = vrot.slane %v16200_v52, 5  ;;  %v1627_v61 = vrot.slane %v1583_v43, 5  ;;  %v16255_v43 = vrot.slane %v2203_v25, 5 }
 0x216   : > { %1338 = vst.msk [vmem:[#allocation5 + $0xb4] sm:$0xf] %vm1127_vm2, %v1323_v10  ;;  %v16245_v32 = vld [vmem:[#allocation2 + $0x28] sm:$0xf]  ;;  %v14014_v10 = vld [vmem:[#allocation13 + $0x68] sm:$0xff]  ;;  %v2209_v30 = vrot.slane %v2207_v29, 4  ;;  %v2200_v8 = vor.u32 %v16228_v15, %v16178_v19 }
 0x217   : > { %1539 = vrot.lane.b32.xlu1 %v1486_v22, %s15520_s5  ;;  %1747 = vrot.lane.b32.xlu0 %v1703_v44, %s15520_s5  ;;  %v1623_v22 = vrot.slane %v1621_v60, 4  ;;  %v1624_v44 = vrot.slane %v1582_v23, 5  ;;  %v1630_v60 = vrot.slane %v1584_v62, 5  ;;  %v1588_v59 = vld [vmem:[#allocation2 + $0x28] sm:$0xf]  ;;  %v1629_v62 = vrot.slane %v1627_v61, 4 }
 0x218   : > { %v2154_v54 = vld [vmem:[#allocation2 + $0x2c] sm:$0xf]  ;;  %v2213_v37 = vshll.u32 %v16232_v36, 16  ;;  %v2217_v46 = vshrl.u32 %v16232_v36, 16  ;;  %v2223_v24 = vshll.u32 %v16245_v32, 16  ;;  %v1642_v57 = vrot.slane %v1588_v59, 5  ;;  %3078 = vmatpush.bf16.msra.mxu2 %v14014_v10 }
 0x219   : > { %1543 = vrot.lane.b32.xlu2 %v1506_v3, %s15520_s5  ;;  %v1625_v41 = vsel %vm16163_vm14, %v1623_v22, %v1624_v44  ;;  %v1626_v23 = vrot.slane %v1624_v44, 4  ;;  %v2056_v3 = vsel %vm16163_vm14, %v2054_v4, %v2055_v5  ;;  %v1632_v44 = vrot.slane %v1630_v60, 4  ;;  %v1589_v36 = vld [vmem:[#allocation2 + $0x2c] sm:$0xf]  ;;  %v1578_v17 = vld [vmem:[#allocation2] sm:$0xe] }
 0x21a   : > { %1677 = vst.msk [vmem:[#allocation5 + $0x40] sm:$0xf] %vm1127_vm2, %v1625_v41  ;;  %v2014_v4 = vsel %vm16163_vm14, %v10482_v9, %v2013_v40  ;;  %v2227_v5 = vshrl.u32 %v16245_v32, 16  ;;  %v2233_v25 = vshll.u32 %v2154_v54, 16  ;;  %v1631_v29 = vsel %vm16163_vm14, %v1629_v62, %v1630_v60  ;;  %v14013_v41 = vld [vmem:[#allocation13 + $0x60] sm:$0xff] }
 0x21b   : > { %v1628_v22 = vsel %vm16163_vm14, %v1626_v23, %v1627_v61  ;;  %v1327_v61 = vld [vmem:[#allocation2 + $0x34] sm:$0xf]  ;;  %1679 = vst.msk [vmem:[#allocation5 + $0x68] sm:$0xf] %vm1127_vm2, %v1631_v29  ;;  %v1634_v31 = vsel %vm16163_vm14, %v1632_v44, %v1633_v56  ;;  %v1641_v9 = vrot.slane %v1639_v47, 4  ;;  %v10481_v40 = vrot.slane %v1578_v17, 9 }
 0x21c   : > { %1678 = vst.msk [vmem:[#allocation5 + $0x54] sm:$0xf] %vm1127_vm2, %v1628_v22  ;;  %v2237_v32 = vshrl.u32 %v2154_v54, 16  ;;  %v16284_v23 = vld [vmem:[#allocation2 + $0x34] sm:$0xf]  ;;  %v2186_v60 = vsel %vm15898_vm5, %v16095_v63, %v16097_v0  ;;  %v2210_v59 = vor.u32 %v2209_v30, %v16255_v43  ;;  %v2017_v63 = vsel %vm16163_vm14, %v16123_v38, %v2016_v39  ;;  %3079 = vmatpush.bf16.msra.mxu2 %v14013_v41 }
 0x21d   : > { %1680 = vst.msk [vmem:[#allocation5 + $0x7c] sm:$0xf] %vm1127_vm2, %v1634_v31  ;;  %v16293_v56 = vld [vmem:[#allocation2 + $0x30] sm:$0xf]  ;;  %v16295_v33 = vld [vmem:[#allocation2 + $0x28] sm:$0xf]  ;;  %v1616_v15 = vsel %vm16163_vm14, %v10481_v40, %v1615_v55 }
 0x21e   : > { %v16297_v47 = vld [vmem:[#allocation2 + $0x2c] sm:$0xf]  ;;  %1342 = vst.msk [vmem:[#allocation5 + $0x104] sm:$0xf] %vm1127_vm2, %v1327_v61  ;;  %v16307_v0 = vrot.slane %v2213_v37, 5  ;;  %v14012_v38 = vld [vmem:[#allocation13 + $0x58] sm:$0xff] }
 0x21f   : > { %1541 = vrot.lane.b32.xlu1 %v1496_v50, %s15520_s5  ;;  %2085 = vrot.lane.b32.xlu0 %v2056_v3, %s15520_s5  ;;  %v1643_v50 = vsel %vm16163_vm14, %v1641_v9, %v1642_v57  ;;  %v1644_v3 = vrot.slane %v1642_v57, 4  ;;  %v16314_v10 = vld [vmem:[#allocation2 + $0x30] sm:$0xf]  ;;  %1674 = vst.msk [vmem:[#allocation5 + $0x4] sm:$0xf] %vm1127_vm2, %v1616_v15  ;;  %v2219_v39 = vrot.slane %v2217_v46, 4  ;;  %v2176_v15 = vsel %vm15898_vm5, %v16168_v12, %v16059_v18 }
 0x220   : > { %1683 = vst.msk [vmem:[#allocation5 + $0xb8] sm:$0xf] %vm1127_vm2, %v1643_v50  ;;  %v1651_v35 = vrot.slane %v16284_v23, 5  ;;  %v1645_v37 = vrot.slane %v1589_v36, 5  ;;  %v16322_v54 = vrot.slane %v2223_v24, 5  ;;  %v16324_v55 = vrot.slane %v2233_v25, 5  ;;  %3080 = vmatpush.bf16.msra.mxu2 %v14012_v38 }
 0x221   : > { %2057 = vrot.lane.b32.xlu2 %v2014_v4, %s15520_s5  ;;  %v2239_v30 = vrot.slane %v2237_v32, 4  ;;  %v2229_v22 = vrot.slane %v2227_v5, 4  ;;  %v16326_v62 = vrot.slane %v2200_v8, 4  ;;  %v16328_v44 = vrot.slane %v2210_v59, 4  ;;  %v16334_v49 = vld [vmem:[#allocation2 + $0x38] sm:$0xf] }
 0x222   : > { %v16332_v48 = vrot.slane %v2031_v7, 4  ;;  %v1648_v46 = vrot.slane %v16314_v10, 5  ;;  %v2243_v24 = vshll.u32 %v16293_v56, 16  ;;  %v2034_v57 = vrot.slane %v16295_v33, 5  ;;  %v1328_v5 = vld [vmem:[#allocation2 + $0x38] sm:$0xf] }
 0x223   : > { %v2037_v4 = vrot.slane %v16297_v47, 5  ;;  %v1646_v25 = vsel %vm16163_vm14, %v1644_v3, %v1645_v37  ;;  %v2220_v29 = vor.u32 %v2219_v39, %v16307_v0  ;;  %v14011_v36 = vld [vmem:[#allocation13 + $0x50] sm:$0xff]  ;;  %v16346_v61 = vld [vmem:[#allocation2 + $0x34] sm:$0xf]  ;;  %v1653_v41 = vrot.slane %v1651_v35, 4 }
 0x224   : > { %v1654_v17 = vrot.slane %v16334_v49, 5  ;;  %v1647_v31 = vrot.slane %v1645_v37, 4  ;;  %v2240_v9 = vor.u32 %v2239_v30, %v16324_v55  ;;  %v2230_v40 = vor.u32 %v2229_v22, %v16322_v54  ;;  %1343 = vst.msk [vmem:[#allocation5 + $0x118] sm:$0xf] %vm1127_vm2, %v1328_v5  ;;  %v1779_v32 = vld [vmem:[#allocation2 + $0x8] sm:$0xf]  ;;  %3081 = vmatpush.bf16.msra.mxu2 %v14011_v36 }
 0x225   : > { %v2247_v8 = vshrl.u32 %v16293_v56, 16  ;;  %1684 = vst.msk [vmem:[#allocation5 + $0xcc] sm:$0xf] %vm1127_vm2, %v1646_v25  ;;  %v2020_v56 = vsel %vm16163_vm14, %v16186_v51, %v2019_v6  ;;  %v2253_v3 = vshll.u32 %v16346_v61, 16  ;;  %v1799_v38 = vshll.u32 %v1779_v32, 16  ;;  %v14010_v37 = vld [vmem:[#allocation13 + $0x48] sm:$0xff] }
 0x226   : > { %v1655_v59 = vsel %vm16163_vm14, %v1653_v41, %v1654_v17  ;;  %v1649_v50 = vsel %vm16163_vm14, %v1647_v31, %v1648_v46  ;;  %v16377_v39 = vrot.slane %v2220_v29, 4  ;;  %v16381_v18 = vrot.slane %v2034_v57, 4  ;;  %v1324_v31 = vld [vmem:[#allocation2 + $0x28] sm:$0xf]  ;;  %v16482_v52 = vld [vmem:[#allocation2 + $0x38] sm:$0xf] }
 0x227   : > { %2345 = vrot.lane.b32.xlu1 %v2316_v1, %s15520_s5  ;;  %2059 = vrot.lane.b32.xlu0 %v2017_v63, %s15520_s5  ;;  %v1796_v63 = vshrl.u32 %v1779_v32, 16  ;;  %v16374_v1 = vld [vmem:[#allocation2 + $0x30] sm:$0xf]  ;;  %1687 = vst.msk [vmem:[#allocation5 + $0x108] sm:$0xf] %vm1127_vm2, %v1655_v59  ;;  %v16383_v30 = vrot.slane %v2240_v9, 4 }
 0x228   : > { %v16385_v6 = vrot.slane %v2243_v24, 5  ;;  %v16387_v51 = vrot.slane %v2230_v40, 4  ;;  %v16391_v22 = vrot.slane %v2037_v4, 4  ;;  %1685 = vst.msk [vmem:[#allocation5 + $0xe0] sm:$0xf] %vm1127_vm2, %v1649_v50  ;;  %v2257_v25 = vshrl.u32 %v16346_v61, 16  ;;  %3082 = vmatpush.bf16.msra.mxu2 %v14010_v37 }
 0x229   : > { %2319 = vrot.lane.b32.xlu2 %v2186_v60, %s15520_s5  ;;  %v1780_v60 = vld [vmem:[#allocation2 + $0xc] sm:$0xf]  ;;  %v1798_v11 = vrot.slane %v1796_v63, 4  ;;  %v2040_v29 = vrot.slane %v16374_v1, 5  ;;  %v1801_v36 = vrot.slane %v1799_v38, 5  ;;  %v2196_v24 = vsel %vm15898_vm5, %v16176_v34, %v16178_v19  ;;  %v14009_v32 = vld [vmem:[#allocation13 + $0x40] sm:$0xff] }
 0x22a   : > { %v1805_v12 = vshll.u32 %v1780_v60, 16  ;;  %v1809_v41 = vshrl.u32 %v1780_v60, 16  ;;  %v16403_v9 = vrot.slane %v2247_v8, 4  ;;  %v16405_v40 = vrot.slane %v2253_v3, 5  ;;  %v16407_v61 = vld [vmem:[#allocation2 + $0x34] sm:$0xf] }
 0x22b   : > { %v1802_v60 = vor.u32 %v1801_v36, %v1798_v11  ;;  %1339 = vst.msk [vmem:[#allocation5 + $0xc8] sm:$0xf] %vm1127_vm2, %v1324_v31  ;;  %v2118_v50 = vld [vmem:[#allocation2 + $0x14] sm:$0xf]  ;;  %v1325_v34 = vld [vmem:[#allocation2 + $0x2c] sm:$0xf]  ;;  %v2023_v11 = vsel %vm16163_vm14, %v16207_v26, %v2022_v42  ;;  %v2029_v42 = vsel %vm16163_vm14, %v16226_v16, %v2028_v20  ;;  %v2206_v26 = vsel %vm15898_vm5, %v16326_v62, %v16255_v43 }
 0x22c   : > { %v1807_v59 = vrot.slane %v1805_v12, 5  ;;  %2133 = vst.msk [vmem:[#allocation5 + $0x20] sm:$0xf] %vm1127_vm2, %v2118_v50  ;;  %v2119_v19 = vld [vmem:[#allocation2 + $0x18] sm:$0xf]  ;;  %v2043_v3 = vrot.slane %v16407_v61, 5  ;;  %3083 = vmatpush.bf16.msra.mxu2 %v14009_v32  ;;  %v2038_v33 = vsel %vm16163_vm14, %v16381_v18, %v2037_v4 }
 0x22d   : > { %v10486_v63 = vld [vmem:[#allocation5] sm:$0xf]  ;;  %v1803_v8 = vrot.slane %v1802_v60, 4  ;;  %1340 = vst.msk [vmem:[#allocation5 + $0xdc] sm:$0xf] %vm1127_vm2, %v1325_v34  ;;  %v16420_v12 = vrot.slane %v2257_v25, 4 }
 0x22e   : > { %2134 = vst.msk [vmem:[#allocation5 + $0x34] sm:$0xf] %vm1127_vm2, %v2119_v19  ;;  %v1326_v38 = vld [vmem:[#allocation2 + $0x30] sm:$0xf]  ;;  %v1785_v36 = vld [vmem:[#allocation2 + $0x20] sm:$0xf] }
 0x22f   : > { %v1520_v5 = vpop.permute.xlu2 %1519  ;;  %2317 = vrot.lane.b32.xlu1 %v2176_v15, %s15520_s5  ;;  %2061 = vrot.lane.b32.xlu0 %v2020_v56, %s15520_s5  ;;  %v1784_v15 = vld [vmem:[#allocation2 + $0x1c] sm:$0xf]  ;;  %v1811_v56 = vrot.slane %v1809_v41, 4  ;;  %1341 = vst.msk [vmem:[#allocation5 + $0xf0] sm:$0xf] %vm1127_vm2, %v1326_v38  ;;  %v1859_v14 = vshrl.u32 %v1785_v36, 16 }
 0x230   : > { %1564 = vst.msk [vmem:[#allocation5 + $0x14] sm:$0xf] %vm1562_vm13, %v1520_v5  ;;  %v1845_v37 = vshll.u32 %v1784_v15, 16  ;;  %v1808_v5 = vsel %vm15898_vm5, %v1803_v8, %v1807_v59  ;;  %v1849_v41 = vshrl.u32 %v1784_v15, 16  ;;  %v1650_v32 = vrot.slane %v1648_v46, 4 }
 0x231   : > { %2321 = vrot.lane.b32.xlu2 %v2196_v24, %s15520_s5  ;;  %1964 = vst.msk [vmem:[#allocation5 + $0x8] sm:$0xf] %vm1127_vm2, %v1808_v5  ;;  %v1855_v24 = vshll.u32 %v1785_v36, 16  ;;  %v1812_v60 = vor.u32 %v1811_v56, %v1807_v59  ;;  %v16439_v19 = vld [vmem:[#allocation2 + $0x24] sm:$0xf]  ;;  %v1861_v16 = vrot.slane %v1859_v14, 4 }
 0x232   : > { %v16426_v31 = vrot.slane %v1845_v37, 5  ;;  %v1851_v34 = vrot.slane %v1849_v41, 4  ;;  %v1865_v59 = vshll.u32 %v16439_v19, 16  ;;  %v16448_v43 = vrot.slane %v2043_v3, 4  ;;  %v2117_v8 = vld [vmem:[#allocation2 + $0x10] sm:$0xf] }
 0x233   : > { %v1857_v20 = vrot.slane %v1855_v24, 5  ;;  %v16452_v10 = vrot.slane %v2040_v29, 4  ;;  %v1652_v62 = vsel %vm16163_vm14, %v1650_v32, %v1651_v35  ;;  %v1813_v56 = vrot.slane %v1812_v60, 4  ;;  %2132 = vst.msk [vmem:[#allocation5 + $0xc] sm:$0xf] %vm1127_vm2, %v2117_v8 }
 0x234   : > { %v1852_v46 = vor.u32 %v1851_v34, %v16426_v31  ;;  %1686 = vst.msk [vmem:[#allocation5 + $0xf4] sm:$0xf] %vm1127_vm2, %v1652_v62  ;;  %v16465_v36 = vrot.slane %v1865_v59, 5  ;;  %v2124_v35 = vld [vmem:[#allocation2 + $0x2c] sm:$0xf]  ;;  %v2032_v41 = vsel %vm16163_vm14, %v16241_v53, %v2031_v7  ;;  %v2250_v24 = vor.u32 %v16403_v9, %v16385_v6 }
 0x235   : > { %v1862_v15 = vor.u32 %v1861_v16, %v1857_v20  ;;  %2139 = vst.msk [vmem:[#allocation5 + $0x98] sm:$0xf] %vm1127_vm2, %v2124_v35  ;;  %v1782_v7 = vld [vmem:[#allocation2 + $0x14] sm:$0xf]  ;;  %v2125_v34 = vld [vmem:[#allocation2 + $0x30] sm:$0xf] }
 0x236   : > { %v1853_v5 = vrot.slane %v1852_v46, 4  ;;  %v1829_v32 = vshrl.u32 %v1782_v7, 16  ;;  %v16497_v62 = vrot.slane %v2250_v24, 4  ;;  %v1869_v46 = vshrl.u32 %v16439_v19, 16  ;;  %2140 = vst.msk [vmem:[#allocation5 + $0xac] sm:$0xf] %vm1127_vm2, %v2125_v34 }
 0x237   : > { %v1522_v50 = vpop.permute.xlu2 %1521  ;;  %v13968_v25 = vld [vmem:[#allocation5 + $0x10] sm:$0xf0]  ;;  %2063 = vrot.lane.b32.xlu1 %v2023_v11, %s15520_s5  ;;  %2323 = vrot.lane.b32.xlu0 %v2206_v26, %s15520_s5  ;;  %v17642_v11 = vrot.slane %v16154_v58, 5  ;;  %v1863_v14 = vrot.slane %v1862_v15, 4  ;;  %v1783_v26 = vld [vmem:[#allocation2 + $0x18] sm:$0xf] }
 0x238   : > { %1565 = vst.msk [vmem:[#allocation5 + $0x28] sm:$0xf] %vm1562_vm13, %v1522_v50  ;;  %v10487_v21 = vor.u32 %v13968_v25, %v10486_v63  ;;  %v1781_v63 = vld [vmem:[#allocation2 + $0x10] sm:$0xf]  ;;  %v1593_v58 = vld [vmem:[#allocation2 + $0x3c] sm:$0x1]  ;;  %v1858_v53 = vsel %vm15898_vm5, %v1853_v5, %v1857_v20 }
 0x239   : > { %2067 = vrot.lane.b32.xlu2 %v2029_v42, %s15520_s5  ;;  %v1815_v38 = vshll.u32 %v1781_v63, 16  ;;  %v1819_v37 = vshrl.u32 %v1781_v63, 16  ;;  %v2026_v23 = vsel %vm16163_vm14, %v16237_v45, %v17642_v11  ;;  %v2216_v45 = vsel %vm15898_vm5, %v16328_v44, %v16307_v0  ;;  %v16480_v50 = vld [vmem:[#allocation2 + $0x38] sm:$0xf]  ;;  %1969 = vst.msk [vmem:[#allocation5 + $0x6c] sm:$0xf] %vm1127_vm2, %v1858_v53 }
 0x23a   : > { %3043 = vmatmul.bf16.vlgmr.msra.gmra.mxu1 %v10487_v21  ;;  %v1657_v42 = vrot.slane %v1593_v58, 5  ;;  %v1868_v25 = vsel %vm15898_vm5, %v1863_v14, %v16465_v36  ;;  %v1825_v44 = vshll.u32 %v1782_v7, 16  ;;  %v1656_v21 = vrot.slane %v1654_v17, 4  ;;  %v1794_v53 = vld [vmem:[#allocation2 + $0x44] sm:$0x1] }
 0x23b   : > { %v1817_v60 = vrot.slane %v1815_v38, 5  ;;  %v1821_v9 = vrot.slane %v1819_v37, 4  ;;  %1970 = vst.msk [vmem:[#allocation5 + $0x80] sm:$0xf] %vm1127_vm2, %v1868_v25  ;;  %v1835_v16 = vshll.u32 %v1783_v26, 16  ;;  %v1839_v59 = vshrl.u32 %v1783_v26, 16 }
 0x23c   : > { %v1827_v63 = vrot.slane %v1825_v44, 5  ;;  %v1831_v8 = vrot.slane %v1829_v32, 4  ;;  %v1658_v49 = vsel %vm16163_vm14, %v1656_v21, %v1657_v42  ;;  %v2046_v37 = vrot.slane %v16480_v50, 5  ;;  %v1793_v42 = vld [vmem:[#allocation2 + $0x40] sm:$0xf] }
 0x23d   : > { %v1818_v0 = vsel %vm15898_vm5, %v1813_v56, %v1817_v60  ;;  %v1822_v20 = vor.u32 %v1821_v9, %v1817_v60  ;;  %v1837_v15 = vrot.slane %v1835_v16, 5  ;;  %v1841_v56 = vrot.slane %v1839_v59, 4  ;;  %1688 = vst.msk [vmem:[#allocation5 + $0x11c] sm:$0xf] %vm1127_vm2, %v1658_v49  ;;  %v2121_v25 = vld [vmem:[#allocation2 + $0x20] sm:$0xf] }
 0x23e   : > { %1965 = vst.msk [vmem:[#allocation5 + $0x1c] sm:$0xf] %vm1127_vm2, %v1818_v0  ;;  %v2263_v11 = vshll.u32 %v16482_v52, 16  ;;  %v1832_v19 = vor.u32 %v1831_v8, %v1827_v63  ;;  %v2226_v60 = vsel %vm15898_vm5, %v16377_v39, %v16322_v54  ;;  %v1935_v7 = vshll.u32 %v1793_v42, 16  ;;  %v1792_v16 = vld [vmem:[#allocation2 + $0x3c] sm:$0xf] }
 0x23f   : > { %2065 = vrot.lane.b32.xlu1 %v2026_v23, %s15520_s5  ;;  %2325 = vrot.lane.b32.xlu0 %v2216_v45, %s15520_s5  ;;  %v1823_v17 = vrot.slane %v1822_v20, 4  ;;  %v1790_v23 = vld [vmem:[#allocation2 + $0x34] sm:$0xf]  ;;  %v1842_v24 = vor.u32 %v1841_v56, %v1837_v15  ;;  %v2035_v45 = vsel %vm16163_vm14, %v16332_v48, %v2034_v57  ;;  %v1939_v9 = vshrl.u32 %v1793_v42, 16  ;;  %v1791_v48 = vld [vmem:[#allocation2 + $0x38] sm:$0xf] }
 0x240   : > { %v1905_v58 = vshll.u32 %v1790_v23, 16  ;;  %v1909_v14 = vshrl.u32 %v1790_v23, 16  ;;  %v1833_v26 = vrot.slane %v1832_v19, 4  ;;  %v1871_v0 = vrot.slane %v1869_v46, 4  ;;  %v1787_v59 = vld [vmem:[#allocation2 + $0x28] sm:$0xf] }
 0x241   : > { %2069 = vrot.lane.b32.xlu2 %v2032_v41, %s15520_s5  ;;  %v1720_v38 = vpop.permute.xlu0 %1719  ;;  %v1828_v35 = vsel %vm15898_vm5, %v1823_v17, %v1827_v63  ;;  %v2120_v41 = vld [vmem:[#allocation2 + $0x1c] sm:$0xf]  ;;  %v2246_v44 = vsel %vm15898_vm5, %v16383_v30, %v16385_v6  ;;  %v1843_v54 = vrot.slane %v1842_v24, 4  ;;  %v16533_v39 = vrot.slane %v1935_v7, 5  ;;  %2136 = vst.msk [vmem:[#allocation5 + $0x5c] sm:$0xf] %vm1127_vm2, %v2121_v25 }
 0x242   : > { %1764 = vst.msk [vmem:[#allocation5 + $0x4] sm:$0xf] %vm1562_vm13, %v1720_v38  ;;  %v16531_v57 = vrot.slane %v1905_v58, 5  ;;  %v1941_v32 = vrot.slane %v1939_v9, 4  ;;  %v1945_v34 = vshll.u32 %v1794_v53, 16  ;;  %v1838_v21 = vsel %vm15898_vm5, %v1833_v26, %v1837_v15 }
 0x243   : > { %v1734_v5 = vpop.permute.xlu2 %1733  ;;  %1966 = vst.msk [vmem:[#allocation5 + $0x30] sm:$0xf] %vm1127_vm2, %v1828_v35  ;;  %v1848_v47 = vsel %vm15898_vm5, %v1843_v54, %v16426_v31  ;;  %v1911_v4 = vrot.slane %v1909_v14, 4  ;;  %v1915_v18 = vshll.u32 %v1791_v48, 16  ;;  %v1919_v30 = vshrl.u32 %v1791_v48, 16 }
 0x244   : > { %1771 = vst.msk [vmem:[#allocation5 + $0x90] sm:$0xf] %vm1562_vm13, %v1734_v5  ;;  %v2236_v6 = vsel %vm15898_vm5, %v16387_v51, %v16324_v55  ;;  %v1942_v20 = vor.u32 %v1941_v32, %v16533_v39  ;;  %v1872_v46 = vor.u32 %v1871_v0, %v16465_v36  ;;  %v2267_v8 = vshrl.u32 %v16482_v52, 16  ;;  %v16560_v24 = vld [vmem:[#allocation2 + $0x3c] sm:$0xf] }
 0x245   : > { %2135 = vst.msk [vmem:[#allocation5 + $0x48] sm:$0xf] %vm1127_vm2, %v2120_v41  ;;  %v1912_v49 = vor.u32 %v1911_v4, %v16531_v57  ;;  %v1917_v17 = vrot.slane %v1915_v18, 5  ;;  %v1921_v15 = vrot.slane %v1919_v30, 4  ;;  %v1947_v56 = vrot.slane %v1945_v34, 5 }
 0x246   : > { %1967 = vst.msk [vmem:[#allocation5 + $0x44] sm:$0xf] %vm1127_vm2, %v1838_v21  ;;  %v1943_v51 = vrot.slane %v1942_v20, 4  ;;  %v1925_v38 = vshll.u32 %v1792_v16, 16  ;;  %v1929_v19 = vshrl.u32 %v1792_v16, 16  ;;  %v1875_v5 = vshll.u32 %v1787_v59, 16 }
 0x247   : > { %2327 = vrot.lane.b32.xlu1 %v2226_v60, %s15520_s5  ;;  %2071 = vrot.lane.b32.xlu0 %v2035_v45, %s15520_s5  ;;  %1968 = vst.msk [vmem:[#allocation5 + $0x58] sm:$0xf] %vm1127_vm2, %v1848_v47  ;;  %v1913_v36 = vrot.slane %v1912_v49, 4  ;;  %v1922_v23 = vor.u32 %v1921_v15, %v1917_v17  ;;  %v1879_v35 = vshrl.u32 %v1787_v59, 16  ;;  %v2260_v41 = vor.u32 %v16420_v12, %v16405_v40  ;;  %v2122_v14 = vld [vmem:[#allocation2 + $0x24] sm:$0xf] }
 0x248   : > { %v1948_v58 = vsel %vm15898_vm5, %v1943_v51, %v1947_v56  ;;  %v16564_v60 = vrot.slane %v1925_v38, 5  ;;  %v1873_v45 = vrot.slane %v1872_v46, 4  ;;  %v2256_v42 = vsel %vm15898_vm5, %v16497_v62, %v16405_v40  ;;  %v1788_v9 = vld [vmem:[#allocation2 + $0x2c] sm:$0xf]  ;;  %v2160_v62 = vld [vmem:[#allocation2 + $0x44] sm:$0xf] }
 0x249   : > { %2331 = vrot.lane.b32.xlu2 %v2246_v44, %s15520_s5  ;;  %v1722_v63 = vpop.permute.xlu0 %1721  ;;  %v1724_v31 = vpop.permute.xlu1 %1723  ;;  %1978 = vst.msk [vmem:[#allocation5 + $0x120] sm:$0xf] %vm1127_vm2, %v1948_v58  ;;  %v1918_v53 = vsel %vm15898_vm5, %v1913_v36, %v1917_v17  ;;  %v1923_v12 = vrot.slane %v1922_v23, 4  ;;  %v1877_v7 = vrot.slane %v1875_v5, 5  ;;  %v2265_v26 = vrot.slane %v2263_v11, 5 }
 0x24a   : > { %1765 = vst.msk [vmem:[#allocation5 + $0x18] sm:$0xf] %vm1562_vm13, %v1722_v63  ;;  %v2269_v25 = vrot.slane %v2267_v8, 4  ;;  %v1881_v0 = vrot.slane %v1879_v35, 4  ;;  %v1885_v44 = vshll.u32 %v1788_v9, 16  ;;  %v1889_v11 = vshrl.u32 %v1788_v9, 16 }
 0x24b   : > { %v1736_v55 = vpop.permute.xlu2 %1735  ;;  %1766 = vst.msk [vmem:[#allocation5 + $0x2c] sm:$0xf] %vm1562_vm13, %v1724_v31  ;;  %v13966_v40 = vld [vmem:[#allocation5 + $0x4] sm:$0xf]  ;;  %v1928_v54 = vsel %vm15898_vm5, %v1923_v12, %v16564_v60  ;;  %v1878_v52 = vsel %vm15898_vm5, %v1873_v45, %v1877_v7  ;;  %v1789_v48 = vld [vmem:[#allocation2 + $0x30] sm:$0xf]  ;;  %v2041_v63 = vsel %vm16163_vm14, %v16391_v22, %v2040_v29 }
 0x24c   : > { %1772 = vst.msk [vmem:[#allocation5 + $0xa4] sm:$0xf] %vm1562_vm13, %v1736_v55  ;;  %v1931_v32 = vrot.slane %v1929_v19, 4  ;;  %v16585_v34 = vld [vmem:[#allocation2 + $0x3c] sm:$0xf]  ;;  %v1887_v21 = vrot.slane %v1885_v44, 5  ;;  %v2270_v15 = vor.u32 %v2269_v25, %v2265_v26 }
 0x24d   : > { %1975 = vst.msk [vmem:[#allocation5 + $0xe4] sm:$0xf] %vm1127_vm2, %v1918_v53  ;;  %v1895_v47 = vshll.u32 %v1789_v48, 16  ;;  %v1899_v4 = vshrl.u32 %v1789_v48, 16  ;;  %v2273_v20 = vshll.u32 %v16560_v24, 16  ;;  %v1891_v16 = vrot.slane %v1889_v11, 4 }
 0x24e   : > { %2137 = vst.msk [vmem:[#allocation5 + $0x70] sm:$0xf] %vm1127_vm2, %v2122_v14  ;;  %v2123_v31 = vld [vmem:[#allocation2 + $0x28] sm:$0xf]  ;;  %v2261_v17 = vrot.slane %v2260_v41, 4  ;;  %v2293_v38 = vshll.u32 %v2160_v62, 16  ;;  %v1932_v22 = vor.u32 %v1931_v32, %v16564_v60  ;;  %v2047_v41 = vsel %vm16163_vm14, %v16448_v43, %v2046_v37 }
 0x24f   : > { %2329 = vrot.lane.b32.xlu1 %v2236_v6, %s15520_s5  ;;  %2073 = vrot.lane.b32.xlu0 %v2038_v33, %s15520_s5  ;;  %1976 = vst.msk [vmem:[#allocation5 + $0xf8] sm:$0xf] %vm1127_vm2, %v1928_v54  ;;  %v1882_v33 = vor.u32 %v1881_v0, %v1877_v7  ;;  %v1897_v49 = vrot.slane %v1895_v47, 5  ;;  %v2130_v55 = vld [vmem:[#allocation2 + $0x44] sm:$0xf]  ;;  %v1892_v51 = vor.u32 %v1891_v16, %v1887_v21  ;;  %v1901_v56 = vrot.slane %v1899_v4, 4 }
 0x250   : > { %1971 = vst.msk [vmem:[#allocation5 + $0x94] sm:$0xf] %vm1127_vm2, %v1878_v52  ;;  %v2297_v19 = vshrl.u32 %v2160_v62, 16  ;;  %v2159_v1 = vld [vmem:[#allocation2 + $0x40] sm:$0xf]  ;;  %v2048_v29 = vrot.slane %v2046_v37, 4  ;;  %v2266_v58 = vsel %vm15898_vm5, %v2261_v17, %v2265_v26 }
 0x251   : > { %2333 = vrot.lane.b32.xlu2 %v2256_v42, %s15520_s5  ;;  %v1726_v18 = vpop.permute.xlu1 %1725  ;;  %v1728_v30 = vpop.permute.xlu0 %1727  ;;  %v10488_v6 = vld [vmem:[#allocation5 + $0x14] sm:$0xf0]  ;;  %v1883_v8 = vrot.slane %v1882_v33, 4  ;;  %v2049_v23 = vrot.slane %v16585_v34, 5  ;;  %2138 = vst.msk [vmem:[#allocation5 + $0x84] sm:$0xf] %vm1127_vm2, %v2123_v31  ;;  %v1902_v35 = vor.u32 %v1901_v56, %v1897_v49 }
 0x252   : > { %1767 = vst.msk [vmem:[#allocation5 + $0x40] sm:$0xf] %vm1562_vm13, %v1726_v18  ;;  %v10491_v46 = vor.u32 %v13966_v40, %v10488_v6  ;;  %v1893_v5 = vrot.slane %v1892_v51, 4  ;;  %v16612_v14 = vrot.slane %v2273_v20, 5  ;;  %v2277_v60 = vshrl.u32 %v16560_v24, 16 }
 0x253   : > { %v1532_v59 = vpop.permute.xlu2 %1531  ;;  %1768 = vst.msk [vmem:[#allocation5 + $0x54] sm:$0xf] %vm1562_vm13, %v1728_v30  ;;  %v1888_v36 = vsel %vm15898_vm5, %v1883_v8, %v1887_v21  ;;  %v2126_v45 = vld [vmem:[#allocation2 + $0x34] sm:$0xf]  ;;  %v2271_v42 = vrot.slane %v2270_v15, 4  ;;  %v2283_v50 = vshll.u32 %v2159_v1, 16  ;;  %v2044_v18 = vsel %vm16163_vm14, %v16452_v10, %v2043_v3 }
 0x254   : > { %1570 = vst.msk [vmem:[#allocation5 + $0x8c] sm:$0xf] %vm1562_vm13, %v1532_v59  ;;  %3084 = vmatmul.bf16.vlgmr.msra.gmra.mxu2 %v10491_v46  ;;  %v1898_v43 = vsel %vm15898_vm5, %v1893_v5, %v1897_v49  ;;  %v1903_v37 = vrot.slane %v1902_v35, 4  ;;  %v16622_v53 = vrot.slane %v2293_v38, 5  ;;  %v2299_v24 = vrot.slane %v2297_v19, 4 }
 0x255   : > { %2145 = vst.msk [vmem:[#allocation5 + $0x110] sm:$0xf] %vm1127_vm2, %v2130_v55  ;;  %v2287_v12 = vshrl.u32 %v2159_v1, 16  ;;  %v1933_v7 = vrot.slane %v1932_v22, 4  ;;  %v2127_v25 = vld [vmem:[#allocation2 + $0x38] sm:$0xf]  ;;  %v2276_v30 = vsel %vm15898_vm5, %v2271_v42, %v16612_v14 }
 0x256   : > { %1972 = vst.msk [vmem:[#allocation5 + $0xa8] sm:$0xf] %vm1127_vm2, %v1888_v36  ;;  %v2379_v0 = vld [vmem:[#allocation2 + $0x18] sm:$0xf]  ;;  %v1908_v40 = vsel %vm15898_vm5, %v1903_v37, %v16531_v57  ;;  %v2378_v62 = vld [vmem:[#allocation2 + $0x14] sm:$0xf]  ;;  %v2300_v48 = vor.u32 %v2299_v24, %v16622_v53 }
 0x257   : > { %2075 = vrot.lane.b32.xlu1 %v2041_v63, %s15520_s5  ;;  %2335 = vrot.lane.b32.xlu0 %v2266_v58, %s15520_s5  ;;  %1973 = vst.msk [vmem:[#allocation5 + $0xbc] sm:$0xf] %vm1127_vm2, %v1898_v43  ;;  %v16630_v54 = vld [vmem:[#allocation2 + $0x20] sm:$0xf]  ;;  %v2128_v52 = vld [vmem:[#allocation2 + $0x3c] sm:$0xf]  ;;  %v1938_v57 = vsel %vm15898_vm5, %v1933_v7, %v16533_v39  ;;  %v2050_v39 = vsel %vm16163_vm14, %v2048_v29, %v2049_v23 }
 0x258   : > { %2141 = vst.msk [vmem:[#allocation5 + $0xc0] sm:$0xf] %vm1127_vm2, %v2126_v45  ;;  %v2377_v11 = vld [vmem:[#allocation2 + $0x10] sm:$0xe]  ;;  %v2279_v32 = vrot.slane %v2277_v60, 4  ;;  %v2414_v34 = vrot.slane %v2379_v0, 5 }
 0x259   : > { %2079 = vrot.lane.b32.xlu2 %v2047_v41, %s15520_s5  ;;  %v1730_v9 = vpop.permute.xlu1 %1729  ;;  %v1524_v26 = vpop.permute.xlu0 %1523  ;;  %v2380_v33 = vld [vmem:[#allocation2 + $0x1c] sm:$0xf]  ;;  %v2051_v21 = vrot.slane %v2049_v23, 4  ;;  %1974 = vst.msk [vmem:[#allocation5 + $0xd0] sm:$0xf] %vm1127_vm2, %v1908_v40  ;;  %v2411_v47 = vrot.slane %v2378_v62, 5 }
 0x25a   : > { %1769 = vst.msk [vmem:[#allocation5 + $0x68] sm:$0xf] %vm1562_vm13, %v1730_v9  ;;  %v2420_v4 = vrot.slane %v16630_v54, 5  ;;  %v16648_v6 = vrot.slane %v2283_v50, 5  ;;  %v2129_v20 = vld [vmem:[#allocation2 + $0x40] sm:$0xf]  ;;  %v2280_v31 = vor.u32 %v2279_v32, %v16612_v14 }
 0x25b   : > { %v1534_v44 = vpop.permute.xlu2 %1533  ;;  %1566 = vst.msk [vmem:[#allocation5 + $0x3c] sm:$0xf] %vm1562_vm13, %v1524_v26  ;;  %v10483_v16 = vrot.slane %v2377_v11, 9  ;;  %v13971_v61 = vld [vmem:[#allocation5 + $0x2c] sm:$0xf]  ;;  %v16655_v3 = vrot.slane %v2287_v12, 4 }
 0x25c   : > { %1571 = vst.msk [vmem:[#allocation5 + $0xa0] sm:$0xf] %vm1562_vm13, %v1534_v44  ;;  %v10508_v59 = vld [vmem:[#allocation5 + $0x3c] sm:$0xf0]  ;;  %v2417_v10 = vrot.slane %v2380_v33, 5  ;;  %v2301_v63 = vrot.slane %v2300_v48, 4 }
 0x25d   : > { %2142 = vst.msk [vmem:[#allocation5 + $0xd4] sm:$0xf] %vm1127_vm2, %v2127_v25  ;;  %v10506_v46 = vld [vmem:[#allocation5 + $0x28] sm:$0xf]  ;;  %v2416_v8 = vrot.slane %v2414_v34, 4  ;;  %v2413_v55 = vrot.slane %v2411_v47, 4  ;;  %v10511_v1 = vor.u32 %v13971_v61, %v10508_v59  ;;  %v2412_v36 = vsel %vm16163_vm14, %v10483_v16, %v2411_v47 }
 0x25e   : > { %2143 = vst.msk [vmem:[#allocation5 + $0xe8] sm:$0xf] %vm1127_vm2, %v2128_v52  ;;  %v2383_v49 = vld [vmem:[#allocation2 + $0x28] sm:$0xf]  ;;  %v2382_v51 = vld [vmem:[#allocation2 + $0x24] sm:$0xf]  ;;  %v2290_v7 = vor.u32 %v16655_v3, %v16648_v6  ;;  %v2306_v26 = vsel %vm15898_vm5, %v2301_v63, %v16093_v27 }
 0x25f   : > { %2077 = vrot.lane.b32.xlu1 %v2044_v18, %s15520_s5  ;;  %2337 = vrot.lane.b32.xlu0 %v2276_v30, %s15520_s5  ;;  %1977 = vst.msk [vmem:[#allocation5 + $0x10c] sm:$0xf] %vm1127_vm2, %v1938_v57  ;;  %v2422_v56 = vrot.slane %v2420_v4, 4  ;;  %v2385_v22 = vld [vmem:[#allocation2 + $0x30] sm:$0xf]  ;;  %v2415_v23 = vsel %vm16163_vm14, %v2413_v55, %v2414_v34  ;;  %v2419_v5 = vrot.slane %v2417_v10, 4  ;;  %v2418_v14 = vsel %vm16163_vm14, %v2416_v8, %v2417_v10 }
 0x260   : > { %2144 = vst.msk [vmem:[#allocation5 + $0xfc] sm:$0xf] %vm1127_vm2, %v2129_v20  ;;  %v2426_v35 = vrot.slane %v2383_v49, 5  ;;  %v2384_v41 = vld [vmem:[#allocation2 + $0x2c] sm:$0xf]  ;;  %v2281_v58 = vrot.slane %v2280_v31, 4 }
 0x261   : > { %2081 = vrot.lane.b32.xlu2 %v2050_v39, %s15520_s5  ;;  %v1526_v17 = vpop.permute.xlu0 %1525  ;;  %v1732_v15 = vpop.permute.xlu1 %1731  ;;  %v2423_v60 = vrot.slane %v2382_v51, 5  ;;  %v17643_v45 = vrot.slane %v16157_v2, 5  ;;  %v14024_v50 = vld [vmem:[#allocation13 + $0xb8] sm:$0xff]  ;;  %2470 = vst.msk [vmem:[#allocation5 + $0x10] sm:$0xf] %vm1127_vm2, %v2412_v36  ;;  %v2421_v43 = vsel %vm16163_vm14, %v2419_v5, %v2420_v4  ;;  %v2432_v37 = vrot.slane %v2385_v22, 5 }
 0x262   : > { %1567 = vst.msk [vmem:[#allocation5 + $0x50] sm:$0xf] %vm1562_vm13, %v1526_v17  ;;  %v13973_v19 = vld [vmem:[#allocation5 + $0x38] sm:$0xf0]  ;;  %v2386_v24 = vld [vmem:[#allocation2 + $0x34] sm:$0xf]  ;;  %v2286_v12 = vsel %vm15898_vm5, %v2281_v58, %v16648_v6  ;;  %3117 = vmatpush.bf16.msra.mxu3 %v14024_v50 }
 0x263   : > { %v1746_v38 = vpop.permute.xlu2 %1745  ;;  %1770 = vst.msk [vmem:[#allocation5 + $0x7c] sm:$0xf] %vm1562_vm13, %v1732_v15  ;;  %v10507_v29 = vor.u32 %v13973_v19, %v10506_v46  ;;  %v2053_v42 = vsel %vm16163_vm14, %v2051_v21, %v17643_v45  ;;  %v2424_v2 = vsel %vm16163_vm14, %v2422_v56, %v2423_v60  ;;  %v2429_v9 = vrot.slane %v2384_v41, 5  ;;  %v14023_v0 = vld [vmem:[#allocation13 + $0xb0] sm:$0xff]  ;;  %v2387_v27 = vld [vmem:[#allocation2 + $0x38] sm:$0xf] }
 0x264   : > { %1777 = vst.msk [vmem:[#allocation5 + $0x108] sm:$0xf] %vm1562_vm13, %v1746_v38  ;;  %3088 = vmatmul.bf16.gmra.mxu2 %v10511_v1  ;;  %v2428_v25 = vrot.slane %v2426_v35, 4  ;;  %v2425_v44 = vrot.slane %v2423_v60, 4  ;;  %v2435_v40 = vrot.slane %v2386_v24, 5  ;;  %v2434_v52 = vrot.slane %v2432_v37, 4 }
 0x265   : > { %3047 = vmatmul.bf16.gmra.mxu1 %v10507_v29  ;;  %2471 = vst.msk [vmem:[#allocation5 + $0x24] sm:$0xf] %vm1127_vm2, %v2415_v23  ;;  %v2291_v48 = vrot.slane %v2290_v7, 4  ;;  %v2431_v34 = vrot.slane %v2429_v9, 4  ;;  %v2438_v33 = vrot.slane %v2387_v27, 5  ;;  %v14022_v57 = vld [vmem:[#allocation13 + $0xa8] sm:$0xff] }
 0x266   : > { %2472 = vst.msk [vmem:[#allocation5 + $0x38] sm:$0xf] %vm1127_vm2, %v2418_v14  ;;  %v2427_v32 = vsel %vm16163_vm14, %v2425_v44, %v2426_v35  ;;  %v2430_v21 = vsel %vm16163_vm14, %v2428_v25, %v2429_v9  ;;  %3118 = vmatpush.bf16.msra.mxu3 %v14023_v0  ;;  %v2437_v4 = vrot.slane %v2435_v40, 4  ;;  %v2436_v18 = vsel %vm16163_vm14, %v2434_v52, %v2435_v40  ;;  %v2388_v30 = vld [vmem:[#allocation2 + $0x3c] sm:$0xf]  ;;  %v14020_v38 = vld [vmem:[#allocation13 + $0x98] sm:$0xff] }
 0x267   : > { %2339 = vrot.lane.b32.xlu1 %v2286_v12, %s15520_s5  ;;  %2083 = vrot.lane.b32.xlu0 %v2053_v42, %s15520_s5  ;;  %2473 = vst.msk [vmem:[#allocation5 + $0x4c] sm:$0xf] %vm1127_vm2, %v2421_v43  ;;  %v2433_v47 = vsel %vm16163_vm14, %v2431_v34, %v2432_v37  ;;  %v2296_v6 = vsel %vm15898_vm5, %v2291_v48, %v16622_v53  ;;  %v13976_v39 = vld [vmem:[#allocation5 + $0x54] sm:$0xf]  ;;  %v10528_v61 = vld [vmem:[#allocation5 + $0x64] sm:$0xf0] }
 0x268   : > { %2474 = vst.msk [vmem:[#allocation5 + $0x60] sm:$0xf] %vm1127_vm2, %v2424_v2  ;;  %v2439_v20 = vsel %vm16163_vm14, %v2437_v4, %v2438_v33  ;;  %v14021_v59 = vld [vmem:[#allocation13 + $0xa0] sm:$0xff]  ;;  %v2440_v3 = vrot.slane %v2438_v33, 4  ;;  %v2441_v10 = vrot.slane %v2388_v30, 5  ;;  %v10531_v17 = vor.u32 %v13976_v39, %v10528_v61  ;;  %v14019_v5 = vld [vmem:[#allocation13 + $0x90] sm:$0xff] }
 0x269   : > { %2343 = vrot.lane.b32.xlu2 %v2306_v26, %s15520_s5  ;;  %v1528_v62 = vpop.permute.xlu1 %1527  ;;  %v1738_v54 = vpop.permute.xlu0 %1737  ;;  %2475 = vst.msk [vmem:[#allocation5 + $0x74] sm:$0xf] %vm1127_vm2, %v2427_v32  ;;  %v10526_v16 = vld [vmem:[#allocation5 + $0x50] sm:$0xf]  ;;  %v2389_v31 = vld [vmem:[#allocation2 + $0x40] sm:$0xf] }
 0x26a   : > { %1568 = vst.msk [vmem:[#allocation5 + $0x64] sm:$0xf] %vm1562_vm13, %v1528_v62  ;;  %3119 = vmatpush.bf16.msra.mxu3 %v14022_v57  ;;  %v2444_v15 = vrot.slane %v2389_v31, 5  ;;  %v2390_v55 = vld [vmem:[#allocation2 + $0x44] sm:$0xf]  ;;  %v2443_v56 = vrot.slane %v2441_v10, 4  ;;  %v2442_v19 = vsel %vm16163_vm14, %v2440_v3, %v2441_v10 }
 0x26b   : > { %v1546_v11 = vpop.permute.xlu2 %1545  ;;  %1773 = vst.msk [vmem:[#allocation5 + $0xb8] sm:$0xf] %vm1562_vm13, %v1738_v54  ;;  %v2447_v51 = vrot.slane %v2390_v55, 5  ;;  %v16722_v1 = vld [vmem:[#allocation2 + $0x48] sm:$0xf]  ;;  %v14018_v42 = vld [vmem:[#allocation13 + $0x88] sm:$0xff] }
 0x26c   : > { %1577 = vst.msk [vmem:[#allocation5 + $0x118] sm:$0xf] %vm1562_vm13, %v1546_v11  ;;  %v2131_v36 = vld [vmem:[#allocation2 + $0x48] sm:$0xf]  ;;  %v2445_v22 = vsel %vm16163_vm14, %v2443_v56, %v2444_v15  ;;  %v2446_v29 = vrot.slane %v2444_v15, 4  ;;  %v2450_v35 = vrot.slane %v16722_v1, 5 }
 0x26d   : > { %2476 = vst.msk [vmem:[#allocation5 + $0x88] sm:$0xf] %vm1127_vm2, %v2430_v21  ;;  %v2449_v23 = vrot.slane %v2447_v51, 4  ;;  %v13981_v50 = vld [vmem:[#allocation5 + $0x7c] sm:$0xf]  ;;  %v14017_v37 = vld [vmem:[#allocation13 + $0x80] sm:$0xff] }
 0x26e   : > { %2477 = vst.msk [vmem:[#allocation5 + $0x9c] sm:$0xf] %vm1127_vm2, %v2433_v47  ;;  %3120 = vmatpush.bf16.msra.mxu3 %v14021_v59  ;;  %v2448_v60 = vsel %vm16163_vm14, %v2446_v29, %v2447_v51  ;;  %v10548_v7 = vld [vmem:[#allocation5 + $0x8c] sm:$0xf0]  ;;  %v13983_v9 = vld [vmem:[#allocation5 + $0x88] sm:$0xf0] }
 0x26f   : > { %2341 = vrot.lane.b32.xlu1 %v2296_v6, %s15520_s5  ;;  %2478 = vst.msk [vmem:[#allocation5 + $0xb0] sm:$0xf] %vm1127_vm2, %v2436_v18  ;;  %v2451_v45 = vsel %vm16163_vm14, %v2449_v23, %v2450_v35  ;;  %v10551_v26 = vor.u32 %v13981_v50, %v10548_v7  ;;  %v13986_v11 = vld [vmem:[#allocation5 + $0xa4] sm:$0xf]  ;;  %v10566_v32 = vld [vmem:[#allocation5 + $0xa0] sm:$0xf] }
 0x270   : > { %2479 = vst.msk [vmem:[#allocation5 + $0xc4] sm:$0xf] %vm1127_vm2, %v2439_v20  ;;  %v14032_v21 = vld [vmem:[#allocation13 + $0xf8] sm:$0xff]  ;;  %v14031_v57 = vld [vmem:[#allocation13 + $0xf0] sm:$0xff]  ;;  %v14030_v30 = vld [vmem:[#allocation13 + $0xe8] sm:$0xff]  ;;  %s17678_s5 = sld [smem:[#allocation60_spill]] }
 0x271   : > { %v1530_v46 = vpop.permute.xlu1 %1529  ;;  %v1740_v53 = vpop.permute.xlu0 %1739  ;;  %v13978_v63 = vld [vmem:[#allocation5 + $0x60] sm:$0xf0]  ;;  %2146 = vst.msk [vmem:[#allocation5 + $0x124] sm:$0xf] %vm1127_vm2, %v2131_v36  ;;  %3158 = vmatpush.bf16.msrb.mxu1 %v14032_v21  ;;  %14825 = vmatpush.bf16.msrb.mxu2 %v14032_v21  ;;  %v14026_v56 = vld [vmem:[#allocation13 + $0xc8] sm:$0xff]  ;;  %v14025_v36 = vld [vmem:[#allocation13 + $0xc0] sm:$0xff] }
 0x272   : > { %1569 = vst.msk [vmem:[#allocation5 + $0x78] sm:$0xf] %vm1562_vm13, %v1530_v46  ;;  %v10527_v49 = vor.u32 %v13978_v63, %v10526_v16  ;;  %3121 = vmatpush.bf16.msra.mxu3 %v14020_v38  ;;  %v10568_v62 = vld [vmem:[#allocation5 + $0xb4] sm:$0xf0]  ;;  %v14029_v16 = vld [vmem:[#allocation13 + $0xe0] sm:$0xff] }
 0x273   : > { %v1544_v8 = vpop.permute.xlu2 %1543  ;;  %1774 = vst.msk [vmem:[#allocation5 + $0xcc] sm:$0xf] %vm1562_vm13, %v1740_v53  ;;  %v10571_v34 = vor.u32 %v13986_v11, %v10568_v62  ;;  %v10608_v23 = vld [vmem:[#allocation5 + $0x104] sm:$0xf0]  ;;  %v11546_v13 = vld [vmem:[#allocation22 + $0x50] sm:$0xf0] }
 0x274   : > { %1576 = vst.msk [vmem:[#allocation5 + $0x104] sm:$0xf] %vm1562_vm13, %v1544_v8  ;;  %3092 = vmatmul.bf16.gmra.mxu2 %v10531_v17  ;;  %v14027_v17 = vld [vmem:[#allocation13 + $0xd0] sm:$0xff] }
 0x275   : > { %3051 = vmatmul.bf16.gmra.mxu1 %v10527_v49  ;;  %2480 = vst.msk [vmem:[#allocation5 + $0xd8] sm:$0xf] %vm1127_vm2, %v2442_v19  ;;  %14826 = vmatpush.bf16.msrb.mxu2 %v14031_v57  ;;  %v14028_v49 = vld [vmem:[#allocation13 + $0xd8] sm:$0xff] }
 0x276   : > { %2481 = vst.msk [vmem:[#allocation5 + $0xec] sm:$0xf] %vm1127_vm2, %v2445_v22  ;;  %3122 = vmatpush.bf16.msra.mxu3 %v14019_v5  ;;  %3159 = vmatpush.bf16.msrb.mxu1 %v14031_v57  ;;  %s10160_s23 = scalar_lea.hbm %s17678_s5, %s15627_s25  ;;  %s15428_s7 = scalar_lea.hbm %s17678_s5, 2 }
 0x277   : > { %2482 = vst.msk [vmem:[#allocation5 + $0x100] sm:$0xf] %vm1127_vm2, %v2448_v60  ;;  %s10164_s30 = sshll.u32 %s10160_s23, 4  ;;  %s10165_s30 = int_to_ptr.hbm [resolvable:$true] %s10164_s30 }
 0x278   : > { %2483 = vst.msk [vmem:[#allocation5 + $0x114] sm:$0xf] %vm1127_vm2, %v2451_v45  ;;  %s15422_s0 = sshra.s32 %s10165_s30, 4  ;;  %s15423_s0 = int_to_ptr.hbm [resolvable:$true] %s15422_s0 }
 0x279   : > { %v1742_v41 = vpop.permute.xlu1 %1741  ;;  %v1536_v58 = vpop.permute.xlu0 %1535  ;;  %v10546_v43 = vld [vmem:[#allocation5 + $0x78] sm:$0xf]  ;;  %14827 = vmatpush.bf16.msrb.mxu2 %v14030_v30  ;;  %s15424_s26 = scalar_lea.hbm %s15423_s0, 1  ;;  %p15429_p3 = scmp.lt.s32.totalorder %s15423_s0, %s17678_s5 }
 0x27a   : > { %1775 = vst.msk [vmem:[#allocation5 + $0xe0] sm:$0xf] %vm1562_vm13, %v1742_v41  ;;  %3123 = vmatpush.bf16.msra.mxu3 %v14018_v42  ;;  %v10547_v25 = vor.u32 %v13983_v9, %v10546_v43  ;;  %3160 = vmatpush.bf16.msrb.mxu1 %v14030_v30  ;;  %v13991_v59 = vld [vmem:[#allocation5 + $0xcc] sm:$0xf]  ;;  %v14034_v9 = vld [vmem:[#allocation13 + $0x108] sm:$0xff]  ;;  %p15425_p0 = scmp.ne.s32.totalorder %s15423_s0, %s15424_s26  ;;  %p15430_p4 = scmp.lt.s32.totalorder %s15428_s7, %s15424_s26 }
 0x27b   : > { %v2058_v14 = vpop.permute.xlu2 %2057  ;;  %1572 = vst.msk [vmem:[#allocation5 + $0xb4] sm:$0xf] %vm1562_vm13, %v1536_v58  ;;  %v14036_v43 = vld [vmem:[#allocation13 + $0x118] sm:$0xff] }
 0x27c   : > { %2102 = vst.msk [vmem:[#allocation5 + $0x8] sm:$0xf] %vm1562_vm13, %v2058_v14  ;;  %v13998_v14 = vld [vmem:[#allocation5 + $0x100] sm:$0xf0]  ;;  %p15426_p1 = pnand %p15425_p0, %p15644_p5  ;;  %p15431_p7 = por %p15430_p4, %p15429_p3 }
 0x27d   : > { %14828 = vmatpush.bf16.msrb.mxu2 %v14029_v16 }
 0x27e   : > { %3124 = vmatpush.bf16.msra.mxu3 %v14017_v37  ;;  %3161 = vmatpush.bf16.msrb.mxu1 %v14029_v16  ;;  %p15427_p2 = pneg %p15426_p1 }
 0x280   : > { %p15432_p8 = pnand %p15431_p7, %p15427_p2 }
 0x281   : > { %v1538_v24 = vpop.permute.xlu0 %1537  ;;  %v1744_v12 = vpop.permute.xlu1 %1743  ;;  %v10588_v6 = vld [vmem:[#allocation5 + $0xdc] sm:$0xf0]  ;;  %14829 = vmatpush.bf16.msrb.mxu2 %v14028_v49 }
 0x282   : > { %1573 = vst.msk [vmem:[#allocation5 + $0xc8] sm:$0xf] %vm1562_vm13, %v1538_v24  ;;  %v13988_v54 = vld [vmem:[#allocation5 + $0xb0] sm:$0xf0]  ;;  %v10591_v46 = vor.u32 %v13991_v59, %v10588_v6  ;;  %3162 = vmatpush.bf16.msrb.mxu1 %v14028_v49 }
 0x283   : > { %v2320_v2 = vpop.permute.xlu2 %2319  ;;  %1776 = vst.msk [vmem:[#allocation5 + $0xf4] sm:$0xf] %vm1562_vm13, %v1744_v12  ;;  %v10567_v33 = vor.u32 %v13988_v54, %v10566_v32  ;;  %v10494_v63 = vld [vmem:[#allocation5 + $0x8] sm:$0xf]  ;;  %v14035_v12 = vld [vmem:[#allocation13 + $0x110] sm:$0xff] }
 0x284   : > { %2363 = vst.msk [vmem:[#allocation5 + $0x20] sm:$0xf] %vm1562_vm13, %v2320_v2  ;;  %3096 = vmatmul.bf16.gmra.mxu2 %v10551_v26 }
 0x285   : > { %3055 = vmatmul.bf16.gmra.mxu1 %v10547_v25  ;;  %14830 = vmatpush.bf16.msrb.mxu2 %v14027_v17 }
 0x286   : > { %3163 = vmatpush.bf16.msrb.mxu1 %v14027_v17  ;;  %v10502_v17 = vld [vmem:[#allocation5 + $0x10] sm:$0xf] }
 0x289   : > { %v1540_v0 = vpop.permute.xlu1 %1539  ;;  %v1748_v44 = vpop.permute.xlu0 %1747  ;;  %v10586_v10 = vld [vmem:[#allocation5 + $0xc8] sm:$0xf]  ;;  %14831 = vmatpush.bf16.msrb.mxu2 %v14026_v56 }
 0x28a   : > { %1574 = vst.msk [vmem:[#allocation5 + $0xdc] sm:$0xf] %vm1562_vm13, %v1540_v0  ;;  %v13996_v38 = vld [vmem:[#allocation5 + $0xf4] sm:$0xf]  ;;  %3164 = vmatpush.bf16.msrb.mxu1 %v14026_v56 }
 0x28b   : > { %v2322_v40 = vpop.permute.xlu2 %2321  ;;  %1778 = vst.msk [vmem:[#allocation5 + $0x11c] sm:$0xf] %vm1562_vm13, %v1748_v44  ;;  %v10611_v60 = vor.u32 %v13996_v38, %v10608_v23  ;;  %v10496_v6 = vld [vmem:[#allocation5 + $0x1c] sm:$0xf0] }
 0x28c   : > { %2364 = vst.msk [vmem:[#allocation5 + $0x34] sm:$0xf] %vm1562_vm13, %v2322_v40 }
 0x28d   : > { %14832 = vmatpush.bf16.msrb.mxu2 %v14025_v36 }
 0x28e   : > { %3165 = vmatpush.bf16.msrb.mxu1 %v14025_v36 }
 0x291   : > { %v1542_v27 = vpop.permute.xlu1 %1541  ;;  %v2086_v52 = vpop.permute.xlu0 %2085  ;;  %v13993_v20 = vld [vmem:[#allocation5 + $0xd8] sm:$0xf0]  ;;  %3203 = vmatpush.bf16.msra.mxu2 %v14036_v43 }
 0x292   : > { %1575 = vst.msk [vmem:[#allocation5 + $0xf0] sm:$0xf] %vm1562_vm13, %v1542_v27  ;;  %v10587_v53 = vor.u32 %v13993_v20, %v10586_v10  ;;  %v2527_v2 = vld [vmem:[#allocation5 + $0x118] sm:$0xff] }
 0x293   : > { %v2068_v48 = vpop.permute.xlu2 %2067  ;;  %2116 = vst.msk [vmem:[#allocation5 + $0x120] sm:$0xf] %vm1562_vm13, %v2086_v52  ;;  %v2718_v25 = vunpack.c.h.b16 %v2527_v2  ;;  %v2717_v0 = vunpack.c.l.b16 %v2527_v2  ;;  %v14033_v52 = vld [vmem:[#allocation13 + $0x100] sm:$0xff] }
 0x294   : > { %2107 = vst.msk [vmem:[#allocation5 + $0x6c] sm:$0xf] %vm1562_vm13, %v2068_v48  ;;  %3100 = vmatmul.bf16.gmra.mxu2 %v10571_v34 }
 0x295   : > { %3059 = vmatmul.bf16.gmra.mxu1 %v10567_v33  ;;  %3204 = vmatpush.bf16.msra.mxu2 %v14035_v12  ;;  %v2758_v27 = vpack.c.b16 %v2718_v25, %v2718_v25  ;;  %v2757_v11 = vpack.c.b16 %v2717_v0, %v2717_v0  ;;  %v10542_v0 = vld [vmem:[#allocation5 + $0x60] sm:$0xf] }
 0x299   : > { %v2346_v47 = vpop.permute.xlu1 %2345  ;;  %v2060_v4 = vpop.permute.xlu0 %2059  ;;  %v10606_v19 = vld [vmem:[#allocation5 + $0xf0] sm:$0xf]  ;;  %3205 = vmatpush.bf16.msra.mxu2 %v14034_v9  ;;  %v13980_v9 = vld [vmem:[#allocation5 + $0x70] sm:$0xf0] }
 0x29a   : > { %2376 = vst.msk [vmem:[#allocation5 + $0x124] sm:$0xf] %vm1562_vm13, %v2346_v47  ;;  %v10607_v42 = vor.u32 %v13998_v14, %v10606_v19  ;;  %v10522_v14 = vld [vmem:[#allocation5 + $0x38] sm:$0xf] }
 0x29b   : > { %v2070_v18 = vpop.permute.xlu2 %2069  ;;  %2103 = vst.msk [vmem:[#allocation5 + $0x1c] sm:$0xf] %vm1562_vm13, %v2060_v4  ;;  %v13979_v48 = vld [vmem:[#allocation5 + $0x68] sm:$0xf0] }
 0x29c   : > { %2108 = vst.msk [vmem:[#allocation5 + $0x80] sm:$0xf] %vm1562_vm13, %v2070_v18 }
 0x29d   : > { %3206 = vmatpush.bf16.msra.mxu2 %v14033_v52 }
 0x2a1   : > { %v2318_v39 = vpop.permute.xlu1 %2317  ;;  %v2062_v61 = vpop.permute.xlu0 %2061  ;;  %v16770_v21 = vld [vmem:[#allocation5 + $0x120] sm:$0xff] }
 0x2a2   : > { %2362 = vst.msk [vmem:[#allocation5 + $0xc] sm:$0xf] %vm1562_vm13, %v2318_v39  ;;  %v13969_v31 = vld [vmem:[#allocation5 + $0x18] sm:$0xf0]  ;;  %v2720_v57 = vunpack.c.h.b16 %v16770_v21 }
 0x2a3   : > { %v2332_v3 = vpop.permute.xlu2 %2331  ;;  %2104 = vst.msk [vmem:[#allocation5 + $0x30] sm:$0xf] %vm1562_vm13, %v2062_v61  ;;  %v10495_v8 = vor.u32 %v13969_v31, %v10494_v63  ;;  %v10554_v16 = vld [vmem:[#allocation5 + $0x80] sm:$0xf]  ;;  %v13970_v63 = vld [vmem:[#allocation5 + $0x20] sm:$0xf0] }
 0x2a4   : > { %2369 = vst.msk [vmem:[#allocation5 + $0x98] sm:$0xf] %vm1562_vm13, %v2332_v3  ;;  %3104 = vmatmul.bf16.gmra.mxu2 %v10591_v46  ;;  %v2760_v20 = vpack.c.b16 %v2720_v57, %v2720_v57  ;;  %v2719_v57 = vunpack.c.l.b16 %v16770_v21 }
 0x2a5   : > { %3063 = vmatmul.bf16.gmra.mxu1 %v10587_v53  ;;  %3125 = vmatmul.bf16.vlgmr.msra.gmra.mxu3 %v10495_v8 }
 0x2a9   : > { %v2064_v15 = vpop.permute.xlu1 %2063  ;;  %v2324_v55 = vpop.permute.xlu0 %2323  ;;  %v13967_v47 = vld [vmem:[#allocation5 + $0xc] sm:$0xf] }
 0x2aa   : > { %2105 = vst.msk [vmem:[#allocation5 + $0x44] sm:$0xf] %vm1562_vm13, %v2064_v15  ;;  %v10514_v5 = vld [vmem:[#allocation5 + $0x30] sm:$0xf]  ;;  %v10499_v39 = vor.u32 %v13967_v47, %v10496_v6 }
 0x2ab   : > { %v2334_v51 = vpop.permute.xlu2 %2333  ;;  %2365 = vst.msk [vmem:[#allocation5 + $0x48] sm:$0xf] %vm1562_vm13, %v2324_v55  ;;  %v13972_v55 = vld [vmem:[#allocation5 + $0x34] sm:$0xf] }
 0x2ac   : > { %2370 = vst.msk [vmem:[#allocation5 + $0xac] sm:$0xf] %vm1562_vm13, %v2334_v51  ;;  %v10503_v51 = vor.u32 %v13970_v63, %v10502_v17  ;;  %v10582_v63 = vld [vmem:[#allocation5 + $0xb0] sm:$0xf] }
 0x2b1   : > { %v2066_v22 = vpop.permute.xlu1 %2065  ;;  %v2326_v29 = vpop.permute.xlu0 %2325  ;;  %v13974_v41 = vld [vmem:[#allocation5 + $0x40] sm:$0xf0] }
 0x2b2   : > { %2106 = vst.msk [vmem:[#allocation5 + $0x58] sm:$0xf] %vm1562_vm13, %v2066_v22  ;;  %v10515_v45 = vor.u32 %v13974_v41, %v10514_v5  ;;  %v10516_v31 = vld [vmem:[#allocation5 + $0x44] sm:$0xf0]  ;;  %v13975_v5 = vld [vmem:[#allocation5 + $0x48] sm:$0xf0] }
 0x2b3   : > { %v2080_v58 = vpop.permute.xlu2 %2079  ;;  %2366 = vst.msk [vmem:[#allocation5 + $0x5c] sm:$0xf] %vm1562_vm13, %v2326_v29  ;;  %v10519_v38 = vor.u32 %v13972_v55, %v10516_v31 }
 0x2b4   : > { %2113 = vst.msk [vmem:[#allocation5 + $0xe4] sm:$0xf] %vm1562_vm13, %v2080_v58  ;;  %3108 = vmatmul.bf16.gmra.mxu2 %v10611_v60 }
 0x2b5   : > { %3067 = vmatmul.bf16.gmra.mxu1 %v10607_v42  ;;  %3129 = vmatmul.bf16.gmra.mxu3 %v10515_v45  ;;  %v10523_v42 = vor.u32 %v13975_v5, %v10522_v14 }
 0x2b7   : > { %v3044_v50 = vpop.f32.mrf.mxu1 }
 0x2b9   : > { %v2328_v37 = vpop.permute.xlu1 %2327  ;;  %v2072_v24 = vpop.permute.xlu0 %2071  ;;  %v10534_v62 = vld [vmem:[#allocation5 + $0x58] sm:$0xf] }
 0x2ba   : > { %2367 = vst.msk [vmem:[#allocation5 + $0x70] sm:$0xf] %vm1562_vm13, %v2328_v37  ;;  %v10535_v32 = vor.u32 %v13979_v48, %v10534_v62  ;;  %v13977_v45 = vld [vmem:[#allocation5 + $0x5c] sm:$0xf]  ;;  %v10543_v62 = vor.u32 %v13980_v9, %v10542_v0  ;;  %v14000_v9 = vld [vmem:[#allocation5 + $0x110] sm:$0xf0] }
 0x2bb   : > { %v2082_v7 = vpop.permute.xlu2 %2081  ;;  %2109 = vst.msk [vmem:[#allocation5 + $0x94] sm:$0xf] %vm1562_vm13, %v2072_v24 }
 0x2bc   : > { %2114 = vst.msk [vmem:[#allocation5 + $0xf8] sm:$0xf] %vm1562_vm13, %v2082_v7 }
 0x2bf   : > { %v3046_v26 = vpop.f32.mrf.mxu1 }
 0x2c1   : > { %v2330_v44 = vpop.permute.xlu1 %2329  ;;  %v2074_v40 = vpop.permute.xlu0 %2073  ;;  %v10536_v41 = vld [vmem:[#allocation5 + $0x6c] sm:$0xf0] }
 0x2c2   : > { %2368 = vst.msk [vmem:[#allocation5 + $0x84] sm:$0xf] %vm1562_vm13, %v2330_v44  ;;  %v13984_v30 = vld [vmem:[#allocation5 + $0x90] sm:$0xf0]  ;;  %v10539_v43 = vor.u32 %v13977_v45, %v10536_v41  ;;  %v2452_v45 = vrot.slane %v2450_v35, 4 }
 0x2c3   : > { %v2344_v54 = vpop.permute.xlu2 %2343  ;;  %2110 = vst.msk [vmem:[#allocation5 + $0xa8] sm:$0xf] %vm1562_vm13, %v2074_v40  ;;  %v10555_v61 = vor.u32 %v13984_v30, %v10554_v16  ;;  %v10556_v40 = vld [vmem:[#allocation5 + $0x94] sm:$0xf0]  ;;  %v13987_v30 = vld [vmem:[#allocation5 + $0xac] sm:$0xf]  ;;  %v2759_v16 = vpack.c.b16 %v2719_v57, %v2719_v57 }
 0x2c4   : > { %2375 = vst.msk [vmem:[#allocation5 + $0x110] sm:$0xf] %vm1562_vm13, %v2344_v54  ;;  %3112 = vmatmul.bf16.gmra.mxu2 %v2758_v27  ;;  %v10614_v54 = vld [vmem:[#allocation5 + $0xf8] sm:$0xf] }
 0x2c5   : > { %3071 = vmatmul.bf16.gmra.mxu1 %v2757_v11  ;;  %3133 = vmatmul.bf16.gmra.mxu3 %v10535_v32 }
 0x2c9   : > { %v2076_v34 = vpop.permute.xlu1 %2075  ;;  %v2336_v33 = vpop.permute.xlu0 %2335  ;;  %v13982_v26 = vld [vmem:[#allocation5 + $0x84] sm:$0xf] }
 0x2ca   : > { %2111 = vst.msk [vmem:[#allocation5 + $0xbc] sm:$0xf] %vm1562_vm13, %v2076_v34  ;;  %v10574_v56 = vld [vmem:[#allocation5 + $0xa8] sm:$0xf]  ;;  %v10559_v27 = vor.u32 %v13982_v26, %v10556_v40 }
 0x2cb   : > { %2371 = vst.msk [vmem:[#allocation5 + $0xc0] sm:$0xf] %vm1562_vm13, %v2336_v33  ;;  %v13985_v33 = vld [vmem:[#allocation5 + $0x98] sm:$0xf0]  ;;  %v10616_v41 = vld [vmem:[#allocation5 + $0x10c] sm:$0xf0] }
 0x2d1   : > { %v2078_v4 = vpop.permute.xlu1 %2077  ;;  %v2338_v18 = vpop.permute.xlu0 %2337  ;;  %v13989_v49 = vld [vmem:[#allocation5 + $0xb8] sm:$0xf0] }
 0x2d2   : > { %2112 = vst.msk [vmem:[#allocation5 + $0xd0] sm:$0xf] %vm1562_vm13, %v2078_v4  ;;  %v10575_v19 = vor.u32 %v13989_v49, %v10574_v56  ;;  %v10576_v47 = vld [vmem:[#allocation5 + $0xbc] sm:$0xf0]  ;;  %v10562_v4 = vld [vmem:[#allocation5 + $0x88] sm:$0xf] }
 0x2d3   : > { %2372 = vst.msk [vmem:[#allocation5 + $0xd4] sm:$0xf] %vm1562_vm13, %v2338_v18  ;;  %v10563_v6 = vor.u32 %v13985_v33, %v10562_v4 }
 0x2d4   : > { %3194 = vmatmul.bf16.vlgmr.msrb.gmra.mxu2 %v2760_v20  ;;  %v10579_v20 = vor.u32 %v13987_v30, %v10576_v47 }
 0x2d5   : > { %3166 = vmatmul.bf16.vlgmr.msrb.gmra.mxu1 %v10499_v39  ;;  %3137 = vmatmul.bf16.gmra.mxu3 %v10555_v61 }
 0x2d7   : > { %v3085_v59 = vpop.f32.mrf.mxu2 }
 0x2d8   : > { %v16775_v3 = vadd.f32 %v3085_v59, %v3044_v50  ;;  %v13994_v50 = vld [vmem:[#allocation5 + $0xe0] sm:$0xf0] }
 0x2d9   : > { %v2340_v10 = vpop.permute.xlu1 %2339  ;;  %v2084_v46 = vpop.permute.xlu0 %2083  ;;  %v10594_v58 = vld [vmem:[#allocation5 + $0xd0] sm:$0xf] }
 0x2da   : > { %2373 = vst.msk [vmem:[#allocation5 + $0xe8] sm:$0xf] %vm1562_vm13, %v2340_v10  ;;  %v10595_v37 = vor.u32 %v13994_v50, %v10594_v58  ;;  %v13992_v31 = vld [vmem:[#allocation5 + $0xd4] sm:$0xf] }
 0x2db   : > { %2115 = vst.msk [vmem:[#allocation5 + $0x10c] sm:$0xf] %vm1562_vm13, %v2084_v46  ;;  %v13990_v46 = vld [vmem:[#allocation5 + $0xc0] sm:$0xf0] }
 0x2df   : > { %v3087_v53 = vpop.f32.mrf.mxu2 }
 0x2e1   : > { %v2342_v8 = vpop.permute.xlu1 %2341  ;;  %v10596_v53 = vld [vmem:[#allocation5 + $0xe4] sm:$0xf0] }
 0x2e2   : > { %v3048_v15 = vpop.f32.mrf.mxu1  ;;  %2374 = vst.msk [vmem:[#allocation5 + $0xfc] sm:$0xf] %vm1562_vm13, %v2342_v8  ;;  %v13999_v25 = vld [vmem:[#allocation5 + $0x108] sm:$0xf0]  ;;  %v10583_v8 = vor.u32 %v13990_v46, %v10582_v63  ;;  %v10599_v49 = vor.u32 %v13992_v31, %v10596_v53  ;;  %v16819_v53 = vld [vmem:[#allocation14] ss:$0 sm:$0xff] }
 0x2e3   : > { %v10615_v52 = vor.u32 %v13999_v25, %v10614_v54  ;;  %v14070_v31 = vld [vmem:[#allocation17 + $0x74] sm:$0xf0]  ;;  %vm5043_vm13 = vsmask.f32 5376 }
 0x2e4   : > { %10768 = vmatmul.msk.bf16.vlgmr.msra.gmra.mxu2 %vm3010_vm15, %v10503_v51 }
 0x2e5   : > { %3170 = vmatmul.bf16.gmra.mxu1 %v10519_v38  ;;  %3141 = vmatmul.bf16.gmra.mxu3 %v10575_v19  ;;  %v13995_v19 = vld [vmem:[#allocation5 + $0xe8] sm:$0xf0] }
 0x2e7   : > { %v3089_v36 = vpop.f32.mrf.mxu2 }
 0x2e8   : > { %v16781_v22 = vadd.f32 %v3089_v36, %v3048_v15 }
 0x2e9   : > { %v13997_v36 = vld [vmem:[#allocation5 + $0xfc] sm:$0xf] }
 0x2ea   : > { %v3050_v29 = vpop.f32.mrf.mxu1  ;;  %v10619_v14 = vor.u32 %v13997_v36, %v10616_v41  ;;  %v10901_v36 = vld [vmem:[#allocation17 + $0x50] sm:$0xf] }
 0x2ef   : > { %v3091_v23 = vpop.f32.mrf.mxu2 }
 0x2f0   : > { %v10602_v23 = vld [vmem:[#allocation5 + $0xd8] sm:$0xf] }
 0x2f1   : > { %v10603_v58 = vor.u32 %v13995_v19, %v10602_v23 }
 0x2f2   : > { %v3052_v60 = vpop.f32.mrf.mxu1 }
 0x2f4   : > { %10769 = vmatmul.msk.bf16.gmra.mxu2 %vm3010_vm15, %v10523_v42 }
 0x2f5   : > { %3174 = vmatmul.bf16.gmra.mxu1 %v10539_v43  ;;  %3145 = vmatmul.bf16.gmra.mxu3 %v10595_v37 }
 0x2f7   : > { %v3093_v24 = vpop.f32.mrf.mxu2 }
 0x2f8   : > { %v16784_v12 = vadd.f32 %v3093_v24, %v3052_v60  ;;  %v2392_v60 = vld [vmem:[#allocation2 + $0x4c] sm:$0x1] }
 0x2f9   : > { %v2453_v42 = vrot.slane %v2392_v60, 5  ;;  %v10893_v60 = vld [vmem:[#allocation17 + $0x40] sm:$0xf] }
 0x2fa   : > { %v3054_v7 = vpop.f32.mrf.mxu1 }
 0x2ff   : > { %v3095_v2 = vpop.f32.mrf.mxu2 }
 0x300   : > { %v10622_v2 = vld [vmem:[#allocation5 + $0x100] sm:$0xf] }
 0x301   : > { %v10623_v35 = vor.u32 %v14000_v9, %v10622_v2  ;;  %v14062_v2 = vld [vmem:[#allocation17 + $0x34] sm:$0xf0] }
 0x302   : > { %v3056_v44 = vpop.f32.mrf.mxu1 }
 0x304   : > { %10770 = vmatmul.msk.bf16.gmra.mxu2 %vm3010_vm15, %v10543_v62 }
 0x305   : > { %3178 = vmatmul.bf16.gmra.mxu1 %v10559_v27  ;;  %3149 = vmatmul.bf16.gmra.mxu3 %v10615_v52 }
 0x307   : > { %v3097_v11 = vpop.f32.mrf.mxu2 }
 0x308   : > { %v16787_v48 = vadd.f32 %v3097_v11, %v3056_v44 }
 0x30a   : > { %v3058_v32 = vpop.f32.mrf.mxu1 }
 0x30f   : > { %v3099_v34 = vpop.f32.mrf.mxu2 }
 0x312   : > { %v3060_v18 = vpop.f32.mrf.mxu1 }
 0x314   : > { %10771 = vmatmul.msk.bf16.gmra.mxu2 %vm3010_vm15, %v10563_v6 }
 0x315   : > { %3182 = vmatmul.bf16.gmra.mxu1 %v10579_v20  ;;  %3153 = vmatmul.bf16.gmra.mxu3 %v2759_v16 }
 0x317   : > { %v3101_v39 = vpop.f32.mrf.mxu2 }
 0x318   : > { %v16791_v61 = vadd.f32 %v3101_v39, %v3060_v18 }
 0x31a   : > { %v3062_v59 = vpop.f32.mrf.mxu1 }
 0x31f   : > { %v3103_v10 = vpop.f32.mrf.mxu2 }
 0x322   : > { %v3064_v21 = vpop.f32.mrf.mxu1 }
 0x324   : > { %10772 = vmatmul.msk.bf16.gmra.mxu2 %vm3010_vm15, %v10583_v8 }
 0x325   : > { %3186 = vmatmul.bf16.gmra.mxu1 %v10599_v49 }
 0x327   : > { %v3105_v17 = vpop.f32.mrf.mxu2 }
 0x328   : > { %v16794_v15 = vadd.f32 %v3105_v17, %v3064_v21  ;;  %v3126_v55 = vpop.f32.mrf.mxu3  ;;  %v10917_v21 = vld [vmem:[#allocation17 + $0x70] sm:$0xf]  ;;  %v10909_v17 = vld [vmem:[#allocation17 + $0x60] sm:$0xf] }
 0x329   : > { %v3127_v51 = vadd.f32 %v3126_v55, %v16775_v3  ;;  %v2454_v3 = vsel %vm16163_vm14, %v2452_v45, %v2453_v42  ;;  %v10918_v49 = vor.u32 %v14070_v31, %v10917_v21  ;;  %v14068_v55 = vld [vmem:[#allocation17 + $0x64] sm:$0xf0] }
 0x32a   : > { %v3066_v56 = vpop.f32.mrf.mxu1  ;;  %2484 = vst.msk [vmem:[#allocation5 + $0x128] sm:$0xf] %vm1127_vm2, %v2454_v3  ;;  %v14064_v45 = vld [vmem:[#allocation17 + $0x44] sm:$0xf0]  ;;  %vm3288_vm2 = vcmask 1040384  }
 0x32b   : > { %4638 = vmatpush.bf16.msrb.mxu3 %v10918_v49  ;;  %vm16838_vm8 = vmand %vm3288_vm2, %vm1191_vm6  ;;  %vm3302_vm6 = vsmask.f32 7942 }
 0x32c   : > { %vm16856_vm10 = vmand %vm3293_vm0, %vm3302_vm6 }
 0x32d   : > { %vm17119_vm0 = vmand %vm5035_vm11, %vm5036_vm12 }
 0x32e   : > { %vm5038_vm3 = vmor %vm17119_vm0, %vm16838_vm8 }
 0x32f   : > { %v3107_v38 = vpop.f32.mrf.mxu2 }
 0x330   : > { %v3128_v29 = vpop.f32.mrf.mxu3  ;;  %v16825_v38 = vld [vmem:[#allocation16] ss:$0 sm:$0xff] }
 0x331   : > { %v2529_v40 = vld [vmem:[#allocation5 + $0x128] sm:$0xf]  ;;  %v14066_v29 = vld [vmem:[#allocation17 + $0x54] sm:$0xf0] }
 0x332   : > { %v3068_v5 = vpop.f32.mrf.mxu1  ;;  %v2721_v27 = vunpack.c.l.b16 %v2529_v40 }
 0x334   : > { %10773 = vmatmul.msk.bf16.gmra.mxu2 %vm3010_vm15, %v10603_v58  ;;  %v2761_v11 = vpack.c.b16 %v2721_v27, %v2721_v27 }
 0x335   : > { %3190 = vmatmul.bf16.gmra.mxu1 %v10619_v14  ;;  %v10902_v14 = vor.u32 %v14066_v29, %v10901_v36 }
 0x337   : > { %v3109_v50 = vpop.f32.mrf.mxu2 }
 0x338   : > { %v16803_v43 = vadd.f32 %v3109_v50, %v3068_v5  ;;  %v3130_v37 = vpop.f32.mrf.mxu3 }
 0x339   : > { %v3131_v8 = vadd.f32 %v3130_v37, %v16781_v22  ;;  %v10894_v37 = vor.u32 %v14064_v45, %v10893_v60 }
 0x33a   : > { %v3070_v24 = vpop.f32.mrf.mxu1 }
 0x33f   : > { %v3111_v7 = vpop.f32.mrf.mxu2 }
 0x340   : > { %v3132_v26 = vpop.f32.mrf.mxu3  ;;  %v10885_v7 = vld [vmem:[#allocation17 + $0x30] sm:$0xf] }
 0x342   : > { %v3072_v1 = vpop.f32.mrf.mxu1 }
 0x344   : > { %10774 = vmatmul.msk.bf16.gmra.mxu2 %vm3010_vm15, %v10623_v35 }
 0x347   : > { %v3113_v25 = vpop.f32.mrf.mxu2 }
 0x348   : > { %v16806_v0 = vadd.f32 %v3113_v25, %v3072_v1  ;;  %v3134_v44 = vpop.f32.mrf.mxu3  ;;  %v10886_v25 = vor.u32 %v14062_v2, %v10885_v7 }
 0x349   : > { %v16809_v62 = vadd.f32 %v3134_v44, %v16784_v12 }
 0x34a   : > { %v3074_v54 = vpop.f32.mrf.mxu1 }
 0x34b   : > { %v3296_v54 = vld [vmem:[#allocation3 + $0x4] sm:$0x2] }
 0x34f   : > { %v3115_v52 = vpop.f32.mrf.mxu2 }
 0x350   : > { %v3136_v32 = vpop.f32.mrf.mxu3  ;;  %v14443_v52 = vld [vmem:[#allocation22 + $0x70c] sm:$0xf0] }
 0x352   : > { %v3167_v34 = vpop.f32.mrf.mxu1 }
 0x353   : > { %v3168_v59 = vadd.f32 %v3167_v34, %v3127_v51  ;;  %v10910_v51 = vor.u32 %v14068_v55, %v10909_v17  ;;  %v3314_v34 = vld [vmem:[#allocation3 + $0x4] sm:$0x4] }
 0x354   : > { %10775 = vmatmul.msk.bf16.gmra.mxu2 %vm3010_vm15, %v2761_v11  ;;  %v3290_v11 = vld [vmem:[#allocation3 + $0x4] sm:$0x1]  ;;  %vm5042_vm15 = vcmask 1045509  }
 0x355   : > { %4639 = vmatpush.bf16.msrb.mxu3 %v10910_v51  ;;  %v10869_v51 = vld [vmem:[#allocation17 + $0x10] sm:$0xf]  ;;  %vm17126_vm1 = vmand %vm5042_vm15, %vm5043_vm13 }
 0x356   : > { %vm5045_vm2 = vmor %vm17126_vm1, %vm16833_vm7 }
 0x357   : > { %v16812_v33 = vpop.f32.mrf.mxu2 }
 0x358   : > { %v16814_v57 = vpop.f32.mrf.mxu3 }
 0x359   : > { %4640 = vmatpush.bf16.msrb.mxu3 %v10902_v14  ;;  %v3139_v36 = vadd.f32 %v16814_v57, %v16787_v48  ;;  %v14056_v14 = vld [vmem:[#allocation17 + $0x4] sm:$0xf0] }
 0x35a   : > { %v3169_v47 = vpop.f32.mrf.mxu1 }
 0x35d   : > { %4641 = vmatpush.bf16.msrb.mxu3 %v10894_v37 }
 0x35f   : > { %v3197_v4 = vpop.f32.mrf.mxu2 }
 0x360   : > { %v3140_v18 = vpop.f32.mrf.mxu3 }
 0x361   : > { %4642 = vmatpush.bf16.msrb.mxu3 %v10886_v25 }
 0x362   : > { %v3171_v30 = vpop.f32.mrf.mxu1 }
 0x363   : > { %v3172_v56 = vadd.f32 %v3171_v30, %v3131_v8 }
 0x367   : > { %v3208_v6 = vpop.f32.mrf.mxu2 }
 0x368   : > { %v3142_v20 = vpop.f32.mrf.mxu3  ;;  %v3209_v46 = vadd.f32 %v3208_v6, %v3168_v59 }
 0x369   : > { %v16817_v12 = vadd.f32 %v3142_v20, %v16791_v61 }
 0x36a   : > { %v3173_v16 = vpop.f32.mrf.mxu1  ;;  %v3244_v61 = vmul.f32 %v16819_v53, %v3209_v46 }
 0x36c   : > { %v3256_v41 = vadd.f32 %v16825_v38, %v3244_v61  ;;  %v14060_v61 = vld [vmem:[#allocation17 + $0x24] sm:$0xf0] }
 0x36e   : > { %v3264_v3 = vmax.f32 %v3256_v41, 0.0 }
 0x36f   : > { %v3210_v39 = vpop.f32.mrf.mxu2 }
 0x370   : > { %v3144_v10 = vpop.f32.mrf.mxu3 }
 0x372   : > { %v16821_v63 = vpop.f32.mrf.mxu1 }
 0x373   : > { %v3176_v31 = vadd.f32 %v16821_v63, %v16809_v62 }
 0x377   : > { %v3212_v19 = vpop.f32.mrf.mxu2 }
 0x378   : > { %v3213_v23 = vadd.f32 %v3212_v19, %v3172_v56  ;;  %v16827_v5 = vpop.f32.mrf.mxu3  ;;  %v10877_v56 = vld [vmem:[#allocation17 + $0x20] sm:$0xf]  ;;  %v14058_v19 = vld [vmem:[#allocation17 + $0x14] sm:$0xf0] }
 0x379   : > { %v10878_v29 = vor.u32 %v14060_v61, %v10877_v56  ;;  %v10870_v63 = vor.u32 %v14058_v19, %v10869_v51  ;;  %v11301_v61 = vld [vmem:[#allocation17 + $0x370] sm:$0xf]  ;;  %v3147_v51 = vadd.f32 %v16827_v5, %v16794_v15  ;;  %v14166_v19 = vld [vmem:[#allocation17 + $0x374] sm:$0xf0] }
 0x37a   : > { %v3245_v22 = vmul.f32 %v16819_v53, %v3213_v23  ;;  %v3177_v58 = vpop.f32.mrf.mxu1  ;;  %v3404_v23 = vld [vmem:[#allocation3] sm:$0xf]  ;;  %v11285_v15 = vld [vmem:[#allocation17 + $0x350] sm:$0xf]  ;;  %v14162_v5 = vld [vmem:[#allocation17 + $0x354] sm:$0xf0] }
 0x37b   : > { %3408 = vst [vmem:[#allocation6] sm:$0xf] %v3404_v23  ;;  %4643 = vmatpush.bf16.msrb.mxu3 %v10878_v29  ;;  %v10861_v58 = vld [vmem:[#allocation17] sm:$0xf]  ;;  %v14150_v29 = vld [vmem:[#allocation17 + $0x2f4] sm:$0xf0]  ;;  %v11302_v23 = vor.u32 %v14166_v19, %v11301_v61 }
 0x37c   : > { %v3257_v42 = vadd.f32 %v16825_v38, %v3245_v22  ;;  %v10862_v57 = vor.u32 %v14056_v14, %v10861_v58  ;;  %v14134_v58 = vld [vmem:[#allocation17 + $0x274] sm:$0xf0]  ;;  %v11229_v14 = vld [vmem:[#allocation17 + $0x2e0] sm:$0xf]  ;;  %v11269_v61 = vld [vmem:[#allocation17 + $0x330] sm:$0xf] }
 0x37d   : > { %4752 = vmatpush.bf16.msrb.mxu2 %v11302_v23 }
 0x37e   : > { %v3265_v50 = vmax.f32 %v3257_v42, 0.0 }
 0x37f   : > { %v3214_v24 = vpop.f32.mrf.mxu2  ;;  %4644 = vmatpush.bf16.msrb.mxu3 %v10870_v63 }
 0x380   : > { %v3278_v9 = vmax.f32 %v3264_v3, %v3265_v50  ;;  %v3148_v26 = vpop.f32.mrf.mxu3 }
 0x382   : > { %v3280_v1 = vrot.slane %v3278_v9, 1  ;;  %v3179_v35 = vpop.f32.mrf.mxu1 }
 0x383   : > { %v3180_v41 = vadd.f32 %v3179_v35, %v3139_v36  ;;  %4645 = vmatpush.bf16.msrb.mxu3 %v10862_v57  ;;  %v11237_v36 = vld [vmem:[#allocation17 + $0x2f0] sm:$0xf] }
 0x384   : > { %v3282_v44 = vmax.f32 %v3278_v9, %v3280_v1  ;;  %v10789_v9 = vld [vmem:[#allocation6] sm:$0xf] }
 0x386   : > { %v3283_v27 = vpack.c.bf16 %v3282_v44, %v3282_v44 }
 0x387   : > { %v3216_v47 = vpop.f32.mrf.mxu2 }
 0x388   : > { %v3285_v4 = vshll.u32 %v3283_v27, 16  ;;  %v3297_v18 = vsel %vm16833_vm7, %v3283_v27, %v3296_v54  ;;  %v10777_v30 = vrot.slane %v3283_v27, 9  ;;  %v3150_v6 = vpop.f32.mrf.mxu3  ;;  %v3217_v17 = vadd.f32 %v3216_v47, %v3176_v31  ;;  %v3327_v47 = vld [vmem:[#allocation3 + $0x8] sm:$0x1] }
 0x389   : > { %3298 = vst [vmem:[#allocation3 + $0x4] sm:$0x2] %v3297_v18  ;;  %v16853_v39 = vadd.f32 %v3150_v6, %v16803_v43 }
 0x38a   : > { %v3291_v20 = vsel %vm16838_vm8, %v3285_v4, %v3290_v11  ;;  %v3315_v16 = vsel %vm16842_vm9, %v10777_v30, %v3314_v34  ;;  %v3181_v59 = vpop.f32.mrf.mxu1  ;;  %v10776_v46 = vrot.slane %v3285_v4, 9  ;;  %v3246_v62 = vmul.f32 %v16819_v53, %v3217_v17  ;;  %v3330_v11 = vld [vmem:[#allocation3 + $0x8] sm:$0x2]  ;;  %v3343_v4 = vld [vmem:[#allocation3 + $0x8] sm:$0x4] }
 0x38b   : > { %3292 = vst [vmem:[#allocation3 + $0x4] sm:$0x1] %v3291_v20 }
 0x38c   : > { %3316 = vst [vmem:[#allocation3 + $0x4] sm:$0x4] %v3315_v16  ;;  %v3258_v3 = vadd.f32 %v16825_v38, %v3246_v62  ;;  %v11173_v62 = vld [vmem:[#allocation17 + $0x270] sm:$0xf] }
 0x38e   : > { %v3266_v24 = vmax.f32 %v3258_v3, 0.0  ;;  %v11174_v3 = vor.u32 %v14134_v58, %v11173_v62  ;;  %v3356_v62 = vld [vmem:[#allocation3 + $0xc] sm:$0x1] }
 0x38f   : > { %v3218_v21 = vpop.f32.mrf.mxu2 }
 0x390   : > { %v3304_v8 = vld [vmem:[#allocation3 + $0x4] sm:$0x2]  ;;  %v3152_v43 = vpop.f32.mrf.mxu3  ;;  %4714 = vmatpush.bf16.msrb.mxu0 %v11174_v3 }
 0x391   : > { %v3305_v49 = vsel %vm16856_vm10, %v10776_v46, %v3304_v8 }
 0x392   : > { %3306 = vst [vmem:[#allocation3 + $0x4] sm:$0x2] %v3305_v49  ;;  %v3183_v55 = vpop.f32.mrf.mxu1 }
 0x393   : > { %v3184_v21 = vadd.f32 %v3183_v55, %v16817_v12  ;;  %v11293_v12 = vld [vmem:[#allocation17 + $0x360] sm:$0xf]  ;;  %v14164_v55 = vld [vmem:[#allocation17 + $0x364] sm:$0xf0] }
 0x397   : > { %v3220_v22 = vpop.f32.mrf.mxu2 }
 0x398   : > { %v3221_v60 = vadd.f32 %v3220_v22, %v3180_v41  ;;  %v16867_v45 = vpop.f32.mrf.mxu3  ;;  %v11238_v41 = vor.u32 %v14150_v29, %v11237_v36 }
 0x399   : > { %v3405_v42 = vld [vmem:[#allocation3 + $0x4] sm:$0xf] }
 0x39a   : > { %v3247_v50 = vmul.f32 %v16819_v53, %v3221_v60  ;;  %v3185_v48 = vpop.f32.mrf.mxu1  ;;  %3409 = vst [vmem:[#allocation6 + $0x24] sm:$0xf] %v3405_v42  ;;  %v14148_v60 = vld [vmem:[#allocation17 + $0x2e4] sm:$0xf0]  ;;  %4733 = vmatpush.bf16.msra.mxu1 %v11238_v41  ;;  %v11294_v42 = vor.u32 %v14164_v55, %v11293_v12  ;;  %v3359_v12 = vld [vmem:[#allocation3 + $0xc] sm:$0x2] }
 0x39b   : > { %v11165_v48 = vld [vmem:[#allocation17 + $0x260] sm:$0xf] }
 0x39c   : > { %v3259_v37 = vadd.f32 %v16825_v38, %v3247_v50  ;;  %v11230_v50 = vor.u32 %v14148_v60, %v11229_v14  ;;  %4753 = vmatpush.bf16.msrb.mxu2 %v11294_v42 }
 0x39e   : > { %v3267_v7 = vmax.f32 %v3259_v37, 0.0  ;;  %v14132_v37 = vld [vmem:[#allocation17 + $0x264] sm:$0xf0]  ;;  %4734 = vmatpush.bf16.msra.mxu1 %v11230_v50 }
 0x39f   : > { %v3222_v2 = vpop.f32.mrf.mxu2 }
 0x3a0   : > { %v3317_v26 = vmax.f32 %v3266_v24, %v3267_v7  ;;  %v3156_v1 = vpop.f32.mrf.mxu3  ;;  %v11221_v24 = vld [vmem:[#allocation17 + $0x2d0] sm:$0xf]  ;;  %v14146_v7 = vld [vmem:[#allocation17 + $0x2d4] sm:$0xf0] }
 0x3a1   : > { %v14041_v35 = vld [vmem:[#allocation6 + $0x20] sm:$0xf0]  ;;  %v11157_v1 = vld [vmem:[#allocation17 + $0x250] sm:$0xf] }
 0x3a2   : > { %v3319_v25 = vrot.slane %v3317_v26, 1  ;;  %v3187_v44 = vpop.f32.mrf.mxu1  ;;  %v16872_v54 = vor.u32 %v14041_v35, %v10789_v9  ;;  %v11166_v9 = vor.u32 %v14132_v37, %v11165_v48  ;;  %v14130_v35 = vld [vmem:[#allocation17 + $0x254] sm:$0xf0] }
 0x3a3   : > { %v3188_v63 = vadd.f32 %v3187_v44, %v3147_v51  ;;  %v14158_v51 = vld [vmem:[#allocation17 + $0x334] sm:$0xf0] }
 0x3a4   : > { %v3321_v27 = vmax.f32 %v3317_v26, %v3319_v25  ;;  %4646 = vmatmul.bf16.vlgmr.msrb.gmra.mxu3 %v16872_v54  ;;  %4715 = vmatpush.bf16.msrb.mxu0 %v11166_v9  ;;  %v11270_v23 = vor.u32 %v14158_v51, %v11269_v61  ;;  %v10973_v9 = vld [vmem:[#allocation17 + $0xe0] sm:$0xf]  ;;  %v14080_v51 = vld [vmem:[#allocation17 + $0xc4] sm:$0xf0] }
 0x3a6   : > { %v3322_v34 = vpack.c.bf16 %v3321_v27, %v3321_v27  ;;  %v11286_v27 = vor.u32 %v14162_v5, %v11285_v15 }
 0x3a7   : > { %v3224_v18 = vpop.f32.mrf.mxu2 }
 0x3a8   : > { %v3324_v30 = vshll.u32 %v3322_v34, 16  ;;  %v3331_v6 = vsel %vm16833_vm7, %v3322_v34, %v3330_v11  ;;  %v10779_v20 = vrot.slane %v3322_v34, 9  ;;  %v3225_v17 = vadd.f32 %v3224_v18, %v3184_v21  ;;  %v11277_v34 = vld [vmem:[#allocation17 + $0x340] sm:$0xf]  ;;  %v14160_v18 = vld [vmem:[#allocation17 + $0x344] sm:$0xf0]  ;;  %4754 = vmatpush.bf16.msrb.mxu2 %v11286_v27 }
 0x3a9   : > { %3332 = vst [vmem:[#allocation3 + $0x8] sm:$0x2] %v3331_v6  ;;  %v11222_v11 = vor.u32 %v14146_v7, %v11221_v24  ;;  %v14144_v6 = vld [vmem:[#allocation17 + $0x2c4] sm:$0xf0]  ;;  %v3155_v24 = vadd.f32 %v16867_v45, %v16806_v0  ;;  %v11205_v7 = vld [vmem:[#allocation17 + $0x2b0] sm:$0xf] }
 0x3aa   : > { %v3328_v16 = vsel %vm16838_vm8, %v3324_v30, %v3327_v47  ;;  %v3344_v59 = vsel %vm16842_vm9, %v10779_v20, %v3343_v4  ;;  %v3189_v46 = vpop.f32.mrf.mxu1  ;;  %v10778_v31 = vrot.slane %v3324_v30, 9  ;;  %v3248_v22 = vmul.f32 %v16819_v53, %v3225_v17  ;;  %v10981_v47 = vld [vmem:[#allocation17 + $0xf0] sm:$0xf]  ;;  %v14086_v4 = vld [vmem:[#allocation17 + $0xf4] sm:$0xf0] }
 0x3ab   : > { %3329 = vst [vmem:[#allocation3 + $0x8] sm:$0x1] %v3328_v16  ;;  %v11213_v30 = vld [vmem:[#allocation17 + $0x2c0] sm:$0xf]  ;;  %v10982_v20 = vor.u32 %v14086_v4, %v10981_v47  ;;  %v14128_v21 = vld [vmem:[#allocation17 + $0x244] sm:$0xf0]  ;;  %4735 = vmatpush.bf16.msra.mxu1 %v11222_v11  ;;  %v3196_v4 = vadd.f32 %v16812_v33, %v3155_v24 }
 0x3ac   : > { %3345 = vst [vmem:[#allocation3 + $0x8] sm:$0x4] %v3344_v59  ;;  %v3260_v26 = vadd.f32 %v16825_v38, %v3248_v22  ;;  %v11158_v59 = vor.u32 %v14130_v35, %v11157_v1  ;;  %v11149_v46 = vld [vmem:[#allocation17 + $0x240] sm:$0xf]  ;;  %v14126_v11 = vld [vmem:[#allocation17 + $0x234] sm:$0xf0] }
 0x3ad   : > { %4657 = vmatpush.bf16.msra.mxu3 %v10982_v20  ;;  %v11150_v36 = vor.u32 %v14128_v21, %v11149_v46  ;;  %v14140_v47 = vld [vmem:[#allocation17 + $0x2a4] sm:$0xf0]  ;;  %v11133_v46 = vld [vmem:[#allocation17 + $0x220] sm:$0xf] }
 0x3ae   : > { %4716 = vmatpush.bf16.msrb.mxu0 %v11158_v59  ;;  %v14154_v59 = vld [vmem:[#allocation17 + $0x314] sm:$0xf0]  ;;  %v14124_v21 = vld [vmem:[#allocation17 + $0x224] sm:$0xf0]  ;;  %v10957_v33 = vld [vmem:[#allocation17 + $0xc0] sm:$0xf] }
 0x3af   : > { %v3226_v8 = vpop.f32.mrf.mxu2  ;;  %v11117_v24 = vld [vmem:[#allocation17 + $0x200] sm:$0xf] }
 0x3b0   : > { %v3336_v49 = vld [vmem:[#allocation3 + $0x8] sm:$0x2] }
 0x3b1   : > { %v3337_v43 = vsel %vm16856_vm10, %v10778_v31, %v3336_v49  ;;  %v3268_v31 = vmax.f32 %v3260_v26, 0.0  ;;  %v11278_v49 = vor.u32 %v14160_v18, %v11277_v34  ;;  %v14084_v26 = vld [vmem:[#allocation17 + $0xe4] sm:$0xf0]  ;;  %v11197_v34 = vld [vmem:[#allocation17 + $0x2a0] sm:$0xf] }
 0x3b2   : > { %3338 = vst [vmem:[#allocation3 + $0x8] sm:$0x2] %v3337_v43  ;;  %v16884_v56 = vpop.f32.mrf.mxu1  ;;  %v11214_v43 = vor.u32 %v14144_v6, %v11213_v30  ;;  %4717 = vmatpush.bf16.msrb.mxu0 %v11150_v36  ;;  %v10974_v35 = vor.u32 %v14084_v26, %v10973_v9  ;;  %v11198_v45 = vor.u32 %v14140_v47, %v11197_v34  ;;  %v10965_v18 = vld [vmem:[#allocation17 + $0xd0] sm:$0xf]  ;;  %v14082_v30 = vld [vmem:[#allocation17 + $0xd4] sm:$0xf0] }
 0x3b3   : > { %4755 = vmatpush.bf16.msrb.mxu2 %v11278_v49  ;;  %v3192_v50 = vadd.f32 %v16884_v56, %v16853_v39  ;;  %v11141_v39 = vld [vmem:[#allocation17 + $0x230] sm:$0xf]  ;;  %v11134_v49 = vor.u32 %v14124_v21, %v11133_v46  ;;  %v14152_v36 = vld [vmem:[#allocation17 + $0x304] sm:$0xf0]  ;;  %v3498_v47 = vld [vmem:[#allocation3 + $0x4] sm:$0xf] }
 0x3b4   : > { %4736 = vmatpush.bf16.msra.mxu1 %v11214_v43  ;;  %4658 = vmatpush.bf16.msra.mxu3 %v10974_v35  ;;  %v11142_v0 = vor.u32 %v14126_v11, %v11141_v39  ;;  %v11253_v6 = vld [vmem:[#allocation17 + $0x310] sm:$0xf] }
 0x3b5   : > { %v11189_v43 = vld [vmem:[#allocation17 + $0x290] sm:$0xf] }
 0x3b6   : > { %4718 = vmatpush.bf16.msrb.mxu0 %v11142_v0 }
 0x3b7   : > { %v3228_v57 = vpop.f32.mrf.mxu2  ;;  %4756 = vmatpush.bf16.msrb.mxu2 %v11270_v23 }
 0x3b8   : > { %v3229_v2 = vadd.f32 %v3228_v57, %v3188_v63  ;;  %v3372_v63 = vld [vmem:[#allocation3 + $0xc] sm:$0x4] }
 0x3ba   : > { %v3249_v25 = vmul.f32 %v16819_v53, %v3229_v2  ;;  %v3193_v44 = vpop.f32.mrf.mxu1  ;;  %v14142_v2 = vld [vmem:[#allocation17 + $0x2b4] sm:$0xf0]  ;;  %4719 = vmatpush.bf16.msrb.mxu0 %v11134_v49 }
 0x3bb   : > { %v11206_v1 = vor.u32 %v14142_v2, %v11205_v7  ;;  %v14156_v44 = vld [vmem:[#allocation17 + $0x324] sm:$0xf0] }
 0x3bc   : > { %v3261_v16 = vadd.f32 %v16825_v38, %v3249_v25  ;;  %v11261_v25 = vld [vmem:[#allocation17 + $0x320] sm:$0xf]  ;;  %v14120_v7 = vld [vmem:[#allocation17 + $0x204] sm:$0xf0] }
 0x3bd   : > { %v11262_v27 = vor.u32 %v14156_v44, %v11261_v25  ;;  %4737 = vmatpush.bf16.msra.mxu1 %v11206_v1  ;;  %v11118_v26 = vor.u32 %v14120_v7, %v11117_v24  ;;  %v3550_v1 = vld [vmem:[#allocation3 + $0x8] sm:$0xf] }
 0x3be   : > { %v3269_v8 = vmax.f32 %v3261_v16, 0.0  ;;  %v10966_v16 = vor.u32 %v14082_v30, %v10965_v18  ;;  %v3559_v44 = vrot.slane %v3550_v1, 5  ;;  %v16935_v24 = vld [vmem:[#allocation3 + $0x8] sm:$0xf] }
 0x3bf   : > { %v3230_v17 = vpop.f32.mrf.mxu2  ;;  %4757 = vmatpush.bf16.msrb.mxu2 %v11262_v27  ;;  %v14076_v27 = vld [vmem:[#allocation17 + $0xa4] sm:$0xf0] }
 0x3c0   : > { %v3346_v19 = vmax.f32 %v3268_v31, %v3269_v8  ;;  %v11254_v8 = vor.u32 %v14154_v59, %v11253_v6  ;;  %v14138_v17 = vld [vmem:[#allocation17 + $0x294] sm:$0xf0]  ;;  %4659 = vmatpush.bf16.msra.mxu3 %v10966_v16  ;;  %v3561_v18 = vrot.slane %v3559_v44, 4  ;;  %v3499_v6 = vld [vmem:[#allocation3 + $0x8] sm:$0xf] }
 0x3c1   : > { %4738 = vmatpush.bf16.msra.mxu1 %v11198_v45  ;;  %v11190_v23 = vor.u32 %v14138_v17, %v11189_v43 }
 0x3c2   : > { %v3348_v29 = vrot.slane %v3346_v19, 1 }
 0x3c3   : > { %4758 = vmatpush.bf16.msrb.mxu2 %v11254_v8  ;;  %v3401_v8 = vld [vmem:[#allocation3 + $0x10] sm:$0x4] }
 0x3c4   : > { %v3350_v41 = vmax.f32 %v3346_v19, %v3348_v29  ;;  %v11245_v19 = vld [vmem:[#allocation17 + $0x300] sm:$0xf] }
 0x3c5   : > { %4739 = vmatpush.bf16.msra.mxu1 %v11190_v23  ;;  %v10933_v23 = vld [vmem:[#allocation17 + $0x90] sm:$0xf] }
 0x3c6   : > { %v3351_v55 = vpack.c.bf16 %v3350_v41, %v3350_v41  ;;  %v10958_v41 = vor.u32 %v14080_v51, %v10957_v33  ;;  %v3506_v33 = vshll.u32 %v3498_v47, 16 }
 0x3c7   : > { %v3232_v22 = vpop.f32.mrf.mxu2 }
 0x3c8   : > { %v3353_v58 = vshll.u32 %v3351_v55, 16  ;;  %v3360_v14 = vsel %vm16833_vm7, %v3351_v55, %v3359_v12  ;;  %v10781_v60 = vrot.slane %v3351_v55, 9  ;;  %v3233_v37 = vadd.f32 %v3232_v22, %v3192_v50  ;;  %v11125_v12 = vld [vmem:[#allocation17 + $0x210] sm:$0xf]  ;;  %v14122_v55 = vld [vmem:[#allocation17 + $0x214] sm:$0xf0]  ;;  %4660 = vmatpush.bf16.msra.mxu3 %v10958_v41 }
 0x3c9   : > { %3361 = vst [vmem:[#allocation3 + $0xc] sm:$0x2] %v3360_v14  ;;  %v10949_v50 = vld [vmem:[#allocation17 + $0xb0] sm:$0xf]  ;;  %v3508_v41 = vrot.slane %v3506_v33, 5 }
 0x3ca   : > { %v3357_v42 = vsel %vm16838_vm8, %v3353_v58, %v3356_v62  ;;  %v3373_v3 = vsel %vm16842_vm9, %v10781_v60, %v3372_v63  ;;  %v10780_v15 = vrot.slane %v3353_v58, 9  ;;  %v3250_v56 = vmul.f32 %v16819_v53, %v3233_v37  ;;  %v3406_v62 = vld [vmem:[#allocation3 + $0x8] sm:$0xf]  ;;  %v11181_v58 = vld [vmem:[#allocation17 + $0x280] sm:$0xf] }
 0x3cb   : > { %3358 = vst [vmem:[#allocation3 + $0xc] sm:$0x1] %v3357_v42  ;;  %v11246_v63 = vor.u32 %v14152_v36, %v11245_v19  ;;  %v11126_v60 = vor.u32 %v14122_v55, %v11125_v12  ;;  %v14136_v42 = vld [vmem:[#allocation17 + $0x284] sm:$0xf0]  ;;  %v3516_v36 = vshrl.u32 %v3499_v6, 16 }
 0x3cc   : > { %3374 = vst [vmem:[#allocation3 + $0xc] sm:$0x4] %v3373_v3  ;;  %v3262_v61 = vadd.f32 %v16825_v38, %v3250_v56  ;;  %v3576_v3 = vld [vmem:[#allocation3 + $0x8] sm:$0xf]  ;;  %v10941_v56 = vld [vmem:[#allocation17 + $0xa0] sm:$0xf] }
 0x3cd   : > { %3410 = vst [vmem:[#allocation6 + $0x48] sm:$0xf] %v3406_v62  ;;  %4759 = vmatpush.bf16.msrb.mxu2 %v11246_v63  ;;  %4720 = vmatpush.bf16.msrb.mxu0 %v11126_v60  ;;  %v10942_v30 = vor.u32 %v14076_v27, %v10941_v56  ;;  %v14074_v55 = vld [vmem:[#allocation17 + $0x94] sm:$0xf0]  ;;  %v10925_v62 = vld [vmem:[#allocation17 + $0x80] sm:$0xf] }
 0x3ce   : > { %3580 = vst [vmem:[#allocation6 + $0x18] sm:$0xf] %v3576_v3  ;;  %v14072_v60 = vld [vmem:[#allocation17 + $0x84] sm:$0xf0] }
 0x3cf   : > { %v3234_v5 = vpop.f32.mrf.mxu2 }
 0x3d0   : > { %v3365_v48 = vld [vmem:[#allocation3 + $0xc] sm:$0x2] }
 0x3d1   : > { %v3366_v57 = vsel %vm16856_vm10, %v10780_v15, %v3365_v48  ;;  %v3270_v15 = vmax.f32 %v3262_v61, 0.0  ;;  %v11182_v48 = vor.u32 %v14136_v42, %v11181_v58  ;;  %4721 = vmatpush.bf16.msrb.mxu0 %v11118_v26  ;;  %v3512_v61 = vshll.u32 %v3499_v6, 16 }
 0x3d2   : > { %3367 = vst [vmem:[#allocation3 + $0xc] sm:$0x2] %v3366_v57  ;;  %v14078_v57 = vld [vmem:[#allocation17 + $0xb4] sm:$0xf0] }
 0x3d3   : > { %v10950_v37 = vor.u32 %v14078_v57, %v10949_v50  ;;  %4740 = vmatpush.bf16.msra.mxu1 %v11182_v48  ;;  %v3514_v12 = vrot.slane %v3512_v61, 5  ;;  %v3412_v50 = vld [vmem:[#allocation3] sm:$0xf]  ;;  %v14100_v61 = vld [vmem:[#allocation17 + $0x164] sm:$0xf0] }
 0x3d4   : > { %v10825_v34 = vld [vmem:[#allocation6 + $0x48] sm:$0xf]  ;;  %v3420_v1 = vshll.u32 %v3412_v50, 16 }
 0x3d5   : > { %4661 = vmatpush.bf16.msra.mxu3 %v10950_v37  ;;  %v10813_v46 = vld [vmem:[#allocation6 + $0x18] sm:$0xf]  ;;  %v3413_v37 = vld [vmem:[#allocation3 + $0x4] sm:$0xf] }
 0x3d7   : > { %v3236_v20 = vpop.f32.mrf.mxu2 }
 0x3d8   : > { %v3237_v31 = vadd.f32 %v3236_v20, %v3196_v4  ;;  %v3388_v4 = vld [vmem:[#allocation3 + $0x10] sm:$0x2]  ;;  %v3503_v20 = vshrl.u32 %v3498_v47, 16 }
 0x3d9   : > { %v3407_v22 = vld [vmem:[#allocation3 + $0xc] sm:$0x3]  ;;  %4662 = vmatpush.bf16.msra.mxu3 %v10942_v30 }
 0x3da   : > { %v3251_v29 = vmul.f32 %v16819_v53, %v3237_v31  ;;  %3411 = vst [vmem:[#allocation6 + $0x6c] sm:$0x3] %v3407_v22  ;;  %v3577_v53 = vld [vmem:[#allocation3 + $0xc] sm:$0xf]  ;;  %v3385_v31 = vld [vmem:[#allocation3 + $0x10] sm:$0x1] }
 0x3db   : > { %3581 = vst [vmem:[#allocation6 + $0x3c] sm:$0xf] %v3577_v53  ;;  %v16909_v35 = vld [vmem:[#allocation3 + $0xc] sm:$0xf]  ;;  %v3505_v17 = vrot.slane %v3503_v20, 4  ;;  %v10934_v53 = vor.u32 %v14074_v55, %v10933_v23  ;;  %v3440_v55 = vshrl.u32 %v16935_v24, 16 }
 0x3dc   : > { %v3263_v14 = vadd.f32 %v16825_v38, %v3251_v29  ;;  %v3549_v38 = vld [vmem:[#allocation3 + $0x4] sm:$0xe]  ;;  %v3562_v39 = vrot.slane %v16909_v35, 5  ;;  %v16916_v21 = vld [vmem:[#allocation3 + $0xc] sm:$0xf] }
 0x3dd   : > { %v10785_v25 = vrot.slane %v3549_v38, 9  ;;  %v3522_v29 = vshll.u32 %v16916_v21, 16  ;;  %v3509_v42 = vor.u32 %v3508_v41, %v3505_v17  ;;  %4663 = vmatpush.bf16.msra.mxu3 %v10934_v53  ;;  %v14198_v53 = vld [vmem:[#allocation17 + $0x474] sm:$0xf0]  ;;  %v14067_v35 = vld [vmem:[#allocation17 + $0x64] sm:$0xf] }
 0x3de   : > { %v3271_v5 = vmax.f32 %v3263_v14, 0.0  ;;  %v3563_v43 = vsel %vm16163_vm14, %v3561_v18, %v3562_v39  ;;  %v3518_v14 = vrot.slane %v3516_v36, 4  ;;  %v14102_v18 = vld [vmem:[#allocation17 + $0x174] sm:$0xf0]  ;;  %v10919_v36 = vld [vmem:[#allocation17 + $0x78] sm:$0xf0] }
 0x3df   : > { %v3238_v2 = vpop.f32.mrf.mxu2  ;;  %v3560_v45 = vsel %vm16163_vm14, %v10785_v25, %v3559_v44  ;;  %3573 = vst [vmem:[#allocation6 + $0x38] sm:$0xf] %v3563_v43  ;;  %v16929_v3 = vrot.slane %v3522_v29, 5  ;;  %v3510_v38 = vrot.slane %v3509_v42, 4  ;;  %v3426_v25 = vshll.u32 %v3413_v37, 16 }
 0x3e0   : > { %v3375_v9 = vmax.f32 %v3270_v15, %v3271_v5  ;;  %3572 = vst [vmem:[#allocation6 + $0x14] sm:$0xf] %v3560_v45  ;;  %v3519_v57 = vor.u32 %v3518_v14, %v3514_v12  ;;  %v10926_v2 = vor.u32 %v14072_v60, %v10925_v62  ;;  %v3430_v44 = vshrl.u32 %v3413_v37, 16  ;;  %v14098_v60 = vld [vmem:[#allocation17 + $0x154] sm:$0xf0] }
 0x3e1   : > { %v14050_v0 = vld [vmem:[#allocation6 + $0x68] sm:$0x30]  ;;  %v3515_v32 = vsel %vm15898_vm5, %v3510_v38, %v3514_v12  ;;  %v3428_v45 = vrot.slane %v3426_v25, 5  ;;  %v16953_v10 = vrot.slane %v3562_v39, 4  ;;  %v11429_v42 = vld [vmem:[#allocation17 + $0x470] sm:$0xf] }
 0x3e2   : > { %v3377_v11 = vrot.slane %v3375_v9, 1  ;;  %v16914_v59 = vor.u32 %v14050_v0, %v10825_v34  ;;  %v14044_v49 = vld [vmem:[#allocation6 + $0x38] sm:$0xf0]  ;;  %v3520_v26 = vrot.slane %v3519_v57, 4  ;;  %v11045_v34 = vld [vmem:[#allocation17 + $0x170] sm:$0xf]  ;;  %4664 = vmatpush.bf16.msra.mxu3 %v10926_v2 }
 0x3e3   : > { %v16923_v19 = vor.u32 %v14044_v49, %v10813_v46  ;;  %3545 = vst [vmem:[#allocation6 + $0x10] sm:$0xf] %v3515_v32  ;;  %v3422_v0 = vrot.slane %v3420_v1, 5  ;;  %v3432_v30 = vrot.slane %v3430_v44, 4  ;;  %v11046_v20 = vor.u32 %v14102_v18, %v11045_v34  ;;  %v11037_v49 = vld [vmem:[#allocation17 + $0x160] sm:$0xf] }
 0x3e4   : > { %v3379_v16 = vmax.f32 %v3375_v9, %v3377_v11  ;;  %4651 = vmatmul.bf16.gmra.mxu3 %v16914_v59  ;;  %v3417_v9 = vshrl.u32 %v3412_v50, 16  ;;  %v3436_v11 = vshll.u32 %v16935_v24, 16  ;;  %v11038_v23 = vor.u32 %v14100_v61, %v11037_v49  ;;  %v14083_v12 = vld [vmem:[#allocation17 + $0xe4] sm:$0xf]  ;;  %v10911_v57 = vld [vmem:[#allocation17 + $0x68] sm:$0xf0] }
 0x3e5   : > { %4760 = vmatmul.bf16.vlgmr.msrb.gmra.mxu2 %v16923_v19  ;;  %v3433_v17 = vor.u32 %v3432_v30, %v3428_v45  ;;  %v10914_v24 = vor.u32 %v14067_v35, %v10911_v57  ;;  %v10967_v38 = vld [vmem:[#allocation17 + $0xd8] sm:$0xf0]  ;;  %v11021_v2 = vld [vmem:[#allocation17 + $0x140] sm:$0xf]  ;;  %v14196_v25 = vld [vmem:[#allocation17 + $0x464] sm:$0xf0] }
 0x3e6   : > { %v3380_v51 = vpack.c.bf16 %v3379_v16, %v3379_v16  ;;  %v10807_v56 = vld [vmem:[#allocation6 + $0x34] sm:$0xf0]  ;;  %v3419_v27 = vrot.slane %v3417_v9, 4  ;;  %v16945_v6 = vrot.slane %v3436_v11, 5  ;;  %v14085_v16 = vld [vmem:[#allocation17 + $0xf4] sm:$0xf]  ;;  %4676 = vmatpush.bf16.msrb.mxu3 %v11046_v20 }
 0x3e7   : > { %v14039_v7 = vld [vmem:[#allocation6 + $0x14] sm:$0xf]  ;;  %v3434_v62 = vrot.slane %v3433_v17, 4  ;;  %v11421_v1 = vld [vmem:[#allocation17 + $0x460] sm:$0xf]  ;;  %v3526_v18 = vshrl.u32 %v16916_v21, 16 }
 0x3e8   : > { %v3382_v63 = vshll.u32 %v3380_v51, 16  ;;  %v3389_v22 = vsel %vm16833_vm7, %v3380_v51, %v3388_v4  ;;  %v10783_v58 = vrot.slane %v3380_v51, 9  ;;  %v16940_v47 = vor.u32 %v14039_v7, %v10807_v56  ;;  %v14069_v51 = vld [vmem:[#allocation17 + $0x74] sm:$0xf]  ;;  %v14079_v11 = vld [vmem:[#allocation17 + $0xc4] sm:$0xf] }
 0x3e9   : > { %3390 = vst [vmem:[#allocation3 + $0x10] sm:$0x2] %v3389_v22  ;;  %v3525_v4 = vsel %vm15898_vm5, %v3520_v26, %v16929_v3  ;;  %v10922_v41 = vor.u32 %v14069_v51, %v10919_v36  ;;  %v11029_v22 = vld [vmem:[#allocation17 + $0x150] sm:$0xf]  ;;  %v14081_v7 = vld [vmem:[#allocation17 + $0xd4] sm:$0xf]  ;;  %v11422_v56 = vor.u32 %v14196_v25, %v11421_v1 }
 0x3ea   : > { %v3386_v15 = vsel %vm16838_vm8, %v3382_v63, %v3385_v31  ;;  %v10782_v5 = vrot.slane %v3382_v63, 9  ;;  %v3402_v48 = vsel %vm16842_vm9, %v10783_v58, %v3401_v8  ;;  %3546 = vst [vmem:[#allocation6 + $0x34] sm:$0xf] %v3525_v4  ;;  %4741 = vmatmul.bf16.vlgmr.msra.gmra.mxu1 %v16940_v47  ;;  %v3423_v31 = vor.u32 %v3422_v0, %v3419_v27  ;;  %v10983_v8 = vld [vmem:[#allocation17 + $0xf8] sm:$0xf0] }
 0x3eb   : > { %3387 = vst [vmem:[#allocation3 + $0x10] sm:$0x1] %v3386_v15  ;;  %v10986_v33 = vor.u32 %v14085_v16, %v10983_v8  ;;  %v10975_v63 = vld [vmem:[#allocation17 + $0xe8] sm:$0xf0]  ;;  %4809 = vmatpush.bf16.msrb.mxu1 %v10922_v41  ;;  %v10805_v50 = vld [vmem:[#allocation6 + $0x10] sm:$0xf]  ;;  %v3439_v15 = vsel %vm15898_vm5, %v3434_v62, %v16945_v6  ;;  %4677 = vmatpush.bf16.msrb.mxu3 %v11038_v23 }
 0x3ec   : > { %3403 = vst [vmem:[#allocation3 + $0x10] sm:$0x4] %v3402_v48  ;;  %v3424_v29 = vrot.slane %v3423_v31, 4  ;;  %v10978_v14 = vor.u32 %v14083_v12, %v10975_v63  ;;  %v11430_v48 = vor.u32 %v14198_v53, %v11429_v42  ;;  %v10970_v9 = vor.u32 %v14081_v7, %v10967_v38  ;;  %v14096_v26 = vld [vmem:[#allocation17 + $0x144] sm:$0xf0] }
 0x3ed   : > { %4828 = vmatpush.bf16.msra.mxu2 %v10986_v33  ;;  %3460 = vst [vmem:[#allocation6 + $0x28] sm:$0xf] %v3439_v15  ;;  %v11022_v44 = vor.u32 %v14096_v26, %v11021_v2  ;;  %v14065_v32 = vld [vmem:[#allocation17 + $0x54] sm:$0xf]  ;;  %v10903_v27 = vld [vmem:[#allocation17 + $0x58] sm:$0xf0] }
 0x3ee   : > { %v3429_v58 = vsel %vm15898_vm5, %v3424_v29, %v3428_v45  ;;  %4790 = vmatpush.bf16.msra.mxu0 %v11430_v48  ;;  %v10906_v34 = vor.u32 %v14065_v32, %v10903_v27  ;;  %v10959_v4 = vld [vmem:[#allocation17 + $0xc8] sm:$0xf0]  ;;  %v3415_v0 = vld [vmem:[#allocation3 + $0xc] sm:$0x7]  ;;  %v3442_v45 = vrot.slane %v3440_v55, 4  ;;  %v3528_v23 = vrot.slane %v3526_v18, 4 }
 0x3ef   : > { %3459 = vst [vmem:[#allocation6 + $0x4] sm:$0xf] %v3429_v58  ;;  %4810 = vmatpush.bf16.msrb.mxu1 %v10914_v24  ;;  %v10962_v30 = vor.u32 %v14079_v11, %v10959_v4  ;;  %v3446_v20 = vshll.u32 %v3415_v0, 16  ;;  %v3450_v16 = vshrl.u32 %v3415_v0, 16  ;;  %v3579_v31 = vld [vmem:[#allocation3 + $0x14] sm:$0x3] }
 0x3f0   : > { %v3394_v46 = vld [vmem:[#allocation3 + $0x10] sm:$0x2]  ;;  %v3443_v49 = vor.u32 %v3442_v45, %v16945_v6  ;;  %3583 = vst [vmem:[#allocation6 + $0x84] sm:$0x3] %v3579_v31  ;;  %v14094_v36 = vld [vmem:[#allocation17 + $0x134] sm:$0xf0]  ;;  %v3529_v1 = vor.u32 %v3528_v23, %v16929_v3 }
 0x3f1   : > { %v3395_v43 = vsel %vm16856_vm10, %v10782_v5, %v3394_v46  ;;  %v11030_v5 = vor.u32 %v14098_v60, %v11029_v22  ;;  %v14043_v39 = vld [vmem:[#allocation6 + $0x30] sm:$0xf0]  ;;  %4829 = vmatpush.bf16.msra.mxu2 %v10978_v14  ;;  %v3448_v33 = vrot.slane %v3446_v20, 5  ;;  %v3452_v61 = vrot.slane %v3450_v16, 4  ;;  %v11413_v29 = vld [vmem:[#allocation17 + $0x450] sm:$0xf] }
 0x3f2   : > { %3396 = vst [vmem:[#allocation3 + $0x10] sm:$0x2] %v3395_v43  ;;  %v16960_v37 = vor.u32 %v14043_v39, %v10805_v50  ;;  %4791 = vmatpush.bf16.msra.mxu0 %v11422_v56  ;;  %v11013_v43 = vld [vmem:[#allocation17 + $0x130] sm:$0xf]  ;;  %v3444_v21 = vrot.slane %v3443_v49, 4  ;;  %v3530_v18 = vrot.slane %v3529_v1, 4 }
 0x3f3   : > { %4678 = vmatpush.bf16.msrb.mxu3 %v11030_v5  ;;  %4811 = vmatpush.bf16.msrb.mxu1 %v10906_v34  ;;  %v3453_v41 = vor.u32 %v3452_v61, %v3448_v33  ;;  %v11014_v12 = vor.u32 %v14094_v36, %v11013_v43  ;;  %v14194_v55 = vld [vmem:[#allocation17 + $0x454] sm:$0xf0]  ;;  %v14063_v62 = vld [vmem:[#allocation17 + $0x44] sm:$0xf]  ;;  %v10895_v6 = vld [vmem:[#allocation17 + $0x48] sm:$0xf0] }
 0x3f4   : > { %4722 = vmatmul.bf16.vlgmr.msrb.gmra.mxu0 %v16960_v37  ;;  %v10791_v17 = vld [vmem:[#allocation6 + $0x24] sm:$0xf0]  ;;  %v3449_v63 = vsel %vm15898_vm5, %v3444_v21, %v3448_v33  ;;  %v11414_v22 = vor.u32 %v14194_v55, %v11413_v29  ;;  %v10898_v58 = vor.u32 %v14063_v62, %v10895_v6  ;;  %v14077_v14 = vld [vmem:[#allocation17 + $0xb4] sm:$0xf]  ;;  %v10951_v60 = vld [vmem:[#allocation17 + $0xb8] sm:$0xf0] }
 0x3f5   : > { %4830 = vmatpush.bf16.msra.mxu2 %v10970_v9  ;;  %v3454_v53 = vrot.slane %v3453_v41, 4  ;;  %3461 = vst [vmem:[#allocation6 + $0x4c] sm:$0xf] %v3449_v63  ;;  %v10954_v50 = vor.u32 %v14077_v14, %v10951_v60  ;;  %v11005_v5 = vld [vmem:[#allocation17 + $0x120] sm:$0xf] }
 0x3f6   : > { %v14037_v8 = vld [vmem:[#allocation6 + $0x4] sm:$0xf]  ;;  %4792 = vmatpush.bf16.msra.mxu0 %v11414_v22  ;;  %v14092_v48 = vld [vmem:[#allocation17 + $0x124] sm:$0xf0]  ;;  %v11405_v35 = vld [vmem:[#allocation17 + $0x440] sm:$0xf] }
 0x3f7   : > { %4679 = vmatpush.bf16.msrb.mxu3 %v11022_v44  ;;  %v16965_v51 = vor.u32 %v14037_v8, %v10791_v17  ;;  %4812 = vmatpush.bf16.msrb.mxu1 %v10898_v58  ;;  %v14192_v39 = vld [vmem:[#allocation17 + $0x444] sm:$0xf0]  ;;  %3462 = vst [vmem:[#allocation6 + $0x70] sm:$0x3] %v3454_v53  ;;  %v11006_v38 = vor.u32 %v14092_v48, %v11005_v5  ;;  %v14053_v9 = vld [vmem:[#allocation6 + $0x80] sm:$0x30] }
 0x3f8   : > { %v11406_v2 = vor.u32 %v14192_v39, %v11405_v35  ;;  %v14061_v26 = vld [vmem:[#allocation17 + $0x34] sm:$0xf]  ;;  %v10887_v44 = vld [vmem:[#allocation17 + $0x38] sm:$0xf0]  ;;  %v14075_v56 = vld [vmem:[#allocation17 + $0xa4] sm:$0xf] }
 0x3f9   : > { %v3578_v46 = vld [vmem:[#allocation3 + $0x10] sm:$0xf]  ;;  %4831 = vmatpush.bf16.msra.mxu2 %v10962_v30  ;;  %4665 = vmatmul.bf16.vlgmr.msra.gmra.mxu3 %v16965_v51  ;;  %v10890_v32 = vor.u32 %v14061_v26, %v10887_v44  ;;  %v10943_v27 = vld [vmem:[#allocation17 + $0xa8] sm:$0xf0]  ;;  %v10997_v0 = vld [vmem:[#allocation17 + $0x110] sm:$0xf] }
 0x3fa   : > { %3582 = vst [vmem:[#allocation6 + $0x60] sm:$0xf] %v3578_v46  ;;  %v3552_v42 = vld [vmem:[#allocation3 + $0x10] sm:$0x7]  ;;  %4793 = vmatpush.bf16.msra.mxu0 %v11406_v2  ;;  %v14090_v45 = vld [vmem:[#allocation17 + $0x114] sm:$0xf0] }
 0x3fb   : > { %4680 = vmatpush.bf16.msrb.mxu3 %v11014_v12  ;;  %v3565_v15 = vrot.slane %v3552_v42, 5  ;;  %v3501_v11 = vld [vmem:[#allocation3 + $0x10] sm:$0x7]  ;;  %4813 = vmatpush.bf16.msrb.mxu1 %v10890_v32  ;;  %v10998_v3 = vor.u32 %v14090_v45, %v10997_v0  ;;  %v11397_v30 = vld [vmem:[#allocation17 + $0x430] sm:$0xf] }
 0x3fc   : > { %v3532_v34 = vshll.u32 %v3501_v11, 16  ;;  %v3536_v4 = vshrl.u32 %v3501_v11, 16  ;;  %v14190_v20 = vld [vmem:[#allocation17 + $0x434] sm:$0xf0]  ;;  %v14059_v8 = vld [vmem:[#allocation17 + $0x24] sm:$0xf] }
 0x3fd   : > { %4832 = vmatpush.bf16.msra.mxu2 %v10954_v50  ;;  %v3566_v24 = vsel %vm16163_vm14, %v16953_v10, %v3565_v15  ;;  %v3567_v7 = vrot.slane %v3565_v15, 4  ;;  %v10946_v10 = vor.u32 %v14075_v56, %v10943_v27  ;;  %v11398_v31 = vor.u32 %v14190_v20, %v11397_v30  ;;  %v10879_v49 = vld [vmem:[#allocation17 + $0x28] sm:$0xf0]  ;;  %v14073_v33 = vld [vmem:[#allocation17 + $0x94] sm:$0xf] }
 0x3fe   : > { %3574 = vst [vmem:[#allocation6 + $0x5c] sm:$0xf] %v3566_v24  ;;  %v3534_v16 = vrot.slane %v3532_v34, 5  ;;  %v3538_v46 = vrot.slane %v3536_v4, 4  ;;  %v10827_v43 = vld [vmem:[#allocation6 + $0x6c] sm:$0x30]  ;;  %v10882_v17 = vor.u32 %v14059_v8, %v10879_v49 }
 0x3ff   : > { %3575 = vst [vmem:[#allocation6 + $0x80] sm:$0x3] %v3567_v7  ;;  %4681 = vmatpush.bf16.msrb.mxu3 %v11006_v38  ;;  %v10935_v61 = vld [vmem:[#allocation17 + $0x98] sm:$0xf0]  ;;  %v14046_v21 = vld [vmem:[#allocation6 + $0x4c] sm:$0xf]  ;;  %4794 = vmatpush.bf16.msra.mxu0 %v11398_v31 }
 0x400   : > { %v3535_v29 = vsel %vm15898_vm5, %v3530_v18, %v3534_v16  ;;  %v3539_v23 = vor.u32 %v3538_v46, %v3534_v16  ;;  %v10938_v41 = vor.u32 %v14073_v33, %v10935_v61  ;;  %v10989_v12 = vld [vmem:[#allocation17 + $0x100] sm:$0xf]  ;;  %v14088_v55 = vld [vmem:[#allocation17 + $0x104] sm:$0xf0]  ;;  %4814 = vmatpush.bf16.msrb.mxu1 %v10882_v17  ;;  %v14057_v60 = vld [vmem:[#allocation17 + $0x14] sm:$0xf]  ;;  %v16981_v42 = vor.u32 %v14046_v21, %v10827_v43 }
 0x401   : > { %v10849_v57 = vld [vmem:[#allocation6 + $0x60] sm:$0xf]  ;;  %4833 = vmatpush.bf16.msra.mxu2 %v10946_v10  ;;  %3547 = vst [vmem:[#allocation6 + $0x58] sm:$0xf] %v3535_v29  ;;  %v10990_v6 = vor.u32 %v14088_v55, %v10989_v12  ;;  %v11389_v63 = vld [vmem:[#allocation17 + $0x420] sm:$0xf] }
 0x402   : > { %v16974_v25 = vor.u32 %v14053_v9, %v10849_v57  ;;  %v3540_v58 = vrot.slane %v3539_v23, 4  ;;  %v14188_v14 = vld [vmem:[#allocation17 + $0x424] sm:$0xf0]  ;;  %v10871_v50 = vld [vmem:[#allocation17 + $0x18] sm:$0xf0] }
 0x403   : > { %4682 = vmatpush.bf16.msrb.mxu3 %v10998_v3  ;;  %v11390_v53 = vor.u32 %v14188_v14, %v11389_v63  ;;  %v14071_v15 = vld [vmem:[#allocation17 + $0x84] sm:$0xf]  ;;  %v10927_v5 = vld [vmem:[#allocation17 + $0x88] sm:$0xf0]  ;;  %v10874_v48 = vor.u32 %v14057_v60, %v10871_v50  ;;  %v3463_v39 = vld [vmem:[#allocation3] sm:$0xe] }
 0x404   : > { %4765 = vmatmul.bf16.gmra.mxu2 %v16974_v25  ;;  %3548 = vst [vmem:[#allocation6 + $0x7c] sm:$0x3] %v3540_v58  ;;  %v10930_v35 = vor.u32 %v14071_v15, %v10927_v5  ;;  %v3464_v57 = vld [vmem:[#allocation3 + $0x4] sm:$0xf]  ;;  %v16985_v24 = vld [vmem:[#allocation3 + $0x8] sm:$0xf] }
 0x405   : > { %v14048_v36 = vld [vmem:[#allocation6 + $0x5c] sm:$0xf]  ;;  %4834 = vmatpush.bf16.msra.mxu2 %v10938_v41  ;;  %4795 = vmatpush.bf16.msra.mxu0 %v11390_v53  ;;  %v10784_v7 = vrot.slane %v3463_v39, 9  ;;  %v3473_v38 = vrot.slane %v3464_v57, 5  ;;  %v11109_v2 = vld [vmem:[#allocation17 + $0x1f0] sm:$0xf] }
 0x406   : > { %v10843_v62 = vld [vmem:[#allocation6 + $0x7c] sm:$0x30]  ;;  %4815 = vmatpush.bf16.msrb.mxu1 %v10874_v48  ;;  %v3476_v9 = vrot.slane %v16985_v24, 5  ;;  %v11381_v1 = vld [vmem:[#allocation17 + $0x410] sm:$0xf] }
 0x407   : > { %v16979_v22 = vor.u32 %v14048_v36, %v10843_v62  ;;  %4683 = vmatpush.bf16.msrb.mxu3 %v10990_v6  ;;  %v14118_v26 = vld [vmem:[#allocation17 + $0x1f4] sm:$0xf0]  ;;  %v3474_v44 = vsel %vm16163_vm14, %v10784_v7, %v3473_v38  ;;  %v3475_v56 = vrot.slane %v3473_v38, 4  ;;  %v14055_v11 = vld [vmem:[#allocation17 + $0x4] sm:$0xf] }
 0x408   : > { %v11110_v32 = vor.u32 %v14118_v26, %v11109_v2  ;;  %v14186_v27 = vld [vmem:[#allocation17 + $0x414] sm:$0xf0]  ;;  %3486 = vst [vmem:[#allocation6 + $0x8] sm:$0xf] %v3474_v44  ;;  %v10863_v34 = vld [vmem:[#allocation17 + $0x8] sm:$0xf0] }
 0x409   : > { %4746 = vmatmul.bf16.gmra.mxu1 %v16979_v22  ;;  %4670 = vmatmul.bf16.gmra.mxu3 %v16981_v42  ;;  %v11382_v10 = vor.u32 %v14186_v27, %v11381_v1  ;;  %v10841_v4 = vld [vmem:[#allocation6 + $0x58] sm:$0xf]  ;;  %v3477_v0 = vsel %vm16163_vm14, %v3475_v56, %v3476_v9  ;;  %v10866_v45 = vor.u32 %v14055_v11, %v10863_v34  ;;  %v14149_v18 = vld [vmem:[#allocation17 + $0x2f4] sm:$0xf]  ;;  %v11239_v3 = vld [vmem:[#allocation17 + $0x2f8] sm:$0xf0] }
 0x40a   : > { %4835 = vmatpush.bf16.msra.mxu2 %v10930_v35  ;;  %v11101_v30 = vld [vmem:[#allocation17 + $0x1e0] sm:$0xf]  ;;  %3487 = vst [vmem:[#allocation6 + $0x2c] sm:$0xf] %v3477_v0  ;;  %v11242_v20 = vor.u32 %v14149_v18, %v11239_v3  ;;  %v14116_v16 = vld [vmem:[#allocation17 + $0x1e4] sm:$0xf0] }
 0x40b   : > { %4695 = vmatpush.bf16.msra.mxu3 %v11110_v32  ;;  %4796 = vmatpush.bf16.msra.mxu0 %v11382_v10  ;;  %v11373_v46 = vld [vmem:[#allocation17 + $0x400] sm:$0xf]  ;;  %v14052_v31 = vld [vmem:[#allocation6 + $0x78] sm:$0x30]  ;;  %v11102_v8 = vor.u32 %v14116_v16, %v11101_v30  ;;  %v14184_v49 = vld [vmem:[#allocation17 + $0x404] sm:$0xf0] }
 0x40c   : > { %4816 = vmatpush.bf16.msrb.mxu1 %v10866_v45  ;;  %v14133_v43 = vld [vmem:[#allocation17 + $0x274] sm:$0xf]  ;;  %v16994_v17 = vor.u32 %v14052_v31, %v10841_v4  ;;  %v11374_v33 = vor.u32 %v14184_v49, %v11373_v46  ;;  %v11175_v61 = vld [vmem:[#allocation17 + $0x278] sm:$0xf0]  ;;  %v14147_v21 = vld [vmem:[#allocation17 + $0x2e4] sm:$0xf] }
 0x40d   : > { %v11231_v36 = vld [vmem:[#allocation17 + $0x2e8] sm:$0xf0]  ;;  %v11178_v29 = vor.u32 %v14133_v43, %v11175_v61  ;;  %v3635_v41 = vld [vmem:[#allocation3 + $0x8] sm:$0xe]  ;;  %v3636_v12 = vld [vmem:[#allocation3 + $0xc] sm:$0xf] }
 0x40e   : > { %4904 = vmatpush.bf16.msrb.mxu2 %v11242_v20  ;;  %v11234_v23 = vor.u32 %v14147_v21, %v11231_v36  ;;  %v3637_v55 = vld [vmem:[#allocation3 + $0x10] sm:$0xf]  ;;  %4727 = vmatmul.bf16.gmra.mxu0 %v16994_v17  ;;  %v10786_v62 = vrot.slane %v3635_v41, 9  ;;  %v3645_v6 = vrot.slane %v3636_v12, 5  ;;  %v11093_v58 = vld [vmem:[#allocation17 + $0x1d0] sm:$0xf] }
 0x40f   : > { %4696 = vmatpush.bf16.msra.mxu3 %v11102_v8  ;;  %v3648_v63 = vrot.slane %v3637_v55, 5  ;;  %4797 = vmatpush.bf16.msra.mxu0 %v11374_v33  ;;  %v14117_v14 = vld [vmem:[#allocation17 + $0x1f4] sm:$0xf]  ;;  %v10797_v60 = vld [vmem:[#allocation6 + $0x8] sm:$0xf]  ;;  %v3478_v16 = vrot.slane %v3476_v9, 4 }
 0x410   : > { %4885 = vmatpush.bf16.msra.mxu1 %v11178_v29  ;;  %v3646_v53 = vsel %vm16163_vm14, %v10786_v62, %v3645_v6  ;;  %v3647_v50 = vrot.slane %v3645_v6, 4  ;;  %v11111_v5 = vld [vmem:[#allocation17 + $0x1f8] sm:$0xf0]  ;;  %v14131_v48 = vld [vmem:[#allocation17 + $0x264] sm:$0xf] }
 0x411   : > { %v14042_v35 = vld [vmem:[#allocation6 + $0x28] sm:$0xf0]  ;;  %3658 = vst [vmem:[#allocation6 + $0x20] sm:$0xf] %v3646_v53  ;;  %v11114_v39 = vor.u32 %v14117_v14, %v11111_v5  ;;  %v11167_v57 = vld [vmem:[#allocation17 + $0x268] sm:$0xf0] }
 0x412   : > { %4905 = vmatpush.bf16.msrb.mxu2 %v11234_v23  ;;  %v3649_v7 = vsel %vm16163_vm14, %v3647_v50, %v3648_v63  ;;  %v11170_v38 = vor.u32 %v14131_v48, %v11167_v57  ;;  %v14145_v2 = vld [vmem:[#allocation17 + $0x2d4] sm:$0xf]  ;;  %v11223_v26 = vld [vmem:[#allocation17 + $0x2d8] sm:$0xf0]  ;;  %v11085_v1 = vld [vmem:[#allocation17 + $0x1c0] sm:$0xf]  ;;  %v17002_v44 = vor.u32 %v14042_v35, %v10797_v60 }
 0x413   : > { %3659 = vst [vmem:[#allocation6 + $0x44] sm:$0xf] %v3649_v7  ;;  %4866 = vmatpush.bf16.msrb.mxu0 %v11114_v39  ;;  %v11226_v56 = vor.u32 %v14145_v2, %v11223_v26  ;;  %v14112_v32 = vld [vmem:[#allocation17 + $0x1c4] sm:$0xf0]  ;;  %v14115_v27 = vld [vmem:[#allocation17 + $0x1e4] sm:$0xf] }
 0x414   : > { %4836 = vmatmul.bf16.vlgmr.msra.gmra.mxu2 %v16965_v51  ;;  %v14114_v51 = vld [vmem:[#allocation17 + $0x1d4] sm:$0xf0]  ;;  %v11086_v11 = vor.u32 %v14112_v32, %v11085_v1  ;;  %v11103_v10 = vld [vmem:[#allocation17 + $0x1e8] sm:$0xf0]  ;;  %v14129_v34 = vld [vmem:[#allocation17 + $0x254] sm:$0xf]  ;;  %4886 = vmatpush.bf16.msra.mxu1 %v11170_v38 }
 0x415   : > { %v11094_v15 = vor.u32 %v14114_v51, %v11093_v58  ;;  %v11159_v4 = vld [vmem:[#allocation17 + $0x258] sm:$0xf0]  ;;  %v11106_v0 = vor.u32 %v14115_v27, %v11103_v10  ;;  %v14143_v18 = vld [vmem:[#allocation17 + $0x2c4] sm:$0xf]  ;;  %v11215_v3 = vld [vmem:[#allocation17 + $0x2c8] sm:$0xf0] }
 0x416   : > { %v11162_v45 = vor.u32 %v14129_v34, %v11159_v4  ;;  %v3466_v30 = vld [vmem:[#allocation3 + $0xc] sm:$0x7]  ;;  %4906 = vmatpush.bf16.msrb.mxu2 %v11226_v56  ;;  %v11218_v20 = vor.u32 %v14143_v18, %v11215_v3  ;;  %v14110_v31 = vld [vmem:[#allocation17 + $0x1b4] sm:$0xf0]  ;;  %v14113_v49 = vld [vmem:[#allocation17 + $0x1d4] sm:$0xf] }
 0x417   : > { %4697 = vmatpush.bf16.msra.mxu3 %v11094_v15  ;;  %v3479_v46 = vrot.slane %v3466_v30, 5  ;;  %4867 = vmatpush.bf16.msrb.mxu0 %v11106_v0  ;;  %v11095_v43 = vld [vmem:[#allocation17 + $0x1d8] sm:$0xf0]  ;;  %v14127_v33 = vld [vmem:[#allocation17 + $0x244] sm:$0xf]  ;;  %v3650_v23 = vrot.slane %v3648_v63, 4 }
 0x418   : > { %v11098_v36 = vor.u32 %v14113_v49, %v11095_v43  ;;  %v11151_v29 = vld [vmem:[#allocation17 + $0x248] sm:$0xf0]  ;;  %v10821_v41 = vld [vmem:[#allocation6 + $0x20] sm:$0xf]  ;;  %4887 = vmatpush.bf16.msra.mxu1 %v11162_v45  ;;  %v14141_v9 = vld [vmem:[#allocation17 + $0x2b4] sm:$0xf] }
 0x419   : > { %4817 = vmatmul.bf16.vlgmr.msrb.gmra.mxu1 %v16872_v54  ;;  %4684 = vmatmul.bf16.vlgmr.msrb.gmra.mxu3 %v17002_v44  ;;  %v11077_v54 = vld [vmem:[#allocation17 + $0x1b0] sm:$0xf]  ;;  %v3480_v61 = vsel %vm16163_vm14, %v3478_v16, %v3479_v46  ;;  %v3481_v21 = vrot.slane %v3479_v46, 4  ;;  %v11154_v24 = vor.u32 %v14127_v33, %v11151_v29  ;;  %v11207_v12 = vld [vmem:[#allocation17 + $0x2b8] sm:$0xf0] }
 0x41a   : > { %v11078_v8 = vor.u32 %v14110_v31, %v11077_v54  ;;  %3488 = vst [vmem:[#allocation6 + $0x50] sm:$0xf] %v3480_v61  ;;  %v14045_v55 = vld [vmem:[#allocation6 + $0x40] sm:$0xf0]  ;;  %4907 = vmatpush.bf16.msrb.mxu2 %v11218_v20  ;;  %v11210_v62 = vor.u32 %v14141_v9, %v11207_v12  ;;  %v11069_v6 = vld [vmem:[#allocation17 + $0x1a0] sm:$0xf] }
 0x41b   : > { %4698 = vmatpush.bf16.msra.mxu3 %v11086_v11  ;;  %3489 = vst [vmem:[#allocation6 + $0x74] sm:$0x3] %v3481_v21  ;;  %4868 = vmatpush.bf16.msrb.mxu0 %v11098_v36  ;;  %v14108_v58 = vld [vmem:[#allocation17 + $0x1a4] sm:$0xf0]  ;;  %v14111_v51 = vld [vmem:[#allocation17 + $0x1c4] sm:$0xf]  ;;  %v17010_v60 = vor.u32 %v14045_v55, %v10821_v41 }
 0x41c   : > { %v11087_v14 = vld [vmem:[#allocation17 + $0x1c8] sm:$0xf0]  ;;  %v11070_v63 = vor.u32 %v14108_v58, %v11069_v6  ;;  %v14125_v50 = vld [vmem:[#allocation17 + $0x234] sm:$0xf]  ;;  %v11143_v15 = vld [vmem:[#allocation17 + $0x238] sm:$0xf0]  ;;  %4888 = vmatpush.bf16.msra.mxu1 %v11154_v24 }
 0x41d   : > { %v11090_v53 = vor.u32 %v14111_v51, %v11087_v14  ;;  %v14139_v5 = vld [vmem:[#allocation17 + $0x2a4] sm:$0xf]  ;;  %v11146_v48 = vor.u32 %v14125_v50, %v11143_v15  ;;  %v11199_v35 = vld [vmem:[#allocation17 + $0x2a8] sm:$0xf0]  ;;  %v3638_v39 = vld [vmem:[#allocation3 + $0x14] sm:$0x7] }
 0x41e   : > { %v11061_v57 = vld [vmem:[#allocation17 + $0x190] sm:$0xf]  ;;  %4798 = vmatmul.bf16.vlgmr.msra.gmra.mxu0 %v17010_v60  ;;  %4908 = vmatpush.bf16.msrb.mxu2 %v11210_v62  ;;  %v11202_v7 = vor.u32 %v14139_v5, %v11199_v35  ;;  %v3651_v38 = vrot.slane %v3638_v39, 5  ;;  %v14106_v2 = vld [vmem:[#allocation17 + $0x194] sm:$0xf0] }
 0x41f   : > { %4699 = vmatpush.bf16.msra.mxu3 %v11078_v8  ;;  %v14109_v26 = vld [vmem:[#allocation17 + $0x1b4] sm:$0xf]  ;;  %4869 = vmatpush.bf16.msrb.mxu0 %v11090_v53  ;;  %v11079_v1 = vld [vmem:[#allocation17 + $0x1b8] sm:$0xf0]  ;;  %v14123_v56 = vld [vmem:[#allocation17 + $0x224] sm:$0xf] }
 0x420   : > { %v11135_v32 = vld [vmem:[#allocation17 + $0x228] sm:$0xf0]  ;;  %v3652_v11 = vsel %vm16163_vm14, %v3650_v23, %v3651_v38  ;;  %v3653_v10 = vrot.slane %v3651_v38, 4  ;;  %v11082_v34 = vor.u32 %v14109_v26, %v11079_v1  ;;  %v14137_v4 = vld [vmem:[#allocation17 + $0x294] sm:$0xf]  ;;  %4889 = vmatpush.bf16.msra.mxu1 %v11146_v48 }
 0x421   : > { %v10833_v27 = vld [vmem:[#allocation6 + $0x50] sm:$0xf]  ;;  %3660 = vst [vmem:[#allocation6 + $0x68] sm:$0xf] %v3652_v11  ;;  %v11138_v45 = vor.u32 %v14123_v56, %v11135_v32  ;;  %v11191_v18 = vld [vmem:[#allocation17 + $0x298] sm:$0xf0] }
 0x422   : > { %v14051_v0 = vld [vmem:[#allocation6 + $0x70] sm:$0x30]  ;;  %4909 = vmatpush.bf16.msrb.mxu2 %v11202_v7  ;;  %3661 = vst [vmem:[#allocation6 + $0x8c] sm:$0x3] %v3653_v10  ;;  %v11194_v3 = vor.u32 %v14137_v4, %v11191_v18  ;;  %v11053_v30 = vld [vmem:[#allocation17 + $0x180] sm:$0xf] }
 0x423   : > { %4700 = vmatpush.bf16.msra.mxu3 %v11070_v63  ;;  %v14104_v20 = vld [vmem:[#allocation17 + $0x184] sm:$0xf0]  ;;  %v17016_v16 = vor.u32 %v14051_v0, %v10833_v27  ;;  %4870 = vmatpush.bf16.msrb.mxu0 %v11082_v34  ;;  %v14107_v54 = vld [vmem:[#allocation17 + $0x1a4] sm:$0xf]  ;;  %v11071_v31 = vld [vmem:[#allocation17 + $0x1a8] sm:$0xf0] }
 0x424   : > { %4841 = vmatmul.bf16.gmra.mxu2 %v16981_v42  ;;  %v11062_v42 = vor.u32 %v14106_v2, %v11061_v57  ;;  %v11054_v46 = vor.u32 %v14104_v20, %v11053_v30  ;;  %v14121_v8 = vld [vmem:[#allocation17 + $0x214] sm:$0xf]  ;;  %v11074_v49 = vor.u32 %v14107_v54, %v11071_v31  ;;  %v11127_v43 = vld [vmem:[#allocation17 + $0x218] sm:$0xf0]  ;;  %v14135_v33 = vld [vmem:[#allocation17 + $0x284] sm:$0xf]  ;;  %4890 = vmatpush.bf16.msra.mxu1 %v11138_v45 }
 0x425   : > { %v11183_v61 = vld [vmem:[#allocation17 + $0x288] sm:$0xf0]  ;;  %v11130_v21 = vor.u32 %v14121_v8, %v11127_v43  ;;  %v3490_v36 = vld [vmem:[#allocation3 + $0x4] sm:$0xf]  ;;  %v3491_v29 = vld [vmem:[#allocation3 + $0x8] sm:$0xf] }
 0x426   : > { %v11365_v23 = vld [vmem:[#allocation17 + $0x3f0] sm:$0xf]  ;;  %4910 = vmatpush.bf16.msrb.mxu2 %v11194_v3  ;;  %v11186_v41 = vor.u32 %v14135_v33, %v11183_v61  ;;  %3494 = vst [vmem:[#allocation6 + $0xc] sm:$0xf] %v3490_v36  ;;  %v14182_v24 = vld [vmem:[#allocation17 + $0x3f4] sm:$0xf0] }
 0x427   : > { %4701 = vmatpush.bf16.msra.mxu3 %v11062_v42  ;;  %v14105_v9 = vld [vmem:[#allocation17 + $0x194] sm:$0xf]  ;;  %4871 = vmatpush.bf16.msrb.mxu0 %v11074_v49  ;;  %3495 = vst [vmem:[#allocation6 + $0x30] sm:$0xf] %v3491_v29  ;;  %v11063_v12 = vld [vmem:[#allocation17 + $0x198] sm:$0xf0] }
 0x428   : > { %v14119_v55 = vld [vmem:[#allocation17 + $0x204] sm:$0xf]  ;;  %v10857_v62 = vld [vmem:[#allocation6 + $0x68] sm:$0xf]  ;;  %v11066_v6 = vor.u32 %v14105_v9, %v11063_v12  ;;  %v11119_v58 = vld [vmem:[#allocation17 + $0x208] sm:$0xf0]  ;;  %4891 = vmatpush.bf16.msra.mxu1 %v11130_v21 }
 0x429   : > { %4822 = vmatmul.bf16.gmra.mxu1 %v16914_v59  ;;  %4689 = vmatmul.bf16.gmra.mxu3 %v17016_v16  ;;  %v11366_v59 = vor.u32 %v14182_v24, %v11365_v23  ;;  %v11357_v51 = vld [vmem:[#allocation17 + $0x3e0] sm:$0xf]  ;;  %v14054_v14 = vld [vmem:[#allocation6 + $0x88] sm:$0x30]  ;;  %v11122_v63 = vor.u32 %v14119_v55, %v11119_v58  ;;  %v14180_v53 = vld [vmem:[#allocation17 + $0x3e4] sm:$0xf0] }
 0x42a   : > { %v14103_v50 = vld [vmem:[#allocation17 + $0x184] sm:$0xf]  ;;  %4911 = vmatpush.bf16.msrb.mxu2 %v11186_v41  ;;  %v11358_v15 = vor.u32 %v14180_v53, %v11357_v51  ;;  %v11055_v5 = vld [vmem:[#allocation17 + $0x188] sm:$0xf0]  ;;  %v14197_v48 = vld [vmem:[#allocation17 + $0x474] sm:$0xf]  ;;  %v17020_v26 = vor.u32 %v14054_v14, %v10857_v62 }
 0x42b   : > { %4702 = vmatpush.bf16.msra.mxu3 %v11054_v46  ;;  %v11431_v35 = vld [vmem:[#allocation17 + $0x478] sm:$0xf0]  ;;  %4872 = vmatpush.bf16.msrb.mxu0 %v11066_v6  ;;  %v11058_v39 = vor.u32 %v14103_v50, %v11055_v5  ;;  %v11349_v7 = vld [vmem:[#allocation17 + $0x3d0] sm:$0xf]  ;;  %v14178_v38 = vld [vmem:[#allocation17 + $0x3d4] sm:$0xf0] }
 0x42c   : > { %v11434_v57 = vor.u32 %v14197_v48, %v11431_v35  ;;  %v14181_v2 = vld [vmem:[#allocation17 + $0x3f4] sm:$0xf]  ;;  %v11367_v42 = vld [vmem:[#allocation17 + $0x3f8] sm:$0xf0]  ;;  %v14195_v1 = vld [vmem:[#allocation17 + $0x464] sm:$0xf]  ;;  %4892 = vmatpush.bf16.msra.mxu1 %v11122_v63  ;;  %v11350_v11 = vor.u32 %v14178_v38, %v11349_v7 }
 0x42d   : > { %v11423_v56 = vld [vmem:[#allocation17 + $0x468] sm:$0xf0]  ;;  %v11370_v32 = vor.u32 %v14181_v2, %v11367_v42  ;;  %v11341_v27 = vld [vmem:[#allocation17 + $0x3c0] sm:$0xf]  ;;  %v14176_v10 = vld [vmem:[#allocation17 + $0x3c4] sm:$0xf0] }
 0x42e   : > { %4803 = vmatmul.bf16.gmra.mxu0 %v17020_v26  ;;  %v14179_v34 = vld [vmem:[#allocation17 + $0x3e4] sm:$0xf]  ;;  %v11359_v4 = vld [vmem:[#allocation17 + $0x3e8] sm:$0xf0]  ;;  %v10799_v0 = vld [vmem:[#allocation6 + $0x2c] sm:$0xf0]  ;;  %v11426_v45 = vor.u32 %v14195_v1, %v11423_v56  ;;  %v11342_v31 = vor.u32 %v14176_v10, %v11341_v27 }
 0x42f   : > { %4771 = vmatpush.bf16.msrb.mxu3 %v11366_v59  ;;  %4873 = vmatpush.bf16.msrb.mxu0 %v11058_v39  ;;  %v14193_v18 = vld [vmem:[#allocation17 + $0x454] sm:$0xf]  ;;  %v3492_v3 = vld [vmem:[#allocation3 + $0xc] sm:$0xf]  ;;  %v11362_v30 = vor.u32 %v14179_v34, %v11359_v4  ;;  %v11415_v20 = vld [vmem:[#allocation17 + $0x458] sm:$0xf0] }
 0x430   : > { %4961 = vmatpush.bf16.msrb.mxu1 %v11434_v57  ;;  %3496 = vst [vmem:[#allocation6 + $0x54] sm:$0xf] %v3492_v3  ;;  %v14177_v46 = vld [vmem:[#allocation17 + $0x3d4] sm:$0xf]  ;;  %v14038_v54 = vld [vmem:[#allocation6 + $0xc] sm:$0xf]  ;;  %v11418_v43 = vor.u32 %v14193_v18, %v11415_v20 }
 0x431   : > { %v11351_v8 = vld [vmem:[#allocation17 + $0x3d8] sm:$0xf0]  ;;  %v10802_v49 = vor.u32 %v14038_v54, %v10799_v0  ;;  %v11333_v33 = vld [vmem:[#allocation17 + $0x3b0] sm:$0xf]  ;;  %v14174_v61 = vld [vmem:[#allocation17 + $0x3b4] sm:$0xf0] }
 0x432   : > { %v11354_v21 = vor.u32 %v14177_v46, %v11351_v8  ;;  %v14191_v36 = vld [vmem:[#allocation17 + $0x444] sm:$0xf]  ;;  %v11407_v29 = vld [vmem:[#allocation17 + $0x448] sm:$0xf0]  ;;  %v11334_v24 = vor.u32 %v14174_v61, %v11333_v33  ;;  %v11325_v59 = vld [vmem:[#allocation17 + $0x3a0] sm:$0xf] }
 0x433   : > { %4772 = vmatpush.bf16.msrb.mxu3 %v11358_v15  ;;  %4942 = vmatpush.bf16.msra.mxu0 %v11370_v32  ;;  %v14175_v23 = vld [vmem:[#allocation17 + $0x3c4] sm:$0xf]  ;;  %v11343_v41 = vld [vmem:[#allocation17 + $0x3c8] sm:$0xf0]  ;;  %v11410_v9 = vor.u32 %v14191_v36, %v11407_v29  ;;  %v14172_v12 = vld [vmem:[#allocation17 + $0x3a4] sm:$0xf0] }
 0x434   : > { %4912 = vmatmul.bf16.vlgmr.msrb.gmra.mxu2 %v16940_v47  ;;  %v3493_v47 = vld [vmem:[#allocation3 + $0x10] sm:$0x3]  ;;  %4962 = vmatpush.bf16.msrb.mxu1 %v11426_v45  ;;  %v11346_v55 = vor.u32 %v14175_v23, %v11343_v41  ;;  %v14189_v62 = vld [vmem:[#allocation17 + $0x434] sm:$0xf]  ;;  %v11399_v6 = vld [vmem:[#allocation17 + $0x438] sm:$0xf0]  ;;  %v11326_v63 = vor.u32 %v14172_v12, %v11325_v59 }
 0x435   : > { %3497 = vst [vmem:[#allocation6 + $0x78] sm:$0x3] %v3493_v47  ;;  %v11317_v58 = vld [vmem:[#allocation17 + $0x390] sm:$0xf]  ;;  %v14173_v51 = vld [vmem:[#allocation17 + $0x3b4] sm:$0xf]  ;;  %v11402_v48 = vor.u32 %v14189_v62, %v11399_v6 }
 0x436   : > { %v3584_v14 = vld [vmem:[#allocation3 + $0x8] sm:$0xf]  ;;  %v3585_v53 = vld [vmem:[#allocation3 + $0xc] sm:$0xf]  ;;  %v17025_v50 = vld [vmem:[#allocation3 + $0x10] sm:$0xf] }
 0x437   : > { %4773 = vmatpush.bf16.msrb.mxu3 %v11350_v11  ;;  %4943 = vmatpush.bf16.msra.mxu0 %v11362_v30  ;;  %v3589_v15 = vshrl.u32 %v3584_v14, 16  ;;  %v3592_v5 = vshll.u32 %v3584_v14, 16  ;;  %v14170_v35 = vld [vmem:[#allocation17 + $0x394] sm:$0xf0]  ;;  %v3598_v39 = vshll.u32 %v3585_v53, 16  ;;  %v3602_v57 = vshrl.u32 %v3585_v53, 16 }
 0x438   : > { %4963 = vmatpush.bf16.msrb.mxu1 %v11418_v43  ;;  %v3608_v7 = vshll.u32 %v17025_v50, 16  ;;  %v14187_v2 = vld [vmem:[#allocation17 + $0x424] sm:$0xf]  ;;  %v11391_v42 = vld [vmem:[#allocation17 + $0x428] sm:$0xf0]  ;;  %v11318_v4 = vor.u32 %v14170_v35, %v11317_v58  ;;  %v3612_v59 = vshrl.u32 %v17025_v50, 16 }
 0x439   : > { %4893 = vmatmul.bf16.vlgmr.msra.gmra.mxu1 %v16960_v37  ;;  %4703 = vmatmul.bf16.vlgmr.msra.gmra.mxu3 %v10802_v49  ;;  %v11335_v37 = vld [vmem:[#allocation17 + $0x3b8] sm:$0xf0]  ;;  %v3591_v1 = vrot.slane %v3589_v15, 4  ;;  %v3594_v56 = vrot.slane %v3592_v5, 5  ;;  %v14171_v32 = vld [vmem:[#allocation17 + $0x3a4] sm:$0xf]  ;;  %v11394_v30 = vor.u32 %v14187_v2, %v11391_v42 }
 0x43a   : > { %v11338_v38 = vor.u32 %v14173_v51, %v11335_v37  ;;  %v11327_v27 = vld [vmem:[#allocation17 + $0x3a8] sm:$0xf0]  ;;  %v3600_v11 = vrot.slane %v3598_v39, 5  ;;  %v3604_v10 = vrot.slane %v3602_v57, 4  ;;  %v11309_v0 = vld [vmem:[#allocation17 + $0x380] sm:$0xf] }
 0x43b   : > { %4774 = vmatpush.bf16.msrb.mxu3 %v11342_v31  ;;  %4944 = vmatpush.bf16.msra.mxu0 %v11354_v21  ;;  %v14168_v45 = vld [vmem:[#allocation17 + $0x384] sm:$0xf0]  ;;  %v3595_v18 = vor.u32 %v3594_v56, %v3591_v1  ;;  %v14047_v3 = vld [vmem:[#allocation6 + $0x54] sm:$0xf]  ;;  %v14185_v20 = vld [vmem:[#allocation17 + $0x414] sm:$0xf] }
 0x43c   : > { %4964 = vmatpush.bf16.msrb.mxu1 %v11410_v9  ;;  %v10835_v34 = vld [vmem:[#allocation6 + $0x74] sm:$0x30]  ;;  %v11383_v47 = vld [vmem:[#allocation17 + $0x418] sm:$0xf0]  ;;  %v3605_v46 = vor.u32 %v3604_v10, %v3600_v11  ;;  %v3610_v54 = vrot.slane %v3608_v7, 5  ;;  %v11310_v33 = vor.u32 %v14168_v45, %v11309_v0  ;;  %v3614_v14 = vrot.slane %v3612_v59, 4 }
 0x43d   : > { %v3596_v31 = vrot.slane %v3595_v18, 4  ;;  %v14101_v8 = vld [vmem:[#allocation17 + $0x174] sm:$0xf]  ;;  %v11047_v43 = vld [vmem:[#allocation17 + $0x178] sm:$0xf0]  ;;  %v10838_v36 = vor.u32 %v14047_v3, %v10835_v34  ;;  %v11386_v29 = vor.u32 %v14185_v20, %v11383_v47 }
 0x43e   : > { %4874 = vmatmul.bf16.vlgmr.msrb.gmra.mxu0 %v10802_v49  ;;  %v3606_v49 = vrot.slane %v3605_v46, 4  ;;  %v14169_v61 = vld [vmem:[#allocation17 + $0x394] sm:$0xf]  ;;  %v11319_v21 = vld [vmem:[#allocation17 + $0x398] sm:$0xf0]  ;;  %v3615_v5 = vor.u32 %v3614_v14, %v3610_v54 }
 0x43f   : > { %4775 = vmatpush.bf16.msrb.mxu3 %v11334_v24  ;;  %4945 = vmatpush.bf16.msra.mxu0 %v11346_v55  ;;  %v3601_v23 = vsel %vm15898_vm5, %v3596_v31, %v3600_v11  ;;  %v14183_v41 = vld [vmem:[#allocation17 + $0x404] sm:$0xf]  ;;  %v11375_v24 = vld [vmem:[#allocation17 + $0x408] sm:$0xf0]  ;;  %v3587_v9 = vld [vmem:[#allocation3 + $0x14] sm:$0x7]  ;;  %v11050_v55 = vor.u32 %v14101_v8, %v11047_v43  ;;  %v11322_v51 = vor.u32 %v14169_v61, %v11319_v21 }
 0x440   : > { %4965 = vmatpush.bf16.msrb.mxu1 %v11402_v48  ;;  %v3611_v12 = vsel %vm15898_vm5, %v3606_v49, %v3610_v54  ;;  %3631 = vst [vmem:[#allocation6 + $0x1c] sm:$0xf] %v3601_v23  ;;  %v14099_v62 = vld [vmem:[#allocation17 + $0x164] sm:$0xf]  ;;  %v3618_v6 = vshll.u32 %v3587_v9, 16  ;;  %v3622_v58 = vshrl.u32 %v3587_v9, 16  ;;  %v11378_v48 = vor.u32 %v14183_v41, %v11375_v24 }
 0x441   : > { %3632 = vst [vmem:[#allocation6 + $0x40] sm:$0xf] %v3611_v12  ;;  %v11039_v37 = vld [vmem:[#allocation17 + $0x168] sm:$0xf0]  ;;  %v11031_v7 = vld [vmem:[#allocation17 + $0x158] sm:$0xf0] }
 0x442   : > { %v11311_v53 = vld [vmem:[#allocation17 + $0x388] sm:$0xf0]  ;;  %v3620_v50 = vrot.slane %v3618_v6, 5  ;;  %v3624_v15 = vrot.slane %v3622_v58, 4  ;;  %v11042_v35 = vor.u32 %v14099_v62, %v11039_v37  ;;  %v14095_v56 = vld [vmem:[#allocation17 + $0x144] sm:$0xf] }
 0x443   : > { %4776 = vmatpush.bf16.msrb.mxu3 %v11326_v63  ;;  %4946 = vmatpush.bf16.msra.mxu0 %v11338_v38  ;;  %v14167_v63 = vld [vmem:[#allocation17 + $0x384] sm:$0xf]  ;;  %v3616_v38 = vrot.slane %v3615_v5, 4  ;;  %v14093_v10 = vld [vmem:[#allocation17 + $0x134] sm:$0xf] }
 0x444   : > { %4917 = vmatmul.bf16.gmra.mxu2 %v16979_v22  ;;  %v11330_v22 = vor.u32 %v14171_v32, %v11327_v27  ;;  %4966 = vmatpush.bf16.msrb.mxu1 %v11394_v30  ;;  %v3625_v39 = vor.u32 %v3624_v15, %v3620_v50  ;;  %v11314_v57 = vor.u32 %v14167_v63, %v11311_v53  ;;  %v11023_v32 = vld [vmem:[#allocation17 + $0x148] sm:$0xf0]  ;;  %v11015_v34 = vld [vmem:[#allocation17 + $0x138] sm:$0xf0]  ;;  %v14091_v3 = vld [vmem:[#allocation17 + $0x124] sm:$0xf] }
 0x445   : > { %v3621_v42 = vsel %vm15898_vm5, %v3616_v38, %v3620_v50  ;;  %v11026_v27 = vor.u32 %v14095_v56, %v11023_v32  ;;  %v11018_v18 = vor.u32 %v14093_v10, %v11015_v34  ;;  %v11007_v30 = vld [vmem:[#allocation17 + $0x128] sm:$0xf0]  ;;  %v14089_v47 = vld [vmem:[#allocation17 + $0x114] sm:$0xf]  ;;  %v10999_v46 = vld [vmem:[#allocation17 + $0x118] sm:$0xf0] }
 0x446   : > { %v3626_v2 = vrot.slane %v3625_v39, 4  ;;  %3633 = vst [vmem:[#allocation6 + $0x64] sm:$0xf] %v3621_v42  ;;  %v11010_v20 = vor.u32 %v14091_v3, %v11007_v30  ;;  %v11002_v54 = vor.u32 %v14089_v47, %v10999_v46  ;;  %v14087_v31 = vld [vmem:[#allocation17 + $0x104] sm:$0xf] }
 0x447   : > { %4777 = vmatpush.bf16.msrb.mxu3 %v11318_v4  ;;  %4947 = vmatpush.bf16.msra.mxu0 %v11330_v22  ;;  %v17037_v4 = vpop.f32.mrf.mxu3  ;;  %v14040_v0 = vld [vmem:[#allocation6 + $0x1c] sm:$0xf]  ;;  %v10991_v8 = vld [vmem:[#allocation17 + $0x108] sm:$0xf0]  ;;  %v11287_v59 = vld [vmem:[#allocation17 + $0x358] sm:$0xf0] }
 0x448   : > { %4967 = vmatpush.bf16.msrb.mxu1 %v11386_v29  ;;  %3634 = vst [vmem:[#allocation6 + $0x88] sm:$0x3] %v3626_v2  ;;  %v10815_v11 = vld [vmem:[#allocation6 + $0x3c] sm:$0xf0]  ;;  %v14165_v43 = vld [vmem:[#allocation17 + $0x374] sm:$0xf]  ;;  %v10994_v49 = vor.u32 %v14087_v31, %v10991_v8 }
 0x449   : > { %4898 = vmatmul.bf16.gmra.mxu1 %v16994_v17  ;;  %4708 = vmatmul.bf16.gmra.mxu3 %v10838_v36  ;;  %v14097_v17 = vld [vmem:[#allocation17 + $0x154] sm:$0xf]  ;;  %v10818_v45 = vor.u32 %v14040_v0, %v10815_v11  ;;  %v11295_v29 = vld [vmem:[#allocation17 + $0x368] sm:$0xf0]  ;;  %v14155_v63 = vld [vmem:[#allocation17 + $0x324] sm:$0xf] }
 0x44a   : > { %v11034_v1 = vor.u32 %v14097_v17, %v11031_v7  ;;  %v14161_v9 = vld [vmem:[#allocation17 + $0x354] sm:$0xf]  ;;  %v11279_v62 = vld [vmem:[#allocation17 + $0x348] sm:$0xf0]  ;;  %v11255_v15 = vld [vmem:[#allocation17 + $0x318] sm:$0xf0] }
 0x44b   : > { %4778 = vmatpush.bf16.msrb.mxu3 %v11310_v33  ;;  %4948 = vmatpush.bf16.msra.mxu0 %v11322_v51  ;;  %v11303_v33 = vld [vmem:[#allocation17 + $0x378] sm:$0xf0]  ;;  %v11290_v12 = vor.u32 %v14161_v9, %v11287_v59  ;;  %v14157_v58 = vld [vmem:[#allocation17 + $0x334] sm:$0xf]  ;;  %v11247_v39 = vld [vmem:[#allocation17 + $0x308] sm:$0xf0] }
 0x44c   : > { %4968 = vmatpush.bf16.msrb.mxu1 %v11378_v48  ;;  %v11306_v21 = vor.u32 %v14165_v43, %v11303_v33  ;;  %v11271_v51 = vld [vmem:[#allocation17 + $0x338] sm:$0xf0]  ;;  %v14153_v50 = vld [vmem:[#allocation17 + $0x314] sm:$0xf] }
 0x44d   : > { %v14049_v61 = vld [vmem:[#allocation6 + $0x64] sm:$0xf]  ;;  %v11274_v14 = vor.u32 %v14157_v58, %v11271_v51  ;;  %v11258_v48 = vor.u32 %v14153_v50, %v11255_v15 }
 0x44e   : > { %4879 = vmatmul.bf16.gmra.mxu0 %v10838_v36  ;;  %v14163_v36 = vld [vmem:[#allocation17 + $0x364] sm:$0xf] }
 0x44f   : > { %4847 = vmatpush.bf16.msra.mxu3 %v11050_v55  ;;  %4949 = vmatpush.bf16.msra.mxu0 %v11314_v57  ;;  %v17040_v22 = vpop.f32.mrf.mxu3  ;;  %v11298_v24 = vor.u32 %v14163_v36, %v11295_v29  ;;  %v14159_v55 = vld [vmem:[#allocation17 + $0x344] sm:$0xf] }
 0x450   : > { %v11282_v6 = vor.u32 %v14159_v55, %v11279_v62 }
 0x453   : > { %4848 = vmatpush.bf16.msra.mxu3 %v11042_v35  ;;  %v14151_v35 = vld [vmem:[#allocation17 + $0x304] sm:$0xf] }
 0x454   : > { %v11250_v57 = vor.u32 %v14151_v35, %v11247_v39 }
 0x457   : > { %4849 = vmatpush.bf16.msra.mxu3 %v11034_v1 }
 0x459   : > { %4969 = vmatmul.bf16.vlgmr.msrb.gmra.mxu1 %v17010_v60  ;;  %4779 = vmatmul.bf16.vlgmr.msrb.gmra.mxu3 %v10818_v45  ;;  %v10851_v60 = vld [vmem:[#allocation6 + $0x84] sm:$0x30] }
 0x45a   : > { %v10854_v23 = vor.u32 %v14049_v61, %v10851_v60 }
 0x45b   : > { %4850 = vmatpush.bf16.msra.mxu3 %v11026_v27 }
 0x45e   : > { %4950 = vmatmul.bf16.vlgmr.msra.gmra.mxu0 %v10818_v45 }
 0x45f   : > { %4851 = vmatpush.bf16.msra.mxu3 %v11018_v18 }
 0x463   : > { %4852 = vmatpush.bf16.msra.mxu3 %v11010_v20 }
 0x467   : > { %4853 = vmatpush.bf16.msra.mxu3 %v11002_v54  ;;  %v4652_v41 = vpop.f32.mrf.mxu3  ;;  %v4742_v32 = vpop.f32.mrf.mxu1 }
 0x469   : > { %4974 = vmatmul.bf16.gmra.mxu1 %v17020_v26  ;;  %4784 = vmatmul.bf16.gmra.mxu3 %v10854_v23  ;;  %v11263_v26 = vld [vmem:[#allocation17 + $0x328] sm:$0xf0] }
 0x46a   : > { %v11266_v53 = vor.u32 %v14155_v63, %v11263_v26  ;;  %v17060_v63 = vld [vmem:[#allocation20] sm:$0x3] }
 0x46b   : > { %4854 = vmatpush.bf16.msra.mxu3 %v10994_v49 }
 0x46e   : > { %4955 = vmatmul.bf16.gmra.mxu0 %v10854_v23 }
 0x46f   : > { %4923 = vmatpush.bf16.msrb.mxu3 %v11306_v21  ;;  %v17043_v37 = vpop.f32.mrf.mxu3  ;;  %v4744_v0 = vpop.f32.mrf.mxu1 }
 0x471   : > { %v4723_v56 = vpop.f32.mrf.mxu0 }
 0x473   : > { %4924 = vmatpush.bf16.msrb.mxu3 %v11298_v24 }
 0x477   : > { %4925 = vmatpush.bf16.msrb.mxu3 %v11290_v12 }
 0x479   : > { %4855 = vmatmul.bf16.vlgmr.msra.gmra.mxu3 %v17002_v44  ;;  %v4725_v11 = vpop.f32.mrf.mxu0 }
 0x47b   : > { %4926 = vmatpush.bf16.msrb.mxu3 %v11282_v6  ;;  %v17057_v6 = vld [vmem:[#allocation19] sm:$0x3] }
 0x47c   : > { %v4666_v5 = vpop.f32.mrf.mxu3 }
 0x47d   : > { %v4667_v44 = vadd.f32 %v4666_v5, %v17037_v4  ;;  %v4761_v4 = vpop.f32.mrf.mxu2 }
 0x47f   : > { %4927 = vmatpush.bf16.msrb.mxu3 %v11274_v14 }
 0x483   : > { %4928 = vmatpush.bf16.msrb.mxu3 %v11266_v53 }
 0x484   : > { %v4668_v17 = vpop.f32.mrf.mxu3 }
 0x485   : > { %v4669_v49 = vadd.f32 %v4668_v17, %v17040_v22  ;;  %v4982_v22 = vperm.slane %v17057_v6, 0 }
 0x486   : > { %v4747_v18 = vpop.f32.mrf.mxu1 }
 0x487   : > { %4929 = vmatpush.bf16.msrb.mxu3 %v11258_v48  ;;  %v4996_v48 = vperm.slane %v17060_v63, 0 }
 0x489   : > { %4860 = vmatmul.bf16.gmra.mxu3 %v17016_v16 }
 0x48b   : > { %4930 = vmatpush.bf16.msrb.mxu3 %v11250_v57  ;;  %v4728_v45 = vpop.f32.mrf.mxu0 }
 0x48c   : > { %v4671_v7 = vpop.f32.mrf.mxu3 }
 0x48d   : > { %v4672_v38 = vadd.f32 %v4671_v7, %v4652_v41 }
 0x493   : > { %v4730_v20 = vpop.f32.mrf.mxu0 }
 0x494   : > { %v4673_v2 = vpop.f32.mrf.mxu3 }
 0x495   : > { %v4674_v26 = vadd.f32 %v4673_v2, %v17043_v37 }
 0x499   : > { %4931 = vmatmul.bf16.vlgmr.msrb.gmra.mxu3 %v16923_v19  ;;  %v4749_v19 = vpop.f32.mrf.mxu1 }
 0x49b   : > { %v4799_v46 = vpop.f32.mrf.mxu0 }
 0x49c   : > { %v4685_v42 = vpop.f32.mrf.mxu3 }
 0x49d   : > { %v4686_v1 = vadd.f32 %v4685_v42, %v4667_v44 }
 0x4a1   : > { %v17050_v54 = vpop.f32.mrf.mxu1 }
 0x4a3   : > { %v4801_v33 = vpop.f32.mrf.mxu0 }
 0x4a4   : > { %v4687_v27 = vpop.f32.mrf.mxu3 }
 0x4a5   : > { %v4688_v36 = vadd.f32 %v4687_v27, %v4669_v49  ;;  %v11608_v49 = vld [vmem:[#allocation22 + $0xc0] sm:$0xf] }
 0x4a9   : > { %4936 = vmatmul.bf16.gmra.mxu3 %v16974_v25  ;;  %v4763_v25 = vpop.f32.mrf.mxu2  ;;  %v17053_v60 = vpop.f32.mrf.mxu1 }
 0x4ab   : > { %v4804_v59 = vpop.f32.mrf.mxu0 }
 0x4ac   : > { %v4690_v10 = vpop.f32.mrf.mxu3 }
 0x4ad   : > { %v4691_v34 = vadd.f32 %v4690_v10, %v4672_v38 }
 0x4b1   : > { %v4766_v41 = vpop.f32.mrf.mxu2  ;;  %v17055_v62 = vpop.f32.mrf.mxu1 }
 0x4b3   : > { %v4806_v39 = vpop.f32.mrf.mxu0 }
 0x4b4   : > { %v4692_v16 = vpop.f32.mrf.mxu3 }
 0x4b5   : > { %v4693_v15 = vadd.f32 %v4692_v16, %v4674_v26 }
 0x4b9   : > { %v4768_v14 = vpop.f32.mrf.mxu2  ;;  %v17064_v38 = vpop.f32.mrf.mxu1 }
 0x4bb   : > { %v17070_v16 = vpop.f32.mrf.mxu0 }
 0x4bc   : > { %v4704_v3 = vpop.f32.mrf.mxu3 }
 0x4bd   : > { %v4705_v30 = vadd.f32 %v4704_v3, %v4686_v1 }
 0x4bf   : > { %v4724_v61 = vadd.f32 %v4723_v56, %v4705_v30 }
 0x4c1   : > { %v4743_v23 = vadd.f32 %v4742_v32, %v4724_v61  ;;  %v17066_v27 = vpop.f32.mrf.mxu2  ;;  %v14243_v61 = vld [vmem:[#allocation22 + $0xcc] sm:$0xf0] }
 0x4c3   : > { %v4762_v9 = vadd.f32 %v4761_v4, %v4743_v23  ;;  %v14275_v23 = vld [vmem:[#allocation22 + $0x1cc] sm:$0xf0] }
 0x4c4   : > { %v4706_v47 = vpop.f32.mrf.mxu3 }
 0x4c5   : > { %v4707_v29 = vadd.f32 %v4706_v47, %v4688_v36 }
 0x4c7   : > { %v4726_v24 = vadd.f32 %v4725_v11, %v4707_v29  ;;  %v11736_v29 = vld [vmem:[#allocation22 + $0x1c0] sm:$0xf] }
 0x4c9   : > { %v4745_v51 = vadd.f32 %v4744_v0, %v4726_v24  ;;  %v17074_v4 = vpop.f32.mrf.mxu2  ;;  %v11609_v24 = vor.u32 %v14243_v61, %v11608_v49 }
 0x4cb   : > { %v4764_v53 = vadd.f32 %v4763_v25, %v4745_v51 }
 0x4cc   : > { %v4709_v31 = vpop.f32.mrf.mxu3 }
 0x4cd   : > { %v4710_v8 = vadd.f32 %v4709_v31, %v4691_v34  ;;  %v11624_v31 = vld [vmem:[#allocation22 + $0xe0] sm:$0xf] }
 0x4cf   : > { %v4729_v43 = vadd.f32 %v4728_v45, %v4710_v8  ;;  %v14247_v8 = vld [vmem:[#allocation22 + $0xec] sm:$0xf0] }
 0x4d0   : > { %v11625_v25 = vor.u32 %v14247_v8, %v11624_v31  ;;  %v14339_v31 = vld [vmem:[#allocation22 + $0x3cc] sm:$0xf0]  ;;  %v4838_v8 = vadd.f32 %v17066_v27, %v17050_v54 }
 0x4d1   : > { %v4748_v7 = vadd.f32 %v4747_v18, %v4729_v43  ;;  %v17072_v18 = vpop.f32.mrf.mxu1  ;;  %v11752_v43 = vld [vmem:[#allocation22 + $0x1e0] sm:$0xf] }
 0x4d2   : > { %8760 = vmatpush.bf16.msra.mxu2 %v11625_v25 }
 0x4d3   : > { %v4767_v32 = vadd.f32 %v4766_v41, %v4748_v7  ;;  %v17076_v41 = vpop.f32.mrf.mxu0 }
 0x4d4   : > { %v4711_v21 = vpop.f32.mrf.mxu3 }
 0x4d5   : > { %v4712_v57 = vadd.f32 %v4711_v21, %v4693_v15  ;;  %v11592_v15 = vld [vmem:[#allocation22 + $0xa0] sm:$0xf] }
 0x4d6   : > { %8761 = vmatpush.bf16.msra.mxu2 %v11609_v24 }
 0x4d7   : > { %v4731_v1 = vadd.f32 %v4730_v20, %v4712_v57  ;;  %v11880_v57 = vld [vmem:[#allocation22 + $0x2e0] sm:$0xf] }
 0x4d9   : > { %v4750_v45 = vadd.f32 %v4749_v19, %v4731_v1  ;;  %v14343_v1 = vld [vmem:[#allocation22 + $0x3ec] sm:$0xf0] }
 0x4db   : > { %v4769_v3 = vadd.f32 %v4768_v14, %v4750_v45  ;;  %v17082_v26 = vpop.f32.mrf.mxu0 }
 0x4dc   : > { %v4780_v12 = vpop.f32.mrf.mxu3 }
 0x4dd   : > { %v4781_v55 = vadd.f32 %v4780_v12, %v4762_v9  ;;  %v17078_v12 = vpop.f32.mrf.mxu1 }
 0x4df   : > { %v4800_v58 = vadd.f32 %v4799_v46, %v4781_v55 }
 0x4e1   : > { %v4986_v5 = vmul.f32 %v4982_v22, %v4800_v58 }
 0x4e3   : > { %v5000_v44 = vadd.f32 %v4996_v48, %v4986_v5  ;;  %v14239_v5 = vld [vmem:[#allocation22 + $0xac] sm:$0xf0]  ;;  %v17090_v25 = vpop.f32.mrf.mxu0 }
 0x4e4   : > { %v4782_v50 = vpop.f32.mrf.mxu3 }
 0x4e5   : > { %v4783_v35 = vadd.f32 %v4782_v50, %v4764_v53  ;;  %v5008_v2 = vmax.f32 %v5000_v44, 0.0  ;;  %v17084_v50 = vpop.f32.mrf.mxu1 }
 0x4e7   : > { %v4802_v17 = vadd.f32 %v4801_v33, %v4783_v35  ;;  %v14279_v33 = vld [vmem:[#allocation22 + $0x1ec] sm:$0xf0]  ;;  %v11593_v35 = vor.u32 %v14239_v5, %v11592_v15 }
 0x4e8   : > { %v11753_v36 = vor.u32 %v14279_v33, %v11752_v43  ;;  %v14231_v15 = vld [vmem:[#allocation22 + $0x6c] sm:$0xf0] }
 0x4e9   : > { %v4988_v42 = vmul.f32 %v4982_v22, %v4802_v17  ;;  %v14311_v17 = vld [vmem:[#allocation22 + $0x2ec] sm:$0xf0]  ;;  %8762 = vmatpush.bf16.msra.mxu2 %v11593_v35 }
 0x4ea   : > { %8774 = vmatpush.bf16.msra.mxu3 %v11753_v36  ;;  %v11881_v44 = vor.u32 %v14311_v17, %v11880_v57  ;;  %v4840_v36 = vadd.f32 %v17074_v4, %v17053_v60  ;;  %v17105_v60 = vperm.slane %v17060_v63, 1  ;;  %v11688_v4 = vld [vmem:[#allocation22 + $0x160] sm:$0xf]  ;;  %v14303_v57 = vld [vmem:[#allocation22 + $0x2ac] sm:$0xf0] }
 0x4eb   : > { %v5002_v56 = vadd.f32 %v4996_v48, %v4988_v42  ;;  %v12008_v42 = vld [vmem:[#allocation22 + $0x3e0] sm:$0xf]  ;;  %v4951_v27 = vpop.f32.mrf.mxu0 }
 0x4ec   : > { %v4785_v37 = vpop.f32.mrf.mxu3  ;;  %8788 = vmatpush.bf16.msrb.mxu0 %v11881_v44  ;;  %v11976_v17 = vld [vmem:[#allocation22 + $0x3a0] sm:$0xf]  ;;  %v14335_v44 = vld [vmem:[#allocation22 + $0x3ac] sm:$0xf0] }
 0x4ed   : > { %v5010_v11 = vmax.f32 %v5002_v56, 0.0  ;;  %v4786_v10 = vadd.f32 %v4785_v37, %v4767_v32  ;;  %v11576_v56 = vld [vmem:[#allocation22 + $0x80] sm:$0xf]  ;;  %v12009_v37 = vor.u32 %v14343_v1, %v12008_v42  ;;  %v17092_v49 = vpop.f32.mrf.mxu1  ;;  %v11977_v63 = vor.u32 %v14335_v44, %v11976_v17 }
 0x4ee   : > { %v11544_v42 = vld [vmem:[#allocation22 + $0x40] sm:$0xf] }
 0x4ef   : > { %v17068_v34 = vmax.f32 %v5008_v2, %v5010_v11  ;;  %v4805_v0 = vadd.f32 %v4804_v59, %v4786_v10  ;;  %v11737_v59 = vor.u32 %v14275_v23, %v11736_v29  ;;  %v14235_v2 = vld [vmem:[#allocation22 + $0x8c] sm:$0xf0]  ;;  %v11704_v11 = vld [vmem:[#allocation22 + $0x180] sm:$0xf]  ;;  %8802 = vmatpush.bf16.msra.mxu1 %v12009_v37 }
 0x4f0   : > { %v14267_v10 = vld [vmem:[#allocation22 + $0x18c] sm:$0xf0]  ;;  %v11672_v37 = vld [vmem:[#allocation22 + $0x140] sm:$0xf] }
 0x4f1   : > { %v4990_v47 = vmul.f32 %v4982_v22, %v4805_v0  ;;  %8775 = vmatpush.bf16.msra.mxu3 %v11737_v59  ;;  %v11577_v0 = vor.u32 %v14235_v2, %v11576_v56  ;;  %v11705_v45 = vor.u32 %v14267_v10, %v11704_v11  ;;  %v14259_v2 = vld [vmem:[#allocation22 + $0x14c] sm:$0xf0]  ;;  %v11832_v11 = vld [vmem:[#allocation22 + $0x280] sm:$0xf] }
 0x4f3   : > { %v5004_v21 = vadd.f32 %v4996_v48, %v4990_v47  ;;  %v11992_v47 = vld [vmem:[#allocation22 + $0x3c0] sm:$0xf]  ;;  %8763 = vmatpush.bf16.msra.mxu2 %v11577_v0  ;;  %v11673_v0 = vor.u32 %v14259_v2, %v11672_v37 }
 0x4f4   : > { %v4787_v30 = vpop.f32.mrf.mxu3  ;;  %v11993_v43 = vor.u32 %v14339_v31, %v11992_v47 }
 0x4f5   : > { %v4788_v20 = vadd.f32 %v4787_v30, %v4769_v3  ;;  %v5012_v58 = vmax.f32 %v5004_v21, 0.0  ;;  %v11864_v3 = vld [vmem:[#allocation22 + $0x2c0] sm:$0xf]  ;;  %v14307_v30 = vld [vmem:[#allocation22 + $0x2cc] sm:$0xf0]  ;;  %v4970_v23 = vpop.f32.mrf.mxu1 }
 0x4f6   : > { %8803 = vmatpush.bf16.msra.mxu1 %v11993_v43  ;;  %v14223_v43 = vld [vmem:[#allocation22 + $0x2c] sm:$0xf0] }
 0x4f7   : > { %v4807_v46 = vadd.f32 %v4806_v39, %v4788_v20  ;;  %v14271_v39 = vld [vmem:[#allocation22 + $0x1ac] sm:$0xf0] }
 0x4f9   : > { %v4992_v19 = vmul.f32 %v4982_v22, %v4807_v46  ;;  %v4842_v22 = vpop.f32.mrf.mxu2  ;;  %v11865_v46 = vor.u32 %v14307_v30, %v11864_v3  ;;  %v11960_v3 = vld [vmem:[#allocation22 + $0x380] sm:$0xf]  ;;  %v14331_v30 = vld [vmem:[#allocation22 + $0x38c] sm:$0xf0] }
 0x4fa   : > { %8804 = vmatpush.bf16.msra.mxu1 %v11977_v63  ;;  %v11961_v31 = vor.u32 %v14331_v30, %v11960_v3  ;;  %v12408_v30 = vld [vmem:[#allocation22 + $0x700] sm:$0xf] }
 0x4fb   : > { %v5006_v9 = vadd.f32 %v4996_v48, %v4992_v19  ;;  %v11720_v48 = vld [vmem:[#allocation22 + $0x1a0] sm:$0xf]  ;;  %8789 = vmatpush.bf16.msrb.mxu0 %v11865_v46 }
 0x4fc   : > { %v4856_v55 = vpop.f32.mrf.mxu3  ;;  %v11721_v7 = vor.u32 %v14271_v39, %v11720_v48  ;;  %v17102_v48 = vperm.slane %v17057_v6, 1  ;;  %v14227_v6 = vld [vmem:[#allocation22 + $0x4c] sm:$0xf0] }
 0x4fd   : > { %v5014_v51 = vmax.f32 %v5006_v9, 0.0  ;;  %v4857_v33 = vadd.f32 %v4856_v55, %v4838_v8  ;;  %v4843_v55 = vadd.f32 %v4842_v22, %v17055_v62  ;;  %v11848_v22 = vld [vmem:[#allocation22 + $0x2a0] sm:$0xf]  ;;  %v11545_v56 = vor.u32 %v14227_v6, %v11544_v42  ;;  %v14375_v42 = vld [vmem:[#allocation22 + $0x4ec] sm:$0xf0] }
 0x4fe   : > { %8776 = vmatpush.bf16.msra.mxu3 %v11721_v7  ;;  %v11849_v7 = vor.u32 %v14303_v57, %v11848_v22  ;;  %v11528_v8 = vld [vmem:[#allocation22 + $0x20] sm:$0xf]  ;;  %8805 = vmatpush.bf16.msra.mxu1 %v11961_v31  ;;  %v14323_v22 = vld [vmem:[#allocation22 + $0x34c] sm:$0xf0] }
 0x4ff   : > { %v17080_v14 = vmax.f32 %v5012_v58, %v5014_v51  ;;  %v4876_v61 = vadd.f32 %v17070_v16, %v4857_v33  ;;  %v5024_v58 = vrot.slane %v17068_v34, 1  ;;  %v11560_v16 = vld [vmem:[#allocation22 + $0x60] sm:$0xf] }
 0x500   : > { %8790 = vmatpush.bf16.msrb.mxu0 %v11849_v7  ;;  %v11656_v33 = vld [vmem:[#allocation22 + $0x120] sm:$0xf] }
 0x501   : > { %v17086_v32 = vpop.f32.mrf.mxu2  ;;  %v4895_v54 = vadd.f32 %v17072_v18, %v4876_v61  ;;  %v11561_v18 = vor.u32 %v14231_v15, %v11560_v16  ;;  %v4972_v61 = vpop.f32.mrf.mxu1  ;;  %v11640_v16 = vld [vmem:[#allocation22 + $0x100] sm:$0xf]  ;;  %v14251_v15 = vld [vmem:[#allocation22 + $0x10c] sm:$0xf0] }
 0x502   : > { %8777 = vmatpush.bf16.msra.mxu3 %v11705_v45  ;;  %v4845_v10 = vadd.f32 %v17086_v32, %v17064_v38  ;;  %v14299_v45 = vld [vmem:[#allocation22 + $0x28c] sm:$0xf0]  ;;  %v11529_v38 = vor.u32 %v14223_v43, %v11528_v8  ;;  %v12136_v57 = vld [vmem:[#allocation22 + $0x4e0] sm:$0xf]  ;;  %v11641_v44 = vor.u32 %v14251_v15, %v11640_v16 }
 0x503   : > { %8764 = vmatpush.bf16.msra.mxu2 %v11561_v18  ;;  %v11833_v46 = vor.u32 %v14299_v45, %v11832_v11  ;;  %v14255_v32 = vld [vmem:[#allocation22 + $0x12c] sm:$0xf0]  ;;  %v12264_v6 = vld [vmem:[#allocation22 + $0x5e0] sm:$0xf]  ;;  %v12137_v63 = vor.u32 %v14375_v42, %v12136_v57  ;;  %v5046_v42 = vld [vmem:[#allocation4] sm:$0x22] }
 0x504   : > { %v4858_v53 = vpop.f32.mrf.mxu3  ;;  %v14287_v45 = vld [vmem:[#allocation22 + $0x22c] sm:$0xf0]  ;;  %v12120_v31 = vld [vmem:[#allocation22 + $0x4c0] sm:$0xf] }
 0x505   : > { %v4859_v29 = vadd.f32 %v4858_v53, %v4840_v36  ;;  %v14263_v53 = vld [vmem:[#allocation22 + $0x16c] sm:$0xf0]  ;;  %8791 = vmatpush.bf16.msrb.mxu0 %v11833_v46  ;;  %v12232_v15 = vld [vmem:[#allocation22 + $0x5a0] sm:$0xf] }
 0x506   : > { %v11689_v62 = vor.u32 %v14263_v53, %v11688_v4  ;;  %v11800_v53 = vld [vmem:[#allocation22 + $0x240] sm:$0xf]  ;;  %v14319_v46 = vld [vmem:[#allocation22 + $0x32c] sm:$0xf0] }
 0x507   : > { %v4878_v24 = vadd.f32 %v17076_v41, %v4859_v29  ;;  %8765 = vmatpush.bf16.msra.mxu2 %v11545_v56  ;;  %v11816_v29 = vld [vmem:[#allocation22 + $0x260] sm:$0xf]  ;;  %v14367_v16 = vld [vmem:[#allocation22 + $0x4ac] sm:$0xf0] }
 0x508   : > { %8778 = vmatpush.bf16.msra.mxu3 %v11689_v62  ;;  %v11928_v62 = vld [vmem:[#allocation22 + $0x340] sm:$0xf] }
 0x509   : > { %v4913_v21 = vpop.f32.mrf.mxu2  ;;  %v4897_v39 = vadd.f32 %v17078_v12, %v4878_v24  ;;  %v4953_v12 = vpop.f32.mrf.mxu0  ;;  %v11944_v24 = vld [vmem:[#allocation22 + $0x360] sm:$0xf]  ;;  %v11929_v11 = vor.u32 %v14323_v22, %v11928_v62 }
 0x50a   : > { %v4914_v9 = vadd.f32 %v4913_v21, %v4895_v54  ;;  %v14295_v54 = vld [vmem:[#allocation22 + $0x26c] sm:$0xf0]  ;;  %v4975_v8 = vpop.f32.mrf.mxu1 }
 0x50b   : > { %8766 = vmatpush.bf16.msra.mxu2 %v11529_v38  ;;  %v14403_v38 = vld [vmem:[#allocation22 + $0x5cc] sm:$0xf0] }
 0x50c   : > { %v4861_v20 = vpop.f32.mrf.mxu3  ;;  %8779 = vmatpush.bf16.msra.mxu3 %v11673_v0  ;;  %v11784_v0 = vld [vmem:[#allocation22 + $0x220] sm:$0xf] }
 0x50d   : > { %v4862_v41 = vadd.f32 %v4861_v20, %v4843_v55  ;;  %v11817_v55 = vor.u32 %v14295_v54, %v11816_v29 }
 0x50f   : > { %v4881_v47 = vadd.f32 %v17082_v26, %v4862_v41  ;;  %v11657_v26 = vor.u32 %v14255_v32, %v11656_v33  ;;  %v14291_v41 = vld [vmem:[#allocation22 + $0x24c] sm:$0xf0]  ;;  %8792 = vmatpush.bf16.msrb.mxu0 %v11817_v55  ;;  %v11785_v33 = vor.u32 %v14287_v45, %v11784_v0  ;;  %v12504_v0 = vld [vmem:[#allocation22 + $0x7c0] sm:$0xf] }
 0x511   : > { %v4915_v5 = vpop.f32.mrf.mxu2  ;;  %v4900_v18 = vadd.f32 %v17084_v50, %v4881_v47  ;;  %8780 = vmatpush.bf16.msra.mxu3 %v11657_v26  ;;  %v11801_v50 = vor.u32 %v14291_v41, %v11800_v53  ;;  %v11768_v26 = vld [vmem:[#allocation22 + $0x200] sm:$0xf] }
 0x512   : > { %v4916_v20 = vadd.f32 %v4915_v5, %v4897_v39 }
 0x513   : > { %8793 = vmatpush.bf16.msrb.mxu0 %v11801_v50  ;;  %v14363_v50 = vld [vmem:[#allocation22 + $0x48c] sm:$0xf0] }
 0x514   : > { %v4863_v19 = vpop.f32.mrf.mxu3 }
 0x515   : > { %8781 = vmatpush.bf16.msra.mxu3 %v11641_v44  ;;  %v12088_v44 = vld [vmem:[#allocation22 + $0x480] sm:$0xf] }
 0x517   : > { %8794 = vmatpush.bf16.msrb.mxu0 %v11785_v33 }
 0x51c   : > { %v4932_v59 = vpop.f32.mrf.mxu3 }
 0x51d   : > { %v4933_v51 = vadd.f32 %v4932_v59, %v4914_v9  ;;  %v14327_v9 = vld [vmem:[#allocation22 + $0x36c] sm:$0xf0]  ;;  %v11512_v59 = vld [vmem:[#allocation22] sm:$0xf] }
 0x51e   : > { %v11945_v4 = vor.u32 %v14327_v9, %v11944_v24  ;;  %v14283_v24 = vld [vmem:[#allocation22 + $0x20c] sm:$0xf0]  ;;  %v11896_v9 = vld [vmem:[#allocation22 + $0x300] sm:$0xf] }
 0x51f   : > { %v4952_v35 = vadd.f32 %v4951_v27, %v4933_v51  ;;  %v4864_v27 = vadd.f32 %v4863_v19, %v4845_v10  ;;  %v14219_v51 = vld [vmem:[#allocation22 + $0xc] sm:$0xf0]  ;;  %v4918_v19 = vpop.f32.mrf.mxu2  ;;  %v4956_v10 = vpop.f32.mrf.mxu0 }
 0x520   : > { %v11513_v39 = vor.u32 %v14219_v51, %v11512_v59  ;;  %v4919_v2 = vadd.f32 %v4918_v19, %v4900_v18  ;;  %8806 = vmatpush.bf16.msra.mxu1 %v11945_v4  ;;  %v12104_v59 = vld [vmem:[#allocation22 + $0x4a0] sm:$0xf]  ;;  %v11769_v51 = vor.u32 %v14283_v24, %v11768_v26 }
 0x521   : > { %v4971_v1 = vadd.f32 %v4970_v23, %v4952_v35  ;;  %v4883_v17 = vadd.f32 %v17090_v25, %v4864_v27  ;;  %v12105_v53 = vor.u32 %v14367_v16, %v12104_v59  ;;  %v12392_v19 = vld [vmem:[#allocation22 + $0x6e0] sm:$0xf] }
 0x522   : > { %8767 = vmatpush.bf16.msra.mxu2 %v11513_v39  ;;  %v12520_v39 = vld [vmem:[#allocation22 + $0x7e0] sm:$0xf]  ;;  %8795 = vmatpush.bf16.msrb.mxu0 %v11769_v51 }
 0x523   : > { %v4987_v21 = vmul.f32 %v17102_v48, %v4971_v1  ;;  %v14407_v1 = vld [vmem:[#allocation22 + $0x5ec] sm:$0xf0]  ;;  %v4902_v43 = vadd.f32 %v17092_v49, %v4883_v17  ;;  %v12488_v24 = vld [vmem:[#allocation22 + $0x7a0] sm:$0xf] }
 0x524   : > { %v4934_v36 = vpop.f32.mrf.mxu3  ;;  %v12265_v56 = vor.u32 %v14407_v1, %v12264_v6  ;;  %8807 = vmatpush.bf16.msra.mxu1 %v11929_v11  ;;  %v14315_v49 = vld [vmem:[#allocation22 + $0x30c] sm:$0xf0]  ;;  %v12056_v59 = vld [vmem:[#allocation22 + $0x440] sm:$0xf] }
 0x525   : > { %v4935_v23 = vadd.f32 %v4934_v36, %v4916_v20  ;;  %v5001_v35 = vadd.f32 %v17105_v60, %v4987_v21  ;;  %v11912_v20 = vld [vmem:[#allocation22 + $0x320] sm:$0xf]  ;;  %v14371_v21 = vld [vmem:[#allocation22 + $0x4cc] sm:$0xf0]  ;;  %v11897_v57 = vor.u32 %v14315_v49, %v11896_v9 }
 0x526   : > { %8816 = vmatpush.bf16.msrb.mxu2 %v12137_v63  ;;  %8830 = vmatpush.bf16.msrb.mxu3 %v12265_v56  ;;  %v12248_v36 = vld [vmem:[#allocation22 + $0x5c0] sm:$0xf]  ;;  %v12121_v27 = vor.u32 %v14371_v21, %v12120_v31  ;;  %v14395_v56 = vld [vmem:[#allocation22 + $0x58c] sm:$0xf0]  ;;  %v4977_v21 = vpop.f32.mrf.mxu1 }
 0x527   : > { %v4954_v5 = vadd.f32 %v4953_v12, %v4935_v23  ;;  %v5009_v12 = vmax.f32 %v5001_v35, 0.0  ;;  %v12249_v23 = vor.u32 %v14403_v38, %v12248_v36  ;;  %v4920_v18 = vpop.f32.mrf.mxu2  ;;  %v14439_v35 = vld [vmem:[#allocation22 + $0x6ec] sm:$0xf0]  ;;  %v12216_v63 = vld [vmem:[#allocation22 + $0x580] sm:$0xf]  ;;  %v4958_v45 = vpop.f32.mrf.mxu0 }
 0x528   : > { %v4921_v22 = vadd.f32 %v4920_v18, %v4902_v43  ;;  %v12393_v17 = vor.u32 %v14439_v35, %v12392_v19  ;;  %v14359_v31 = vld [vmem:[#allocation22 + $0x46c] sm:$0xf0]  ;;  %v5039_v43 = vld [vmem:[#allocation4] sm:$0x11]  ;;  %v12360_v38 = vld [vmem:[#allocation22 + $0x6a0] sm:$0xf] }
 0x529   : > { %v4973_v7 = vadd.f32 %v4972_v61, %v4954_v5  ;;  %v11913_v61 = vor.u32 %v14319_v46, %v11912_v20  ;;  %v14399_v5 = vld [vmem:[#allocation22 + $0x5ac] sm:$0xf0]  ;;  %v12072_v46 = vld [vmem:[#allocation22 + $0x460] sm:$0xf] }
 0x52a   : > { %8817 = vmatpush.bf16.msrb.mxu2 %v12121_v27  ;;  %8831 = vmatpush.bf16.msrb.mxu3 %v12249_v23  ;;  %v12233_v41 = vor.u32 %v14399_v5, %v12232_v15  ;;  %v14467_v20 = vld [vmem:[#allocation22 + $0x7cc] sm:$0xf0]  ;;  %v12073_v26 = vor.u32 %v14359_v31, %v12072_v46  ;;  %v12184_v18 = vld [vmem:[#allocation22 + $0x540] sm:$0xf] }
 0x52b   : > { %v4989_v37 = vmul.f32 %v17102_v48, %v4973_v7  ;;  %8808 = vmatpush.bf16.msra.mxu1 %v11913_v61  ;;  %v14471_v7 = vld [vmem:[#allocation22 + $0x7ec] sm:$0xf0]  ;;  %8844 = vmatpush.bf16.msra.mxu0 %v12393_v17  ;;  %v12505_v36 = vor.u32 %v14467_v20, %v12504_v0  ;;  %v12040_v17 = vld [vmem:[#allocation22 + $0x420] sm:$0xf] }
 0x52c   : > { %v4937_v25 = vpop.f32.mrf.mxu3  ;;  %v12521_v1 = vor.u32 %v14471_v7, %v12520_v39  ;;  %v14391_v61 = vld [vmem:[#allocation22 + $0x56c] sm:$0xf0] }
 0x52d   : > { %v5003_v3 = vadd.f32 %v17105_v60, %v4989_v37  ;;  %v4938_v47 = vadd.f32 %v4937_v25, %v4919_v2  ;;  %v5028_v37 = vmax.f32 %v17068_v34, %v5024_v58  ;;  %v14435_v25 = vld [vmem:[#allocation22 + $0x6cc] sm:$0xf0]  ;;  %v12200_v58 = vld [vmem:[#allocation22 + $0x560] sm:$0xf] }
 0x52e   : > { %8818 = vmatpush.bf16.msrb.mxu2 %v12105_v53  ;;  %8832 = vmatpush.bf16.msrb.mxu3 %v12233_v41  ;;  %v14463_v9 = vld [vmem:[#allocation22 + $0x7ac] sm:$0xf0]  ;;  %v12201_v49 = vor.u32 %v14391_v61, %v12200_v58  ;;  %v12344_v41 = vld [vmem:[#allocation22 + $0x680] sm:$0xf] }
 0x52f   : > { %v5011_v32 = vmax.f32 %v5003_v3, 0.0  ;;  %v4957_v54 = vadd.f32 %v4956_v10, %v4938_v47  ;;  %v12089_v10 = vor.u32 %v14363_v50, %v12088_v44  ;;  %v12217_v47 = vor.u32 %v14395_v56, %v12216_v63  ;;  %8809 = vmatpush.bf16.msra.mxu1 %v11897_v57  ;;  %v14427_v19 = vld [vmem:[#allocation22 + $0x68c] sm:$0xf0]  ;;  %v12328_v63 = vld [vmem:[#allocation22 + $0x660] sm:$0xf] }
 0x530   : > { %v12489_v53 = vor.u32 %v14463_v9, %v12488_v24  ;;  %v14351_v7 = vld [vmem:[#allocation22 + $0x42c] sm:$0xf0]  ;;  %v12440_v61 = vld [vmem:[#allocation22 + $0x740] sm:$0xf]  ;;  %v11440_v9 = vld [vmem:[#allocation7] sm:$0xf] }
 0x531   : > { %v5021_v55 = vmax.f32 %v5009_v12, %v5011_v32  ;;  %v4976_v4 = vadd.f32 %v4975_v8, %v4957_v54  ;;  %v12376_v12 = vld [vmem:[#allocation22 + $0x6c0] sm:$0xf]  ;;  %v14431_v32 = vld [vmem:[#allocation22 + $0x6ac] sm:$0xf0] }
 0x532   : > { %v12377_v34 = vor.u32 %v14435_v25, %v12376_v12  ;;  %8819 = vmatpush.bf16.msrb.mxu2 %v12089_v10  ;;  %8833 = vmatpush.bf16.msrb.mxu3 %v12217_v47  ;;  %v12361_v5 = vor.u32 %v14431_v32, %v12360_v38  ;;  %v14423_v56 = vld [vmem:[#allocation22 + $0x66c] sm:$0xf0]  ;;  %v12024_v25 = vld [vmem:[#allocation22 + $0x400] sm:$0xf] }
 0x533   : > { %v5025_v62 = vrot.slane %v5021_v55, 1  ;;  %v4991_v3 = vmul.f32 %v17102_v48, %v4976_v4  ;;  %8858 = vmatpush.bf16.msrb.mxu1 %v12521_v1  ;;  %v14387_v4 = vld [vmem:[#allocation22 + $0x54c] sm:$0xf0]  ;;  %v12329_v47 = vor.u32 %v14423_v56, %v12328_v63  ;;  %v5067_v38 = vld [vmem:[#allocation4 + $0x18] sm:$0x22] }
 0x534   : > { %v4939_v6 = vpop.f32.mrf.mxu3  ;;  %8845 = vmatpush.bf16.msra.mxu0 %v12377_v34  ;;  %v12185_v57 = vor.u32 %v14387_v4, %v12184_v18  ;;  %v14383_v1 = vld [vmem:[#allocation22 + $0x52c] sm:$0xf0]  ;;  %v12424_v4 = vld [vmem:[#allocation22 + $0x720] sm:$0xf] }
 0x535   : > { %v5029_v2 = vmax.f32 %v5021_v55, %v5025_v62  ;;  %v4940_v11 = vadd.f32 %v4939_v6, %v4921_v22  ;;  %v14355_v55 = vld [vmem:[#allocation22 + $0x44c] sm:$0xf0]  ;;  %v5005_v16 = vadd.f32 %v17105_v60, %v4991_v3  ;;  %v12472_v62 = vld [vmem:[#allocation22 + $0x780] sm:$0xf] }
 0x536   : > { %8820 = vmatpush.bf16.msrb.mxu2 %v12073_v26  ;;  %v12057_v39 = vor.u32 %v14355_v55, %v12056_v59  ;;  %v14459_v22 = vld [vmem:[#allocation22 + $0x78c] sm:$0xf0]  ;;  %8834 = vmatpush.bf16.msrb.mxu3 %v12201_v49  ;;  %v12168_v6 = vld [vmem:[#allocation22 + $0x520] sm:$0xf] }
 0x537   : > { %v5030_v8 = vpack.c.bf16 %v5029_v2, %v5028_v37  ;;  %v4959_v33 = vadd.f32 %v4958_v45, %v4940_v11  ;;  %8859 = vmatpush.bf16.msrb.mxu1 %v12505_v36  ;;  %v12473_v50 = vor.u32 %v14459_v22, %v12472_v62  ;;  %v12041_v2 = vor.u32 %v14351_v7, %v12040_v17  ;;  %v12456_v11 = vld [vmem:[#allocation22 + $0x760] sm:$0xf]  ;;  %v14455_v10 = vld [vmem:[#allocation22 + $0x76c] sm:$0xf0] }
 0x538   : > { %8846 = vmatpush.bf16.msra.mxu0 %v12361_v5  ;;  %v12169_v12 = vor.u32 %v14383_v1, %v12168_v6  ;;  %v14347_v0 = vld [vmem:[#allocation22 + $0x40c] sm:$0xf0]  ;;  %v12152_v45 = vld [vmem:[#allocation22 + $0x500] sm:$0xf]  ;;  %v12457_v31 = vor.u32 %v14455_v10, %v12456_v11 }
 0x539   : > { %v5032_v54 = vshll.u32 %v5030_v8, 16  ;;  %v5047_v27 = vsel %vm5045_vm2, %v5030_v8, %v5046_v42  ;;  %v4978_v23 = vadd.f32 %v4977_v21, %v4959_v33  ;;  %v12345_v42 = vor.u32 %v14427_v19, %v12344_v41  ;;  %v14379_v20 = vld [vmem:[#allocation22 + $0x50c] sm:$0xf0]  ;;  %v12312_v8 = vld [vmem:[#allocation22 + $0x640] sm:$0xf] }
 0x53a   : > { %5048 = vst [vmem:[#allocation4] sm:$0x22] %v5047_v27  ;;  %8821 = vmatpush.bf16.msrb.mxu2 %v12057_v39  ;;  %8835 = vmatpush.bf16.msrb.mxu3 %v12185_v57  ;;  %v12025_v58 = vor.u32 %v14347_v0, %v12024_v25  ;;  %v14451_v21 = vld [vmem:[#allocation22 + $0x74c] sm:$0xf0]  ;;  %v5064_v36 = vld [vmem:[#allocation4 + $0x18] sm:$0x11]  ;;  %v12153_v32 = vor.u32 %v14379_v20, %v12152_v45 }
 0x53b   : > { %v5040_v51 = vsel %vm5038_vm3, %v5032_v54, %v5039_v43  ;;  %v4993_v15 = vmul.f32 %v17102_v48, %v4978_v23  ;;  %v5013_v48 = vmax.f32 %v5005_v16, 0.0  ;;  %8860 = vmatpush.bf16.msrb.mxu1 %v12489_v53  ;;  %v14419_v43 = vld [vmem:[#allocation22 + $0x64c] sm:$0xf0]  ;;  %v12648_v54 = vld [vmem:[#allocation22 + $0x8e0] sm:$0xf]  ;;  %v15015_v27 = vld [vmem:[#allocation4 + $0x10] sm:$0xff] }
 0x53c   : > { %5041 = vst [vmem:[#allocation4] sm:$0x11] %v5040_v51  ;;  %8847 = vmatpush.bf16.msra.mxu0 %v12345_v42  ;;  %v5077_v23 = vshrl.u32 %v15015_v27, 16  ;;  %v12313_v24 = vor.u32 %v14419_v43, %v12312_v8  ;;  %v14503_v49 = vld [vmem:[#allocation22 + $0x8ec] sm:$0xf0]  ;;  %v5080_v7 = vshll.u32 %v15015_v27, 16 }
 0x53d   : > { %v5007_v35 = vadd.f32 %v17105_v60, %v4993_v15  ;;  %v5053_v60 = vrot.slane %v17080_v14, 1  ;;  %v12776_v59 = vld [vmem:[#allocation22 + $0x9e0] sm:$0xf]  ;;  %v14535_v55 = vld [vmem:[#allocation22 + $0x9ec] sm:$0xf0]  ;;  %v12649_v41 = vor.u32 %v14503_v49, %v12648_v54 }
 0x53e   : > { %8822 = vmatpush.bf16.msrb.mxu2 %v12041_v2  ;;  %8836 = vmatpush.bf16.msrb.mxu3 %v12169_v12  ;;  %v14199_v51 = vld [vmem:[#allocation7 + $0x4] sm:$0xf]  ;;  %v12296_v16 = vld [vmem:[#allocation22 + $0x620] sm:$0xf]  ;;  %v14415_v15 = vld [vmem:[#allocation22 + $0x62c] sm:$0xf0]  ;;  %v12777_v19 = vor.u32 %v14535_v55, %v12776_v59 }
 0x53f   : > { %v5015_v44 = vmax.f32 %v5007_v35, 0.0  ;;  %8861 = vmatpush.bf16.msrb.mxu1 %v12473_v50  ;;  %v5057_v33 = vmax.f32 %v17080_v14, %v5053_v60  ;;  %v12441_v14 = vor.u32 %v14451_v21, %v12440_v61  ;;  %v14447_v53 = vld [vmem:[#allocation22 + $0x72c] sm:$0xf0]  ;;  %v12632_v35 = vld [vmem:[#allocation22 + $0x8c0] sm:$0xf]  ;;  %v5079_v17 = vrot.slane %v5077_v23, 4 }
 0x540   : > { %8848 = vmatpush.bf16.msra.mxu0 %v12329_v47  ;;  %v14499_v39 = vld [vmem:[#allocation22 + $0x8cc] sm:$0xf0]  ;;  %v12760_v62 = vld [vmem:[#allocation22 + $0x9c0] sm:$0xf]  ;;  %v12425_v60 = vor.u32 %v14447_v53, %v12424_v4 }
 0x541   : > { %v5050_v37 = vmax.f32 %v5013_v48, %v5015_v44  ;;  %v14531_v22 = vld [vmem:[#allocation22 + $0x9cc] sm:$0xf0]  ;;  %v12297_v44 = vor.u32 %v14415_v15, %v12296_v16  ;;  %v12280_v42 = vld [vmem:[#allocation22 + $0x600] sm:$0xf]  ;;  %v12633_v25 = vor.u32 %v14499_v39, %v12632_v35 }
 0x542   : > { %8823 = vmatpush.bf16.msrb.mxu2 %v12025_v58  ;;  %8837 = vmatpush.bf16.msrb.mxu3 %v12153_v32  ;;  %v14411_v6 = vld [vmem:[#allocation22 + $0x60c] sm:$0xf0]  ;;  %v12761_v0 = vor.u32 %v14531_v22, %v12760_v62  ;;  %v12744_v8 = vld [vmem:[#allocation22 + $0x9a0] sm:$0xf]  ;;  %v5099_v32 = vld [vmem:[#allocation4 + $0x10] sm:$0xee] }
 0x543   : > { %v5054_v3 = vrot.slane %v5050_v37, 1  ;;  %v5071_v46 = vld [vmem:[#allocation4] sm:$0x11]  ;;  %8862 = vmatpush.bf16.msrb.mxu1 %v12457_v31  ;;  %v14495_v47 = vld [vmem:[#allocation22 + $0x8ac] sm:$0xf0]  ;;  %v12281_v20 = vor.u32 %v14411_v6, %v12280_v42  ;;  %v11435_v23 = vrot.slane %v5099_v32, 9 }
 0x544   : > { %5073 = vst [vmem:[#allocation7 + $0x48] sm:$0x11] %v5071_v46  ;;  %v5075_v57 = vld [vmem:[#allocation4] sm:$0x33]  ;;  %8849 = vmatpush.bf16.msra.mxu0 %v12313_v24  ;;  %v12409_v46 = vor.u32 %v14443_v52, %v12408_v30  ;;  %v14527_v43 = vld [vmem:[#allocation22 + $0x9ac] sm:$0xf0] }
 0x545   : > { %v5058_v34 = vmax.f32 %v5050_v37, %v5054_v3  ;;  %v5086_v1 = vshll.u32 %v5075_v57, 16  ;;  %v5090_v50 = vshrl.u32 %v5075_v57, 16  ;;  %v5082_v37 = vrot.slane %v5080_v7, 5  ;;  %v17171_v10 = vld [vmem:[#allocation4] sm:$0xff]  ;;  %v12616_v3 = vld [vmem:[#allocation22 + $0x8a0] sm:$0xf] }
 0x546   : > { %5114 = vst [vmem:[#allocation7 + $0x18] sm:$0xff] %v17171_v10  ;;  %v12600_v58 = vld [vmem:[#allocation22 + $0x880] sm:$0xf]  ;;  %v14491_v61 = vld [vmem:[#allocation22 + $0x88c] sm:$0xf0] }
 0x547   : > { %v5059_v26 = vpack.c.bf16 %v5058_v34, %v5057_v33  ;;  %8863 = vmatpush.bf16.msrb.mxu1 %v12441_v14  ;;  %v5088_v2 = vrot.slane %v5086_v1, 5  ;;  %v5092_v11 = vrot.slane %v5090_v50, 4  ;;  %v5083_v12 = vor.u32 %v5082_v37, %v5079_v17  ;;  %v12728_v21 = vld [vmem:[#allocation22 + $0x980] sm:$0xf]  ;;  %v5100_v54 = vld [vmem:[#allocation4] sm:$0x33] }
 0x548   : > { %8850 = vmatpush.bf16.msra.mxu0 %v12297_v44  ;;  %v14523_v27 = vld [vmem:[#allocation22 + $0x98c] sm:$0xf0]  ;;  %v12904_v24 = vld [vmem:[#allocation22 + $0xae0] sm:$0xf]  ;;  %v12601_v14 = vor.u32 %v14491_v61, %v12600_v58 }
 0x549   : > { %v5061_v5 = vshll.u32 %v5059_v26, 16  ;;  %v5068_v18 = vsel %vm5045_vm2, %v5059_v26, %v5067_v38  ;;  %v5093_v45 = vor.u32 %v5092_v11, %v5088_v2  ;;  %v5084_v31 = vrot.slane %v5083_v12, 4  ;;  %v14567_v59 = vld [vmem:[#allocation22 + $0xaec] sm:$0xf0]  ;;  %v13032_v55 = vld [vmem:[#allocation22 + $0xbe0] sm:$0xf] }
 0x54a   : > { %5069 = vst [vmem:[#allocation4 + $0x18] sm:$0x22] %v5068_v18  ;;  %v12745_v38 = vor.u32 %v14527_v43, %v12744_v8  ;;  %v5105_v26 = vrot.slane %v5100_v54, 5  ;;  %v14599_v16 = vld [vmem:[#allocation22 + $0xbec] sm:$0xf0]  ;;  %v12905_v17 = vor.u32 %v14567_v59, %v12904_v24 }
 0x54b   : > { %v5065_v40 = vsel %vm5038_vm3, %v5061_v5, %v5064_v36  ;;  %v14208_v29 = vld [vmem:[#allocation7 + $0x44] sm:$0x10]  ;;  %v11442_v48 = vld [vmem:[#allocation7 + $0x48] sm:$0x10]  ;;  %8864 = vmatpush.bf16.msrb.mxu1 %v12425_v60  ;;  %v5094_v33 = vrot.slane %v5093_v45, 4  ;;  %v5089_v34 = vsel %vm15898_vm5, %v5084_v31, %v5088_v2  ;;  %v12617_v36 = vor.u32 %v14495_v47, %v12616_v3 }
 0x54c   : > { %5066 = vst [vmem:[#allocation4 + $0x18] sm:$0x11] %v5065_v40  ;;  %v17167_v63 = vor.u32 %v14208_v29, %v11440_v9  ;;  %v17169_v56 = vor.u32 %v14199_v51, %v11442_v48  ;;  %8851 = vmatpush.bf16.msra.mxu0 %v12281_v20  ;;  %v5106_v9 = vsel %vm16163_vm14, %v11435_v23, %v5105_v26  ;;  %v5107_v49 = vrot.slane %v5105_v26, 4  ;;  %v12584_v15 = vld [vmem:[#allocation22 + $0x860] sm:$0xf] }
 0x54d   : > { %5097 = vst [vmem:[#allocation7 + $0x8] sm:$0xff] %v5089_v34  ;;  %v12729_v51 = vor.u32 %v14523_v27, %v12728_v21  ;;  %v14487_v5 = vld [vmem:[#allocation22 + $0x86c] sm:$0xf0]  ;;  %v12712_v18 = vld [vmem:[#allocation22 + $0x960] sm:$0xf]  ;;  %v13033_v7 = vor.u32 %v14599_v16, %v13032_v55  ;;  %v5119_v21 = vshrl.u32 %v17171_v10, 16 }
 0x54e   : > { %8768 = vmatmul.bf16.vlgmr.msra.gmra.mxu2 %v17167_v63  ;;  %8782 = vmatmul.bf16.vlgmr.msra.gmra.mxu3 %v17169_v56  ;;  %5098 = vst [vmem:[#allocation7 + $0x50] sm:$0x11] %v5094_v33  ;;  %v14519_v4 = vld [vmem:[#allocation22 + $0x96c] sm:$0xf0]  ;;  %v13016_v35 = vld [vmem:[#allocation22 + $0xbc0] sm:$0xf]  ;;  %v12585_v48 = vor.u32 %v14487_v5, %v12584_v15 }
 0x54f   : > { %8872 = vmatpush.bf16.msra.mxu2 %v12649_v41  ;;  %8886 = vmatpush.bf16.msra.mxu3 %v12777_v19  ;;  %5110 = vst [vmem:[#allocation7 + $0x10] sm:$0xff] %v5106_v9  ;;  %v12888_v41 = vld [vmem:[#allocation22 + $0xac0] sm:$0xf]  ;;  %v14563_v19 = vld [vmem:[#allocation22 + $0xacc] sm:$0xf0]  ;;  %v12713_v44 = vor.u32 %v14519_v4, %v12712_v18  ;;  %v5121_v5 = vrot.slane %v5119_v21, 4 }
 0x550   : > { %8865 = vmatpush.bf16.msrb.mxu1 %v12409_v46  ;;  %5111 = vst [vmem:[#allocation7 + $0x58] sm:$0x11] %v5107_v49  ;;  %v14595_v39 = vld [vmem:[#allocation22 + $0xbcc] sm:$0xf0]  ;;  %v12568_v42 = vld [vmem:[#allocation22 + $0x840] sm:$0xf]  ;;  %v12889_v2 = vor.u32 %v14563_v19, %v12888_v41 }
 0x551   : > { %v14483_v6 = vld [vmem:[#allocation22 + $0x84c] sm:$0xf0]  ;;  %v12696_v50 = vld [vmem:[#allocation22 + $0x940] sm:$0xf]  ;;  %v13017_v11 = vor.u32 %v14595_v39, %v13016_v35  ;;  %v5122_v18 = vshll.u32 %v17171_v10, 16 }
 0x552   : > { %v14515_v60 = vld [vmem:[#allocation22 + $0x94c] sm:$0xf0]  ;;  %v12872_v52 = vld [vmem:[#allocation22 + $0xaa0] sm:$0xf]  ;;  %v12569_v45 = vor.u32 %v14483_v6, %v12568_v42 }
 0x553   : > { %8873 = vmatpush.bf16.msra.mxu2 %v12633_v25  ;;  %8887 = vmatpush.bf16.msra.mxu3 %v12761_v0  ;;  %v5113_v1 = vld [vmem:[#allocation4 + $0x18] sm:$0x11]  ;;  %v14559_v0 = vld [vmem:[#allocation22 + $0xaac] sm:$0xf0]  ;;  %v12697_v31 = vor.u32 %v14515_v60, %v12696_v50 }
 0x554   : > { %v11448_v53 = vld [vmem:[#allocation7 + $0x8] sm:$0xf]  ;;  %v14200_v22 = vld [vmem:[#allocation7 + $0xc] sm:$0xf]  ;;  %5115 = vst [vmem:[#allocation7 + $0x60] sm:$0x11] %v5113_v1 }
 0x555   : > { %v14209_v62 = vld [vmem:[#allocation7 + $0x4c] sm:$0x10]  ;;  %v11450_v57 = vld [vmem:[#allocation7 + $0x50] sm:$0x10]  ;;  %v13000_v20 = vld [vmem:[#allocation22 + $0xba0] sm:$0xf] }
 0x556   : > { %v17180_v40 = vor.u32 %v14209_v62, %v11448_v53  ;;  %v17182_v29 = vor.u32 %v14200_v22, %v11450_v57  ;;  %v11456_v30 = vld [vmem:[#allocation7 + $0x10] sm:$0xf]  ;;  %v14201_v37 = vld [vmem:[#allocation7 + $0x14] sm:$0xf]  ;;  %v14591_v46 = vld [vmem:[#allocation22 + $0xbac] sm:$0xf0] }
 0x557   : > { %8874 = vmatpush.bf16.msra.mxu2 %v12617_v36  ;;  %8888 = vmatpush.bf16.msra.mxu3 %v12745_v38  ;;  %v14210_v12 = vld [vmem:[#allocation7 + $0x54] sm:$0x10]  ;;  %v11458_v25 = vld [vmem:[#allocation7 + $0x58] sm:$0x10]  ;;  %v14479_v43 = vld [vmem:[#allocation22 + $0x82c] sm:$0xf0]  ;;  %v12873_v36 = vor.u32 %v14559_v0, %v12872_v52  ;;  %v13001_v38 = vor.u32 %v14591_v46, %v13000_v20 }
 0x558   : > { %8796 = vmatmul.bf16.vlgmr.msrb.gmra.mxu0 %v17180_v40  ;;  %8810 = vmatmul.bf16.vlgmr.msra.gmra.mxu1 %v17182_v29  ;;  %v17186_v3 = vor.u32 %v14210_v12, %v11456_v30  ;;  %v17188_v47 = vor.u32 %v14201_v37, %v11458_v25  ;;  %v12552_v8 = vld [vmem:[#allocation22 + $0x820] sm:$0xf]  ;;  %v14511_v34 = vld [vmem:[#allocation22 + $0x92c] sm:$0xf0] }
 0x559   : > { %8900 = vmatpush.bf16.msrb.mxu0 %v12905_v17  ;;  %8914 = vmatpush.bf16.msra.mxu1 %v13033_v7  ;;  %v12680_v33 = vld [vmem:[#allocation22 + $0x920] sm:$0xf]  ;;  %v14555_v61 = vld [vmem:[#allocation22 + $0xa8c] sm:$0xf0]  ;;  %v12553_v23 = vor.u32 %v14479_v43, %v12552_v8  ;;  %v5124_v7 = vrot.slane %v5122_v18, 5 }
 0x55a   : > { %v12856_v58 = vld [vmem:[#allocation22 + $0xa80] sm:$0xf]  ;;  %v14587_v54 = vld [vmem:[#allocation22 + $0xb8c] sm:$0xf0]  ;;  %v12681_v26 = vor.u32 %v14511_v34, %v12680_v33 }
 0x55b   : > { %8875 = vmatpush.bf16.msra.mxu2 %v12601_v14  ;;  %8889 = vmatpush.bf16.msra.mxu3 %v12729_v51  ;;  %v12984_v32 = vld [vmem:[#allocation22 + $0xb80] sm:$0xf]  ;;  %v14475_v24 = vld [vmem:[#allocation22 + $0x80c] sm:$0xf0]  ;;  %v12857_v4 = vor.u32 %v14555_v61, %v12856_v58  ;;  %v14211_v62 = vld [vmem:[#allocation7 + $0x5c] sm:$0x10]  ;;  %v5125_v60 = vor.u32 %v5124_v7, %v5121_v5 }
 0x55c   : > { %v12536_v27 = vld [vmem:[#allocation22 + $0x800] sm:$0xf]  ;;  %v14507_v49 = vld [vmem:[#allocation22 + $0x90c] sm:$0xf0]  ;;  %v12985_v53 = vor.u32 %v14587_v54, %v12984_v32 }
 0x55d   : > { %8901 = vmatpush.bf16.msrb.mxu0 %v12889_v2  ;;  %8915 = vmatpush.bf16.msra.mxu1 %v13017_v11  ;;  %v12664_v9 = vld [vmem:[#allocation22 + $0x900] sm:$0xf]  ;;  %v14631_v55 = vld [vmem:[#allocation22 + $0xcec] sm:$0xf0]  ;;  %v12537_v57 = vor.u32 %v14475_v24, %v12536_v27  ;;  %v5126_v43 = vrot.slane %v5125_v60, 4 }
 0x55e   : > { %8824 = vmatmul.bf16.vlgmr.msrb.gmra.mxu2 %v17186_v3  ;;  %8838 = vmatmul.bf16.vlgmr.msrb.gmra.mxu3 %v17188_v47  ;;  %v13160_v59 = vld [vmem:[#allocation22 + $0xce0] sm:$0xf]  ;;  %v14663_v16 = vld [vmem:[#allocation22 + $0xdec] sm:$0xf0]  ;;  %v12665_v17 = vor.u32 %v14507_v49, %v12664_v9  ;;  %v5141_v49 = vld [vmem:[#allocation4] sm:$0xee] }
 0x55f   : > { %8876 = vmatpush.bf16.msra.mxu2 %v12585_v48  ;;  %8890 = vmatpush.bf16.msra.mxu3 %v12713_v44  ;;  %v13288_v14 = vld [vmem:[#allocation22 + $0xde0] sm:$0xf]  ;;  %v14551_v41 = vld [vmem:[#allocation22 + $0xa6c] sm:$0xf0]  ;;  %v11464_v48 = vld [vmem:[#allocation7 + $0x18] sm:$0xf]  ;;  %v13161_v42 = vor.u32 %v14631_v55, %v13160_v59 }
 0x560   : > { %v12840_v51 = vld [vmem:[#allocation22 + $0xa60] sm:$0xf]  ;;  %v14583_v22 = vld [vmem:[#allocation22 + $0xb6c] sm:$0xf0]  ;;  %v11466_v44 = vld [vmem:[#allocation7 + $0x60] sm:$0x10]  ;;  %v13289_v6 = vor.u32 %v14663_v16, %v13288_v14  ;;  %v17194_v20 = vor.u32 %v14211_v62, %v11464_v48 }
 0x561   : > { %v5117_v15 = vld [vmem:[#allocation4 + $0x18] sm:$0x33]  ;;  %8902 = vmatpush.bf16.msrb.mxu0 %v12873_v36  ;;  %8916 = vmatpush.bf16.msra.mxu1 %v13001_v38  ;;  %v14627_v30 = vld [vmem:[#allocation22 + $0xccc] sm:$0xf0]  ;;  %v12841_v11 = vor.u32 %v14551_v41, %v12840_v51  ;;  %v11436_v16 = vrot.slane %v5141_v49, 9 }
 0x562   : > { %v12968_v19 = vld [vmem:[#allocation22 + $0xb60] sm:$0xf]  ;;  %v5128_v35 = vshll.u32 %v5117_v15, 16  ;;  %v5132_v39 = vshrl.u32 %v5117_v15, 16  ;;  %v14659_v52 = vld [vmem:[#allocation22 + $0xdcc] sm:$0xf0] }
 0x563   : > { %8877 = vmatpush.bf16.msra.mxu2 %v12569_v45  ;;  %8891 = vmatpush.bf16.msra.mxu3 %v12697_v31  ;;  %v13144_v50 = vld [vmem:[#allocation22 + $0xcc0] sm:$0xf]  ;;  %v12969_v12 = vor.u32 %v14583_v22, %v12968_v19  ;;  %v14547_v0 = vld [vmem:[#allocation22 + $0xa4c] sm:$0xf0] }
 0x564   : > { %v5130_v10 = vrot.slane %v5128_v35, 5  ;;  %v5134_v1 = vrot.slane %v5132_v39, 4  ;;  %v13272_v37 = vld [vmem:[#allocation22 + $0xdc0] sm:$0xf]  ;;  %v14579_v8 = vld [vmem:[#allocation22 + $0xb4c] sm:$0xf0]  ;;  %v13145_v34 = vor.u32 %v14627_v30, %v13144_v50 }
 0x565   : > { %8903 = vmatpush.bf16.msrb.mxu0 %v12857_v4  ;;  %8917 = vmatpush.bf16.msra.mxu1 %v12985_v53  ;;  %v14202_v2 = vld [vmem:[#allocation7 + $0x1c] sm:$0xf]  ;;  %v13273_v58 = vor.u32 %v14659_v52, %v13272_v37  ;;  %v14543_v38 = vld [vmem:[#allocation22 + $0xa2c] sm:$0xf0] }
 0x566   : > { %v12824_v25 = vld [vmem:[#allocation22 + $0xa40] sm:$0xf]  ;;  %v5135_v45 = vor.u32 %v5134_v1, %v5130_v10  ;;  %v17196_v46 = vor.u32 %v14202_v2, %v11466_v44  ;;  %v5131_v21 = vsel %vm15898_vm5, %v5126_v43, %v5130_v10  ;;  %v14623_v54 = vld [vmem:[#allocation22 + $0xcac] sm:$0xf0] }
 0x567   : > { %8878 = vmatpush.bf16.msra.mxu2 %v12553_v23  ;;  %8892 = vmatpush.bf16.msra.mxu3 %v12681_v26  ;;  %v12952_v31 = vld [vmem:[#allocation22 + $0xb40] sm:$0xf]  ;;  %v14655_v23 = vld [vmem:[#allocation22 + $0xdac] sm:$0xf0]  ;;  %v12825_v26 = vor.u32 %v14547_v0, %v12824_v25  ;;  %5139 = vst [vmem:[#allocation7 + $0x20] sm:$0xff] %v5131_v21 }
 0x568   : > { %v5136_v33 = vrot.slane %v5135_v45, 4  ;;  %v13128_v61 = vld [vmem:[#allocation22 + $0xca0] sm:$0xf]  ;;  %8852 = vmatmul.bf16.vlgmr.msra.gmra.mxu0 %v17194_v20  ;;  %8866 = vmatmul.bf16.vlgmr.msrb.gmra.mxu1 %v17196_v46  ;;  %v12953_v24 = vor.u32 %v14579_v8, %v12952_v31  ;;  %v14575_v9 = vld [vmem:[#allocation22 + $0xb2c] sm:$0xf0] }
 0x569   : > { %v12808_v36 = vld [vmem:[#allocation22 + $0xa20] sm:$0xf]  ;;  %8904 = vmatpush.bf16.msrb.mxu0 %v12841_v11  ;;  %8918 = vmatpush.bf16.msra.mxu1 %v12969_v12  ;;  %v13129_v14 = vor.u32 %v14623_v54, %v13128_v61  ;;  %v14539_v4 = vld [vmem:[#allocation22 + $0xa0c] sm:$0xf0] }
 0x56a   : > { %v12936_v32 = vld [vmem:[#allocation22 + $0xb20] sm:$0xf]  ;;  %5140 = vst [vmem:[#allocation7 + $0x68] sm:$0x11] %v5136_v33  ;;  %v14571_v41 = vld [vmem:[#allocation22 + $0xb0c] sm:$0xf0]  ;;  %v12809_v62 = vor.u32 %v14543_v38, %v12808_v36 }
 0x56b   : > { %8879 = vmatpush.bf16.msra.mxu2 %v12537_v57  ;;  %8893 = vmatpush.bf16.msra.mxu3 %v12665_v17  ;;  %v13256_v27 = vld [vmem:[#allocation22 + $0xda0] sm:$0xf]  ;;  %v14619_v19 = vld [vmem:[#allocation22 + $0xc8c] sm:$0xf0]  ;;  %v12937_v22 = vor.u32 %v14575_v9, %v12936_v32 }
 0x56c   : > { %v5142_v59 = vld [vmem:[#allocation4 + $0x18] sm:$0x33]  ;;  %v13257_v51 = vor.u32 %v14655_v23, %v13256_v27  ;;  %v14651_v39 = vld [vmem:[#allocation22 + $0xd8c] sm:$0xf0] }
 0x56d   : > { %v17202_v55 = vld [vmem:[#allocation4 + $0x18] sm:$0xff]  ;;  %v5147_v15 = vrot.slane %v5142_v59, 5  ;;  %8905 = vmatpush.bf16.msrb.mxu0 %v12825_v26  ;;  %8919 = vmatpush.bf16.msra.mxu1 %v12953_v24  ;;  %v14695_v17 = vld [vmem:[#allocation22 + $0xeec] sm:$0xf0] }
 0x56e   : > { %v13112_v5 = vld [vmem:[#allocation22 + $0xc80] sm:$0xf]  ;;  %5156 = vst [vmem:[#allocation7 + $0x30] sm:$0xff] %v17202_v55  ;;  %v14615_v50 = vld [vmem:[#allocation22 + $0xc6c] sm:$0xf0] }
 0x56f   : > { %8928 = vmatpush.bf16.msrb.mxu2 %v13161_v42  ;;  %8942 = vmatpush.bf16.msrb.mxu3 %v13289_v6  ;;  %v12792_v18 = vld [vmem:[#allocation22 + $0xa00] sm:$0xf]  ;;  %v5148_v7 = vsel %vm16163_vm14, %v11436_v16, %v5147_v15  ;;  %v5149_v48 = vrot.slane %v5147_v15, 4  ;;  %v14727_v42 = vld [vmem:[#allocation22 + $0xfec] sm:$0xf0]  ;;  %v13113_v6 = vor.u32 %v14619_v19, %v13112_v5 }
 0x570   : > { %v12920_v53 = vld [vmem:[#allocation22 + $0xb00] sm:$0xf]  ;;  %5152 = vst [vmem:[#allocation7 + $0x28] sm:$0xff] %v5148_v7  ;;  %v11472_v60 = vld [vmem:[#allocation7 + $0x20] sm:$0xf]  ;;  %v12793_v12 = vor.u32 %v14539_v4, %v12792_v18 }
 0x571   : > { %v13240_v35 = vld [vmem:[#allocation22 + $0xd80] sm:$0xf]  ;;  %5153 = vst [vmem:[#allocation7 + $0x70] sm:$0x11] %v5149_v48  ;;  %v14647_v37 = vld [vmem:[#allocation22 + $0xd6c] sm:$0xf0]  ;;  %8906 = vmatpush.bf16.msrb.mxu0 %v12809_v62  ;;  %8920 = vmatpush.bf16.msra.mxu1 %v12937_v22  ;;  %v12921_v25 = vor.u32 %v14571_v41, %v12920_v53 }
 0x572   : > { %v13416_v57 = vld [vmem:[#allocation22 + $0xee0] sm:$0xf]  ;;  %v13241_v10 = vor.u32 %v14651_v39, %v13240_v35  ;;  %v14212_v52 = vld [vmem:[#allocation7 + $0x64] sm:$0x10]  ;;  %v14203_v2 = vld [vmem:[#allocation7 + $0x24] sm:$0xf] }
 0x573   : > { %8929 = vmatpush.bf16.msrb.mxu2 %v13145_v34  ;;  %8943 = vmatpush.bf16.msrb.mxu3 %v13273_v58  ;;  %v13544_v44 = vld [vmem:[#allocation22 + $0xfe0] sm:$0xf]  ;;  %v11474_v11 = vld [vmem:[#allocation7 + $0x68] sm:$0x10]  ;;  %v17207_v0 = vor.u32 %v14212_v52, %v11472_v60  ;;  %v13417_v31 = vor.u32 %v14695_v17, %v13416_v57 }
 0x574   : > { %v13096_v1 = vld [vmem:[#allocation22 + $0xc60] sm:$0xf]  ;;  %v17209_v45 = vor.u32 %v14203_v2, %v11474_v11  ;;  %v13545_v8 = vor.u32 %v14727_v42, %v13544_v44  ;;  %v14691_v33 = vld [vmem:[#allocation22 + $0xecc] sm:$0xf0] }
 0x575   : > { %v13224_v30 = vld [vmem:[#allocation22 + $0xd60] sm:$0xf]  ;;  %v14723_v58 = vld [vmem:[#allocation22 + $0xfcc] sm:$0xf0]  ;;  %v13097_v61 = vor.u32 %v14615_v50, %v13096_v1  ;;  %8880 = vmatmul.bf16.vlgmr.msra.gmra.mxu2 %v17207_v0  ;;  %8907 = vmatpush.bf16.msrb.mxu0 %v12793_v12 }
 0x576   : > { %v13400_v43 = vld [vmem:[#allocation22 + $0xec0] sm:$0xf]  ;;  %v13225_v21 = vor.u32 %v14647_v37, %v13224_v30  ;;  %v14611_v38 = vld [vmem:[#allocation22 + $0xc4c] sm:$0xf0]  ;;  %8894 = vmatmul.bf16.vlgmr.msra.gmra.mxu3 %v17209_v45  ;;  %8921 = vmatpush.bf16.msra.mxu1 %v12921_v25 }
 0x577   : > { %8930 = vmatpush.bf16.msrb.mxu2 %v13129_v14  ;;  %8944 = vmatpush.bf16.msrb.mxu3 %v13257_v51  ;;  %v13528_v34 = vld [vmem:[#allocation22 + $0xfc0] sm:$0xf]  ;;  %v14643_v54 = vld [vmem:[#allocation22 + $0xd4c] sm:$0xf0]  ;;  %v11480_v27 = vld [vmem:[#allocation7 + $0x28] sm:$0xf]  ;;  %v13401_v49 = vor.u32 %v14691_v33, %v13400_v43 }
 0x578   : > { %v13080_v36 = vld [vmem:[#allocation22 + $0xc40] sm:$0xf]  ;;  %v14204_v23 = vld [vmem:[#allocation7 + $0x2c] sm:$0xf]  ;;  %v14213_v24 = vld [vmem:[#allocation7 + $0x6c] sm:$0x10]  ;;  %v13529_v59 = vor.u32 %v14723_v58, %v13528_v34 }
 0x579   : > { %v13208_v32 = vld [vmem:[#allocation22 + $0xd40] sm:$0xf]  ;;  %8956 = vmatpush.bf16.msra.mxu0 %v13417_v31  ;;  %v11482_v9 = vld [vmem:[#allocation7 + $0x70] sm:$0x10]  ;;  %v14687_v14 = vld [vmem:[#allocation22 + $0xeac] sm:$0xf0]  ;;  %v13081_v51 = vor.u32 %v14611_v38, %v13080_v36  ;;  %v17213_v16 = vor.u32 %v14213_v24, %v11480_v27 }
 0x57a   : > { %v13384_v26 = vld [vmem:[#allocation22 + $0xea0] sm:$0xf]  ;;  %8970 = vmatpush.bf16.msrb.mxu1 %v13545_v8  ;;  %v17215_v15 = vor.u32 %v14204_v23, %v11482_v9  ;;  %v14719_v18 = vld [vmem:[#allocation22 + $0xfac] sm:$0xf0]  ;;  %v13209_v4 = vor.u32 %v14643_v54, %v13208_v32  ;;  %v11488_v9 = vld [vmem:[#allocation7 + $0x30] sm:$0xf] }
 0x57b   : > { %8931 = vmatpush.bf16.msrb.mxu2 %v13113_v6  ;;  %8945 = vmatpush.bf16.msrb.mxu3 %v13241_v10  ;;  %v13512_v5 = vld [vmem:[#allocation22 + $0xfa0] sm:$0xf]  ;;  %v14607_v41 = vld [vmem:[#allocation22 + $0xc2c] sm:$0xf0]  ;;  %v13385_v62 = vor.u32 %v14687_v14, %v13384_v26 }
 0x57c   : > { %v13064_v53 = vld [vmem:[#allocation22 + $0xc20] sm:$0xf]  ;;  %v14639_v35 = vld [vmem:[#allocation22 + $0xd2c] sm:$0xf0]  ;;  %8908 = vmatmul.bf16.vlgmr.msrb.gmra.mxu0 %v17213_v16  ;;  %8922 = vmatmul.bf16.vlgmr.msra.gmra.mxu1 %v17215_v15  ;;  %v13513_v22 = vor.u32 %v14719_v18, %v13512_v5 }
 0x57d   : > { %v13192_v19 = vld [vmem:[#allocation22 + $0xd20] sm:$0xf]  ;;  %8957 = vmatpush.bf16.msra.mxu0 %v13401_v49  ;;  %v14683_v57 = vld [vmem:[#allocation22 + $0xe8c] sm:$0xf0]  ;;  %v13065_v48 = vor.u32 %v14607_v41, %v13064_v53  ;;  %v14205_v49 = vld [vmem:[#allocation7 + $0x34] sm:$0xf] }
 0x57e   : > { %v13368_v39 = vld [vmem:[#allocation22 + $0xe80] sm:$0xf]  ;;  %8971 = vmatpush.bf16.msrb.mxu1 %v13529_v59  ;;  %v14715_v7 = vld [vmem:[#allocation22 + $0xf8c] sm:$0xf0]  ;;  %v13193_v44 = vor.u32 %v14639_v35, %v13192_v19 }
 0x57f   : > { %8932 = vmatpush.bf16.msrb.mxu2 %v13097_v61  ;;  %8946 = vmatpush.bf16.msrb.mxu3 %v13225_v21  ;;  %v13496_v17 = vld [vmem:[#allocation22 + $0xf80] sm:$0xf]  ;;  %v14603_v6 = vld [vmem:[#allocation22 + $0xc0c] sm:$0xf0]  ;;  %v13369_v2 = vor.u32 %v14683_v57, %v13368_v39 }
 0x580   : > { %v13048_v42 = vld [vmem:[#allocation22 + $0xc00] sm:$0xf]  ;;  %v14635_v1 = vld [vmem:[#allocation22 + $0xd0c] sm:$0xf0]  ;;  %v13497_v11 = vor.u32 %v14715_v7, %v13496_v17  ;;  %v5161_v7 = vshrl.u32 %v17202_v55, 16 }
 0x581   : > { %v13176_v10 = vld [vmem:[#allocation22 + $0xd00] sm:$0xf]  ;;  %v14759_v60 = vld [vmem:[#allocation22 + $0x10ec] sm:$0xf0]  ;;  %8958 = vmatpush.bf16.msra.mxu0 %v13385_v62  ;;  %v13049_v43 = vor.u32 %v14603_v6, %v13048_v42 }
 0x582   : > { %v13672_v50 = vld [vmem:[#allocation22 + $0x10e0] sm:$0xf]  ;;  %v14791_v37 = vld [vmem:[#allocation22 + $0x11ec] sm:$0xf0]  ;;  %8972 = vmatpush.bf16.msrb.mxu1 %v13513_v22  ;;  %v13177_v33 = vor.u32 %v14635_v1, %v13176_v10  ;;  %v5163_v1 = vrot.slane %v5161_v7, 4 }
 0x583   : > { %8933 = vmatpush.bf16.msrb.mxu2 %v13081_v51  ;;  %8947 = vmatpush.bf16.msrb.mxu3 %v13209_v4  ;;  %v13800_v30 = vld [vmem:[#allocation22 + $0x11e0] sm:$0xf]  ;;  %v5155_v52 = vld [vmem:[#allocation4 + $0x8] sm:$0x11]  ;;  %v13673_v61 = vor.u32 %v14759_v60, %v13672_v50 }
 0x584   : > { %v13352_v12 = vld [vmem:[#allocation22 + $0xe60] sm:$0xf]  ;;  %5157 = vst [vmem:[#allocation7 + $0x78] sm:$0x11] %v5155_v52  ;;  %v14679_v25 = vld [vmem:[#allocation22 + $0xe6c] sm:$0xf0]  ;;  %v13801_v21 = vor.u32 %v14791_v37, %v13800_v30 }
 0x585   : > { %v13480_v31 = vld [vmem:[#allocation22 + $0xf60] sm:$0xf]  ;;  %v14711_v8 = vld [vmem:[#allocation22 + $0xf6c] sm:$0xf0]  ;;  %8959 = vmatpush.bf16.msra.mxu0 %v13369_v2  ;;  %v13353_v54 = vor.u32 %v14679_v25, %v13352_v12 }
 0x586   : > { %v13336_v34 = vld [vmem:[#allocation22 + $0xe40] sm:$0xf]  ;;  %v14675_v58 = vld [vmem:[#allocation22 + $0xe4c] sm:$0xf0]  ;;  %8973 = vmatpush.bf16.msrb.mxu1 %v13497_v11  ;;  %v13481_v27 = vor.u32 %v14711_v8, %v13480_v31 }
 0x587   : > { %8934 = vmatpush.bf16.msrb.mxu2 %v13065_v48  ;;  %8948 = vmatpush.bf16.msrb.mxu3 %v13193_v44  ;;  %v13464_v36 = vld [vmem:[#allocation22 + $0xf40] sm:$0xf]  ;;  %v14707_v38 = vld [vmem:[#allocation22 + $0xf4c] sm:$0xf0]  ;;  %v13337_v51 = vor.u32 %v14675_v58, %v13336_v34  ;;  %v5164_v48 = vshll.u32 %v17202_v55, 16 }
 0x588   : > { %v13656_v32 = vld [vmem:[#allocation22 + $0x10c0] sm:$0xf]  ;;  %v14755_v23 = vld [vmem:[#allocation22 + $0x10cc] sm:$0xf0]  ;;  %v13465_v5 = vor.u32 %v14707_v38, %v13464_v36  ;;  %v14277_v38 = vld [vmem:[#allocation22 + $0x1e4] sm:$0xf] }
 0x589   : > { %v13784_v26 = vld [vmem:[#allocation22 + $0x11c0] sm:$0xf]  ;;  %v14787_v24 = vld [vmem:[#allocation22 + $0x11cc] sm:$0xf0]  ;;  %v13657_v19 = vor.u32 %v14755_v23, %v13656_v32  ;;  %8960 = vmatpush.bf16.msra.mxu0 %v13353_v54  ;;  %v5166_v50 = vrot.slane %v5164_v48, 5 }
 0x58a   : > { %v13640_v59 = vld [vmem:[#allocation22 + $0x10a0] sm:$0xf]  ;;  %v14751_v14 = vld [vmem:[#allocation22 + $0x10ac] sm:$0xf0]  ;;  %v13785_v35 = vor.u32 %v14787_v24, %v13784_v26  ;;  %8974 = vmatpush.bf16.msrb.mxu1 %v13481_v27  ;;  %v11754_v32 = vld [vmem:[#allocation22 + $0x1f0] sm:$0xf0] }
 0x58b   : > { %8935 = vmatpush.bf16.msrb.mxu2 %v13049_v43  ;;  %8949 = vmatpush.bf16.msrb.mxu3 %v13177_v33  ;;  %v14214_v18 = vld [vmem:[#allocation7 + $0x74] sm:$0x10]  ;;  %v11490_v4 = vld [vmem:[#allocation7 + $0x78] sm:$0x10]  ;;  %v14671_v41 = vld [vmem:[#allocation22 + $0xe2c] sm:$0xf0]  ;;  %v13641_v52 = vor.u32 %v14751_v14, %v13640_v59  ;;  %v5167_v8 = vor.u32 %v5166_v50, %v5163_v1 }
 0x58c   : > { %v13320_v53 = vld [vmem:[#allocation22 + $0xe20] sm:$0xf]  ;;  %v17219_v62 = vor.u32 %v14214_v18, %v11488_v9  ;;  %v17221_v22 = vor.u32 %v14205_v49, %v11490_v4  ;;  %v14783_v57 = vld [vmem:[#allocation22 + $0x11ac] sm:$0xf0]  ;;  %v11757_v4 = vor.u32 %v14277_v38, %v11754_v32  ;;  %v14269_v1 = vld [vmem:[#allocation22 + $0x1a4] sm:$0xf] }
 0x58d   : > { %v13768_v39 = vld [vmem:[#allocation22 + $0x11a0] sm:$0xf]  ;;  %v5159_v17 = vld [vmem:[#allocation4 + $0x8] sm:$0x33]  ;;  %8961 = vmatpush.bf16.msra.mxu0 %v13337_v51  ;;  %v13321_v25 = vor.u32 %v14671_v41, %v13320_v53  ;;  %v5168_v54 = vrot.slane %v5167_v8, 4 }
 0x58e   : > { %v13448_v44 = vld [vmem:[#allocation22 + $0xf20] sm:$0xf]  ;;  %v14703_v42 = vld [vmem:[#allocation22 + $0xf2c] sm:$0xf0]  ;;  %v5170_v6 = vshll.u32 %v5159_v17, 16  ;;  %v5174_v10 = vshrl.u32 %v5159_v17, 16  ;;  %8936 = vmatmul.bf16.vlgmr.msrb.gmra.mxu2 %v17219_v62  ;;  %8950 = vmatmul.bf16.vlgmr.msrb.gmra.mxu3 %v17221_v22  ;;  %v13769_v2 = vor.u32 %v14783_v57, %v13768_v39 }
 0x58f   : > { %8984 = vmatpush.bf16.msra.mxu2 %v13673_v61  ;;  %8998 = vmatpush.bf16.msra.mxu3 %v13801_v21  ;;  %v13304_v60 = vld [vmem:[#allocation22 + $0xe00] sm:$0xf]  ;;  %v14667_v30 = vld [vmem:[#allocation22 + $0xe0c] sm:$0xf0]  ;;  %v13449_v31 = vor.u32 %v14703_v42, %v13448_v44  ;;  %v14245_v61 = vld [vmem:[#allocation22 + $0xe4] sm:$0xf] }
 0x590   : > { %v13432_v37 = vld [vmem:[#allocation22 + $0xf00] sm:$0xf]  ;;  %v5172_v11 = vrot.slane %v5170_v6, 5  ;;  %v5176_v12 = vrot.slane %v5174_v10, 4  ;;  %8975 = vmatpush.bf16.msrb.mxu1 %v13465_v5  ;;  %v14747_v43 = vld [vmem:[#allocation22 + $0x108c] sm:$0xf0]  ;;  %v13305_v9 = vor.u32 %v14667_v30, %v13304_v60 }
 0x591   : > { %v13624_v55 = vld [vmem:[#allocation22 + $0x1080] sm:$0xf]  ;;  %v14779_v34 = vld [vmem:[#allocation22 + $0x118c] sm:$0xf0]  ;;  %v11626_v21 = vld [vmem:[#allocation22 + $0xf0] sm:$0xf0]  ;;  %8962 = vmatpush.bf16.msra.mxu0 %v13321_v25 }
 0x592   : > { %v13752_v33 = vld [vmem:[#allocation22 + $0x1180] sm:$0xf]  ;;  %v14699_v58 = vld [vmem:[#allocation22 + $0xf0c] sm:$0xf0]  ;;  %v5177_v36 = vor.u32 %v5176_v12, %v5172_v11  ;;  %v13625_v23 = vor.u32 %v14747_v43, %v13624_v55  ;;  %v5173_v59 = vsel %vm15898_vm5, %v5168_v54, %v5172_v11  ;;  %v11629_v18 = vor.u32 %v14245_v61, %v11626_v21  ;;  %v14241_v53 = vld [vmem:[#allocation22 + $0xc4] sm:$0xf] }
 0x593   : > { %8985 = vmatpush.bf16.msra.mxu2 %v13657_v19  ;;  %8999 = vmatpush.bf16.msra.mxu3 %v13785_v35  ;;  %v13753_v26 = vor.u32 %v14779_v34, %v13752_v33  ;;  %v13608_v24 = vld [vmem:[#allocation22 + $0x1060] sm:$0xf]  ;;  %v13433_v49 = vor.u32 %v14699_v58, %v13432_v37  ;;  %v14743_v14 = vld [vmem:[#allocation22 + $0x106c] sm:$0xf0]  ;;  %5181 = vst [vmem:[#allocation7 + $0x38] sm:$0xff] %v5173_v59  ;;  %vm10149_vm5 = vcmask 253952  }
 0x594   : > { %v5178_v27 = vrot.slane %v5177_v36, 4  ;;  %8976 = vmatpush.bf16.msrb.mxu1 %v13449_v31  ;;  %v13736_v51 = vld [vmem:[#allocation22 + $0x1160] sm:$0xf]  ;;  %v14775_v5 = vld [vmem:[#allocation22 + $0x116c] sm:$0xf0]  ;;  %v13609_v39 = vor.u32 %v14743_v14, %v13608_v24 }
 0x595   : > { %v11610_v41 = vld [vmem:[#allocation22 + $0xd0] sm:$0xf0]  ;;  %v14273_v19 = vld [vmem:[#allocation22 + $0x1c4] sm:$0xf]  ;;  %v13737_v57 = vor.u32 %v14775_v5, %v13736_v51  ;;  %v13592_v17 = vld [vmem:[#allocation22 + $0x1040] sm:$0xf]  ;;  %8963 = vmatpush.bf16.msra.mxu0 %v13305_v9 }
 0x596   : > { %5182 = vst [vmem:[#allocation7 + $0x80] sm:$0x11] %v5178_v27  ;;  %v11738_v35 = vld [vmem:[#allocation22 + $0x1d0] sm:$0xf0]  ;;  %v13720_v7 = vld [vmem:[#allocation22 + $0x1140] sm:$0xf]  ;;  %v11613_v44 = vor.u32 %v14241_v53, %v11610_v41  ;;  %v13593_v60 = vor.u32 %v14739_v28, %v13592_v17 }
 0x597   : > { %8986 = vmatpush.bf16.msra.mxu2 %v13641_v52  ;;  %9000 = vmatpush.bf16.msra.mxu3 %v13769_v2  ;;  %v14771_v48 = vld [vmem:[#allocation22 + $0x114c] sm:$0xf0]  ;;  %v11741_v42 = vor.u32 %v14273_v19, %v11738_v35  ;;  %v14237_v6 = vld [vmem:[#allocation22 + $0xa4] sm:$0xf]  ;;  %v11594_v10 = vld [vmem:[#allocation22 + $0xb0] sm:$0xf0] }
 0x598   : > { %8977 = vmatpush.bf16.msrb.mxu1 %v13433_v49  ;;  %v11722_v50 = vld [vmem:[#allocation22 + $0x1b0] sm:$0xf0]  ;;  %v13721_v30 = vor.u32 %v14771_v48, %v13720_v7  ;;  %v13576_v37 = vld [vmem:[#allocation22 + $0x1020] sm:$0xf]  ;;  %v14735_v52 = vld [vmem:[#allocation22 + $0x102c] sm:$0xf0]  ;;  %v11597_v33 = vor.u32 %v14237_v6, %v11594_v10 }
 0x599   : > { %9012 = vmatpush.bf16.msrb.mxu0 %v11629_v18  ;;  %v13704_v2 = vld [vmem:[#allocation22 + $0x1120] sm:$0xf]  ;;  %v14233_v55 = vld [vmem:[#allocation22 + $0x84] sm:$0xf]  ;;  %v11578_v25 = vld [vmem:[#allocation22 + $0x90] sm:$0xf0]  ;;  %v11725_v34 = vor.u32 %v14269_v1, %v11722_v50  ;;  %v13577_v54 = vor.u32 %v14735_v52, %v13576_v37 }
 0x59a   : > { %v11496_v11 = vld [vmem:[#allocation7 + $0x38] sm:$0xf]  ;;  %v14206_v12 = vld [vmem:[#allocation7 + $0x3c] sm:$0xf]  ;;  %v14767_v31 = vld [vmem:[#allocation22 + $0x112c] sm:$0xf0]  ;;  %v11581_v18 = vor.u32 %v14233_v55, %v11578_v25 }
 0x59b   : > { %8987 = vmatpush.bf16.msra.mxu2 %v13625_v23  ;;  %9001 = vmatpush.bf16.msra.mxu3 %v13753_v26  ;;  %v14265_v58 = vld [vmem:[#allocation22 + $0x184] sm:$0xf]  ;;  %v11706_v36 = vld [vmem:[#allocation22 + $0x190] sm:$0xf0]  ;;  %v13560_v38 = vld [vmem:[#allocation22 + $0x1000] sm:$0xf]  ;;  %v13705_v27 = vor.u32 %v14767_v31, %v13704_v2 }
 0x59c   : > { %9026 = vmatpush.bf16.msra.mxu1 %v11757_v4  ;;  %v14731_v32 = vld [vmem:[#allocation22 + $0x100c] sm:$0xf0]  ;;  %v13688_v23 = vld [vmem:[#allocation22 + $0x1100] sm:$0xf]  ;;  %v14229_v9 = vld [vmem:[#allocation22 + $0x64] sm:$0xf]  ;;  %v11709_v4 = vor.u32 %v14265_v58, %v11706_v36 }
 0x59d   : > { %v14215_v8 = vld [vmem:[#allocation7 + $0x7c] sm:$0x10]  ;;  %v11498_v43 = vld [vmem:[#allocation7 + $0x80] sm:$0x10]  ;;  %9013 = vmatpush.bf16.msrb.mxu0 %v11613_v44  ;;  %v5183_v26 = vld [vmem:[#allocation4 + $0x18] sm:$0xee]  ;;  %v13561_v28 = vor.u32 %v14731_v32, %v13560_v38 }
 0x59e   : > { %v17229_v61 = vor.u32 %v14215_v8, %v11496_v11  ;;  %v17231_v21 = vor.u32 %v14206_v12, %v11498_v43  ;;  %v5184_v24 = vld [vmem:[#allocation4 + $0x8] sm:$0x33]  ;;  %v14309_v14 = vld [vmem:[#allocation22 + $0x2e4] sm:$0xf]  ;;  %v11437_v51 = vrot.slane %v5183_v26, 9 }
 0x59f   : > { %8988 = vmatpush.bf16.msra.mxu2 %v13609_v39  ;;  %9002 = vmatpush.bf16.msra.mxu3 %v13737_v57  ;;  %v11562_v49 = vld [vmem:[#allocation22 + $0x70] sm:$0xf0]  ;;  %v14763_v59 = vld [vmem:[#allocation22 + $0x110c] sm:$0xf0]  ;;  %v5189_v5 = vrot.slane %v5184_v24, 5 }
 0x5a0   : > { %9027 = vmatpush.bf16.msra.mxu1 %v11741_v42  ;;  %8964 = vmatmul.bf16.vlgmr.msra.gmra.mxu0 %v17229_v61  ;;  %v11882_v53 = vld [vmem:[#allocation22 + $0x2f0] sm:$0xf0]  ;;  %v14341_v41 = vld [vmem:[#allocation22 + $0x3e4] sm:$0xf]  ;;  %v13689_v7 = vor.u32 %v14763_v59, %v13688_v23  ;;  %v11565_v10 = vor.u32 %v14229_v9, %v11562_v49 }
 0x5a1   : > { %8978 = vmatmul.bf16.vlgmr.msrb.gmra.mxu1 %v17231_v21  ;;  %9014 = vmatpush.bf16.msrb.mxu0 %v11597_v33  ;;  %v12010_v19 = vld [vmem:[#allocation22 + $0x3f0] sm:$0xf0]  ;;  %v14261_v35 = vld [vmem:[#allocation22 + $0x164] sm:$0xf]  ;;  %v5190_v57 = vsel %vm16163_vm14, %v11437_v51, %v5189_v5  ;;  %v5191_v17 = vrot.slane %v5189_v5, 4  ;;  %v11885_v44 = vor.u32 %v14309_v14, %v11882_v53 }
 0x5a2   : > { %v11690_v39 = vld [vmem:[#allocation22 + $0x170] sm:$0xf0]  ;;  %5194 = vst [vmem:[#allocation7 + $0x40] sm:$0xff] %v5190_v57  ;;  %v14225_v48 = vld [vmem:[#allocation22 + $0x44] sm:$0xf]  ;;  %v12013_v42 = vor.u32 %v14341_v41, %v12010_v19 }
 0x5a3   : > { %8989 = vmatpush.bf16.msra.mxu2 %v13593_v60  ;;  %9003 = vmatpush.bf16.msra.mxu3 %v13721_v30  ;;  %5195 = vst [vmem:[#allocation7 + $0x88] sm:$0x11] %v5191_v17  ;;  %v14305_v6 = vld [vmem:[#allocation22 + $0x2c4] sm:$0xf]  ;;  %v11693_v1 = vor.u32 %v14261_v35, %v11690_v39  ;;  %v11866_v50 = vld [vmem:[#allocation22 + $0x2d0] sm:$0xf0]  ;;  %v11549_v8 = vor.u32 %v14225_v48, %v11546_v13 }
 0x5a4   : > { %9028 = vmatpush.bf16.msra.mxu1 %v11725_v34  ;;  %v14337_v60 = vld [vmem:[#allocation22 + $0x3c4] sm:$0xf]  ;;  %v11994_v30 = vld [vmem:[#allocation22 + $0x3d0] sm:$0xf0]  ;;  %v11869_v12 = vor.u32 %v14305_v6, %v11866_v50 }
 0x5a5   : > { %9015 = vmatpush.bf16.msrb.mxu0 %v11581_v18  ;;  %v14257_v37 = vld [vmem:[#allocation22 + $0x144] sm:$0xf]  ;;  %v11674_v52 = vld [vmem:[#allocation22 + $0x150] sm:$0xf0]  ;;  %v11997_v55 = vor.u32 %v14337_v60, %v11994_v30 }
 0x5a6   : > { %v14221_v2 = vld [vmem:[#allocation22 + $0x24] sm:$0xf]  ;;  %v11530_v11 = vld [vmem:[#allocation22 + $0x30] sm:$0xf0]  ;;  %v11677_v43 = vor.u32 %v14257_v37, %v11674_v52 }
 0x5a7   : > { %8990 = vmatpush.bf16.msra.mxu2 %v13577_v54  ;;  %9004 = vmatpush.bf16.msra.mxu3 %v13705_v27  ;;  %v14301_v25 = vld [vmem:[#allocation22 + $0x2a4] sm:$0xf]  ;;  %v11850_v31 = vld [vmem:[#allocation22 + $0x2b0] sm:$0xf0]  ;;  %v11533_v51 = vor.u32 %v14221_v2, %v11530_v11 }
 0x5a8   : > { %9029 = vmatpush.bf16.msra.mxu1 %v11709_v4  ;;  %v14253_v33 = vld [vmem:[#allocation22 + $0x124] sm:$0xf]  ;;  %v11978_v58 = vld [vmem:[#allocation22 + $0x3b0] sm:$0xf0]  ;;  %v11853_v23 = vor.u32 %v14301_v25, %v11850_v31 }
 0x5a9   : > { %9016 = vmatpush.bf16.msrb.mxu0 %v11565_v10  ;;  %v14333_v34 = vld [vmem:[#allocation22 + $0x3a4] sm:$0xf]  ;;  %v14207_v38 = vld [vmem:[#allocation7 + $0x44] sm:$0xf]  ;;  %v11658_v32 = vld [vmem:[#allocation22 + $0x130] sm:$0xf0] }
 0x5aa   : > { %v11504_v36 = vld [vmem:[#allocation7 + $0x40] sm:$0xf]  ;;  %v14216_v54 = vld [vmem:[#allocation7 + $0x84] sm:$0x10]  ;;  %v11506_v27 = vld [vmem:[#allocation7 + $0x88] sm:$0x10]  ;;  %v11981_v59 = vor.u32 %v14333_v34, %v11978_v58  ;;  %v11661_v5 = vor.u32 %v14253_v33, %v11658_v32 }
 0x5ab   : > { %8991 = vmatpush.bf16.msra.mxu2 %v13561_v28  ;;  %9005 = vmatpush.bf16.msra.mxu3 %v13689_v7  ;;  %v17237_v26 = vor.u32 %v14216_v54, %v11504_v36  ;;  %v17239_v24 = vor.u32 %v14207_v38, %v11506_v27  ;;  %v14217_v9 = vld [vmem:[#allocation22 + $0x4] sm:$0xf]  ;;  %v11514_v49 = vld [vmem:[#allocation22 + $0x10] sm:$0xf0] }
 0x5ac   : > { %9030 = vmatpush.bf16.msra.mxu1 %v11693_v1  ;;  %v14297_v14 = vld [vmem:[#allocation22 + $0x284] sm:$0xf]  ;;  %v11834_v18 = vld [vmem:[#allocation22 + $0x290] sm:$0xf0]  ;;  %v11517_v48 = vor.u32 %v14217_v9, %v11514_v49 }
 0x5ad   : > { %9017 = vmatpush.bf16.msrb.mxu0 %v11549_v8  ;;  %v14329_v4 = vld [vmem:[#allocation22 + $0x384] sm:$0xf]  ;;  %v11962_v53 = vld [vmem:[#allocation22 + $0x390] sm:$0xf0]  ;;  %v11837_v28 = vor.u32 %v14297_v14, %v11834_v18 }
 0x5ae   : > { %8992 = vmatmul.bf16.vlgmr.msra.gmra.mxu2 %v17237_v26  ;;  %9006 = vmatmul.bf16.vlgmr.msra.gmra.mxu3 %v17239_v24  ;;  %v14249_v41 = vld [vmem:[#allocation22 + $0x104] sm:$0xf]  ;;  %v11642_v19 = vld [vmem:[#allocation22 + $0x110] sm:$0xf0]  ;;  %v11965_v7 = vor.u32 %v14329_v4, %v11962_v53 }
 0x5af   : > { %9040 = vmatpush.bf16.msrb.mxu2 %v11885_v44  ;;  %9054 = vmatpush.bf16.msrb.mxu3 %v12013_v42  ;;  %v14373_v35 = vld [vmem:[#allocation22 + $0x4e4] sm:$0xf]  ;;  %v12138_v39 = vld [vmem:[#allocation22 + $0x4f0] sm:$0xf0]  ;;  %v11645_v44 = vor.u32 %v14249_v41, %v11642_v19 }
 0x5b0   : > { %9031 = vmatpush.bf16.msra.mxu1 %v11677_v43  ;;  %v14405_v57 = vld [vmem:[#allocation22 + $0x5e4] sm:$0xf]  ;;  %v12266_v17 = vld [vmem:[#allocation22 + $0x5f0] sm:$0xf0]  ;;  %v12141_v10 = vor.u32 %v14373_v35, %v12138_v39 }
 0x5b1   : > { %9018 = vmatpush.bf16.msrb.mxu0 %v11533_v51  ;;  %v14369_v42 = vld [vmem:[#allocation22 + $0x4c4] sm:$0xf]  ;;  %v12269_v1 = vor.u32 %v14405_v57, %v12266_v17  ;;  %v11818_v50 = vld [vmem:[#allocation22 + $0x270] sm:$0xf0] }
 0x5b2   : > { %v14293_v6 = vld [vmem:[#allocation22 + $0x264] sm:$0xf]  ;;  %v11946_v30 = vld [vmem:[#allocation22 + $0x370] sm:$0xf0] }
 0x5b3   : > { %9041 = vmatpush.bf16.msrb.mxu2 %v11869_v12  ;;  %9055 = vmatpush.bf16.msrb.mxu3 %v11997_v55  ;;  %v14325_v60 = vld [vmem:[#allocation22 + $0x364] sm:$0xf]  ;;  %v12122_v13 = vld [vmem:[#allocation22 + $0x4d0] sm:$0xf0]  ;;  %v11821_v2 = vor.u32 %v14293_v6, %v11818_v50 }
 0x5b4   : > { %9032 = vmatpush.bf16.msra.mxu1 %v11661_v5  ;;  %v14401_v37 = vld [vmem:[#allocation22 + $0x5c4] sm:$0xf]  ;;  %v12250_v52 = vld [vmem:[#allocation22 + $0x5d0] sm:$0xf0]  ;;  %v11949_v11 = vor.u32 %v14325_v60, %v11946_v30  ;;  %v12125_v25 = vor.u32 %v14369_v42, %v12122_v13 }
 0x5b5   : > { %9019 = vmatpush.bf16.msrb.mxu0 %v11517_v48  ;;  %v14365_v12 = vld [vmem:[#allocation22 + $0x4a4] sm:$0xf]  ;;  %v12253_v31 = vor.u32 %v14401_v37, %v12250_v52  ;;  %v11802_v8 = vld [vmem:[#allocation22 + $0x250] sm:$0xf0] }
 0x5b6   : > { %v14289_v55 = vld [vmem:[#allocation22 + $0x244] sm:$0xf]  ;;  %v11930_v33 = vld [vmem:[#allocation22 + $0x350] sm:$0xf0] }
 0x5b7   : > { %9042 = vmatpush.bf16.msrb.mxu2 %v11853_v23  ;;  %9056 = vmatpush.bf16.msrb.mxu3 %v11981_v59  ;;  %v14321_v43 = vld [vmem:[#allocation22 + $0x344] sm:$0xf]  ;;  %v12106_v34 = vld [vmem:[#allocation22 + $0x4b0] sm:$0xf0]  ;;  %v11805_v38 = vor.u32 %v14289_v55, %v11802_v8 }
 0x5b8   : > { %9033 = vmatpush.bf16.msra.mxu1 %v11645_v44  ;;  %v14397_v58 = vld [vmem:[#allocation22 + $0x5a4] sm:$0xf]  ;;  %v12234_v36 = vld [vmem:[#allocation22 + $0x5b0] sm:$0xf0]  ;;  %9020 = vmatmul.bf16.vlgmr.msrb.gmra.mxu0 %v17167_v63  ;;  %v11933_v32 = vor.u32 %v14321_v43, %v11930_v33  ;;  %v12109_v23 = vor.u32 %v14365_v12, %v12106_v34 }
 0x5b9   : > { %9068 = vmatpush.bf16.msra.mxu0 %v12141_v10  ;;  %v14361_v54 = vld [vmem:[#allocation22 + $0x484] sm:$0xf]  ;;  %v12237_v9 = vor.u32 %v14397_v58, %v12234_v36  ;;  %v11786_v49 = vld [vmem:[#allocation22 + $0x230] sm:$0xf0] }
 0x5ba   : > { %v14285_v27 = vld [vmem:[#allocation22 + $0x224] sm:$0xf]  ;;  %v11914_v14 = vld [vmem:[#allocation22 + $0x330] sm:$0xf0] }
 0x5bb   : > { %9043 = vmatpush.bf16.msrb.mxu2 %v11837_v28  ;;  %9057 = vmatpush.bf16.msrb.mxu3 %v11965_v7  ;;  %v14317_v59 = vld [vmem:[#allocation22 + $0x324] sm:$0xf]  ;;  %v12090_v51 = vld [vmem:[#allocation22 + $0x490] sm:$0xf0]  ;;  %v11789_v4 = vor.u32 %v14285_v27, %v11786_v49 }
 0x5bc   : > { %9082 = vmatpush.bf16.msrb.mxu1 %v12269_v1  ;;  %v14393_v5 = vld [vmem:[#allocation22 + $0x584] sm:$0xf]  ;;  %v12218_v18 = vld [vmem:[#allocation22 + $0x590] sm:$0xf0]  ;;  %v11917_v53 = vor.u32 %v14317_v59, %v11914_v14  ;;  %v12093_v39 = vor.u32 %v14361_v54, %v12090_v51 }
 0x5bd   : > { %9034 = vmatmul.bf16.vlgmr.msra.gmra.mxu1 %v17169_v56  ;;  %9069 = vmatpush.bf16.msra.mxu0 %v12125_v25  ;;  %v14357_v41 = vld [vmem:[#allocation22 + $0x464] sm:$0xf]  ;;  %v12074_v19 = vld [vmem:[#allocation22 + $0x470] sm:$0xf0]  ;;  %v12221_v57 = vor.u32 %v14393_v5, %v12218_v18 }
 0x5be   : > { %v14281_v35 = vld [vmem:[#allocation22 + $0x204] sm:$0xf]  ;;  %v11770_v17 = vld [vmem:[#allocation22 + $0x210] sm:$0xf0]  ;;  %v12077_v30 = vor.u32 %v14357_v41, %v12074_v19 }
 0x5bf   : > { %9044 = vmatpush.bf16.msrb.mxu2 %v11821_v2  ;;  %9058 = vmatpush.bf16.msrb.mxu3 %v11949_v11  ;;  %v14313_v28 = vld [vmem:[#allocation22 + $0x304] sm:$0xf]  ;;  %v11898_v7 = vld [vmem:[#allocation22 + $0x310] sm:$0xf0]  ;;  %v11773_v50 = vor.u32 %v14281_v35, %v11770_v17 }
 0x5c0   : > { %9083 = vmatpush.bf16.msrb.mxu1 %v12253_v31  ;;  %v14389_v48 = vld [vmem:[#allocation22 + $0x564] sm:$0xf]  ;;  %v12202_v44 = vld [vmem:[#allocation22 + $0x570] sm:$0xf0]  ;;  %v11901_v60 = vor.u32 %v14313_v28, %v11898_v7 }
 0x5c1   : > { %9070 = vmatpush.bf16.msra.mxu0 %v12109_v23  ;;  %v14437_v42 = vld [vmem:[#allocation22 + $0x6e4] sm:$0xf]  ;;  %v12394_v6 = vld [vmem:[#allocation22 + $0x6f0] sm:$0xf0]  ;;  %v12205_v13 = vor.u32 %v14389_v48, %v12202_v44 }
 0x5c2   : > { %v14469_v10 = vld [vmem:[#allocation22 + $0x7e4] sm:$0xf]  ;;  %v12522_v1 = vld [vmem:[#allocation22 + $0x7f0] sm:$0xf0]  ;;  %v12397_v12 = vor.u32 %v14437_v42, %v12394_v6 }
 0x5c3   : > { %9045 = vmatpush.bf16.msrb.mxu2 %v11805_v38  ;;  %9059 = vmatpush.bf16.msrb.mxu3 %v11933_v32  ;;  %v14353_v37 = vld [vmem:[#allocation22 + $0x444] sm:$0xf]  ;;  %v12058_v52 = vld [vmem:[#allocation22 + $0x450] sm:$0xf0]  ;;  %v12525_v55 = vor.u32 %v14469_v10, %v12522_v1 }
 0x5c4   : > { %9084 = vmatpush.bf16.msrb.mxu1 %v12237_v9  ;;  %v14385_v2 = vld [vmem:[#allocation22 + $0x544] sm:$0xf]  ;;  %v12186_v11 = vld [vmem:[#allocation22 + $0x550] sm:$0xf0]  ;;  %v12061_v33 = vor.u32 %v14353_v37, %v12058_v52 }
 0x5c5   : > { %9071 = vmatpush.bf16.msra.mxu0 %v12093_v39  ;;  %v14433_v25 = vld [vmem:[#allocation22 + $0x6c4] sm:$0xf]  ;;  %v12378_v31 = vld [vmem:[#allocation22 + $0x6d0] sm:$0xf0]  ;;  %v12189_v34 = vor.u32 %v14385_v2, %v12186_v11 }
 0x5c6   : > { %v14465_v8 = vld [vmem:[#allocation22 + $0x7c4] sm:$0xf]  ;;  %v12506_v43 = vld [vmem:[#allocation22 + $0x7d0] sm:$0xf0]  ;;  %v12381_v54 = vor.u32 %v14433_v25, %v12378_v31 }
 0x5c7   : > { %9046 = vmatpush.bf16.msrb.mxu2 %v11789_v4  ;;  %9060 = vmatpush.bf16.msrb.mxu3 %v11917_v53  ;;  %v14349_v58 = vld [vmem:[#allocation22 + $0x424] sm:$0xf]  ;;  %v12042_v36 = vld [vmem:[#allocation22 + $0x430] sm:$0xf0]  ;;  %v12509_v27 = vor.u32 %v14465_v8, %v12506_v43 }
 0x5c8   : > { %9085 = vmatpush.bf16.msrb.mxu1 %v12221_v57  ;;  %v14381_v38 = vld [vmem:[#allocation22 + $0x524] sm:$0xf]  ;;  %v12170_v32 = vld [vmem:[#allocation22 + $0x530] sm:$0xf0]  ;;  %v12045_v14 = vor.u32 %v14349_v58, %v12042_v36 }
 0x5c9   : > { %9072 = vmatpush.bf16.msra.mxu0 %v12077_v30  ;;  %v14429_v23 = vld [vmem:[#allocation22 + $0x6a4] sm:$0xf]  ;;  %v12362_v9 = vld [vmem:[#allocation22 + $0x6b0] sm:$0xf0]  ;;  %v12173_v51 = vor.u32 %v14381_v38, %v12170_v32 }
 0x5ca   : > { %v14461_v49 = vld [vmem:[#allocation22 + $0x7a4] sm:$0xf]  ;;  %v12490_v59 = vld [vmem:[#allocation22 + $0x7b0] sm:$0xf0]  ;;  %v12365_v41 = vor.u32 %v14429_v23, %v12362_v9 }
 0x5cb   : > { %9047 = vmatpush.bf16.msrb.mxu2 %v11773_v50  ;;  %9061 = vmatpush.bf16.msrb.mxu3 %v11901_v60  ;;  %v14345_v5 = vld [vmem:[#allocation22 + $0x404] sm:$0xf]  ;;  %v12026_v18 = vld [vmem:[#allocation22 + $0x410] sm:$0xf0]  ;;  %v12493_v19 = vor.u32 %v14461_v49, %v12490_v59 }
 0x5cc   : > { %9086 = vmatpush.bf16.msrb.mxu1 %v12205_v13  ;;  %v14377_v4 = vld [vmem:[#allocation22 + $0x504] sm:$0xf]  ;;  %v12154_v53 = vld [vmem:[#allocation22 + $0x510] sm:$0xf0]  ;;  %v12029_v42 = vor.u32 %v14345_v5, %v12026_v18 }
 0x5cd   : > { %9073 = vmatpush.bf16.msra.mxu0 %v12061_v33  ;;  %v14501_v35 = vld [vmem:[#allocation22 + $0x8e4] sm:$0xf]  ;;  %v12650_v39 = vld [vmem:[#allocation22 + $0x8f0] sm:$0xf0]  ;;  %v12157_v6 = vor.u32 %v14377_v4, %v12154_v53 }
 0x5ce   : > { %9048 = vmatmul.bf16.vlgmr.msrb.gmra.mxu2 %v17180_v40  ;;  %9062 = vmatmul.bf16.vlgmr.msrb.gmra.mxu3 %v17182_v29  ;;  %v14533_v57 = vld [vmem:[#allocation22 + $0x9e4] sm:$0xf]  ;;  %v12778_v17 = vld [vmem:[#allocation22 + $0x9f0] sm:$0xf0]  ;;  %v12653_v10 = vor.u32 %v14501_v35, %v12650_v39 }
 0x5cf   : > { %9096 = vmatpush.bf16.msra.mxu2 %v12397_v12  ;;  %9110 = vmatpush.bf16.msra.mxu3 %v12525_v55  ;;  %v14425_v28 = vld [vmem:[#allocation22 + $0x684] sm:$0xf]  ;;  %v12346_v7 = vld [vmem:[#allocation22 + $0x690] sm:$0xf0]  ;;  %v12781_v1 = vor.u32 %v14533_v57, %v12778_v17 }
 0x5d0   : > { %9087 = vmatpush.bf16.msrb.mxu1 %v12189_v34  ;;  %v14457_v48 = vld [vmem:[#allocation22 + $0x784] sm:$0xf]  ;;  %v12474_v44 = vld [vmem:[#allocation22 + $0x790] sm:$0xf0]  ;;  %v12349_v30 = vor.u32 %v14425_v28, %v12346_v7 }
 0x5d1   : > { %9074 = vmatpush.bf16.msra.mxu0 %v12045_v14  ;;  %v14497_v50 = vld [vmem:[#allocation22 + $0x8c4] sm:$0xf]  ;;  %v12634_v60 = vld [vmem:[#allocation22 + $0x8d0] sm:$0xf0]  ;;  %v12477_v13 = vor.u32 %v14457_v48, %v12474_v44  ;;  %v8769_v11 = vpop.f32.mrf.mxu2  ;;  %v8783_v12 = vpop.f32.mrf.mxu3 }
 0x5d2   : > { %v14529_v37 = vld [vmem:[#allocation22 + $0x9c4] sm:$0xf]  ;;  %v12762_v52 = vld [vmem:[#allocation22 + $0x9d0] sm:$0xf0]  ;;  %v8784_v8 = vadd.f32 %v8783_v12, %v8769_v11  ;;  %v12637_v43 = vor.u32 %v14497_v50, %v12634_v60 }
 0x5d3   : > { %9097 = vmatpush.bf16.msra.mxu2 %v12381_v54  ;;  %9111 = vmatpush.bf16.msra.mxu3 %v12509_v27  ;;  %v14421_v2 = vld [vmem:[#allocation22 + $0x664] sm:$0xf]  ;;  %v12330_v55 = vld [vmem:[#allocation22 + $0x670] sm:$0xf0]  ;;  %v12765_v33 = vor.u32 %v14529_v37, %v12762_v52 }
 0x5d4   : > { %9088 = vmatpush.bf16.msrb.mxu1 %v12173_v51  ;;  %v14453_v25 = vld [vmem:[#allocation22 + $0x764] sm:$0xf]  ;;  %v12458_v31 = vld [vmem:[#allocation22 + $0x770] sm:$0xf0]  ;;  %v12333_v36 = vor.u32 %v14421_v2, %v12330_v55 }
 0x5d5   : > { %9075 = vmatpush.bf16.msra.mxu0 %v12029_v42  ;;  %v14493_v34 = vld [vmem:[#allocation22 + $0x8a4] sm:$0xf]  ;;  %v12618_v58 = vld [vmem:[#allocation22 + $0x8b0] sm:$0xf0]  ;;  %v12461_v38 = vor.u32 %v14453_v25, %v12458_v31  ;;  %v8797_v28 = vpop.f32.mrf.mxu0  ;;  %v8811_v7 = vpop.f32.mrf.mxu1 }
 0x5d6   : > { %v14525_v32 = vld [vmem:[#allocation22 + $0x9a4] sm:$0xf]  ;;  %v12746_v54 = vld [vmem:[#allocation22 + $0x9b0] sm:$0xf0]  ;;  %v12621_v59 = vor.u32 %v14493_v34, %v12618_v58 }
 0x5d7   : > { %9098 = vmatpush.bf16.msra.mxu2 %v12365_v41  ;;  %9112 = vmatpush.bf16.msra.mxu3 %v12493_v19  ;;  %v14417_v27 = vld [vmem:[#allocation22 + $0x644] sm:$0xf]  ;;  %v12314_v23 = vld [vmem:[#allocation22 + $0x650] sm:$0xf0]  ;;  %v12749_v14 = vor.u32 %v14525_v32, %v12746_v54 }
 0x5d8   : > { %9089 = vmatpush.bf16.msrb.mxu1 %v12157_v6  ;;  %9076 = vmatmul.bf16.vlgmr.msra.gmra.mxu0 %v17186_v3  ;;  %v14449_v9 = vld [vmem:[#allocation22 + $0x744] sm:$0xf]  ;;  %v12442_v49 = vld [vmem:[#allocation22 + $0x750] sm:$0xf0]  ;;  %v12317_v18 = vor.u32 %v14417_v27, %v12314_v23 }
 0x5d9   : > { %9124 = vmatpush.bf16.msrb.mxu0 %v12653_v10  ;;  %v14489_v51 = vld [vmem:[#allocation22 + $0x884] sm:$0xf]  ;;  %v12602_v5 = vld [vmem:[#allocation22 + $0x890] sm:$0xf0]  ;;  %v12445_v4 = vor.u32 %v14449_v9, %v12442_v49  ;;  %v17249_v17 = vpop.f32.mrf.mxu2  ;;  %v17251_v52 = vpop.f32.mrf.mxu3 }
 0x5da   : > { %v14521_v53 = vld [vmem:[#allocation22 + $0x984] sm:$0xf]  ;;  %v12730_v41 = vld [vmem:[#allocation22 + $0x990] sm:$0xf0]  ;;  %v12605_v48 = vor.u32 %v14489_v51, %v12602_v5 }
 0x5db   : > { %9099 = vmatpush.bf16.msra.mxu2 %v12349_v30  ;;  %9113 = vmatpush.bf16.msra.mxu3 %v12477_v13  ;;  %v14413_v19 = vld [vmem:[#allocation22 + $0x624] sm:$0xf]  ;;  %v12298_v35 = vld [vmem:[#allocation22 + $0x630] sm:$0xf0]  ;;  %v12733_v44 = vor.u32 %v14521_v53, %v12730_v41 }
 0x5dc   : > { %9138 = vmatpush.bf16.msra.mxu1 %v12781_v1  ;;  %v14445_v39 = vld [vmem:[#allocation22 + $0x724] sm:$0xf]  ;;  %v12426_v57 = vld [vmem:[#allocation22 + $0x730] sm:$0xf0]  ;;  %v8798_v1 = vadd.f32 %v8797_v28, %v8784_v8  ;;  %v12301_v50 = vor.u32 %v14413_v19, %v12298_v35 }
 0x5dd   : > { %9090 = vmatmul.bf16.vlgmr.msrb.gmra.mxu1 %v17188_v47  ;;  %9125 = vmatpush.bf16.msrb.mxu0 %v12637_v43  ;;  %v14485_v42 = vld [vmem:[#allocation22 + $0x864] sm:$0xf]  ;;  %v12586_v6 = vld [vmem:[#allocation22 + $0x870] sm:$0xf0]  ;;  %v12429_v60 = vor.u32 %v14445_v39, %v12426_v57  ;;  %v17253_v51 = vpop.f32.mrf.mxu0  ;;  %v17255_v5 = vpop.f32.mrf.mxu1 }
 0x5de   : > { %v14517_v10 = vld [vmem:[#allocation22 + $0x964] sm:$0xf]  ;;  %v12714_v30 = vld [vmem:[#allocation22 + $0x970] sm:$0xf0]  ;;  %v8812_v55 = vadd.f32 %v8811_v7, %v8798_v1 }
 0x5df   : > { %9100 = vmatpush.bf16.msra.mxu2 %v12333_v36  ;;  %9114 = vmatpush.bf16.msra.mxu3 %v12461_v38  ;;  %v14409_v13 = vld [vmem:[#allocation22 + $0x604] sm:$0xf]  ;;  %v12282_v37 = vld [vmem:[#allocation22 + $0x610] sm:$0xf0]  ;;  %v12717_v8 = vor.u32 %v14517_v10, %v12714_v30 }
 0x5e0   : > { %9139 = vmatpush.bf16.msra.mxu1 %v12765_v33  ;;  %v14441_v2 = vld [vmem:[#allocation22 + $0x704] sm:$0xf]  ;;  %v12410_v11 = vld [vmem:[#allocation22 + $0x710] sm:$0xf0]  ;;  %v12589_v33 = vor.u32 %v14485_v42, %v12586_v6  ;;  %v12285_v58 = vor.u32 %v14409_v13, %v12282_v37 }
 0x5e1   : > { %9126 = vmatpush.bf16.msrb.mxu0 %v12621_v59  ;;  %v14565_v12 = vld [vmem:[#allocation22 + $0xae4] sm:$0xf]  ;;  %v12906_v25 = vld [vmem:[#allocation22 + $0xaf0] sm:$0xf0]  ;;  %v12413_v36 = vor.u32 %v14441_v2, %v12410_v11  ;;  %v8825_v39 = vpop.f32.mrf.mxu2  ;;  %v8839_v10 = vpop.f32.mrf.mxu3 }
 0x5e2   : > { %v14597_v31 = vld [vmem:[#allocation22 + $0xbe4] sm:$0xf]  ;;  %v13034_v43 = vld [vmem:[#allocation22 + $0xbf0] sm:$0xf0]  ;;  %v12909_v27 = vor.u32 %v14565_v12, %v12906_v25 }
 0x5e3   : > { %9101 = vmatpush.bf16.msra.mxu2 %v12317_v18  ;;  %9115 = vmatpush.bf16.msra.mxu3 %v12445_v4  ;;  %v14481_v34 = vld [vmem:[#allocation22 + $0x844] sm:$0xf]  ;;  %v12570_v38 = vld [vmem:[#allocation22 + $0x850] sm:$0xf0]  ;;  %v13037_v23 = vor.u32 %v14597_v31, %v13034_v43 }
 0x5e4   : > { %9140 = vmatpush.bf16.msra.mxu1 %v12749_v14  ;;  %v14513_v32 = vld [vmem:[#allocation22 + $0x944] sm:$0xf]  ;;  %v12698_v54 = vld [vmem:[#allocation22 + $0x950] sm:$0xf0]  ;;  %v12573_v18 = vor.u32 %v14481_v34, %v12570_v38 }
 0x5e5   : > { %9127 = vmatpush.bf16.msrb.mxu0 %v12605_v48  ;;  %v14561_v9 = vld [vmem:[#allocation22 + $0xac4] sm:$0xf]  ;;  %v12890_v49 = vld [vmem:[#allocation22 + $0xad0] sm:$0xf0]  ;;  %v12701_v4 = vor.u32 %v14513_v32, %v12698_v54  ;;  %v8826_v48 = vadd.f32 %v8825_v39, %v8812_v55 }
 0x5e6   : > { %v14593_v59 = vld [vmem:[#allocation22 + $0xbc4] sm:$0xf]  ;;  %v13018_v14 = vld [vmem:[#allocation22 + $0xbd0] sm:$0xf0]  ;;  %v12893_v57 = vor.u32 %v14561_v9, %v12890_v49 }
 0x5e7   : > { %9102 = vmatpush.bf16.msra.mxu2 %v12301_v50  ;;  %9116 = vmatpush.bf16.msra.mxu3 %v12429_v60  ;;  %v14477_v53 = vld [vmem:[#allocation22 + $0x824] sm:$0xf]  ;;  %v12554_v41 = vld [vmem:[#allocation22 + $0x830] sm:$0xf0]  ;;  %v13021_v28 = vor.u32 %v14593_v59, %v13018_v14  ;;  %v8840_v37 = vadd.f32 %v8839_v10, %v8826_v48  ;;  %v8867_v59 = vpop.f32.mrf.mxu1 }
 0x5e8   : > { %9141 = vmatpush.bf16.msra.mxu1 %v12733_v44  ;;  %v14509_v19 = vld [vmem:[#allocation22 + $0x924] sm:$0xf]  ;;  %v12682_v35 = vld [vmem:[#allocation22 + $0x930] sm:$0xf0]  ;;  %v12557_v1 = vor.u32 %v14477_v53, %v12554_v41 }
 0x5e9   : > { %9128 = vmatpush.bf16.msrb.mxu0 %v12589_v33  ;;  %v14557_v7 = vld [vmem:[#allocation22 + $0xaa4] sm:$0xf]  ;;  %v12874_v44 = vld [vmem:[#allocation22 + $0xab0] sm:$0xf0]  ;;  %v12685_v50 = vor.u32 %v14509_v19, %v12682_v35 }
 0x5ea   : > { %v14589_v42 = vld [vmem:[#allocation22 + $0xba4] sm:$0xf]  ;;  %v13002_v6 = vld [vmem:[#allocation22 + $0xbb0] sm:$0xf0]  ;;  %v12877_v55 = vor.u32 %v14557_v7, %v12874_v44 }
 0x5eb   : > { %9103 = vmatpush.bf16.msra.mxu2 %v12285_v58  ;;  %9117 = vmatpush.bf16.msra.mxu3 %v12413_v36  ;;  %v14473_v60 = vld [vmem:[#allocation22 + $0x804] sm:$0xf]  ;;  %v12538_v30 = vld [vmem:[#allocation22 + $0x810] sm:$0xf0]  ;;  %v13005_v25 = vor.u32 %v14589_v42, %v13002_v6  ;;  %v8853_v36 = vpop.f32.mrf.mxu0 }
 0x5ec   : > { %9142 = vmatpush.bf16.msra.mxu1 %v12717_v8  ;;  %v14505_v13 = vld [vmem:[#allocation22 + $0x904] sm:$0xf]  ;;  %v12666_v2 = vld [vmem:[#allocation22 + $0x910] sm:$0xf0]  ;;  %v12541_v38 = vor.u32 %v14473_v60, %v12538_v30  ;;  %v8854_v54 = vadd.f32 %v8853_v36, %v8840_v37  ;;  %v17263_v37 = vpop.f32.mrf.mxu2 }
 0x5ed   : > { %9129 = vmatpush.bf16.msrb.mxu0 %v12573_v18  ;;  %v14629_v11 = vld [vmem:[#allocation22 + $0xce4] sm:$0xf]  ;;  %v13162_v12 = vld [vmem:[#allocation22 + $0xcf0] sm:$0xf0]  ;;  %v12669_v32 = vor.u32 %v14505_v13, %v12666_v2 }
 0x5ee   : > { %9104 = vmatmul.bf16.vlgmr.msra.gmra.mxu2 %v17194_v20  ;;  %9118 = vmatmul.bf16.vlgmr.msra.gmra.mxu3 %v17196_v46  ;;  %v14661_v31 = vld [vmem:[#allocation22 + $0xde4] sm:$0xf]  ;;  %v13290_v43 = vld [vmem:[#allocation22 + $0xdf0] sm:$0xf0]  ;;  %v17259_v19 = vadd.f32 %v8867_v59, %v8854_v54 }
 0x5ef   : > { %9152 = vmatpush.bf16.msrb.mxu2 %v12909_v27  ;;  %9166 = vmatpush.bf16.msrb.mxu3 %v13037_v23  ;;  %v14553_v33 = vld [vmem:[#allocation22 + $0xa84] sm:$0xf]  ;;  %v12858_v8 = vld [vmem:[#allocation22 + $0xa90] sm:$0xf0]  ;;  %v13165_v27 = vor.u32 %v14629_v11, %v13162_v12  ;;  %v13293_v23 = vor.u32 %v14661_v31, %v13290_v43  ;;  %v17269_v59 = vpop.f32.mrf.mxu1 }
 0x5f0   : > { %9143 = vmatpush.bf16.msra.mxu1 %v12701_v4  ;;  %v14585_v34 = vld [vmem:[#allocation22 + $0xb84] sm:$0xf]  ;;  %v12986_v58 = vld [vmem:[#allocation22 + $0xb90] sm:$0xf0]  ;;  %v12861_v14 = vor.u32 %v14553_v33, %v12858_v8 }
 0x5f1   : > { %9130 = vmatpush.bf16.msrb.mxu0 %v12557_v1  ;;  %v14625_v9 = vld [vmem:[#allocation22 + $0xcc4] sm:$0xf]  ;;  %v13146_v49 = vld [vmem:[#allocation22 + $0xcd0] sm:$0xf0]  ;;  %v12989_v18 = vor.u32 %v14585_v34, %v12986_v58 }
 0x5f2   : > { %v14657_v4 = vld [vmem:[#allocation22 + $0xdc4] sm:$0xf]  ;;  %v13274_v53 = vld [vmem:[#allocation22 + $0xdd0] sm:$0xf0] }
 0x5f3   : > { %9153 = vmatpush.bf16.msrb.mxu2 %v12893_v57  ;;  %9167 = vmatpush.bf16.msrb.mxu3 %v13021_v28  ;;  %v14549_v41 = vld [vmem:[#allocation22 + $0xa64] sm:$0xf]  ;;  %v12842_v35 = vld [vmem:[#allocation22 + $0xa70] sm:$0xf0]  ;;  %v13149_v28 = vor.u32 %v14625_v9, %v13146_v49  ;;  %v13277_v7 = vor.u32 %v14657_v4, %v13274_v53 }
 0x5f4   : > { %9144 = vmatpush.bf16.msra.mxu1 %v12685_v50  ;;  %v14581_v39 = vld [vmem:[#allocation22 + $0xb64] sm:$0xf]  ;;  %v12970_v57 = vld [vmem:[#allocation22 + $0xb70] sm:$0xf0]  ;;  %v12845_v42 = vor.u32 %v14549_v41, %v12842_v35 }
 0x5f5   : > { %9131 = vmatpush.bf16.msrb.mxu0 %v12541_v38  ;;  %v14621_v48 = vld [vmem:[#allocation22 + $0xca4] sm:$0xf]  ;;  %v13130_v44 = vld [vmem:[#allocation22 + $0xcb0] sm:$0xf0]  ;;  %v12973_v6 = vor.u32 %v14581_v39, %v12970_v57 }
 0x5f6   : > { %v14653_v10 = vld [vmem:[#allocation22 + $0xda4] sm:$0xf]  ;;  %v13258_v1 = vld [vmem:[#allocation22 + $0xdb0] sm:$0xf0]  ;;  %v13133_v2 = vor.u32 %v14621_v48, %v13130_v44 }
 0x5f7   : > { %9154 = vmatpush.bf16.msrb.mxu2 %v12877_v55  ;;  %9168 = vmatpush.bf16.msrb.mxu3 %v13005_v25  ;;  %v14545_v50 = vld [vmem:[#allocation22 + $0xa44] sm:$0xf]  ;;  %v12826_v60 = vld [vmem:[#allocation22 + $0xa50] sm:$0xf0]  ;;  %v13261_v11 = vor.u32 %v14653_v10, %v13258_v1  ;;  %v17265_v25 = vpop.f32.mrf.mxu3 }
 0x5f8   : > { %9145 = vmatpush.bf16.msra.mxu1 %v12669_v32  ;;  %9132 = vmatmul.bf16.vlgmr.msrb.gmra.mxu0 %v17207_v0  ;;  %v14577_v30 = vld [vmem:[#allocation22 + $0xb44] sm:$0xf]  ;;  %v12954_v13 = vld [vmem:[#allocation22 + $0xb50] sm:$0xf0]  ;;  %v12829_v31 = vor.u32 %v14545_v50, %v12826_v60  ;;  %v17267_v32 = vpop.f32.mrf.mxu0  ;;  %v8881_v10 = vpop.f32.mrf.mxu2 }
 0x5f9   : > { %9180 = vmatpush.bf16.msra.mxu0 %v13165_v27  ;;  %v14617_v12 = vld [vmem:[#allocation22 + $0xc84] sm:$0xf]  ;;  %v13114_v55 = vld [vmem:[#allocation22 + $0xc90] sm:$0xf0]  ;;  %v12957_v43 = vor.u32 %v14577_v30, %v12954_v13 }
 0x5fa   : > { %v14649_v33 = vld [vmem:[#allocation22 + $0xd84] sm:$0xf]  ;;  %v13242_v8 = vld [vmem:[#allocation22 + $0xd90] sm:$0xf0]  ;;  %v13117_v54 = vor.u32 %v14617_v12, %v13114_v55 }
 0x5fb   : > { %9155 = vmatpush.bf16.msrb.mxu2 %v12861_v14  ;;  %9169 = vmatpush.bf16.msrb.mxu3 %v12989_v18  ;;  %v14541_v34 = vld [vmem:[#allocation22 + $0xa24] sm:$0xf]  ;;  %v12810_v58 = vld [vmem:[#allocation22 + $0xa30] sm:$0xf0]  ;;  %v13245_v27 = vor.u32 %v14649_v33, %v13242_v8 }
 0x5fc   : > { %9194 = vmatpush.bf16.msrb.mxu1 %v13293_v23  ;;  %v14573_v36 = vld [vmem:[#allocation22 + $0xb24] sm:$0xf]  ;;  %v12938_v38 = vld [vmem:[#allocation22 + $0xb30] sm:$0xf0]  ;;  %v12813_v14 = vor.u32 %v14541_v34, %v12810_v58 }
 0x5fd   : > { %9146 = vmatmul.bf16.vlgmr.msra.gmra.mxu1 %v17209_v45  ;;  %9181 = vmatpush.bf16.msra.mxu0 %v13149_v28  ;;  %v14613_v23 = vld [vmem:[#allocation22 + $0xc64] sm:$0xf]  ;;  %v13098_v9 = vld [vmem:[#allocation22 + $0xc70] sm:$0xf0]  ;;  %v12941_v18 = vor.u32 %v14573_v36, %v12938_v38 }
 0x5fe   : > { %v14645_v49 = vld [vmem:[#allocation22 + $0xd64] sm:$0xf]  ;;  %v13226_v4 = vld [vmem:[#allocation22 + $0xd70] sm:$0xf0]  ;;  %v13101_v44 = vor.u32 %v14613_v23, %v13098_v9 }
 0x5ff   : > { %9156 = vmatpush.bf16.msrb.mxu2 %v12845_v42  ;;  %9170 = vmatpush.bf16.msrb.mxu3 %v12973_v6  ;;  %v14537_v53 = vld [vmem:[#allocation22 + $0xa04] sm:$0xf]  ;;  %v12794_v41 = vld [vmem:[#allocation22 + $0xa10] sm:$0xf0]  ;;  %v13229_v42 = vor.u32 %v14645_v49, %v13226_v4  ;;  %v8923_v4 = vpop.f32.mrf.mxu1 }
 0x600   : > { %9195 = vmatpush.bf16.msrb.mxu1 %v13277_v7  ;;  %v14569_v35 = vld [vmem:[#allocation22 + $0xb04] sm:$0xf]  ;;  %v12922_v39 = vld [vmem:[#allocation22 + $0xb10] sm:$0xf0]  ;;  %v12797_v1 = vor.u32 %v14537_v53, %v12794_v41 }
 0x601   : > { %9182 = vmatpush.bf16.msra.mxu0 %v13133_v2  ;;  %v14693_v57 = vld [vmem:[#allocation22 + $0xee4] sm:$0xf]  ;;  %v13418_v28 = vld [vmem:[#allocation22 + $0xef0] sm:$0xf0]  ;;  %v12925_v50 = vor.u32 %v14569_v35, %v12922_v39  ;;  %v8882_v2 = vadd.f32 %v8881_v10, %v17259_v19 }
 0x602   : > { %v14725_v7 = vld [vmem:[#allocation22 + $0xfe4] sm:$0xf]  ;;  %v13546_v48 = vld [vmem:[#allocation22 + $0xff0] sm:$0xf0] }
 0x603   : > { %9157 = vmatpush.bf16.msrb.mxu2 %v12829_v31  ;;  %9171 = vmatpush.bf16.msrb.mxu3 %v12957_v43  ;;  %v14609_v6 = vld [vmem:[#allocation22 + $0xc44] sm:$0xf]  ;;  %v13082_v60 = vld [vmem:[#allocation22 + $0xc50] sm:$0xf0]  ;;  %v13549_v12 = vor.u32 %v14725_v7, %v13546_v48  ;;  %v8895_v31 = vpop.f32.mrf.mxu3 }
 0x604   : > { %9196 = vmatpush.bf16.msrb.mxu1 %v13261_v11  ;;  %v14641_v30 = vld [vmem:[#allocation22 + $0xd44] sm:$0xf]  ;;  %v13210_v13 = vld [vmem:[#allocation22 + $0xd50] sm:$0xf0]  ;;  %v13421_v11 = vor.u32 %v14693_v57, %v13418_v28  ;;  %v8896_v34 = vadd.f32 %v8895_v31, %v8882_v2  ;;  %v13085_v58 = vor.u32 %v14609_v6, %v13082_v60 }
 0x605   : > { %9183 = vmatpush.bf16.msra.mxu0 %v13117_v54  ;;  %v14689_v55 = vld [vmem:[#allocation22 + $0xec4] sm:$0xf]  ;;  %v13402_v43 = vld [vmem:[#allocation22 + $0xed0] sm:$0xf0]  ;;  %v13213_v36 = vor.u32 %v14641_v30, %v13210_v13  ;;  %v8909_v54 = vpop.f32.mrf.mxu0 }
 0x606   : > { %v14721_v33 = vld [vmem:[#allocation22 + $0xfc4] sm:$0xf]  ;;  %v13530_v8 = vld [vmem:[#allocation22 + $0xfd0] sm:$0xf0]  ;;  %v8910_v19 = vadd.f32 %v8909_v54, %v8896_v34  ;;  %v13405_v49 = vor.u32 %v14689_v55, %v13402_v43  ;;  %v17276_v43 = vpop.f32.mrf.mxu2 }
 0x607   : > { %9158 = vmatpush.bf16.msrb.mxu2 %v12813_v14  ;;  %9172 = vmatpush.bf16.msrb.mxu3 %v12941_v18  ;;  %v14605_v38 = vld [vmem:[#allocation22 + $0xc24] sm:$0xf]  ;;  %v13194_v9 = vld [vmem:[#allocation22 + $0xd30] sm:$0xf0]  ;;  %v13533_v14 = vor.u32 %v14721_v33, %v13530_v8  ;;  %17656 = vst [vmem:[#allocation45_spill] sm:$0xff] %v17276_v43 }
 0x608   : > { %9197 = vmatpush.bf16.msrb.mxu1 %v13245_v27  ;;  %v13066_v27 = vld [vmem:[#allocation22 + $0xc30] sm:$0xf0]  ;;  %v14637_v23 = vld [vmem:[#allocation22 + $0xd24] sm:$0xf]  ;;  %v17272_v39 = vadd.f32 %v8923_v4, %v8910_v19  ;;  %v13152_v43 = vld [vmem:[#allocation22 + $0xcc8] sm:$0xf] }
 0x609   : > { %9184 = vmatpush.bf16.msra.mxu0 %v13101_v44  ;;  %v14685_v18 = vld [vmem:[#allocation22 + $0xea4] sm:$0xf]  ;;  %v13386_v53 = vld [vmem:[#allocation22 + $0xeb0] sm:$0xf0]  ;;  %v13069_v57 = vor.u32 %v14605_v38, %v13066_v27  ;;  %v13197_v28 = vor.u32 %v14637_v23, %v13194_v9 }
 0x60a   : > { %v14717_v41 = vld [vmem:[#allocation22 + $0xfa4] sm:$0xf]  ;;  %v13514_v35 = vld [vmem:[#allocation22 + $0xfb0] sm:$0xf0] }
 0x60b   : > { %9159 = vmatpush.bf16.msrb.mxu2 %v12797_v1  ;;  %9173 = vmatpush.bf16.msrb.mxu3 %v12925_v50  ;;  %v14601_v7 = vld [vmem:[#allocation22 + $0xc04] sm:$0xf]  ;;  %v13050_v48 = vld [vmem:[#allocation22 + $0xc10] sm:$0xf0]  ;;  %v13389_v1 = vor.u32 %v14685_v18, %v13386_v53  ;;  %v13517_v50 = vor.u32 %v14717_v41, %v13514_v35  ;;  %v17278_v9 = vpop.f32.mrf.mxu3 }
 0x60c   : > { %9198 = vmatpush.bf16.msrb.mxu1 %v13229_v42  ;;  %v14633_v44 = vld [vmem:[#allocation22 + $0xd04] sm:$0xf]  ;;  %v13178_v42 = vld [vmem:[#allocation22 + $0xd10] sm:$0xf0]  ;;  %v13053_v55 = vor.u32 %v14601_v7, %v13050_v48  ;;  %17657 = vst [vmem:[#allocation46_spill] sm:$0xff] %v17278_v9 }
 0x60d   : > { %9185 = vmatpush.bf16.msra.mxu0 %v13085_v58  ;;  %v14757_v6 = vld [vmem:[#allocation22 + $0x10e4] sm:$0xf]  ;;  %v13674_v10 = vld [vmem:[#allocation22 + $0x10f0] sm:$0xf0]  ;;  %v13181_v31 = vor.u32 %v14633_v44, %v13178_v42 }
 0x60e   : > { %9160 = vmatmul.bf16.vlgmr.msrb.gmra.mxu2 %v17213_v16  ;;  %9174 = vmatmul.bf16.vlgmr.msrb.gmra.mxu3 %v17215_v15  ;;  %v14789_v60 = vld [vmem:[#allocation22 + $0x11e4] sm:$0xf]  ;;  %v13802_v30 = vld [vmem:[#allocation22 + $0x11f0] sm:$0xf0]  ;;  %v13677_v33 = vor.u32 %v14757_v6, %v13674_v10 }
 0x60f   : > { %9208 = vmatpush.bf16.msra.mxu2 %v13421_v11  ;;  %9222 = vmatpush.bf16.msra.mxu3 %v13549_v12  ;;  %v14681_v13 = vld [vmem:[#allocation22 + $0xe84] sm:$0xf]  ;;  %v13370_v2 = vld [vmem:[#allocation22 + $0xe90] sm:$0xf0]  ;;  %v13805_v8 = vor.u32 %v14789_v60, %v13802_v30 }
 0x610   : > { %9199 = vmatpush.bf16.msrb.mxu1 %v13213_v36  ;;  %v14713_v11 = vld [vmem:[#allocation22 + $0xf84] sm:$0xf]  ;;  %v13498_v12 = vld [vmem:[#allocation22 + $0xf90] sm:$0xf0]  ;;  %v13373_v36 = vor.u32 %v14681_v13, %v13370_v2 }
 0x611   : > { %9186 = vmatpush.bf16.msra.mxu0 %v13069_v57  ;;  %v14753_v34 = vld [vmem:[#allocation22 + $0x10c4] sm:$0xf]  ;;  %v13658_v58 = vld [vmem:[#allocation22 + $0x10d0] sm:$0xf0]  ;;  %v13501_v38 = vor.u32 %v14713_v11, %v13498_v12 }
 0x612   : > { %v14785_v54 = vld [vmem:[#allocation22 + $0x11c4] sm:$0xf]  ;;  %v13786_v27 = vld [vmem:[#allocation22 + $0x11d0] sm:$0xf0]  ;;  %v13661_v18 = vor.u32 %v14753_v34, %v13658_v58 }
 0x613   : > { %9209 = vmatpush.bf16.msra.mxu2 %v13405_v49  ;;  %9223 = vmatpush.bf16.msra.mxu3 %v13533_v14  ;;  %v14677_v23 = vld [vmem:[#allocation22 + $0xe64] sm:$0xf]  ;;  %v13354_v19 = vld [vmem:[#allocation22 + $0xe70] sm:$0xf0]  ;;  %v13789_v4 = vor.u32 %v14785_v54, %v13786_v27 }
 0x614   : > { %9200 = vmatpush.bf16.msrb.mxu1 %v13197_v28  ;;  %v14709_v49 = vld [vmem:[#allocation22 + $0xf64] sm:$0xf]  ;;  %v13482_v14 = vld [vmem:[#allocation22 + $0xf70] sm:$0xf0]  ;;  %v13357_v35 = vor.u32 %v14677_v23, %v13354_v19 }
 0x615   : > { %9187 = vmatpush.bf16.msra.mxu0 %v13053_v55  ;;  %v14749_v53 = vld [vmem:[#allocation22 + $0x10a4] sm:$0xf]  ;;  %v13642_v41 = vld [vmem:[#allocation22 + $0x10b0] sm:$0xf0]  ;;  %v13485_v57 = vor.u32 %v14709_v49, %v13482_v14 }
 0x616   : > { %v14781_v28 = vld [vmem:[#allocation22 + $0x11a4] sm:$0xf]  ;;  %v13770_v7 = vld [vmem:[#allocation22 + $0x11b0] sm:$0xf0]  ;;  %v13645_v10 = vor.u32 %v14749_v53, %v13642_v41  ;;  %v17285_v41 = vpop.f32.mrf.mxu1 }
 0x617   : > { %9210 = vmatpush.bf16.msra.mxu2 %v13389_v1  ;;  %9224 = vmatpush.bf16.msra.mxu3 %v13517_v50  ;;  %v14673_v48 = vld [vmem:[#allocation22 + $0xe44] sm:$0xf]  ;;  %v13338_v44 = vld [vmem:[#allocation22 + $0xe50] sm:$0xf0]  ;;  %v13773_v1 = vor.u32 %v14781_v28, %v13770_v7  ;;  %v8937_v50 = vpop.f32.mrf.mxu2  ;;  %17659 = vst [vmem:[#allocation48_spill] sm:$0xff] %v17285_v41 }
 0x618   : > { %9201 = vmatpush.bf16.msrb.mxu1 %v13181_v31  ;;  %9188 = vmatmul.bf16.vlgmr.msra.gmra.mxu0 %v17219_v62  ;;  %v14705_v42 = vld [vmem:[#allocation22 + $0xf44] sm:$0xf]  ;;  %v13466_v6 = vld [vmem:[#allocation22 + $0xf50] sm:$0xf0]  ;;  %v8938_v13 = vadd.f32 %v8937_v50, %v17272_v39  ;;  %v13341_v2 = vor.u32 %v14673_v48, %v13338_v44  ;;  %v11632_v28 = vld [vmem:[#allocation22 + $0xe8] sm:$0xf] }
 0x619   : > { %9236 = vmatpush.bf16.msrb.mxu0 %v13677_v33  ;;  %v14745_v60 = vld [vmem:[#allocation22 + $0x1084] sm:$0xf]  ;;  %v13626_v30 = vld [vmem:[#allocation22 + $0x1090] sm:$0xf0]  ;;  %v13469_v11 = vor.u32 %v14705_v42, %v13466_v6  ;;  %v8951_v33 = vpop.f32.mrf.mxu3  ;;  %v14248_v7 = vld [vmem:[#allocation22 + $0xf4] sm:$0xf0] }
 0x61a   : > { %v14777_v12 = vld [vmem:[#allocation22 + $0x1184] sm:$0xf]  ;;  %v13754_v55 = vld [vmem:[#allocation22 + $0x1190] sm:$0xf0]  ;;  %v13629_v54 = vor.u32 %v14745_v60, %v13626_v30  ;;  %v11760_v48 = vld [vmem:[#allocation22 + $0x1e8] sm:$0xf] }
 0x61b   : > { %9211 = vmatpush.bf16.msra.mxu2 %v13373_v36  ;;  %9225 = vmatpush.bf16.msra.mxu3 %v13501_v38  ;;  %v14669_v31 = vld [vmem:[#allocation22 + $0xe24] sm:$0xf]  ;;  %v13450_v58 = vld [vmem:[#allocation22 + $0xf30] sm:$0xf0]  ;;  %v8952_v36 = vadd.f32 %v8951_v33, %v8938_v13  ;;  %v17283_v38 = vpop.f32.mrf.mxu0  ;;  %v13757_v27 = vor.u32 %v14777_v12, %v13754_v55  ;;  %v14280_v44 = vld [vmem:[#allocation22 + $0x1f4] sm:$0xf0] }
 0x61c   : > { %9250 = vmatpush.bf16.msra.mxu1 %v13805_v8  ;;  %v13322_v8 = vld [vmem:[#allocation22 + $0xe30] sm:$0xf0]  ;;  %v14701_v34 = vld [vmem:[#allocation22 + $0xf24] sm:$0xf]  ;;  %17658 = vst [vmem:[#allocation47_spill] sm:$0xff] %v17283_v38 }
 0x61d   : > { %9202 = vmatmul.bf16.vlgmr.msrb.gmra.mxu1 %v17221_v22  ;;  %9237 = vmatpush.bf16.msrb.mxu0 %v13661_v18  ;;  %v14741_v23 = vld [vmem:[#allocation22 + $0x1064] sm:$0xf]  ;;  %v13610_v19 = vld [vmem:[#allocation22 + $0x1070] sm:$0xf0]  ;;  %v13325_v39 = vor.u32 %v14669_v31, %v13322_v8  ;;  %v13453_v14 = vor.u32 %v14701_v34, %v13450_v58  ;;  %v11616_v12 = vld [vmem:[#allocation22 + $0xc8] sm:$0xf] }
 0x61e   : > { %v14773_v49 = vld [vmem:[#allocation22 + $0x1164] sm:$0xf]  ;;  %v13738_v18 = vld [vmem:[#allocation22 + $0x1170] sm:$0xf0]  ;;  %v13613_v42 = vor.u32 %v14741_v23, %v13610_v19  ;;  %v14244_v55 = vld [vmem:[#allocation22 + $0xd4] sm:$0xf0] }
 0x61f   : > { %9212 = vmatpush.bf16.msra.mxu2 %v13357_v35  ;;  %9226 = vmatpush.bf16.msra.mxu3 %v13485_v57  ;;  %v13306_v53 = vld [vmem:[#allocation22 + $0xe10] sm:$0xf0]  ;;  %v14697_v35 = vld [vmem:[#allocation22 + $0xf04] sm:$0xf]  ;;  %v13741_v6 = vor.u32 %v14773_v49, %v13738_v18  ;;  %v11744_v31 = vld [vmem:[#allocation22 + $0x1c8] sm:$0xf] }
 0x620   : > { %9251 = vmatpush.bf16.msra.mxu1 %v13789_v4  ;;  %v14665_v4 = vld [vmem:[#allocation22 + $0xe04] sm:$0xf]  ;;  %v13434_v57 = vld [vmem:[#allocation22 + $0xf10] sm:$0xf0]  ;;  %v14276_v33 = vld [vmem:[#allocation22 + $0x1d4] sm:$0xf0] }
 0x621   : > { %9238 = vmatpush.bf16.msrb.mxu0 %v13645_v10  ;;  %v14737_v10 = vld [vmem:[#allocation22 + $0x1044] sm:$0xf]  ;;  %v13437_v50 = vor.u32 %v14697_v35, %v13434_v57  ;;  %v13594_v60 = vld [vmem:[#allocation22 + $0x1050] sm:$0xf0]  ;;  %v11745_v18 = vor.u32 %v14276_v33, %v11744_v31  ;;  %v14240_v35 = vld [vmem:[#allocation22 + $0xb4] sm:$0xf0] }
 0x622   : > { %v14769_v30 = vld [vmem:[#allocation22 + $0x1144] sm:$0xf]  ;;  %v13722_v13 = vld [vmem:[#allocation22 + $0x1150] sm:$0xf0]  ;;  %v13597_v34 = vor.u32 %v14737_v10, %v13594_v60  ;;  %v11728_v57 = vld [vmem:[#allocation22 + $0x1a8] sm:$0xf] }
 0x623   : > { %9213 = vmatpush.bf16.msra.mxu2 %v13341_v2  ;;  %9227 = vmatpush.bf16.msra.mxu3 %v13469_v11  ;;  %v11633_v2 = vor.u32 %v14248_v7, %v11632_v28  ;;  %v11761_v11 = vor.u32 %v14280_v44, %v11760_v48  ;;  %v8965_v8 = vpop.f32.mrf.mxu0  ;;  %v13725_v58 = vor.u32 %v14769_v30, %v13722_v13  ;;  %v13578_v23 = vld [vmem:[#allocation22 + $0x1030] sm:$0xf0]  ;;  %v14765_v19 = vld [vmem:[#allocation22 + $0x1124] sm:$0xf]  ;;  %v14272_v28 = vld [vmem:[#allocation22 + $0x1b4] sm:$0xf0] }
 0x624   : > { %9252 = vmatpush.bf16.msra.mxu1 %v13773_v1  ;;  %v13309_v1 = vor.u32 %v14665_v4, %v13306_v53  ;;  %v13706_v49 = vld [vmem:[#allocation22 + $0x1130] sm:$0xf0]  ;;  %v11600_v4 = vld [vmem:[#allocation22 + $0xa8] sm:$0xf]  ;;  %v14729_v48 = vld [vmem:[#allocation22 + $0x1004] sm:$0xf]  ;;  %v11729_v60 = vor.u32 %v14272_v28, %v11728_v57 }
 0x625   : > { %9239 = vmatpush.bf16.msrb.mxu0 %v13629_v54  ;;  %v14733_v54 = vld [vmem:[#allocation22 + $0x1024] sm:$0xf]  ;;  %v13562_v44 = vld [vmem:[#allocation22 + $0x1010] sm:$0xf0]  ;;  %v11888_v10 = vld [vmem:[#allocation22 + $0x2e8] sm:$0xf] }
 0x626   : > { %v13581_v7 = vor.u32 %v14733_v54, %v13578_v23  ;;  %v12016_v30 = vld [vmem:[#allocation22 + $0x3e8] sm:$0xf]  ;;  %v14344_v13 = vld [vmem:[#allocation22 + $0x3f4] sm:$0xf0]  ;;  %v13565_v31 = vor.u32 %v14729_v48, %v13562_v44  ;;  %v17293_v48 = vpop.f32.mrf.mxu3 }
 0x627   : > { %9214 = vmatpush.bf16.msra.mxu2 %v13325_v39  ;;  %9228 = vmatpush.bf16.msra.mxu3 %v13453_v14  ;;  %v8979_v39 = vpop.f32.mrf.mxu1  ;;  %v11617_v14 = vor.u32 %v14244_v55, %v11616_v12  ;;  %v11712_v12 = vld [vmem:[#allocation22 + $0x188] sm:$0xf]  ;;  %v14268_v55 = vld [vmem:[#allocation22 + $0x194] sm:$0xf0]  ;;  %17661 = vst [vmem:[#allocation50_spill] sm:$0xff] %v17293_v48 }
 0x628   : > { %9253 = vmatpush.bf16.msra.mxu1 %v13757_v27  ;;  %v8966_v27 = vadd.f32 %v8965_v8, %v8952_v36  ;;  %v13709_v36 = vor.u32 %v14765_v19, %v13706_v49  ;;  %v14308_v54 = vld [vmem:[#allocation22 + $0x2d4] sm:$0xf0]  ;;  %v11713_v23 = vor.u32 %v14268_v55, %v11712_v12  ;;  %v12000_v19 = vld [vmem:[#allocation22 + $0x3c8] sm:$0xf] }
 0x629   : > { %9240 = vmatpush.bf16.msrb.mxu0 %v13613_v42  ;;  %v14761_v42 = vld [vmem:[#allocation22 + $0x1104] sm:$0xf]  ;;  %v14340_v49 = vld [vmem:[#allocation22 + $0x3d4] sm:$0xf0]  ;;  %v11840_v55 = vld [vmem:[#allocation22 + $0x288] sm:$0xf] }
 0x62a   : > { %v17287_v53 = vadd.f32 %v8979_v39, %v8966_v27  ;;  %v11568_v39 = vld [vmem:[#allocation22 + $0x68] sm:$0xf]  ;;  %v12001_v28 = vor.u32 %v14340_v49, %v12000_v19  ;;  %v14256_v19 = vld [vmem:[#allocation22 + $0x134] sm:$0xf0] }
 0x62b   : > { %9215 = vmatpush.bf16.msra.mxu2 %v13309_v1  ;;  %9229 = vmatpush.bf16.msra.mxu3 %v13437_v50  ;;  %v14312_v1 = vld [vmem:[#allocation22 + $0x2f4] sm:$0xf0]  ;;  %v11601_v50 = vor.u32 %v14240_v35, %v11600_v4  ;;  %v17291_v35 = vpop.f32.mrf.mxu2 }
 0x62c   : > { %9254 = vmatpush.bf16.msra.mxu1 %v13741_v6  ;;  %v13690_v6 = vld [vmem:[#allocation22 + $0x1110] sm:$0xf0]  ;;  %v11889_v8 = vor.u32 %v14312_v1, %v11888_v10  ;;  %v14264_v4 = vld [vmem:[#allocation22 + $0x174] sm:$0xf0]  ;;  %17660 = vst [vmem:[#allocation49_spill] sm:$0xff] %v17291_v35 }
 0x62d   : > { %9241 = vmatpush.bf16.msrb.mxu0 %v13597_v34  ;;  %v13693_v33 = vor.u32 %v14761_v42, %v13690_v6  ;;  %v12017_v34 = vor.u32 %v14344_v13, %v12016_v30  ;;  %v11984_v6 = vld [vmem:[#allocation22 + $0x3a8] sm:$0xf]  ;;  %v14336_v10 = vld [vmem:[#allocation22 + $0x3b4] sm:$0xf0]  ;;  %v17297_v13 = vpop.f32.mrf.mxu0 }
 0x62e   : > { %9216 = vmatmul.bf16.vlgmr.msra.gmra.mxu2 %v17229_v61  ;;  %9230 = vmatmul.bf16.vlgmr.msra.gmra.mxu3 %v17231_v21  ;;  %v11552_v1 = vld [vmem:[#allocation22 + $0x48] sm:$0xf]  ;;  %v14260_v30 = vld [vmem:[#allocation22 + $0x154] sm:$0xf0]  ;;  %17662 = vst [vmem:[#allocation51_spill] sm:$0xff] %v17297_v13  ;;  %v11985_v12 = vor.u32 %v14336_v10, %v11984_v6 }
 0x62f   : > { %9264 = vmatpush.bf16.msrb.mxu2 %v11633_v2  ;;  %9278 = vmatpush.bf16.msrb.mxu3 %v11761_v11  ;;  %v11584_v2 = vld [vmem:[#allocation22 + $0x88] sm:$0xf]  ;;  %v14236_v11 = vld [vmem:[#allocation22 + $0x94] sm:$0xf0] }
 0x630   : > { %9255 = vmatpush.bf16.msra.mxu1 %v13725_v58  ;;  %v11872_v58 = vld [vmem:[#allocation22 + $0x2c8] sm:$0xf]  ;;  %v11585_v27 = vor.u32 %v14236_v11, %v11584_v2  ;;  %v17299_v2 = vpop.f32.mrf.mxu1  ;;  %v14220_v10 = vld [vmem:[#allocation22 + $0x14] sm:$0xf0] }
 0x631   : > { %9242 = vmatpush.bf16.msrb.mxu0 %v13581_v7  ;;  %v11873_v57 = vor.u32 %v14308_v54, %v11872_v58  ;;  %v11856_v7 = vld [vmem:[#allocation22 + $0x2a8] sm:$0xf]  ;;  %17663 = vst [vmem:[#allocation52_spill] sm:$0xff] %v17299_v2  ;;  %v14332_v58 = vld [vmem:[#allocation22 + $0x394] sm:$0xf0] }
 0x632   : > { %v11536_v54 = vld [vmem:[#allocation22 + $0x28] sm:$0xf]  ;;  %v14372_v2 = vld [vmem:[#allocation22 + $0x4d4] sm:$0xf0] }
 0x633   : > { %9265 = vmatpush.bf16.msrb.mxu2 %v11617_v14  ;;  %9279 = vmatpush.bf16.msrb.mxu3 %v11745_v18  ;;  %v14232_v14 = vld [vmem:[#allocation22 + $0x74] sm:$0xf0]  ;;  %v11696_v18 = vld [vmem:[#allocation22 + $0x168] sm:$0xf]  ;;  %v8993_v49 = vpop.f32.mrf.mxu2 }
 0x634   : > { %9256 = vmatpush.bf16.msra.mxu1 %v13709_v36  ;;  %v14304_v36 = vld [vmem:[#allocation22 + $0x2b4] sm:$0xf0]  ;;  %v11569_v44 = vor.u32 %v14232_v14, %v11568_v39  ;;  %v11697_v42 = vor.u32 %v14264_v4, %v11696_v18  ;;  %v8994_v39 = vadd.f32 %v8993_v49, %v17287_v53  ;;  %v11824_v4 = vld [vmem:[#allocation22 + $0x268] sm:$0xf] }
 0x635   : > { %9243 = vmatpush.bf16.msrb.mxu0 %v13565_v31  ;;  %v11857_v11 = vor.u32 %v14304_v36, %v11856_v7  ;;  %v14300_v31 = vld [vmem:[#allocation22 + $0x294] sm:$0xf0]  ;;  %v9007_v7 = vpop.f32.mrf.mxu3  ;;  %v11520_v6 = vld [vmem:[#allocation22 + $0x8] sm:$0xf] }
 0x636   : > { %v11841_v14 = vor.u32 %v14300_v31, %v11840_v55  ;;  %v12272_v55 = vld [vmem:[#allocation22 + $0x5e8] sm:$0xf]  ;;  %v14408_v31 = vld [vmem:[#allocation22 + $0x5f4] sm:$0xf0] }
 0x637   : > { %9266 = vmatpush.bf16.msrb.mxu2 %v11601_v50  ;;  %9280 = vmatpush.bf16.msrb.mxu3 %v11729_v60  ;;  %v14228_v50 = vld [vmem:[#allocation22 + $0x54] sm:$0xf0]  ;;  %v11680_v60 = vld [vmem:[#allocation22 + $0x148] sm:$0xf] }
 0x638   : > { %9257 = vmatpush.bf16.msra.mxu1 %v13693_v33  ;;  %9244 = vmatmul.bf16.vlgmr.msrb.gmra.mxu0 %v17237_v26  ;;  %v11553_v33 = vor.u32 %v14228_v50, %v11552_v1  ;;  %v17302_v1 = vadd.f32 %v9007_v7, %v8994_v39  ;;  %v11648_v50 = vld [vmem:[#allocation22 + $0x108] sm:$0xf]  ;;  %v14324_v49 = vld [vmem:[#allocation22 + $0x354] sm:$0xf0]  ;;  %v12273_v7 = vor.u32 %v14408_v31, %v12272_v55 }
 0x639   : > { %9292 = vmatpush.bf16.msra.mxu0 %v11889_v8  ;;  %v11681_v8 = vor.u32 %v14260_v30, %v11680_v60  ;;  %v14252_v60 = vld [vmem:[#allocation22 + $0x114] sm:$0xf0]  ;;  %v12144_v30 = vld [vmem:[#allocation22 + $0x4e8] sm:$0xf] }
 0x63a   : > { %17664 = vst [vmem:[#allocation53_spill] sm:$0xff] %v17302_v1  ;;  %v9035_v53 = vpop.f32.mrf.mxu1  ;;  %v12128_v1 = vld [vmem:[#allocation22 + $0x4c8] sm:$0xf]  ;;  %v14404_v48 = vld [vmem:[#allocation22 + $0x5d4] sm:$0xf0] }
 0x63b   : > { %9267 = vmatpush.bf16.msrb.mxu2 %v11585_v27  ;;  %9281 = vmatpush.bf16.msrb.mxu3 %v11713_v23  ;;  %v14224_v27 = vld [vmem:[#allocation22 + $0x34] sm:$0xf0]  ;;  %v11664_v23 = vld [vmem:[#allocation22 + $0x128] sm:$0xf] }
 0x63c   : > { %9306 = vmatpush.bf16.msrb.mxu1 %v12017_v34  ;;  %v11968_v34 = vld [vmem:[#allocation22 + $0x388] sm:$0xf]  ;;  %v11537_v36 = vor.u32 %v14224_v27, %v11536_v54  ;;  %v11521_v54 = vor.u32 %v14220_v10, %v11520_v6  ;;  %v11649_v27 = vor.u32 %v14252_v60, %v11648_v50  ;;  %v14368_v10 = vld [vmem:[#allocation22 + $0x4b4] sm:$0xf0] }
 0x63d   : > { %9258 = vmatmul.bf16.vlgmr.msra.gmra.mxu1 %v17239_v24  ;;  %9293 = vmatpush.bf16.msra.mxu0 %v11873_v57  ;;  %v11969_v18 = vor.u32 %v14332_v58, %v11968_v34  ;;  %v14296_v57 = vld [vmem:[#allocation22 + $0x274] sm:$0xf0]  ;;  %v11808_v58 = vld [vmem:[#allocation22 + $0x248] sm:$0xf] }
 0x63e   : > { %v12256_v13 = vld [vmem:[#allocation22 + $0x5c8] sm:$0xf]  ;;  %v14400_v60 = vld [vmem:[#allocation22 + $0x5b4] sm:$0xf0] }
 0x63f   : > { %9268 = vmatpush.bf16.msrb.mxu2 %v11569_v44  ;;  %9282 = vmatpush.bf16.msrb.mxu3 %v11697_v42  ;;  %v11665_v44 = vor.u32 %v14256_v19, %v11664_v23  ;;  %v14328_v42 = vld [vmem:[#allocation22 + $0x374] sm:$0xf0]  ;;  %v11936_v19 = vld [vmem:[#allocation22 + $0x348] sm:$0xf] }
 0x640   : > { %9307 = vmatpush.bf16.msrb.mxu1 %v12001_v28  ;;  %v11952_v28 = vld [vmem:[#allocation22 + $0x368] sm:$0xf]  ;;  %v14292_v23 = vld [vmem:[#allocation22 + $0x254] sm:$0xf0] }
 0x641   : > { %9294 = vmatpush.bf16.msra.mxu0 %v11857_v11  ;;  %v9021_v11 = vpop.f32.mrf.mxu0  ;;  %v12112_v6 = vld [vmem:[#allocation22 + $0x4a8] sm:$0xf]  ;;  %v14316_v31 = vld [vmem:[#allocation22 + $0x314] sm:$0xf0] }
 0x642   : > { %v17304_v34 = vadd.f32 %v9035_v53, %v9021_v11  ;;  %v12240_v50 = vld [vmem:[#allocation22 + $0x5a8] sm:$0xf]  ;;  %v14500_v41 = vld [vmem:[#allocation22 + $0x8d4] sm:$0xf0] }
 0x643   : > { %9269 = vmatpush.bf16.msrb.mxu2 %v11553_v33  ;;  %9283 = vmatpush.bf16.msrb.mxu3 %v11681_v8  ;;  %v11825_v33 = vor.u32 %v14296_v57, %v11824_v4  ;;  %v11953_v8 = vor.u32 %v14328_v42, %v11952_v28  ;;  %v11792_v4 = vld [vmem:[#allocation22 + $0x228] sm:$0xf]  ;;  %v14288_v57 = vld [vmem:[#allocation22 + $0x234] sm:$0xf0]  ;;  %v12257_v42 = vor.u32 %v14404_v48, %v12256_v13 }
 0x644   : > { %9308 = vmatpush.bf16.msrb.mxu1 %v11985_v12  ;;  %v14376_v12 = vld [vmem:[#allocation22 + $0x4f4] sm:$0xf0]  ;;  %v11920_v28 = vld [vmem:[#allocation22 + $0x328] sm:$0xf]  ;;  %v12113_v48 = vor.u32 %v14368_v10, %v12112_v6  ;;  %v12241_v13 = vor.u32 %v14400_v60, %v12240_v50  ;;  %v17310_v6 = vpop.f32.mrf.mxu3 }
 0x645   : > { %9295 = vmatpush.bf16.msra.mxu0 %v11841_v14  ;;  %v12145_v39 = vor.u32 %v14376_v12, %v12144_v30  ;;  %v11809_v14 = vor.u32 %v14292_v23, %v11808_v58  ;;  %v11793_v30 = vor.u32 %v14288_v57, %v11792_v4  ;;  %v11776_v53 = vld [vmem:[#allocation22 + $0x208] sm:$0xf]  ;;  %v14284_v12 = vld [vmem:[#allocation22 + $0x214] sm:$0xf0]  ;;  %17666 = vst [vmem:[#allocation55_spill] sm:$0xff] %v17310_v6 }
 0x646   : > { %v11904_v55 = vld [vmem:[#allocation22 + $0x308] sm:$0xf]  ;;  %v14396_v23 = vld [vmem:[#allocation22 + $0x594] sm:$0xf0] }
 0x647   : > { %9270 = vmatpush.bf16.msrb.mxu2 %v11537_v36  ;;  %9284 = vmatpush.bf16.msrb.mxu3 %v11665_v44  ;;  %v14320_v36 = vld [vmem:[#allocation22 + $0x334] sm:$0xf0]  ;;  %v12129_v44 = vor.u32 %v14372_v2, %v12128_v1  ;;  %v12528_v2 = vld [vmem:[#allocation22 + $0x7e8] sm:$0xf] }
 0x648   : > { %9309 = vmatpush.bf16.msrb.mxu1 %v11969_v18  ;;  %v11937_v18 = vor.u32 %v14324_v49, %v11936_v19  ;;  %v11921_v11 = vor.u32 %v14320_v36, %v11920_v28  ;;  %v14472_v1 = vld [vmem:[#allocation22 + $0x7f4] sm:$0xf0]  ;;  %v12096_v58 = vld [vmem:[#allocation22 + $0x488] sm:$0xf]  ;;  %v11777_v19 = vor.u32 %v14284_v12, %v11776_v53  ;;  %v11905_v49 = vor.u32 %v14316_v31, %v11904_v55 }
 0x649   : > { %9296 = vmatpush.bf16.msra.mxu0 %v11825_v33  ;;  %v12400_v33 = vld [vmem:[#allocation22 + $0x6e8] sm:$0xf]  ;;  %v14436_v4 = vld [vmem:[#allocation22 + $0x6d4] sm:$0xf0] }
 0x64a   : > { %v12512_v36 = vld [vmem:[#allocation22 + $0x7c8] sm:$0xf]  ;;  %v14360_v10 = vld [vmem:[#allocation22 + $0x474] sm:$0xf0] }
 0x64b   : > { %9271 = vmatpush.bf16.msrb.mxu2 %v11521_v54  ;;  %9285 = vmatpush.bf16.msrb.mxu3 %v11649_v27  ;;  %v14364_v54 = vld [vmem:[#allocation22 + $0x494] sm:$0xf0]  ;;  %v12224_v27 = vld [vmem:[#allocation22 + $0x588] sm:$0xf] }
 0x64c   : > { %9310 = vmatpush.bf16.msrb.mxu1 %v11953_v8  ;;  %v14440_v8 = vld [vmem:[#allocation22 + $0x6f4] sm:$0xf0]  ;;  %v12097_v57 = vor.u32 %v14364_v54, %v12096_v58  ;;  %v12225_v28 = vor.u32 %v14396_v23, %v12224_v27  ;;  %v12208_v50 = vld [vmem:[#allocation22 + $0x568] sm:$0xf]  ;;  %v17314_v58 = vpop.f32.mrf.mxu0 }
 0x64d   : > { %9297 = vmatpush.bf16.msra.mxu0 %v11809_v14  ;;  %v12529_v14 = vor.u32 %v14472_v1, %v12528_v2  ;;  %v14392_v60 = vld [vmem:[#allocation22 + $0x574] sm:$0xf0]  ;;  %v12368_v53 = vld [vmem:[#allocation22 + $0x6a8] sm:$0xf] }
 0x64e   : > { %9272 = vmatmul.bf16.vlgmr.msrb.gmra.mxu2 %v17167_v63  ;;  %9286 = vmatmul.bf16.vlgmr.msrb.gmra.mxu3 %v17169_v56  ;;  %v14432_v12 = vld [vmem:[#allocation22 + $0x6b4] sm:$0xf0]  ;;  %v12209_v31 = vor.u32 %v14392_v60, %v12208_v50  ;;  %v12192_v2 = vld [vmem:[#allocation22 + $0x548] sm:$0xf] }
 0x64f   : > { %9320 = vmatpush.bf16.msra.mxu2 %v12145_v39  ;;  %9334 = vmatpush.bf16.msra.mxu3 %v12273_v7  ;;  %v17308_v39 = vpop.f32.mrf.mxu2  ;;  %v12401_v7 = vor.u32 %v14440_v8, %v12400_v33  ;;  %v12496_v33 = vld [vmem:[#allocation22 + $0x7a8] sm:$0xf]  ;;  %v14464_v8 = vld [vmem:[#allocation22 + $0x7b4] sm:$0xf0]  ;;  %v12369_v54 = vor.u32 %v14432_v12, %v12368_v53 }
 0x650   : > { %9311 = vmatpush.bf16.msrb.mxu1 %v11937_v18  ;;  %17665 = vst [vmem:[#allocation54_spill] sm:$0xff] %v17308_v39  ;;  %v12384_v18 = vld [vmem:[#allocation22 + $0x6c8] sm:$0xf]  ;;  %v14388_v1 = vld [vmem:[#allocation22 + $0x554] sm:$0xf0]  ;;  %v12497_v27 = vor.u32 %v14464_v8, %v12496_v33 }
 0x651   : > { %9298 = vmatpush.bf16.msra.mxu0 %v11793_v30  ;;  %v12385_v30 = vor.u32 %v14436_v4, %v12384_v18  ;;  %v12193_v4 = vor.u32 %v14388_v1, %v12192_v2  ;;  %v14384_v50 = vld [vmem:[#allocation22 + $0x534] sm:$0xf0]  ;;  %v12336_v53 = vld [vmem:[#allocation22 + $0x668] sm:$0xf] }
 0x652   : > { %v14424_v12 = vld [vmem:[#allocation22 + $0x674] sm:$0xf0]  ;;  %v12032_v8 = vld [vmem:[#allocation22 + $0x408] sm:$0xf] }
 0x653   : > { %9321 = vmatpush.bf16.msra.mxu2 %v12129_v44  ;;  %9335 = vmatpush.bf16.msra.mxu3 %v12257_v42  ;;  %v14468_v44 = vld [vmem:[#allocation22 + $0x7d4] sm:$0xf0]  ;;  %v12080_v42 = vld [vmem:[#allocation22 + $0x468] sm:$0xf] }
 0x654   : > { %9312 = vmatpush.bf16.msrb.mxu1 %v11921_v11  ;;  %v12513_v11 = vor.u32 %v14468_v44, %v12512_v36  ;;  %v12081_v55 = vor.u32 %v14360_v10, %v12080_v42  ;;  %v12048_v36 = vld [vmem:[#allocation22 + $0x428] sm:$0xf]  ;;  %v9063_v44 = vpop.f32.mrf.mxu3  ;;  %v14352_v42 = vld [vmem:[#allocation22 + $0x434] sm:$0xf0] }
 0x655   : > { %9299 = vmatpush.bf16.msra.mxu0 %v11777_v19  ;;  %v12352_v19 = vld [vmem:[#allocation22 + $0x688] sm:$0xf]  ;;  %v14456_v33 = vld [vmem:[#allocation22 + $0x774] sm:$0xf0] }
 0x656   : > { %v12176_v10 = vld [vmem:[#allocation22 + $0x528] sm:$0xf]  ;;  %v14380_v2 = vld [vmem:[#allocation22 + $0x514] sm:$0xf0] }
 0x657   : > { %9322 = vmatpush.bf16.msra.mxu2 %v12113_v48  ;;  %9336 = vmatpush.bf16.msra.mxu3 %v12241_v13  ;;  %v12064_v48 = vld [vmem:[#allocation22 + $0x448] sm:$0xf]  ;;  %v14356_v13 = vld [vmem:[#allocation22 + $0x454] sm:$0xf0]  ;;  %v9049_v23 = vpop.f32.mrf.mxu2 }
 0x658   : > { %9313 = vmatpush.bf16.msrb.mxu1 %v11905_v49  ;;  %9300 = vmatmul.bf16.vlgmr.msra.gmra.mxu0 %v17180_v40  ;;  %v14428_v49 = vld [vmem:[#allocation22 + $0x694] sm:$0xf0]  ;;  %v12065_v18 = vor.u32 %v14356_v13, %v12064_v48  ;;  %v12160_v13 = vld [vmem:[#allocation22 + $0x508] sm:$0xf] }
 0x659   : > { %9348 = vmatpush.bf16.msrb.mxu0 %v12401_v7  ;;  %v17316_v7 = vpop.f32.mrf.mxu1  ;;  %v14348_v48 = vld [vmem:[#allocation22 + $0x414] sm:$0xf0]  ;;  %v12656_v1 = vld [vmem:[#allocation22 + $0x8e8] sm:$0xf] }
 0x65a   : > { %v14504_v6 = vld [vmem:[#allocation22 + $0x8f4] sm:$0xf0]  ;;  %v12640_v35 = vld [vmem:[#allocation22 + $0x8c8] sm:$0xf] }
 0x65b   : > { %9323 = vmatpush.bf16.msra.mxu2 %v12097_v57  ;;  %9337 = vmatpush.bf16.msra.mxu3 %v12225_v28  ;;  %v12480_v57 = vld [vmem:[#allocation22 + $0x788] sm:$0xf]  ;;  %v14460_v28 = vld [vmem:[#allocation22 + $0x794] sm:$0xf0] }
 0x65c   : > { %9362 = vmatpush.bf16.msra.mxu1 %v12529_v14  ;;  %v9050_v14 = vadd.f32 %v9049_v23, %v17304_v34  ;;  %v12049_v34 = vor.u32 %v14352_v42, %v12048_v36  ;;  %v9077_v23 = vpop.f32.mrf.mxu0  ;;  %v14420_v36 = vld [vmem:[#allocation22 + $0x654] sm:$0xf0] }
 0x65d   : > { %9314 = vmatmul.bf16.vlgmr.msrb.gmra.mxu1 %v17182_v29  ;;  %9349 = vmatpush.bf16.msrb.mxu0 %v12385_v30  ;;  %v12353_v30 = vor.u32 %v14428_v49, %v12352_v19  ;;  %v12337_v19 = vor.u32 %v14424_v12, %v12336_v53  ;;  %v14452_v42 = vld [vmem:[#allocation22 + $0x754] sm:$0xf0]  ;;  %v12304_v12 = vld [vmem:[#allocation22 + $0x628] sm:$0xf] }
 0x65e   : > { %v9064_v60 = vadd.f32 %v9063_v44, %v9050_v14  ;;  %v12784_v14 = vld [vmem:[#allocation22 + $0x9e8] sm:$0xf]  ;;  %v14632_v38 = vld [vmem:[#allocation22 + $0xcf4] sm:$0xf0] }
 0x65f   : > { %9324 = vmatpush.bf16.msra.mxu2 %v12081_v55  ;;  %9338 = vmatpush.bf16.msra.mxu3 %v12209_v31  ;;  %v12464_v55 = vld [vmem:[#allocation22 + $0x768] sm:$0xf]  ;;  %v12177_v31 = vor.u32 %v14384_v50, %v12176_v10  ;;  %v12657_v50 = vor.u32 %v14504_v6, %v12656_v1 }
 0x660   : > { %9363 = vmatpush.bf16.msra.mxu1 %v12513_v11  ;;  %v12481_v11 = vor.u32 %v14460_v28, %v12480_v57  ;;  %v12465_v49 = vor.u32 %v14456_v33, %v12464_v55  ;;  %v12320_v57 = vld [vmem:[#allocation22 + $0x648] sm:$0xf]  ;;  %v12161_v28 = vor.u32 %v14380_v2, %v12160_v13  ;;  %v14416_v55 = vld [vmem:[#allocation22 + $0x634] sm:$0xf0]  ;;  %v12641_v33 = vor.u32 %v14500_v41, %v12640_v35 }
 0x661   : > { %9350 = vmatpush.bf16.msrb.mxu0 %v12369_v54  ;;  %v14536_v54 = vld [vmem:[#allocation22 + $0x9f4] sm:$0xf0]  ;;  %v12448_v44 = vld [vmem:[#allocation22 + $0x748] sm:$0xf]  ;;  %v12305_v1 = vor.u32 %v14416_v55, %v12304_v12 }
 0x662   : > { %v12785_v39 = vor.u32 %v14536_v54, %v12784_v14  ;;  %v12449_v53 = vor.u32 %v14452_v42, %v12448_v44  ;;  %v12624_v6 = vld [vmem:[#allocation22 + $0x8a8] sm:$0xf]  ;;  %v14528_v2 = vld [vmem:[#allocation22 + $0x9b4] sm:$0xf0] }
 0x663   : > { %9325 = vmatpush.bf16.msra.mxu2 %v12065_v18  ;;  %9339 = vmatpush.bf16.msra.mxu3 %v12193_v4  ;;  %v9091_v18 = vpop.f32.mrf.mxu1  ;;  %v12033_v4 = vor.u32 %v14348_v48, %v12032_v8  ;;  %v14496_v48 = vld [vmem:[#allocation22 + $0x8b4] sm:$0xf0]  ;;  %v12752_v13 = vld [vmem:[#allocation22 + $0x9a8] sm:$0xf] }
 0x664   : > { %9364 = vmatpush.bf16.msra.mxu1 %v12497_v27  ;;  %v9078_v27 = vadd.f32 %v9077_v23, %v9064_v60  ;;  %v12768_v60 = vld [vmem:[#allocation22 + $0x9c8] sm:$0xf]  ;;  %v14412_v54 = vld [vmem:[#allocation22 + $0x614] sm:$0xf0]  ;;  %v12625_v41 = vor.u32 %v14496_v48, %v12624_v6  ;;  %v12753_v35 = vor.u32 %v14528_v2, %v12752_v13  ;;  %v17323_v13 = vpop.f32.mrf.mxu2 }
 0x665   : > { %9351 = vmatpush.bf16.msrb.mxu0 %v12353_v30  ;;  %v14532_v30 = vld [vmem:[#allocation22 + $0x9d4] sm:$0xf0]  ;;  %v12288_v14 = vld [vmem:[#allocation22 + $0x608] sm:$0xf] }
 0x666   : > { %v17319_v10 = vadd.f32 %v9091_v18, %v9078_v27  ;;  %v12769_v8 = vor.u32 %v14532_v30, %v12768_v60  ;;  %v12416_v27 = vld [vmem:[#allocation22 + $0x708] sm:$0xf]  ;;  %v14600_v18 = vld [vmem:[#allocation22 + $0xbf4] sm:$0xf0]  ;;  %v12289_v42 = vor.u32 %v14412_v54, %v12288_v14  ;;  %v17325_v54 = vpop.f32.mrf.mxu3 }
 0x667   : > { %9326 = vmatpush.bf16.msra.mxu2 %v12049_v34  ;;  %9340 = vmatpush.bf16.msra.mxu3 %v12177_v31  ;;  %v12432_v34 = vld [vmem:[#allocation22 + $0x728] sm:$0xf]  ;;  %v14448_v31 = vld [vmem:[#allocation22 + $0x734] sm:$0xf0] }
 0x668   : > { %9365 = vmatpush.bf16.msra.mxu1 %v12481_v11  ;;  %v12321_v11 = vor.u32 %v14420_v36, %v12320_v57  ;;  %v12433_v23 = vor.u32 %v14448_v31, %v12432_v34  ;;  %v13040_v57 = vld [vmem:[#allocation22 + $0xbe8] sm:$0xf]  ;;  %v14524_v44 = vld [vmem:[#allocation22 + $0x994] sm:$0xf0] }
 0x669   : > { %9352 = vmatpush.bf16.msrb.mxu0 %v12337_v19  ;;  %v14444_v19 = vld [vmem:[#allocation22 + $0x714] sm:$0xf0]  ;;  %v12736_v36 = vld [vmem:[#allocation22 + $0x988] sm:$0xf]  ;;  %v13041_v30 = vor.u32 %v14600_v18, %v13040_v57 }
 0x66a   : > { %v12737_v55 = vor.u32 %v14524_v44, %v12736_v36  ;;  %v13024_v34 = vld [vmem:[#allocation22 + $0xbc8] sm:$0xf]  ;;  %v14596_v31 = vld [vmem:[#allocation22 + $0xbd4] sm:$0xf0] }
 0x66b   : > { %9327 = vmatpush.bf16.msra.mxu2 %v12033_v4  ;;  %9341 = vmatpush.bf16.msra.mxu3 %v12161_v28  ;;  %v12608_v4 = vld [vmem:[#allocation22 + $0x888] sm:$0xf]  ;;  %v14492_v28 = vld [vmem:[#allocation22 + $0x894] sm:$0xf0] }
 0x66c   : > { %9366 = vmatpush.bf16.msra.mxu1 %v12465_v49  ;;  %v12912_v49 = vld [vmem:[#allocation22 + $0xae8] sm:$0xf]  ;;  %v12609_v12 = vor.u32 %v14492_v28, %v12608_v4  ;;  %v14520_v48 = vld [vmem:[#allocation22 + $0x974] sm:$0xf0]  ;;  %v17329_v4 = vpop.f32.mrf.mxu0 }
 0x66d   : > { %9353 = vmatpush.bf16.msrb.mxu0 %v12321_v11  ;;  %v12896_v11 = vld [vmem:[#allocation22 + $0xac8] sm:$0xf]  ;;  %v14560_v14 = vld [vmem:[#allocation22 + $0xab4] sm:$0xf0] }
 0x66e   : > { %9328 = vmatmul.bf16.vlgmr.msra.gmra.mxu2 %v17186_v3  ;;  %9342 = vmatmul.bf16.vlgmr.msra.gmra.mxu3 %v17188_v47  ;;  %v12720_v6 = vld [vmem:[#allocation22 + $0x968] sm:$0xf]  ;;  %v14516_v18 = vld [vmem:[#allocation22 + $0x954] sm:$0xf0] }
 0x66f   : > { %9376 = vmatpush.bf16.msrb.mxu2 %v12657_v50  ;;  %9390 = vmatpush.bf16.msrb.mxu3 %v12785_v39  ;;  %v14568_v39 = vld [vmem:[#allocation22 + $0xaf4] sm:$0xf0]  ;;  %v12417_v50 = vor.u32 %v14444_v19, %v12416_v27  ;;  %v12721_v19 = vor.u32 %v14520_v48, %v12720_v6  ;;  %v12704_v57 = vld [vmem:[#allocation22 + $0x948] sm:$0xf] }
 0x670   : > { %9367 = vmatpush.bf16.msra.mxu1 %v12449_v53  ;;  %v12913_v60 = vor.u32 %v14568_v39, %v12912_v49  ;;  %v14564_v53 = vld [vmem:[#allocation22 + $0xad4] sm:$0xf0]  ;;  %v13008_v49 = vld [vmem:[#allocation22 + $0xba8] sm:$0xf] }
 0x671   : > { %9354 = vmatpush.bf16.msrb.mxu0 %v12305_v1  ;;  %v12897_v2 = vor.u32 %v14564_v53, %v12896_v11  ;;  %v13025_v1 = vor.u32 %v14596_v31, %v13024_v34  ;;  %v14592_v39 = vld [vmem:[#allocation22 + $0xbb4] sm:$0xf0]  ;;  %v12864_v44 = vld [vmem:[#allocation22 + $0xa88] sm:$0xf] }
 0x672   : > { %v13009_v36 = vor.u32 %v14592_v39, %v13008_v49  ;;  %v12992_v11 = vld [vmem:[#allocation22 + $0xb88] sm:$0xf]  ;;  %v14588_v53 = vld [vmem:[#allocation22 + $0xb94] sm:$0xf0] }
 0x673   : > { %9377 = vmatpush.bf16.msrb.mxu2 %v12641_v33  ;;  %9391 = vmatpush.bf16.msrb.mxu3 %v12769_v8  ;;  %v12592_v33 = vld [vmem:[#allocation22 + $0x868] sm:$0xf]  ;;  %v14488_v8 = vld [vmem:[#allocation22 + $0x874] sm:$0xf0]  ;;  %v12993_v48 = vor.u32 %v14588_v53, %v12992_v11 }
 0x674   : > { %9368 = vmatpush.bf16.msra.mxu1 %v12433_v23  ;;  %v12880_v23 = vld [vmem:[#allocation22 + $0xaa8] sm:$0xf]  ;;  %v12593_v27 = vor.u32 %v14488_v8, %v12592_v33  ;;  %v14512_v31 = vld [vmem:[#allocation22 + $0x934] sm:$0xf0]  ;;  %v9105_v33 = vpop.f32.mrf.mxu2 }
 0x675   : > { %9355 = vmatpush.bf16.msrb.mxu0 %v12289_v42  ;;  %v12881_v28 = vor.u32 %v14560_v14, %v12880_v23  ;;  %v14556_v42 = vld [vmem:[#allocation22 + $0xa94] sm:$0xf0]  ;;  %v12688_v34 = vld [vmem:[#allocation22 + $0x928] sm:$0xf]  ;;  %v9106_v8 = vadd.f32 %v9105_v33, %v17319_v10  ;;  %v9119_v14 = vpop.f32.mrf.mxu3 }
 0x676   : > { %v12865_v6 = vor.u32 %v14556_v42, %v12864_v44  ;;  %v12976_v23 = vld [vmem:[#allocation22 + $0xb68] sm:$0xf]  ;;  %v14584_v49 = vld [vmem:[#allocation22 + $0xb74] sm:$0xf0] }
 0x677   : > { %9378 = vmatpush.bf16.msrb.mxu2 %v12625_v41  ;;  %9392 = vmatpush.bf16.msrb.mxu3 %v12753_v35  ;;  %v12576_v41 = vld [vmem:[#allocation22 + $0x848] sm:$0xf]  ;;  %v14484_v35 = vld [vmem:[#allocation22 + $0x854] sm:$0xf0]  ;;  %v12977_v53 = vor.u32 %v14584_v49, %v12976_v23 }
 0x678   : > { %9369 = vmatpush.bf16.msra.mxu1 %v12417_v50  ;;  %9356 = vmatmul.bf16.vlgmr.msrb.gmra.mxu0 %v17194_v20  ;;  %v17331_v50 = vpop.f32.mrf.mxu1  ;;  %v12544_v39 = vld [vmem:[#allocation22 + $0x808] sm:$0xf]  ;;  %v14664_v44 = vld [vmem:[#allocation22 + $0xdf4] sm:$0xf0] }
 0x679   : > { %9404 = vmatpush.bf16.msra.mxu0 %v12913_v60  ;;  %v12577_v60 = vor.u32 %v14484_v35, %v12576_v41  ;;  %v14476_v41 = vld [vmem:[#allocation22 + $0x814] sm:$0xf0]  ;;  %v9120_v35 = vadd.f32 %v9119_v14, %v9106_v8  ;;  %v13296_v10 = vld [vmem:[#allocation22 + $0xde8] sm:$0xf] }
 0x67a   : > { %v14580_v33 = vld [vmem:[#allocation22 + $0xb54] sm:$0xf0]  ;;  %v13297_v9 = vor.u32 %v14664_v44, %v13296_v10  ;;  %v12800_v44 = vld [vmem:[#allocation22 + $0xa08] sm:$0xf] }
 0x67b   : > { %9379 = vmatpush.bf16.msrb.mxu2 %v12609_v12  ;;  %9393 = vmatpush.bf16.msrb.mxu3 %v12737_v55  ;;  %v12560_v12 = vld [vmem:[#allocation22 + $0x828] sm:$0xf]  ;;  %v14480_v55 = vld [vmem:[#allocation22 + $0x834] sm:$0xf0] }
 0x67c   : > { %9418 = vmatpush.bf16.msrb.mxu1 %v13041_v30  ;;  %v12705_v30 = vor.u32 %v14516_v18, %v12704_v57  ;;  %v12672_v57 = vld [vmem:[#allocation22 + $0x908] sm:$0xf]  ;;  %v14508_v18 = vld [vmem:[#allocation22 + $0x914] sm:$0xf0] }
 0x67d   : > { %9370 = vmatmul.bf16.vlgmr.msra.gmra.mxu1 %v17196_v46  ;;  %9405 = vmatpush.bf16.msra.mxu0 %v12897_v2  ;;  %v12848_v2 = vld [vmem:[#allocation22 + $0xa68] sm:$0xf] }
 0x67f   : > { %9380 = vmatpush.bf16.msrb.mxu2 %v12593_v27  ;;  %9394 = vmatpush.bf16.msrb.mxu3 %v12721_v19  ;;  %v12561_v27 = vor.u32 %v14480_v55, %v12560_v12  ;;  %v12689_v19 = vor.u32 %v14512_v31, %v12688_v34  ;;  %v12545_v12 = vor.u32 %v14476_v41, %v12544_v39  ;;  %v14548_v34 = vld [vmem:[#allocation22 + $0xa54] sm:$0xf0]  ;;  %v12960_v31 = vld [vmem:[#allocation22 + $0xb48] sm:$0xf] }
 0x680   : > { %9419 = vmatpush.bf16.msrb.mxu1 %v13025_v1  ;;  %v14552_v1 = vld [vmem:[#allocation22 + $0xa74] sm:$0xf0]  ;;  %v12673_v55 = vor.u32 %v14508_v18, %v12672_v57  ;;  %v12944_v41 = vld [vmem:[#allocation22 + $0xb28] sm:$0xf] }
 0x681   : > { %9406 = vmatpush.bf16.msra.mxu0 %v12881_v28  ;;  %v13168_v28 = vld [vmem:[#allocation22 + $0xce8] sm:$0xf]  ;;  %v12849_v11 = vor.u32 %v14552_v1, %v12848_v2  ;;  %v14660_v1 = vld [vmem:[#allocation22 + $0xdd4] sm:$0xf0] }
 0x682   : > { %v13169_v14 = vor.u32 %v14632_v38, %v13168_v28  ;;  %v13280_v2 = vld [vmem:[#allocation22 + $0xdc8] sm:$0xf]  ;;  %v14544_v39 = vld [vmem:[#allocation22 + $0xa34] sm:$0xf0] }
 0x683   : > { %9381 = vmatpush.bf16.msrb.mxu2 %v12577_v60  ;;  %9395 = vmatpush.bf16.msrb.mxu3 %v12705_v30  ;;  %v12832_v60 = vld [vmem:[#allocation22 + $0xa48] sm:$0xf]  ;;  %v9147_v30 = vpop.f32.mrf.mxu1  ;;  %v14576_v38 = vld [vmem:[#allocation22 + $0xb34] sm:$0xf0]  ;;  %v13281_v57 = vor.u32 %v14660_v1, %v13280_v2 }
 0x684   : > { %9420 = vmatpush.bf16.msrb.mxu1 %v13009_v36  ;;  %v9133_v36 = vpop.f32.mrf.mxu0  ;;  %v12833_v23 = vor.u32 %v14548_v34, %v12832_v60  ;;  %v13264_v18 = vld [vmem:[#allocation22 + $0xda8] sm:$0xf]  ;;  %v14656_v28 = vld [vmem:[#allocation22 + $0xdb4] sm:$0xf0]  ;;  %v12945_v10 = vor.u32 %v14576_v38, %v12944_v41 }
 0x685   : > { %v9134_v42 = vadd.f32 %v9133_v36, %v9120_v35  ;;  %9407 = vmatpush.bf16.msra.mxu0 %v12865_v6  ;;  %v9038_v6 = vadd.f32 %v17316_v7, %v17314_v58  ;;  %v13136_v58 = vld [vmem:[#allocation22 + $0xca8] sm:$0xf]  ;;  %v14624_v7 = vld [vmem:[#allocation22 + $0xcb4] sm:$0xf0] }
 0x686   : > { %v13137_v60 = vor.u32 %v14624_v7, %v13136_v58  ;;  %v13120_v34 = vld [vmem:[#allocation22 + $0xc88] sm:$0xf]  ;;  %v14724_v41 = vld [vmem:[#allocation22 + $0xfd4] sm:$0xf0]  ;;  %v9107_v7 = vpop.f32.mrf.mxu2 }
 0x687   : > { %9382 = vmatpush.bf16.msrb.mxu2 %v12561_v27  ;;  %9396 = vmatpush.bf16.msrb.mxu3 %v12689_v19  ;;  %v17334_v8 = vadd.f32 %v9147_v30, %v9134_v42  ;;  %v12961_v27 = vor.u32 %v14580_v33, %v12960_v31  ;;  %v12816_v19 = vld [vmem:[#allocation22 + $0xa28] sm:$0xf]  ;;  %v9052_v49 = vadd.f32 %v17323_v13, %v9038_v6  ;;  %v14540_v42 = vld [vmem:[#allocation22 + $0xa14] sm:$0xf0] }
 0x688   : > { %9421 = vmatpush.bf16.msrb.mxu1 %v12993_v48  ;;  %v14628_v48 = vld [vmem:[#allocation22 + $0xcd4] sm:$0xf0]  ;;  %v12817_v36 = vor.u32 %v14544_v39, %v12816_v19  ;;  %v12928_v13 = vld [vmem:[#allocation22 + $0xb08] sm:$0xf]  ;;  %v13265_v30 = vor.u32 %v14656_v28, %v13264_v18  ;;  %v9121_v18 = vpop.f32.mrf.mxu3 }
 0x689   : > { %9408 = vmatpush.bf16.msra.mxu0 %v12849_v11  ;;  %v13153_v35 = vor.u32 %v14628_v48, %v13152_v43  ;;  %v9066_v11 = vadd.f32 %v17325_v54, %v9052_v49  ;;  %v13424_v43 = vld [vmem:[#allocation22 + $0xee8] sm:$0xf]  ;;  %v14620_v31 = vld [vmem:[#allocation22 + $0xc94] sm:$0xf0]  ;;  %v12801_v54 = vor.u32 %v14540_v42, %v12800_v44 }
 0x68a   : > { %v13248_v33 = vld [vmem:[#allocation22 + $0xd88] sm:$0xf]  ;;  %v13121_v19 = vor.u32 %v14620_v31, %v13120_v34  ;;  %v14648_v58 = vld [vmem:[#allocation22 + $0xd74] sm:$0xf0] }
 0x68b   : > { %9383 = vmatpush.bf16.msrb.mxu2 %v12545_v12  ;;  %9397 = vmatpush.bf16.msrb.mxu3 %v12673_v55  ;;  %v13552_v12 = vld [vmem:[#allocation22 + $0xfe8] sm:$0xf]  ;;  %v14728_v55 = vld [vmem:[#allocation22 + $0xff4] sm:$0xf0]  ;;  %v9080_v48 = vadd.f32 %v17329_v4, %v9066_v11 }
 0x68c   : > { %9422 = vmatpush.bf16.msrb.mxu1 %v12977_v53  ;;  %v14696_v53 = vld [vmem:[#allocation22 + $0xef4] sm:$0xf0]  ;;  %v13553_v1 = vor.u32 %v14728_v55, %v13552_v12  ;;  %v13536_v39 = vld [vmem:[#allocation22 + $0xfc8] sm:$0xf]  ;;  %v9135_v12 = vpop.f32.mrf.mxu0 }
 0x68d   : > { %9409 = vmatpush.bf16.msra.mxu0 %v12833_v23  ;;  %v13425_v2 = vor.u32 %v14696_v53, %v13424_v43  ;;  %v13408_v23 = vld [vmem:[#allocation22 + $0xec8] sm:$0xf]  ;;  %v9094_v4 = vadd.f32 %v17331_v50, %v9080_v48  ;;  %v14688_v44 = vld [vmem:[#allocation22 + $0xeb4] sm:$0xf0] }
 0x68e   : > { %9384 = vmatmul.bf16.vlgmr.msrb.gmra.mxu2 %v17207_v0  ;;  %9398 = vmatmul.bf16.vlgmr.msrb.gmra.mxu3 %v17209_v45  ;;  %v13104_v38 = vld [vmem:[#allocation22 + $0xc68] sm:$0xf] }
 0x68f   : > { %9432 = vmatpush.bf16.msra.mxu2 %v13169_v14  ;;  %9446 = vmatpush.bf16.msra.mxu3 %v13297_v9  ;;  %v14572_v9 = vld [vmem:[#allocation22 + $0xb14] sm:$0xf0]  ;;  %v13520_v11 = vld [vmem:[#allocation22 + $0xfa8] sm:$0xf]  ;;  %v9108_v53 = vadd.f32 %v9107_v7, %v9094_v4 }
 0x690   : > { %9423 = vmatpush.bf16.msrb.mxu1 %v12961_v27  ;;  %v14652_v14 = vld [vmem:[#allocation22 + $0xd94] sm:$0xf0]  ;;  %v12929_v6 = vor.u32 %v14572_v9, %v12928_v13  ;;  %v13088_v43 = vld [vmem:[#allocation22 + $0xc48] sm:$0xf] }
 0x691   : > { %9410 = vmatpush.bf16.msra.mxu0 %v12817_v36  ;;  %v14692_v27 = vld [vmem:[#allocation22 + $0xed4] sm:$0xf0]  ;;  %v13249_v49 = vor.u32 %v14652_v14, %v13248_v33  ;;  %v13537_v36 = vor.u32 %v14724_v41, %v13536_v39  ;;  %v13216_v50 = vld [vmem:[#allocation22 + $0xd48] sm:$0xf]  ;;  %v9149_v14 = vpop.f32.mrf.mxu1  ;;  %v9161_v39 = vpop.f32.mrf.mxu2 }
 0x692   : > { %v13409_v28 = vor.u32 %v14692_v27, %v13408_v23  ;;  %v14720_v9 = vld [vmem:[#allocation22 + $0xfb4] sm:$0xf0]  ;;  %v13376_v31 = vld [vmem:[#allocation22 + $0xe88] sm:$0xf]  ;;  %v9122_v23 = vadd.f32 %v9121_v18, %v9108_v53  ;;  %v9175_v41 = vpop.f32.mrf.mxu3 }
 0x693   : > { %9433 = vmatpush.bf16.msra.mxu2 %v13153_v35  ;;  %9447 = vmatpush.bf16.msra.mxu3 %v13281_v57  ;;  %v14616_v35 = vld [vmem:[#allocation22 + $0xc74] sm:$0xf0]  ;;  %v13232_v57 = vld [vmem:[#allocation22 + $0xd68] sm:$0xf]  ;;  %v13521_v34 = vor.u32 %v14720_v9, %v13520_v11 }
 0x694   : > { %9424 = vmatpush.bf16.msrb.mxu1 %v12945_v10  ;;  %v13392_v10 = vld [vmem:[#allocation22 + $0xea8] sm:$0xf]  ;;  %v13105_v42 = vor.u32 %v14616_v35, %v13104_v38  ;;  %v13233_v13 = vor.u32 %v14648_v58, %v13232_v57  ;;  %v14684_v33 = vld [vmem:[#allocation22 + $0xe94] sm:$0xf0]  ;;  %v9162_v38 = vadd.f32 %v9161_v39, %v17334_v8 }
 0x695   : > { %9411 = vmatpush.bf16.msra.mxu0 %v12801_v54  ;;  %v13393_v55 = vor.u32 %v14688_v44, %v13392_v10  ;;  %v13504_v48 = vld [vmem:[#allocation22 + $0xf88] sm:$0xf]  ;;  %v14608_v27 = vld [vmem:[#allocation22 + $0xc34] sm:$0xf0]  ;;  %v13377_v35 = vor.u32 %v14684_v33, %v13376_v31  ;;  %v9189_v53 = vpop.f32.mrf.mxu0 }
 0x696   : > { %v13360_v58 = vld [vmem:[#allocation22 + $0xe68] sm:$0xf]  ;;  %v14680_v7 = vld [vmem:[#allocation22 + $0xe74] sm:$0xf0] }
 0x697   : > { %9434 = vmatpush.bf16.msra.mxu2 %v13137_v60  ;;  %9448 = vmatpush.bf16.msra.mxu3 %v13265_v30  ;;  %v14612_v60 = vld [vmem:[#allocation22 + $0xc54] sm:$0xf0]  ;;  %v13488_v4 = vld [vmem:[#allocation22 + $0xf68] sm:$0xf] }
 0x698   : > { %9425 = vmatpush.bf16.msrb.mxu1 %v12929_v6  ;;  %9412 = vmatmul.bf16.vlgmr.msra.gmra.mxu0 %v17213_v16  ;;  %v14644_v30 = vld [vmem:[#allocation22 + $0xd54] sm:$0xf0]  ;;  %v13089_v54 = vor.u32 %v14612_v60, %v13088_v43  ;;  %v13056_v18 = vld [vmem:[#allocation22 + $0xc08] sm:$0xf] }
 0x699   : > { %9460 = vmatpush.bf16.msrb.mxu0 %v13425_v2  ;;  %v13217_v6 = vor.u32 %v14644_v30, %v13216_v50  ;;  %v14716_v2 = vld [vmem:[#allocation22 + $0xf94] sm:$0xf0]  ;;  %v13184_v11 = vld [vmem:[#allocation22 + $0xd08] sm:$0xf]  ;;  %v9163_v39 = vpop.f32.mrf.mxu2 }
 0x69a   : > { %v13505_v57 = vor.u32 %v14716_v2, %v13504_v48  ;;  %v14712_v10 = vld [vmem:[#allocation22 + $0xf74] sm:$0xf0]  ;;  %v13680_v43 = vld [vmem:[#allocation22 + $0x10e8] sm:$0xf]  ;;  %v9203_v33 = vpop.f32.mrf.mxu1 }
 0x69b   : > { %9435 = vmatpush.bf16.msra.mxu2 %v13121_v19  ;;  %9449 = vmatpush.bf16.msra.mxu3 %v13249_v49  ;;  %v13200_v19 = vld [vmem:[#allocation22 + $0xd28] sm:$0xf]  ;;  %v14640_v49 = vld [vmem:[#allocation22 + $0xd34] sm:$0xf0] }
 0x69c   : > { %9474 = vmatpush.bf16.msra.mxu1 %v13553_v1  ;;  %v13072_v1 = vld [vmem:[#allocation22 + $0xc28] sm:$0xf]  ;;  %v14604_v44 = vld [vmem:[#allocation22 + $0xc14] sm:$0xf0] }
 0x69d   : > { %9426 = vmatmul.bf16.vlgmr.msrb.gmra.mxu1 %v17215_v15  ;;  %9461 = vmatpush.bf16.msrb.mxu0 %v13409_v28  ;;  %v13073_v28 = vor.u32 %v14608_v27, %v13072_v1  ;;  %v14636_v9 = vld [vmem:[#allocation22 + $0xd14] sm:$0xf0]  ;;  %v13808_v8 = vld [vmem:[#allocation22 + $0x11e8] sm:$0xf] }
 0x69e   : > { %v14760_v60 = vld [vmem:[#allocation22 + $0x10f4] sm:$0xf0]  ;;  %v13344_v31 = vld [vmem:[#allocation22 + $0xe48] sm:$0xf] }
 0x69f   : > { %9436 = vmatpush.bf16.msra.mxu2 %v13105_v42  ;;  %9450 = vmatpush.bf16.msra.mxu3 %v13233_v13  ;;  %v9136_v42 = vadd.f32 %v9135_v12, %v9122_v23  ;;  %v9176_v13 = vadd.f32 %v9175_v41, %v9162_v38  ;;  %v14792_v50 = vld [vmem:[#allocation22 + $0x11f4] sm:$0xf0]  ;;  %v13472_v48 = vld [vmem:[#allocation22 + $0xf48] sm:$0xf]  ;;  %v13681_v27 = vor.u32 %v14760_v60, %v13680_v43 }
 0x6a0   : > { %9475 = vmatpush.bf16.msra.mxu1 %v13537_v36  ;;  %v13201_v36 = vor.u32 %v14640_v49, %v13200_v19  ;;  %v14676_v12 = vld [vmem:[#allocation22 + $0xe54] sm:$0xf0]  ;;  %v13809_v19 = vor.u32 %v14792_v50, %v13808_v8  ;;  %v13664_v49 = vld [vmem:[#allocation22 + $0x10c8] sm:$0xf] }
 0x6a1   : > { %9462 = vmatpush.bf16.msrb.mxu0 %v13393_v55  ;;  %v9190_v30 = vadd.f32 %v9189_v53, %v9176_v13  ;;  %v13361_v55 = vor.u32 %v14680_v7, %v13360_v58  ;;  %v14708_v2 = vld [vmem:[#allocation22 + $0xf54] sm:$0xf0]  ;;  %v9150_v1 = vadd.f32 %v9149_v14, %v9136_v42  ;;  %v13792_v38 = vld [vmem:[#allocation22 + $0x11c8] sm:$0xf]  ;;  %v13345_v58 = vor.u32 %v14676_v12, %v13344_v31  ;;  %v11634_v31 = vld [vmem:[#allocation22 + $0xf8] sm:$0xf0] }
 0x6a2   : > { %v14756_v41 = vld [vmem:[#allocation22 + $0x10d4] sm:$0xf0]  ;;  %v13473_v7 = vor.u32 %v14708_v2, %v13472_v48  ;;  %v13456_v14 = vld [vmem:[#allocation22 + $0xf28] sm:$0xf]  ;;  %v11762_v12 = vld [vmem:[#allocation22 + $0x1f8] sm:$0xf0] }
 0x6a3   : > { %9437 = vmatpush.bf16.msra.mxu2 %v13089_v54  ;;  %9451 = vmatpush.bf16.msra.mxu3 %v13217_v6  ;;  %v13057_v54 = vor.u32 %v14604_v44, %v13056_v18  ;;  %v13185_v6 = vor.u32 %v14636_v9, %v13184_v11  ;;  %v17347_v23 = vadd.f32 %v9203_v33, %v9190_v30  ;;  %v13648_v13 = vld [vmem:[#allocation22 + $0x10a8] sm:$0xf]  ;;  %v14752_v11 = vld [vmem:[#allocation22 + $0x10b4] sm:$0xf0] }
 0x6a4   : > { %9476 = vmatpush.bf16.msra.mxu1 %v13521_v34  ;;  %v13489_v34 = vor.u32 %v14712_v10, %v13488_v4  ;;  %v13328_v4 = vld [vmem:[#allocation22 + $0xe28] sm:$0xf]  ;;  %v14704_v10 = vld [vmem:[#allocation22 + $0xf34] sm:$0xf0]  ;;  %v13665_v44 = vor.u32 %v14756_v41, %v13664_v49  ;;  %v13649_v33 = vor.u32 %v14752_v11, %v13648_v13  ;;  %v14238_v13 = vld [vmem:[#allocation22 + $0xac] sm:$0xf] }
 0x6a5   : > { %9463 = vmatpush.bf16.msrb.mxu0 %v13377_v35  ;;  %v14788_v35 = vld [vmem:[#allocation22 + $0x11d4] sm:$0xf0]  ;;  %v13776_v9 = vld [vmem:[#allocation22 + $0x11a8] sm:$0xf]  ;;  %v13457_v60 = vor.u32 %v14704_v10, %v13456_v14  ;;  %v11602_v11 = vld [vmem:[#allocation22 + $0xb8] sm:$0xf0] }
 0x6a6   : > { %v13793_v42 = vor.u32 %v14788_v35, %v13792_v38  ;;  %v14784_v43 = vld [vmem:[#allocation22 + $0x11b4] sm:$0xf0]  ;;  %v13312_v8 = vld [vmem:[#allocation22 + $0xe08] sm:$0xf]  ;;  %v14242_v38 = vld [vmem:[#allocation22 + $0xcc] sm:$0xf] }
 0x6a7   : > { %9438 = vmatpush.bf16.msra.mxu2 %v13073_v28  ;;  %9452 = vmatpush.bf16.msra.mxu3 %v13201_v36  ;;  %v9177_v28 = vpop.f32.mrf.mxu3  ;;  %v14672_v36 = vld [vmem:[#allocation22 + $0xe34] sm:$0xf0]  ;;  %v13440_v30 = vld [vmem:[#allocation22 + $0xf08] sm:$0xf]  ;;  %v11618_v35 = vld [vmem:[#allocation22 + $0xd8] sm:$0xf0] }
 0x6a8   : > { %9477 = vmatpush.bf16.msra.mxu1 %v13505_v57  ;;  %v9164_v57 = vadd.f32 %v9163_v39, %v9150_v1  ;;  %v13329_v53 = vor.u32 %v14672_v36, %v13328_v4  ;;  %v14668_v50 = vld [vmem:[#allocation22 + $0xe14] sm:$0xf0]  ;;  %v13632_v48 = vld [vmem:[#allocation22 + $0x1088] sm:$0xf]  ;;  %v11746_v4 = vld [vmem:[#allocation22 + $0x1d8] sm:$0xf0] }
 0x6a9   : > { %9464 = vmatpush.bf16.msrb.mxu0 %v13361_v55  ;;  %v14700_v55 = vld [vmem:[#allocation22 + $0xf14] sm:$0xf0]  ;;  %v13760_v1 = vld [vmem:[#allocation22 + $0x1188] sm:$0xf] }
 0x6aa   : > { %v17349_v18 = vadd.f32 %v9177_v28, %v9164_v57  ;;  %v14748_v2 = vld [vmem:[#allocation22 + $0x1094] sm:$0xf0]  ;;  %v13441_v49 = vor.u32 %v14700_v55, %v13440_v30  ;;  %v13616_v28 = vld [vmem:[#allocation22 + $0x1068] sm:$0xf] }
 0x6ab   : > { %9439 = vmatpush.bf16.msra.mxu2 %v13057_v54  ;;  %9453 = vmatpush.bf16.msra.mxu3 %v13185_v6  ;;  %v13777_v54 = vor.u32 %v14784_v43, %v13776_v9  ;;  %v14278_v6 = vld [vmem:[#allocation22 + $0x1ec] sm:$0xf]  ;;  %v13633_v57 = vor.u32 %v14748_v2, %v13632_v48  ;;  %v14744_v36 = vld [vmem:[#allocation22 + $0x1074] sm:$0xf0]  ;;  %v13744_v14 = vld [vmem:[#allocation22 + $0x1168] sm:$0xf] }
 0x6ac   : > { %9478 = vmatpush.bf16.msra.mxu1 %v13489_v34  ;;  %v14246_v34 = vld [vmem:[#allocation22 + $0xec] sm:$0xf]  ;;  %v11765_v41 = vor.u32 %v14278_v6, %v11762_v12  ;;  %v14776_v10 = vld [vmem:[#allocation22 + $0x1174] sm:$0xf0]  ;;  %v13617_v9 = vor.u32 %v14744_v36, %v13616_v28  ;;  %v13728_v30 = vld [vmem:[#allocation22 + $0x1148] sm:$0xf] }
 0x6ad   : > { %9465 = vmatpush.bf16.msrb.mxu0 %v13345_v58  ;;  %v11637_v39 = vor.u32 %v14246_v34, %v11634_v31  ;;  %v13745_v43 = vor.u32 %v14776_v10, %v13744_v14  ;;  %v14772_v55 = vld [vmem:[#allocation22 + $0x1154] sm:$0xf0]  ;;  %v9191_v34 = vpop.f32.mrf.mxu0  ;;  %v9205_v31 = vpop.f32.mrf.mxu1  ;;  %v14234_v6 = vld [vmem:[#allocation22 + $0x8c] sm:$0xf]  ;;  %v11586_v12 = vld [vmem:[#allocation22 + $0x98] sm:$0xf0] }
 0x6ae   : > { %9440 = vmatmul.bf16.vlgmr.msra.gmra.mxu2 %v17219_v62  ;;  %9454 = vmatmul.bf16.vlgmr.msra.gmra.mxu3 %v17221_v22  ;;  %v13729_v2 = vor.u32 %v14772_v55, %v13728_v30  ;;  %v11570_v28 = vld [vmem:[#allocation22 + $0x78] sm:$0xf0]  ;;  %v14262_v36 = vld [vmem:[#allocation22 + $0x16c] sm:$0xf] }
 0x6af   : > { %9488 = vmatpush.bf16.msrb.mxu2 %v13681_v27  ;;  %9502 = vmatpush.bf16.msrb.mxu3 %v13809_v19  ;;  %v14780_v27 = vld [vmem:[#allocation22 + $0x1194] sm:$0xf0]  ;;  %v13313_v19 = vor.u32 %v14668_v50, %v13312_v8  ;;  %v13600_v8 = vld [vmem:[#allocation22 + $0x1048] sm:$0xf]  ;;  %v14342_v30 = vld [vmem:[#allocation22 + $0x3ec] sm:$0xf] }
 0x6b0   : > { %9479 = vmatpush.bf16.msra.mxu1 %v13473_v7  ;;  %v13761_v58 = vor.u32 %v14780_v27, %v13760_v1  ;;  %v14274_v7 = vld [vmem:[#allocation22 + $0x1cc] sm:$0xf]  ;;  %v14740_v50 = vld [vmem:[#allocation22 + $0x1054] sm:$0xf0]  ;;  %v11714_v27 = vld [vmem:[#allocation22 + $0x198] sm:$0xf0] }
 0x6b1   : > { %9466 = vmatpush.bf16.msrb.mxu0 %v13329_v53  ;;  %v14270_v53 = vld [vmem:[#allocation22 + $0x1ac] sm:$0xf]  ;;  %v13601_v48 = vor.u32 %v14740_v50, %v13600_v8  ;;  %v11890_v50 = vld [vmem:[#allocation22 + $0x2f8] sm:$0xf0] }
 0x6b2   : > { %v14266_v1 = vld [vmem:[#allocation22 + $0x18c] sm:$0xf]  ;;  %v12018_v55 = vld [vmem:[#allocation22 + $0x3f8] sm:$0xf0] }
 0x6b3   : > { %9489 = vmatpush.bf16.msrb.mxu2 %v13665_v44  ;;  %9503 = vmatpush.bf16.msrb.mxu3 %v13793_v42  ;;  %v11621_v44 = vor.u32 %v14242_v38, %v11618_v35  ;;  %v11749_v42 = vor.u32 %v14274_v7, %v11746_v4  ;;  %v9217_v38 = vpop.f32.mrf.mxu2  ;;  %v9231_v35 = vpop.f32.mrf.mxu3  ;;  %v11717_v7 = vor.u32 %v14266_v1, %v11714_v27  ;;  %v14230_v4 = vld [vmem:[#allocation22 + $0x6c] sm:$0xf]  ;;  %v11682_v1 = vld [vmem:[#allocation22 + $0x158] sm:$0xf0]  ;;  %v17357_v27 = vld [vmem:[#allocation23] sm:$0xf] }
 0x6b4   : > { %9480 = vmatpush.bf16.msra.mxu1 %v13457_v60  ;;  %v11730_v60 = vld [vmem:[#allocation22 + $0x1b8] sm:$0xf0] }
 0x6b5   : > { %9467 = vmatpush.bf16.msrb.mxu0 %v13313_v19  ;;  %v13584_v19 = vld [vmem:[#allocation22 + $0x1028] sm:$0xf]  ;;  %v9245_v8 = vpop.f32.mrf.mxu0 }
 0x6b7   : > { %9490 = vmatpush.bf16.msrb.mxu2 %v13649_v33  ;;  %9504 = vmatpush.bf16.msrb.mxu3 %v13777_v54  ;;  %v11605_v33 = vor.u32 %v14238_v13, %v11602_v11  ;;  %v11733_v54 = vor.u32 %v14270_v53, %v11730_v60  ;;  %v14732_v13 = vld [vmem:[#allocation22 + $0x1014] sm:$0xf0]  ;;  %v9192_v11 = vadd.f32 %v9191_v34, %v17349_v18  ;;  %v14310_v60 = vld [vmem:[#allocation22 + $0x2ec] sm:$0xf] }
 0x6b8   : > { %9481 = vmatpush.bf16.msra.mxu1 %v13441_v49  ;;  %9468 = vmatmul.bf16.vlgmr.msrb.gmra.mxu0 %v17229_v61  ;;  %v14736_v49 = vld [vmem:[#allocation22 + $0x1034] sm:$0xf0]  ;;  %v14258_v34 = vld [vmem:[#allocation22 + $0x14c] sm:$0xf] }
 0x6b9   : > { %9516 = vmatpush.bf16.msra.mxu0 %v11637_v39  ;;  %v13712_v39 = vld [vmem:[#allocation22 + $0x1128] sm:$0xf]  ;;  %v13585_v14 = vor.u32 %v14736_v49, %v13584_v19  ;;  %v14764_v53 = vld [vmem:[#allocation22 + $0x1114] sm:$0xf0]  ;;  %v9206_v19 = vadd.f32 %v9205_v31, %v9192_v11  ;;  %v11893_v49 = vor.u32 %v14310_v60, %v11890_v50  ;;  %v14254_v31 = vld [vmem:[#allocation22 + $0x12c] sm:$0xf] }
 0x6ba   : > { %v11666_v11 = vld [vmem:[#allocation22 + $0x138] sm:$0xf0] }
 0x6bb   : > { %9491 = vmatpush.bf16.msrb.mxu2 %v13633_v57  ;;  %9505 = vmatpush.bf16.msrb.mxu3 %v13761_v58  ;;  %v9218_v57 = vadd.f32 %v9217_v38, %v17347_v23  ;;  %v11589_v58 = vor.u32 %v14234_v6, %v11586_v12  ;;  %v9259_v23 = vpop.f32.mrf.mxu1  ;;  %v14226_v12 = vld [vmem:[#allocation22 + $0x4c] sm:$0xf]  ;;  %v9219_v38 = vpop.f32.mrf.mxu2 }
 0x6bc   : > { %9530 = vmatpush.bf16.msrb.mxu1 %v11765_v41  ;;  %v14768_v41 = vld [vmem:[#allocation22 + $0x1134] sm:$0xf0] }
 0x6bd   : > { %9482 = vmatmul.bf16.vlgmr.msra.gmra.mxu1 %v17231_v21  ;;  %9517 = vmatpush.bf16.msra.mxu0 %v11621_v44  ;;  %v13713_v10 = vor.u32 %v14768_v41, %v13712_v39  ;;  %v11698_v44 = vld [vmem:[#allocation22 + $0x178] sm:$0xf0]  ;;  %v12021_v39 = vor.u32 %v14342_v30, %v12018_v55  ;;  %v14306_v41 = vld [vmem:[#allocation22 + $0x2cc] sm:$0xf] }
 0x6be   : > { %v11701_v6 = vor.u32 %v14262_v36, %v11698_v44  ;;  %v9220_v36 = vadd.f32 %v9219_v38, %v9206_v19  ;;  %v11538_v44 = vld [vmem:[#allocation22 + $0x38] sm:$0xf0]  ;;  %v14334_v55 = vld [vmem:[#allocation22 + $0x3ac] sm:$0xf] }
 0x6bf   : > { %9492 = vmatpush.bf16.msrb.mxu2 %v13617_v9  ;;  %9506 = vmatpush.bf16.msrb.mxu3 %v13745_v43  ;;  %v9232_v9 = vadd.f32 %v9231_v35, %v9218_v57  ;;  %v13696_v43 = vld [vmem:[#allocation22 + $0x1108] sm:$0xf]  ;;  %v11874_v57 = vld [vmem:[#allocation22 + $0x2d8] sm:$0xf0]  ;;  %v14406_v38 = vld [vmem:[#allocation22 + $0x5ec] sm:$0xf] }
 0x6c0   : > { %9531 = vmatpush.bf16.msrb.mxu1 %v11749_v42  ;;  %v13568_v42 = vld [vmem:[#allocation22 + $0x1008] sm:$0xf]  ;;  %v13697_v18 = vor.u32 %v14764_v53, %v13696_v43  ;;  %v11877_v53 = vor.u32 %v14306_v41, %v11874_v57  ;;  %v11858_v30 = vld [vmem:[#allocation22 + $0x2b8] sm:$0xf0]  ;;  %v14298_v57 = vld [vmem:[#allocation22 + $0x28c] sm:$0xf] }
 0x6c1   : > { %9518 = vmatpush.bf16.msra.mxu0 %v11605_v33  ;;  %v9246_v33 = vadd.f32 %v9245_v8, %v9232_v9  ;;  %v14302_v8 = vld [vmem:[#allocation22 + $0x2ac] sm:$0xf]  ;;  %v12146_v19 = vld [vmem:[#allocation22 + $0x4f8] sm:$0xf0] }
 0x6c3   : > { %9493 = vmatpush.bf16.msrb.mxu2 %v13601_v48  ;;  %9507 = vmatpush.bf16.msrb.mxu3 %v13729_v2  ;;  %v11554_v48 = vld [vmem:[#allocation22 + $0x58] sm:$0xf0]  ;;  %v13569_v2 = vor.u32 %v14732_v13, %v13568_v42  ;;  %v9786_v42 = vld [vmem:[#allocation25] sm:$0xf]  ;;  %v9233_v13 = vpop.f32.mrf.mxu3 }
 0x6c4   : > { %9532 = vmatpush.bf16.msrb.mxu1 %v11733_v54  ;;  %v11573_v54 = vor.u32 %v14230_v4, %v11570_v28  ;;  %v11557_v35 = vor.u32 %v14226_v12, %v11554_v48  ;;  %v9260_v4 = vadd.f32 %v9259_v23, %v9246_v33  ;;  %v9771_v28 = vperm.slane %v17357_v27, 1  ;;  %v9247_v23 = vpop.f32.mrf.mxu0  ;;  %v11986_v33 = vld [vmem:[#allocation22 + $0x3b8] sm:$0xf0]  ;;  %v14218_v48 = vld [vmem:[#allocation22 + $0xc] sm:$0xf] }
 0x6c5   : > { %9519 = vmatpush.bf16.msra.mxu0 %v11589_v58  ;;  %v14338_v58 = vld [vmem:[#allocation22 + $0x3cc] sm:$0xf]  ;;  %v9789_v9 = vperm.slane %v9786_v42, 1  ;;  %v9234_v43 = vadd.f32 %v9233_v13, %v9220_v36  ;;  %v11669_v12 = vor.u32 %v14254_v31, %v11666_v11  ;;  %v11989_v41 = vor.u32 %v14334_v55, %v11986_v33  ;;  %v11970_v36 = vld [vmem:[#allocation22 + $0x398] sm:$0xf0] }
 0x6c6   : > { %v14374_v27 = vld [vmem:[#allocation22 + $0x4ec] sm:$0xf]  ;;  %v12130_v11 = vld [vmem:[#allocation22 + $0x4d8] sm:$0xf0] }
 0x6c7   : > { %9494 = vmatpush.bf16.msrb.mxu2 %v13585_v14  ;;  %9508 = vmatpush.bf16.msrb.mxu3 %v13713_v10  ;;  %v11685_v14 = vor.u32 %v14258_v34, %v11682_v1  ;;  %v14222_v10 = vld [vmem:[#allocation22 + $0x2c] sm:$0xf]  ;;  %v9261_v34 = vpop.f32.mrf.mxu1  ;;  %v11650_v1 = vld [vmem:[#allocation22 + $0x118] sm:$0xf0]  ;;  %v12149_v42 = vor.u32 %v14374_v27, %v12146_v19 }
 0x6c8   : > { %9533 = vmatpush.bf16.msrb.mxu1 %v11717_v7  ;;  %v12002_v7 = vld [vmem:[#allocation22 + $0x3d8] sm:$0xf0]  ;;  %v11541_v50 = vor.u32 %v14222_v10, %v11538_v44  ;;  %v14370_v31 = vld [vmem:[#allocation22 + $0x4cc] sm:$0xf] }
 0x6c9   : > { %9520 = vmatpush.bf16.msra.mxu0 %v11573_v54  ;;  %v12005_v60 = vor.u32 %v14338_v58, %v12002_v7  ;;  %v9779_v54 = vmul.f32 %v9771_v28, %v9260_v4  ;;  %v11842_v7 = vld [vmem:[#allocation22 + $0x298] sm:$0xf0]  ;;  %v14330_v4 = vld [vmem:[#allocation22 + $0x38c] sm:$0xf] }
 0x6ca   : > { %v11826_v55 = vld [vmem:[#allocation22 + $0x278] sm:$0xf0]  ;;  %v14326_v33 = vld [vmem:[#allocation22 + $0x36c] sm:$0xf] }
 0x6cb   : > { %9495 = vmatpush.bf16.msrb.mxu2 %v13569_v2  ;;  %9509 = vmatpush.bf16.msrb.mxu3 %v13697_v18  ;;  %v11522_v2 = vld [vmem:[#allocation22 + $0x18] sm:$0xf0]  ;;  %v14250_v18 = vld [vmem:[#allocation22 + $0x10c] sm:$0xf] }
 0x6cc   : > { %9534 = vmatpush.bf16.msrb.mxu1 %v11701_v6  ;;  %v9248_v6 = vadd.f32 %v9247_v23, %v9234_v43  ;;  %v11525_v58 = vor.u32 %v14218_v48, %v11522_v2  ;;  %v11653_v44 = vor.u32 %v14250_v18, %v11650_v1  ;;  %v12258_v23 = vld [vmem:[#allocation22 + $0x5d8] sm:$0xf0]  ;;  %v14366_v48 = vld [vmem:[#allocation22 + $0x4ac] sm:$0xf] }
 0x6cd   : > { %9521 = vmatpush.bf16.msra.mxu0 %v11557_v35  ;;  %v12274_v35 = vld [vmem:[#allocation22 + $0x5f8] sm:$0xf0]  ;;  %v14398_v1 = vld [vmem:[#allocation22 + $0x5ac] sm:$0xf] }
 0x6ce   : > { %9496 = vmatmul.bf16.vlgmr.msrb.gmra.mxu2 %v17237_v26  ;;  %9510 = vmatmul.bf16.vlgmr.msrb.gmra.mxu3 %v17239_v24  ;;  %v12277_v13 = vor.u32 %v14406_v38, %v12274_v35  ;;  %v12242_v27 = vld [vmem:[#allocation22 + $0x5b8] sm:$0xf0]  ;;  %v14290_v19 = vld [vmem:[#allocation22 + $0x24c] sm:$0xf] }
 0x6cf   : > { %9544 = vmatpush.bf16.msra.mxu2 %v11893_v49  ;;  %9558 = vmatpush.bf16.msra.mxu3 %v12021_v39  ;;  %v9262_v49 = vadd.f32 %v9261_v34, %v9248_v6  ;;  %v11861_v39 = vor.u32 %v14302_v8, %v11858_v30  ;;  %v14402_v8 = vld [vmem:[#allocation22 + $0x5cc] sm:$0xf]  ;;  %v11954_v6 = vld [vmem:[#allocation22 + $0x378] sm:$0xf0]  ;;  %v12245_v35 = vor.u32 %v14398_v1, %v12242_v27 }
 0x6d0   : > { %9535 = vmatpush.bf16.msrb.mxu1 %v11685_v14  ;;  %v9797_v14 = vadd.f32 %v9789_v9, %v9779_v54  ;;  %v14294_v30 = vld [vmem:[#allocation22 + $0x26c] sm:$0xf]  ;;  %v11957_v34 = vor.u32 %v14326_v33, %v11954_v6  ;;  %v11906_v33 = vld [vmem:[#allocation22 + $0x318] sm:$0xf0] }
 0x6d1   : > { %v9783_v10 = vmul.f32 %v9771_v28, %v9262_v49  ;;  %9522 = vmatpush.bf16.msra.mxu0 %v11541_v50  ;;  %v12133_v50 = vor.u32 %v14370_v31, %v12130_v11  ;;  %v11829_v18 = vor.u32 %v14294_v30, %v11826_v55  ;;  %v11810_v49 = vld [vmem:[#allocation22 + $0x258] sm:$0xf0]  ;;  %v14358_v31 = vld [vmem:[#allocation22 + $0x46c] sm:$0xf] }
 0x6d2   : > { %v9805_v54 = vmax.f32 %v9797_v14, 0.0  ;;  %v12226_v14 = vld [vmem:[#allocation22 + $0x598] sm:$0xf0]  ;;  %v14314_v55 = vld [vmem:[#allocation22 + $0x30c] sm:$0xf] }
 0x6d3   : > { %9545 = vmatpush.bf16.msra.mxu2 %v11877_v53  ;;  %9559 = vmatpush.bf16.msra.mxu3 %v12005_v60  ;;  %v9801_v43 = vadd.f32 %v9789_v9, %v9783_v10  ;;  %v11845_v53 = vor.u32 %v14298_v57, %v11842_v7  ;;  %v11973_v60 = vor.u32 %v14330_v4, %v11970_v36  ;;  %v12114_v9 = vld [vmem:[#allocation22 + $0x4b8] sm:$0xf0]  ;;  %v14362_v57 = vld [vmem:[#allocation22 + $0x48c] sm:$0xf] }
 0x6d4   : > { %9536 = vmatpush.bf16.msrb.mxu1 %v11669_v12  ;;  %v12261_v12 = vor.u32 %v14402_v8, %v12258_v23  ;;  %v12117_v38 = vor.u32 %v14366_v48, %v12114_v9  ;;  %v11813_v7 = vor.u32 %v14290_v19, %v11810_v49  ;;  %v14394_v36 = vld [vmem:[#allocation22 + $0x58c] sm:$0xf]  ;;  %v12082_v11 = vld [vmem:[#allocation22 + $0x478] sm:$0xf0] }
 0x6d5   : > { %v9809_v28 = vmax.f32 %v9801_v43, 0.0  ;;  %9523 = vmatpush.bf16.msra.mxu0 %v11525_v58  ;;  %v12098_v58 = vld [vmem:[#allocation22 + $0x498] sm:$0xf0]  ;;  %v14286_v10 = vld [vmem:[#allocation22 + $0x22c] sm:$0xf] }
 0x6d6   : > { %v14390_v43 = vld [vmem:[#allocation22 + $0x56c] sm:$0xf]  ;;  %v12210_v8 = vld [vmem:[#allocation22 + $0x578] sm:$0xf0] }
 0x6d7   : > { %9546 = vmatpush.bf16.msra.mxu2 %v11861_v39  ;;  %9560 = vmatpush.bf16.msra.mxu3 %v11989_v41  ;;  %v17362_v2 = vmax.f32 %v9805_v54, %v9809_v28  ;;  %v14322_v39 = vld [vmem:[#allocation22 + $0x34c] sm:$0xf]  ;;  %v11938_v41 = vld [vmem:[#allocation22 + $0x358] sm:$0xf0]  ;;  %v12213_v48 = vor.u32 %v14390_v43, %v12210_v8 }
 0x6d8   : > { %9537 = vmatpush.bf16.msrb.mxu1 %v11653_v44  ;;  %9524 = vmatmul.bf16.vlgmr.msra.gmra.mxu0 %v17167_v63  ;;  %v11941_v4 = vor.u32 %v14322_v39, %v11938_v41  ;;  %v11794_v44 = vld [vmem:[#allocation22 + $0x238] sm:$0xf0]  ;;  %v14318_v63 = vld [vmem:[#allocation22 + $0x32c] sm:$0xf] }
 0x6d9   : > { %9572 = vmatpush.bf16.msrb.mxu0 %v12149_v42  ;;  %v11922_v42 = vld [vmem:[#allocation22 + $0x338] sm:$0xf0]  ;;  %v14282_v23 = vld [vmem:[#allocation22 + $0x20c] sm:$0xf] }
 0x6da   : > { %v11778_v30 = vld [vmem:[#allocation22 + $0x218] sm:$0xf0]  ;;  %v14438_v6 = vld [vmem:[#allocation22 + $0x6ec] sm:$0xf] }
 0x6db   : > { %9547 = vmatpush.bf16.msra.mxu2 %v11845_v53  ;;  %9561 = vmatpush.bf16.msra.mxu3 %v11973_v60  ;;  %v11797_v53 = vor.u32 %v14286_v10, %v11794_v44  ;;  %v11925_v60 = vor.u32 %v14318_v63, %v11922_v42  ;;  %v12402_v54 = vld [vmem:[#allocation22 + $0x6f8] sm:$0xf0]  ;;  %v14470_v28 = vld [vmem:[#allocation22 + $0x7ec] sm:$0xf] }
 0x6dc   : > { %9586 = vmatpush.bf16.msra.mxu1 %v12277_v13  ;;  %v12229_v13 = vor.u32 %v14394_v36, %v12226_v14  ;;  %v14354_v9 = vld [vmem:[#allocation22 + $0x44c] sm:$0xf]  ;;  %v12066_v1 = vld [vmem:[#allocation22 + $0x458] sm:$0xf0]  ;;  %v12405_v49 = vor.u32 %v14438_v6, %v12402_v54 }
 0x6dd   : > { %9538 = vmatmul.bf16.vlgmr.msrb.gmra.mxu1 %v17169_v56  ;;  %9573 = vmatpush.bf16.msrb.mxu0 %v12133_v50  ;;  %v12101_v56 = vor.u32 %v14362_v57, %v12098_v58  ;;  %v12530_v50 = vld [vmem:[#allocation22 + $0x7f8] sm:$0xf0]  ;;  %v14386_v27 = vld [vmem:[#allocation22 + $0x54c] sm:$0xf]  ;;  %v12069_v58 = vor.u32 %v14354_v9, %v12066_v1 }
 0x6de   : > { %v12194_v19 = vld [vmem:[#allocation22 + $0x558] sm:$0xf0]  ;;  %v12533_v39 = vor.u32 %v14470_v28, %v12530_v50  ;;  %v14434_v41 = vld [vmem:[#allocation22 + $0x6cc] sm:$0xf] }
 0x6df   : > { %9548 = vmatpush.bf16.msra.mxu2 %v11829_v18  ;;  %9562 = vmatpush.bf16.msra.mxu3 %v11957_v34  ;;  %v11781_v18 = vor.u32 %v14282_v23, %v11778_v30  ;;  %v11909_v34 = vor.u32 %v14314_v55, %v11906_v33  ;;  %v12514_v57 = vld [vmem:[#allocation22 + $0x7d8] sm:$0xf0]  ;;  %v14382_v14 = vld [vmem:[#allocation22 + $0x52c] sm:$0xf] }
 0x6e0   : > { %9587 = vmatpush.bf16.msra.mxu1 %v12261_v12  ;;  %v12085_v12 = vor.u32 %v14358_v31, %v12082_v11  ;;  %v12050_v36 = vld [vmem:[#allocation22 + $0x438] sm:$0xf0]  ;;  %v14430_v42 = vld [vmem:[#allocation22 + $0x6ac] sm:$0xf] }
 0x6e1   : > { %9574 = vmatpush.bf16.msrb.mxu0 %v12117_v38  ;;  %v12386_v38 = vld [vmem:[#allocation22 + $0x6d8] sm:$0xf0]  ;;  %v14378_v8 = vld [vmem:[#allocation22 + $0x50c] sm:$0xf] }
 0x6e2   : > { %v12178_v10 = vld [vmem:[#allocation22 + $0x538] sm:$0xf0]  ;;  %v12389_v44 = vor.u32 %v14434_v41, %v12386_v38  ;;  %v14502_v30 = vld [vmem:[#allocation22 + $0x8ec] sm:$0xf] }
 0x6e3   : > { %9549 = vmatpush.bf16.msra.mxu2 %v11813_v7  ;;  %9563 = vmatpush.bf16.msra.mxu3 %v11941_v4  ;;  %v12197_v7 = vor.u32 %v14386_v27, %v12194_v19  ;;  %v14350_v4 = vld [vmem:[#allocation22 + $0x42c] sm:$0xf]  ;;  %v12498_v31 = vld [vmem:[#allocation22 + $0x7b8] sm:$0xf0]  ;;  %v12181_v43 = vor.u32 %v14382_v14, %v12178_v10 }
 0x6e4   : > { %9588 = vmatpush.bf16.msra.mxu1 %v12245_v35  ;;  %v14466_v35 = vld [vmem:[#allocation22 + $0x7cc] sm:$0xf]  ;;  %v12053_v11 = vor.u32 %v14350_v4, %v12050_v36  ;;  %v12162_v23 = vld [vmem:[#allocation22 + $0x518] sm:$0xf0] }
 0x6e5   : > { %9575 = vmatpush.bf16.msrb.mxu0 %v12101_v56  ;;  %v12517_v63 = vor.u32 %v14466_v35, %v12514_v57  ;;  %v12370_v56 = vld [vmem:[#allocation22 + $0x6b8] sm:$0xf0]  ;;  %v14534_v54 = vld [vmem:[#allocation22 + $0x9ec] sm:$0xf] }
 0x6e6   : > { %v12658_v55 = vld [vmem:[#allocation22 + $0x8f8] sm:$0xf0]  ;;  %v12373_v33 = vor.u32 %v14430_v42, %v12370_v56  ;;  %v14426_v50 = vld [vmem:[#allocation22 + $0x68c] sm:$0xf] }
 0x6e7   : > { %9550 = vmatpush.bf16.msra.mxu2 %v11797_v53  ;;  %9564 = vmatpush.bf16.msra.mxu3 %v11925_v60  ;;  %v14346_v53 = vld [vmem:[#allocation22 + $0x40c] sm:$0xf]  ;;  %v12034_v60 = vld [vmem:[#allocation22 + $0x418] sm:$0xf0] }
 0x6e8   : > { %9589 = vmatpush.bf16.msra.mxu1 %v12229_v13  ;;  %v14462_v13 = vld [vmem:[#allocation22 + $0x7ac] sm:$0xf]  ;;  %v12786_v28 = vld [vmem:[#allocation22 + $0x9f8] sm:$0xf0] }
 0x6e9   : > { %9576 = vmatpush.bf16.msrb.mxu0 %v12085_v12  ;;  %v12501_v6 = vor.u32 %v14462_v13, %v12498_v31  ;;  %v12354_v12 = vld [vmem:[#allocation22 + $0x698] sm:$0xf0]  ;;  %v12789_v1 = vor.u32 %v14534_v54, %v12786_v28  ;;  %v14422_v38 = vld [vmem:[#allocation22 + $0x66c] sm:$0xf] }
 0x6ea   : > { %v12482_v9 = vld [vmem:[#allocation22 + $0x798] sm:$0xf0]  ;;  %v12357_v19 = vor.u32 %v14426_v50, %v12354_v12  ;;  %v14454_v57 = vld [vmem:[#allocation22 + $0x76c] sm:$0xf] }
 0x6eb   : > { %9551 = vmatpush.bf16.msra.mxu2 %v11781_v18  ;;  %9565 = vmatpush.bf16.msra.mxu3 %v11909_v34  ;;  %v12037_v18 = vor.u32 %v14346_v53, %v12034_v60  ;;  %v12165_v34 = vor.u32 %v14378_v8, %v12162_v23  ;;  %v12642_v27 = vld [vmem:[#allocation22 + $0x8d8] sm:$0xf0]  ;;  %v14494_v36 = vld [vmem:[#allocation22 + $0x8ac] sm:$0xf] }
 0x6ec   : > { %9590 = vmatpush.bf16.msra.mxu1 %v12213_v48  ;;  %v14458_v48 = vld [vmem:[#allocation22 + $0x78c] sm:$0xf]  ;;  %v12770_v41 = vld [vmem:[#allocation22 + $0x9d8] sm:$0xf0] }
 0x6ed   : > { %9577 = vmatpush.bf16.msrb.mxu0 %v12069_v58  ;;  %v12338_v35 = vld [vmem:[#allocation22 + $0x678] sm:$0xf0]  ;;  %v14418_v56 = vld [vmem:[#allocation22 + $0x64c] sm:$0xf] }
 0x6ee   : > { %9552 = vmatmul.bf16.vlgmr.msra.gmra.mxu2 %v17180_v40  ;;  %9566 = vmatmul.bf16.vlgmr.msra.gmra.mxu3 %v17182_v29  ;;  %v12661_v40 = vor.u32 %v14502_v30, %v12658_v55  ;;  %v14498_v29 = vld [vmem:[#allocation22 + $0x8cc] sm:$0xf]  ;;  %v12466_v58 = vld [vmem:[#allocation22 + $0x778] sm:$0xf0]  ;;  %v12341_v10 = vor.u32 %v14422_v38, %v12338_v35 }
 0x6ef   : > { %9600 = vmatpush.bf16.msrb.mxu2 %v12405_v49  ;;  %9614 = vmatpush.bf16.msrb.mxu3 %v12533_v39  ;;  %v12485_v49 = vor.u32 %v14458_v48, %v12482_v9  ;;  %v14530_v39 = vld [vmem:[#allocation22 + $0x9cc] sm:$0xf]  ;;  %v12626_v14 = vld [vmem:[#allocation22 + $0x8b8] sm:$0xf0] }
 0x6f0   : > { %9591 = vmatpush.bf16.msra.mxu1 %v12197_v7  ;;  %v12645_v7 = vor.u32 %v14498_v29, %v12642_v27  ;;  %v12773_v4 = vor.u32 %v14530_v39, %v12770_v41  ;;  %v12754_v42 = vld [vmem:[#allocation22 + $0x9b8] sm:$0xf0]  ;;  %v14450_v31 = vld [vmem:[#allocation22 + $0x74c] sm:$0xf] }
 0x6f1   : > { %9578 = vmatpush.bf16.msrb.mxu0 %v12053_v11  ;;  %v12322_v13 = vld [vmem:[#allocation22 + $0x658] sm:$0xf0]  ;;  %v14490_v60 = vld [vmem:[#allocation22 + $0x88c] sm:$0xf] }
 0x6f2   : > { %v12450_v11 = vld [vmem:[#allocation22 + $0x758] sm:$0xf0]  ;;  %v12325_v23 = vor.u32 %v14418_v56, %v12322_v13  ;;  %v14522_v55 = vld [vmem:[#allocation22 + $0x98c] sm:$0xf] }
 0x6f3   : > { %9601 = vmatpush.bf16.msrb.mxu2 %v12389_v44  ;;  %9615 = vmatpush.bf16.msrb.mxu3 %v12517_v63  ;;  %v12469_v44 = vor.u32 %v14454_v57, %v12466_v58  ;;  %v14526_v63 = vld [vmem:[#allocation22 + $0x9ac] sm:$0xf]  ;;  %v12610_v8 = vld [vmem:[#allocation22 + $0x898] sm:$0xf0]  ;;  %v12453_v30 = vor.u32 %v14450_v31, %v12450_v11 }
 0x6f4   : > { %9592 = vmatpush.bf16.msra.mxu1 %v12181_v43  ;;  %v12629_v43 = vor.u32 %v14494_v36, %v12626_v14  ;;  %v12757_v53 = vor.u32 %v14526_v63, %v12754_v42  ;;  %v12306_v54 = vld [vmem:[#allocation22 + $0x638] sm:$0xf0]  ;;  %v14486_v12 = vld [vmem:[#allocation22 + $0x86c] sm:$0xf] }
 0x6f5   : > { %9579 = vmatpush.bf16.msrb.mxu0 %v12037_v18  ;;  %v12434_v28 = vld [vmem:[#allocation22 + $0x738] sm:$0xf0]  ;;  %v14518_v9 = vld [vmem:[#allocation22 + $0x96c] sm:$0xf] }
 0x6f6   : > { %v12594_v48 = vld [vmem:[#allocation22 + $0x878] sm:$0xf0]  ;;  %v14442_v27 = vld [vmem:[#allocation22 + $0x70c] sm:$0xf] }
 0x6f7   : > { %9602 = vmatpush.bf16.msrb.mxu2 %v12373_v33  ;;  %9616 = vmatpush.bf16.msrb.mxu3 %v12501_v6  ;;  %v12738_v33 = vld [vmem:[#allocation22 + $0x998] sm:$0xf0]  ;;  %v14414_v6 = vld [vmem:[#allocation22 + $0x62c] sm:$0xf]  ;;  %v12597_v35 = vor.u32 %v14486_v12, %v12594_v48 }
 0x6f8   : > { %9593 = vmatpush.bf16.msra.mxu1 %v12165_v34  ;;  %9580 = vmatmul.bf16.vlgmr.msrb.gmra.mxu0 %v17186_v3  ;;  %v14446_v3 = vld [vmem:[#allocation22 + $0x72c] sm:$0xf]  ;;  %v12741_v50 = vor.u32 %v14522_v55, %v12738_v33  ;;  %v12309_v18 = vor.u32 %v14414_v6, %v12306_v54  ;;  %v12290_v29 = vld [vmem:[#allocation22 + $0x618] sm:$0xf0]  ;;  %v8786_v6 = vadd.f32 %v17251_v52, %v17249_v17  ;;  %v17376_v17 = vpop.f32.mrf.mxu3 }
 0x6f9   : > { %9628 = vmatpush.bf16.msra.mxu0 %v12661_v40  ;;  %v12437_v34 = vor.u32 %v14446_v3, %v12434_v28  ;;  %v12722_v40 = vld [vmem:[#allocation22 + $0x978] sm:$0xf0]  ;;  %v14598_v41 = vld [vmem:[#allocation22 + $0xbec] sm:$0xf] }
 0x6fa   : > { %v12914_v39 = vld [vmem:[#allocation22 + $0xaf8] sm:$0xf0]  ;;  %v12725_v57 = vor.u32 %v14518_v9, %v12722_v40  ;;  %v14482_v58 = vld [vmem:[#allocation22 + $0x84c] sm:$0xf] }
 0x6fb   : > { %9603 = vmatpush.bf16.msrb.mxu2 %v12357_v19  ;;  %9617 = vmatpush.bf16.msrb.mxu3 %v12485_v49  ;;  %v12418_v19 = vld [vmem:[#allocation22 + $0x718] sm:$0xf0]  ;;  %v14566_v49 = vld [vmem:[#allocation22 + $0xaec] sm:$0xf] }
 0x6fc   : > { %9642 = vmatpush.bf16.msrb.mxu1 %v12789_v1  ;;  %v14410_v1 = vld [vmem:[#allocation22 + $0x60c] sm:$0xf]  ;;  %v13042_v38 = vld [vmem:[#allocation22 + $0xbf8] sm:$0xf0] }
 0x6fd   : > { %9594 = vmatmul.bf16.vlgmr.msra.gmra.mxu1 %v17188_v47  ;;  %9629 = vmatpush.bf16.msra.mxu0 %v12645_v7  ;;  %v12613_v47 = vor.u32 %v14490_v60, %v12610_v8  ;;  %v12293_v7 = vor.u32 %v14410_v1, %v12290_v29  ;;  %v12578_v36 = vld [vmem:[#allocation22 + $0x858] sm:$0xf0]  ;;  %v14514_v14 = vld [vmem:[#allocation22 + $0x94c] sm:$0xf]  ;;  %v13045_v63 = vor.u32 %v14598_v41, %v13042_v38  ;;  %v17374_v1 = vpop.f32.mrf.mxu2 }
 0x6fe   : > { %v14562_v42 = vld [vmem:[#allocation22 + $0xacc] sm:$0xf]  ;;  %v12898_v56 = vld [vmem:[#allocation22 + $0xad8] sm:$0xf0]  ;;  %v12581_v11 = vor.u32 %v14482_v58, %v12578_v36 }
 0x6ff   : > { %9604 = vmatpush.bf16.msrb.mxu2 %v12341_v10  ;;  %9618 = vmatpush.bf16.msrb.mxu3 %v12469_v44  ;;  %v12706_v10 = vld [vmem:[#allocation22 + $0x958] sm:$0xf0]  ;;  %v12917_v44 = vor.u32 %v14566_v49, %v12914_v39  ;;  %v14594_v13 = vld [vmem:[#allocation22 + $0xbcc] sm:$0xf]  ;;  %v8800_v39 = vadd.f32 %v17253_v51, %v8786_v6 }
 0x700   : > { %9643 = vmatpush.bf16.msrb.mxu1 %v12773_v4  ;;  %v12421_v4 = vor.u32 %v14442_v27, %v12418_v19  ;;  %v13026_v31 = vld [vmem:[#allocation22 + $0xbd8] sm:$0xf0]  ;;  %v14510_v8 = vld [vmem:[#allocation22 + $0x92c] sm:$0xf] }
 0x701   : > { %9630 = vmatpush.bf16.msra.mxu0 %v12629_v43  ;;  %v12709_v43 = vor.u32 %v14514_v14, %v12706_v10  ;;  %v12562_v60 = vld [vmem:[#allocation22 + $0x838] sm:$0xf0]  ;;  %v13029_v55 = vor.u32 %v14594_v13, %v13026_v31  ;;  %v14558_v33 = vld [vmem:[#allocation22 + $0xaac] sm:$0xf]  ;;  %v8814_v51 = vadd.f32 %v17255_v5, %v8800_v39 }
 0x702   : > { %v12882_v54 = vld [vmem:[#allocation22 + $0xab8] sm:$0xf0]  ;;  %v14590_v3 = vld [vmem:[#allocation22 + $0xbac] sm:$0xf] }
 0x703   : > { %9605 = vmatpush.bf16.msrb.mxu2 %v12325_v23  ;;  %9619 = vmatpush.bf16.msrb.mxu3 %v12453_v30  ;;  %v12690_v23 = vld [vmem:[#allocation22 + $0x938] sm:$0xf0]  ;;  %v12901_v30 = vor.u32 %v14562_v42, %v12898_v56  ;;  %v14474_v12 = vld [vmem:[#allocation22 + $0x80c] sm:$0xf]  ;;  %v12885_v52 = vor.u32 %v14558_v33, %v12882_v54  ;;  %v8828_v31 = vadd.f32 %v17263_v37, %v8814_v51  ;;  %v17381_v33 = vpop.f32.mrf.mxu0 }
 0x704   : > { %9644 = vmatpush.bf16.msrb.mxu1 %v12757_v53  ;;  %v14478_v53 = vld [vmem:[#allocation22 + $0x82c] sm:$0xf]  ;;  %v13010_v28 = vld [vmem:[#allocation22 + $0xbb8] sm:$0xf0] }
 0x705   : > { %9631 = vmatpush.bf16.msra.mxu0 %v12613_v47  ;;  %v12565_v47 = vor.u32 %v14478_v53, %v12562_v60  ;;  %v12546_v48 = vld [vmem:[#allocation22 + $0x818] sm:$0xf0]  ;;  %v14506_v9 = vld [vmem:[#allocation22 + $0x90c] sm:$0xf]  ;;  %v13013_v29 = vor.u32 %v14590_v3, %v13010_v28  ;;  %v17385_v3 = vpop.f32.mrf.mxu2  ;;  %v17387_v28 = vpop.f32.mrf.mxu3 }
 0x706   : > { %v13170_v40 = vld [vmem:[#allocation22 + $0xcf8] sm:$0xf0]  ;;  %v14662_v27 = vld [vmem:[#allocation22 + $0xdec] sm:$0xf] }
 0x707   : > { %9606 = vmatpush.bf16.msrb.mxu2 %v12309_v18  ;;  %9620 = vmatpush.bf16.msrb.mxu3 %v12437_v34  ;;  %v12674_v18 = vld [vmem:[#allocation22 + $0x918] sm:$0xf0]  ;;  %v14630_v34 = vld [vmem:[#allocation22 + $0xcec] sm:$0xf] }
 0x708   : > { %9645 = vmatpush.bf16.msrb.mxu1 %v12741_v50  ;;  %v12693_v50 = vor.u32 %v14510_v8, %v12690_v23  ;;  %v13298_v19 = vld [vmem:[#allocation22 + $0xdf8] sm:$0xf0]  ;;  %v14554_v49 = vld [vmem:[#allocation22 + $0xa8c] sm:$0xf] }
 0x709   : > { %9632 = vmatpush.bf16.msra.mxu0 %v12597_v35  ;;  %v12866_v41 = vld [vmem:[#allocation22 + $0xa98] sm:$0xf0]  ;;  %v12677_v35 = vor.u32 %v14506_v9, %v12674_v18  ;;  %v13301_v58 = vor.u32 %v14662_v27, %v13298_v19  ;;  %v14658_v10 = vld [vmem:[#allocation22 + $0xdcc] sm:$0xf]  ;;  %v17390_v19 = vpop.f32.mrf.mxu1 }
 0x70a   : > { %v12994_v38 = vld [vmem:[#allocation22 + $0xb98] sm:$0xf0]  ;;  %v12869_v36 = vor.u32 %v14554_v49, %v12866_v41  ;;  %v14582_v56 = vld [vmem:[#allocation22 + $0xb6c] sm:$0xf] }
 0x70b   : > { %9607 = vmatpush.bf16.msrb.mxu2 %v12293_v7  ;;  %9621 = vmatpush.bf16.msrb.mxu3 %v12421_v4  ;;  %v14626_v7 = vld [vmem:[#allocation22 + $0xccc] sm:$0xf]  ;;  %v13154_v4 = vld [vmem:[#allocation22 + $0xcd8] sm:$0xf0] }
 0x70c   : > { %9646 = vmatpush.bf16.msrb.mxu1 %v12725_v57  ;;  %v13173_v57 = vor.u32 %v14630_v34, %v13170_v40  ;;  %v12850_v42 = vld [vmem:[#allocation22 + $0xa78] sm:$0xf0]  ;;  %v14622_v53 = vld [vmem:[#allocation22 + $0xcac] sm:$0xf] }
 0x70d   : > { %9633 = vmatpush.bf16.msra.mxu0 %v12581_v11  ;;  %v12978_v13 = vld [vmem:[#allocation22 + $0xb78] sm:$0xf0]  ;;  %v13157_v11 = vor.u32 %v14626_v7, %v13154_v4  ;;  %v14546_v5 = vld [vmem:[#allocation22 + $0xa4c] sm:$0xf] }
 0x70e   : > { %9608 = vmatmul.bf16.vlgmr.msrb.gmra.mxu2 %v17194_v20  ;;  %9622 = vmatmul.bf16.vlgmr.msrb.gmra.mxu3 %v17196_v46  ;;  %v14586_v20 = vld [vmem:[#allocation22 + $0xb8c] sm:$0xf]  ;;  %v12549_v46 = vor.u32 %v14474_v12, %v12546_v48  ;;  %v13138_v60 = vld [vmem:[#allocation22 + $0xcb8] sm:$0xf0]  ;;  %v12981_v23 = vor.u32 %v14582_v56, %v12978_v13  ;;  %v17398_v56 = vpop.f32.mrf.mxu0 }
 0x70f   : > { %9656 = vmatpush.bf16.msra.mxu2 %v12917_v44  ;;  %9670 = vmatpush.bf16.msra.mxu3 %v13045_v63  ;;  %v12997_v14 = vor.u32 %v14586_v20, %v12994_v38  ;;  %v13282_v44 = vld [vmem:[#allocation22 + $0xdd8] sm:$0xf0]  ;;  %v14550_v63 = vld [vmem:[#allocation22 + $0xa6c] sm:$0xf] }
 0x710   : > { %9647 = vmatpush.bf16.msrb.mxu1 %v12709_v43  ;;  %v13285_v43 = vor.u32 %v14658_v10, %v13282_v44  ;;  %v12853_v8 = vor.u32 %v14550_v63, %v12850_v42  ;;  %v12834_v37 = vld [vmem:[#allocation22 + $0xa58] sm:$0xf0]  ;;  %v14578_v6 = vld [vmem:[#allocation22 + $0xb4c] sm:$0xf]  ;;  %v17393_v10 = vpop.f32.mrf.mxu2 }
 0x711   : > { %9634 = vmatpush.bf16.msra.mxu0 %v12565_v47  ;;  %v12962_v54 = vld [vmem:[#allocation22 + $0xb58] sm:$0xf0]  ;;  %v8842_v47 = vadd.f32 %v17265_v25, %v8828_v31  ;;  %v14618_v48 = vld [vmem:[#allocation22 + $0xc8c] sm:$0xf] }
 0x712   : > { %v13122_v9 = vld [vmem:[#allocation22 + $0xc98] sm:$0xf0]  ;;  %v12965_v18 = vor.u32 %v14578_v6, %v12962_v54  ;;  %v14542_v40 = vld [vmem:[#allocation22 + $0xa2c] sm:$0xf] }
 0x713   : > { %9657 = vmatpush.bf16.msra.mxu2 %v12901_v30  ;;  %9671 = vmatpush.bf16.msra.mxu3 %v13029_v55  ;;  %v14654_v30 = vld [vmem:[#allocation22 + $0xdac] sm:$0xf]  ;;  %v13266_v55 = vld [vmem:[#allocation22 + $0xdb8] sm:$0xf0]  ;;  %v8856_v25 = vadd.f32 %v17267_v32, %v8842_v47  ;;  %v13125_v49 = vor.u32 %v14618_v48, %v13122_v9  ;;  %v17395_v32 = vpop.f32.mrf.mxu3  ;;  %v17404_v9 = vpop.f32.mrf.mxu1 }
 0x714   : > { %9648 = vmatpush.bf16.msrb.mxu1 %v12693_v50  ;;  %v13141_v50 = vor.u32 %v14622_v53, %v13138_v60  ;;  %v13269_v12 = vor.u32 %v14654_v30, %v13266_v55  ;;  %v13250_v34 = vld [vmem:[#allocation22 + $0xd98] sm:$0xf0]  ;;  %v14614_v41 = vld [vmem:[#allocation22 + $0xc6c] sm:$0xf] }
 0x715   : > { %9635 = vmatpush.bf16.msra.mxu0 %v12549_v46  ;;  %v12946_v27 = vld [vmem:[#allocation22 + $0xb38] sm:$0xf0]  ;;  %v14646_v38 = vld [vmem:[#allocation22 + $0xd6c] sm:$0xf]  ;;  %v8870_v42 = vadd.f32 %v17269_v59, %v8856_v25 }
 0x716   : > { %v13106_v20 = vld [vmem:[#allocation22 + $0xc78] sm:$0xf0]  ;;  %v14570_v4 = vld [vmem:[#allocation22 + $0xb0c] sm:$0xf] }
 0x717   : > { %9658 = vmatpush.bf16.msra.mxu2 %v12885_v52  ;;  %9672 = vmatpush.bf16.msra.mxu3 %v13013_v29  ;;  %v12818_v52 = vld [vmem:[#allocation22 + $0xa38] sm:$0xf0]  ;;  %v14574_v29 = vld [vmem:[#allocation22 + $0xb2c] sm:$0xf]  ;;  %v13109_v13 = vor.u32 %v14614_v41, %v13106_v20  ;;  %v17407_v41 = vpop.f32.mrf.mxu0 }
 0x718   : > { %9649 = vmatpush.bf16.msrb.mxu1 %v12677_v35  ;;  %9636 = vmatmul.bf16.vlgmr.msra.gmra.mxu0 %v17207_v0  ;;  %v12837_v0 = vor.u32 %v14546_v5, %v12834_v37  ;;  %v12821_v46 = vor.u32 %v14542_v40, %v12818_v52  ;;  %v12949_v35 = vor.u32 %v14574_v29, %v12946_v27  ;;  %v12802_v7 = vld [vmem:[#allocation22 + $0xa18] sm:$0xf0]  ;;  %v14726_v63 = vld [vmem:[#allocation22 + $0xfec] sm:$0xf] }
 0x719   : > { %9684 = vmatpush.bf16.msrb.mxu0 %v13173_v57  ;;  %v13234_v57 = vld [vmem:[#allocation22 + $0xd78] sm:$0xf0]  ;;  %v14690_v59 = vld [vmem:[#allocation22 + $0xecc] sm:$0xf] }
 0x71a   : > { %v13426_v44 = vld [vmem:[#allocation22 + $0xef8] sm:$0xf0]  ;;  %v13237_v31 = vor.u32 %v14646_v38, %v13234_v57  ;;  %v17667_v37 = vld [vmem:[#allocation45_spill] sm:$0xff] }
 0x71b   : > { %9659 = vmatpush.bf16.msra.mxu2 %v12869_v36  ;;  %9673 = vmatpush.bf16.msra.mxu3 %v12997_v14  ;;  %v12930_v36 = vld [vmem:[#allocation22 + $0xb18] sm:$0xf0]  ;;  %v14694_v14 = vld [vmem:[#allocation22 + $0xeec] sm:$0xf]  ;;  %v8884_v6 = vadd.f32 %v17667_v37, %v8870_v42 }
 0x71c   : > { %9698 = vmatpush.bf16.msra.mxu1 %v13301_v58  ;;  %v14538_v58 = vld [vmem:[#allocation22 + $0xa0c] sm:$0xf]  ;;  %v13554_v51 = vld [vmem:[#allocation22 + $0xff8] sm:$0xf0]  ;;  %v12933_v60 = vor.u32 %v14570_v4, %v12930_v36  ;;  %v13429_v55 = vor.u32 %v14694_v14, %v13426_v44  ;;  %v9290_v44 = vadd.f32 %v17387_v28, %v17385_v3 }
 0x71d   : > { %9650 = vmatmul.bf16.vlgmr.msrb.gmra.mxu1 %v17209_v45  ;;  %9685 = vmatpush.bf16.msrb.mxu0 %v13157_v11  ;;  %v14650_v45 = vld [vmem:[#allocation22 + $0xd8c] sm:$0xf]  ;;  %v12805_v53 = vor.u32 %v14538_v58, %v12802_v7  ;;  %v13218_v30 = vld [vmem:[#allocation22 + $0xd58] sm:$0xf0]  ;;  %v13557_v5 = vor.u32 %v14726_v63, %v13554_v51  ;;  %v17410_v58 = vpop.f32.mrf.mxu2  ;;  %v17412_v7 = vpop.f32.mrf.mxu3 }
 0x71e   : > { %v13253_v39 = vor.u32 %v14650_v45, %v13250_v34  ;;  %v14610_v11 = vld [vmem:[#allocation22 + $0xc4c] sm:$0xf]  ;;  %v13410_v54 = vld [vmem:[#allocation22 + $0xed8] sm:$0xf0] }
 0x71f   : > { %9660 = vmatpush.bf16.msra.mxu2 %v12853_v8  ;;  %9674 = vmatpush.bf16.msra.mxu3 %v12981_v23  ;;  %v13090_v8 = vld [vmem:[#allocation22 + $0xc58] sm:$0xf0]  ;;  %v14642_v23 = vld [vmem:[#allocation22 + $0xd4c] sm:$0xf]  ;;  %v13413_v34 = vor.u32 %v14690_v59, %v13410_v54 }
 0x720   : > { %9699 = vmatpush.bf16.msra.mxu1 %v13285_v43  ;;  %v9288_v43 = vadd.f32 %v17376_v17, %v17374_v1  ;;  %v14722_v47 = vld [vmem:[#allocation22 + $0xfcc] sm:$0xf]  ;;  %v13221_v48 = vor.u32 %v14642_v23, %v13218_v30  ;;  %v13202_v45 = vld [vmem:[#allocation22 + $0xd38] sm:$0xf0]  ;;  %v17420_v23 = vpop.f32.mrf.mxu1 }
 0x721   : > { %9686 = vmatpush.bf16.msrb.mxu0 %v13141_v50  ;;  %v13538_v50 = vld [vmem:[#allocation22 + $0xfd8] sm:$0xf0]  ;;  %v14606_v1 = vld [vmem:[#allocation22 + $0xc2c] sm:$0xf] }
 0x722   : > { %v9302_v17 = vadd.f32 %v17381_v33, %v9288_v43  ;;  %v13541_v40 = vor.u32 %v14722_v47, %v13538_v50  ;;  %v14686_v52 = vld [vmem:[#allocation22 + $0xeac] sm:$0xf]  ;;  %v17668_v29 = vld [vmem:[#allocation46_spill] sm:$0xff] }
 0x723   : > { %9661 = vmatpush.bf16.msra.mxu2 %v12837_v0  ;;  %9675 = vmatpush.bf16.msra.mxu3 %v12965_v18  ;;  %v13074_v0 = vld [vmem:[#allocation22 + $0xc38] sm:$0xf0]  ;;  %v14638_v18 = vld [vmem:[#allocation22 + $0xd2c] sm:$0xf]  ;;  %v8898_v27 = vadd.f32 %v17668_v29, %v8884_v6 }
 0x724   : > { %9700 = vmatpush.bf16.msra.mxu1 %v13269_v12  ;;  %v13093_v12 = vor.u32 %v14610_v11, %v13090_v8  ;;  %v13394_v25 = vld [vmem:[#allocation22 + $0xeb8] sm:$0xf0]  ;;  %v13077_v33 = vor.u32 %v14606_v1, %v13074_v0  ;;  %v13205_v20 = vor.u32 %v14638_v18, %v13202_v45  ;;  %v14602_v38 = vld [vmem:[#allocation22 + $0xc0c] sm:$0xf]  ;;  %v9316_v57 = vadd.f32 %v17390_v19, %v9302_v17 }
 0x725   : > { %9687 = vmatpush.bf16.msrb.mxu0 %v13125_v49  ;;  %v14718_v49 = vld [vmem:[#allocation22 + $0xfac] sm:$0xf]  ;;  %v13186_v4 = vld [vmem:[#allocation22 + $0xd18] sm:$0xf0]  ;;  %v13397_v63 = vor.u32 %v14686_v52, %v13394_v25  ;;  %v9385_v45 = vpop.f32.mrf.mxu2  ;;  %v9359_v25 = vpop.f32.mrf.mxu0 }
 0x726   : > { %v14758_v36 = vld [vmem:[#allocation22 + $0x10ec] sm:$0xf]  ;;  %v13682_v14 = vld [vmem:[#allocation22 + $0x10f8] sm:$0xf0] }
 0x727   : > { %9662 = vmatpush.bf16.msra.mxu2 %v12821_v46  ;;  %9676 = vmatpush.bf16.msra.mxu3 %v12949_v35  ;;  %v13058_v46 = vld [vmem:[#allocation22 + $0xc18] sm:$0xf0]  ;;  %v14634_v35 = vld [vmem:[#allocation22 + $0xd0c] sm:$0xf]  ;;  %v13685_v3 = vor.u32 %v14758_v36, %v13682_v14 }
 0x728   : > { %9701 = vmatpush.bf16.msra.mxu1 %v13253_v39  ;;  %v13522_v39 = vld [vmem:[#allocation22 + $0xfb8] sm:$0xf0]  ;;  %v14790_v42 = vld [vmem:[#allocation22 + $0x11ec] sm:$0xf]  ;;  %v13189_v8 = vor.u32 %v14634_v35, %v13186_v4 }
 0x729   : > { %9688 = vmatpush.bf16.msrb.mxu0 %v13109_v13  ;;  %v13525_v51 = vor.u32 %v14718_v49, %v13522_v39  ;;  %v13810_v19 = vld [vmem:[#allocation22 + $0x11f8] sm:$0xf0]  ;;  %v14682_v13 = vld [vmem:[#allocation22 + $0xe8c] sm:$0xf] }
 0x72a   : > { %v13378_v43 = vld [vmem:[#allocation22 + $0xe98] sm:$0xf0]  ;;  %v13813_v28 = vor.u32 %v14790_v42, %v13810_v19  ;;  %v14754_v30 = vld [vmem:[#allocation22 + $0x10cc] sm:$0xf] }
 0x72b   : > { %9663 = vmatpush.bf16.msra.mxu2 %v12805_v53  ;;  %9677 = vmatpush.bf16.msra.mxu3 %v12933_v60  ;;  %v14714_v53 = vld [vmem:[#allocation22 + $0xf8c] sm:$0xf]  ;;  %v13061_v60 = vor.u32 %v14602_v38, %v13058_v46  ;;  %v13381_v59 = vor.u32 %v14682_v13, %v13378_v43  ;;  %v13794_v54 = vld [vmem:[#allocation22 + $0x11d8] sm:$0xf0] }
 0x72c   : > { %9702 = vmatpush.bf16.msra.mxu1 %v13237_v31  ;;  %v17669_v31 = vld [vmem:[#allocation47_spill] sm:$0xff]  ;;  %v14786_v6 = vld [vmem:[#allocation22 + $0x11cc] sm:$0xf] }
 0x72d   : > { %9689 = vmatpush.bf16.msrb.mxu0 %v13093_v12  ;;  %v8912_v11 = vadd.f32 %v17669_v31, %v8898_v27  ;;  %v14678_v47 = vld [vmem:[#allocation22 + $0xe6c] sm:$0xf]  ;;  %v13362_v12 = vld [vmem:[#allocation22 + $0xe78] sm:$0xf0]  ;;  %v9373_v31 = vpop.f32.mrf.mxu1 }
 0x72e   : > { %9664 = vmatmul.bf16.vlgmr.msra.gmra.mxu2 %v17213_v16  ;;  %9678 = vmatmul.bf16.vlgmr.msra.gmra.mxu3 %v17215_v15  ;;  %v13506_v16 = vld [vmem:[#allocation22 + $0xf98] sm:$0xf0]  ;;  %v9330_v15 = vadd.f32 %v17393_v10, %v9316_v57  ;;  %v17670_v10 = vld [vmem:[#allocation48_spill] sm:$0xff]  ;;  %v17671_v0 = vld [vmem:[#allocation49_spill] sm:$0xff]  ;;  %v13365_v49 = vor.u32 %v14678_v47, %v13362_v12 }
 0x72f   : > { %9712 = vmatpush.bf16.msrb.mxu2 %v13429_v55  ;;  %9726 = vmatpush.bf16.msrb.mxu3 %v13557_v5  ;;  %v13666_v55 = vld [vmem:[#allocation22 + $0x10d8] sm:$0xf0]  ;;  %v9304_v5 = vadd.f32 %v17398_v56, %v9290_v44  ;;  %v13509_v37 = vor.u32 %v14714_v53, %v13506_v16  ;;  %v8926_v50 = vadd.f32 %v17670_v10, %v8912_v11  ;;  %v17426_v56 = vpop.f32.mrf.mxu3  ;;  %v14750_v52 = vld [vmem:[#allocation22 + $0x10ac] sm:$0xf] }
 0x730   : > { %9703 = vmatpush.bf16.msra.mxu1 %v13221_v48  ;;  %v14710_v48 = vld [vmem:[#allocation22 + $0xf6c] sm:$0xf]  ;;  %v13490_v1 = vld [vmem:[#allocation22 + $0xf78] sm:$0xf0]  ;;  %v9344_v17 = vadd.f32 %v17395_v32, %v9330_v15 }
 0x731   : > { %9690 = vmatpush.bf16.msrb.mxu0 %v13077_v33  ;;  %v8940_v18 = vadd.f32 %v17671_v0, %v8926_v50  ;;  %v13650_v29 = vld [vmem:[#allocation22 + $0x10b8] sm:$0xf0]  ;;  %v9318_v27 = vadd.f32 %v17404_v9, %v9304_v5  ;;  %v13493_v32 = vor.u32 %v14710_v48, %v13490_v1  ;;  %v14782_v39 = vld [vmem:[#allocation22 + $0x11ac] sm:$0xf] }
 0x732   : > { %v13778_v33 = vld [vmem:[#allocation22 + $0x11b8] sm:$0xf0]  ;;  %v14706_v46 = vld [vmem:[#allocation22 + $0xf4c] sm:$0xf]  ;;  %v9358_v57 = vadd.f32 %v17407_v41, %v9344_v17  ;;  %v13653_v14 = vor.u32 %v14750_v52, %v13650_v29 }
 0x733   : > { %9713 = vmatpush.bf16.msrb.mxu2 %v13413_v34  ;;  %9727 = vmatpush.bf16.msrb.mxu3 %v13541_v40  ;;  %v13669_v34 = vor.u32 %v14754_v30, %v13666_v55  ;;  %v13797_v40 = vor.u32 %v14786_v6, %v13794_v54  ;;  %v13346_v38 = vld [vmem:[#allocation22 + $0xe58] sm:$0xf0]  ;;  %v9332_v4 = vadd.f32 %v17410_v58, %v9318_v27  ;;  %v14670_v13 = vld [vmem:[#allocation22 + $0xe2c] sm:$0xf]  ;;  %v9413_v55 = vpop.f32.mrf.mxu0 }
 0x734   : > { %9704 = vmatpush.bf16.msra.mxu1 %v13205_v20  ;;  %v14674_v20 = vld [vmem:[#allocation22 + $0xe4c] sm:$0xf]  ;;  %v13474_v35 = vld [vmem:[#allocation22 + $0xf58] sm:$0xf0]  ;;  %v13781_v44 = vor.u32 %v14782_v39, %v13778_v33  ;;  %v9372_v58 = vadd.f32 %v17420_v23, %v9358_v57  ;;  %v9387_v23 = vpop.f32.mrf.mxu2 }
 0x735   : > { %9691 = vmatpush.bf16.msrb.mxu0 %v13061_v60  ;;  %v17672_v9 = vld [vmem:[#allocation50_spill] sm:$0xff]  ;;  %v13477_v42 = vor.u32 %v14706_v46, %v13474_v35  ;;  %v14702_v41 = vld [vmem:[#allocation22 + $0xf2c] sm:$0xf]  ;;  %v9346_v53 = vadd.f32 %v17412_v7, %v9332_v4  ;;  %v17673_v16 = vld [vmem:[#allocation51_spill] sm:$0xff] }
 0x736   : > { %v8954_v36 = vadd.f32 %v17672_v9, %v8940_v18  ;;  %v13762_v19 = vld [vmem:[#allocation22 + $0x1198] sm:$0xf0]  ;;  %v9386_v30 = vadd.f32 %v9385_v45, %v9372_v58  ;;  %v14666_v54 = vld [vmem:[#allocation22 + $0xe0c] sm:$0xf] }
 0x737   : > { %9714 = vmatpush.bf16.msrb.mxu2 %v13397_v63  ;;  %9728 = vmatpush.bf16.msrb.mxu3 %v13525_v51  ;;  %v14746_v63 = vld [vmem:[#allocation22 + $0x108c] sm:$0xf]  ;;  %v13634_v51 = vld [vmem:[#allocation22 + $0x1098] sm:$0xf0]  ;;  %v9401_v47 = vpop.f32.mrf.mxu3  ;;  %v9360_v12 = vadd.f32 %v9359_v25, %v9346_v53 }
 0x738   : > { %9705 = vmatpush.bf16.msra.mxu1 %v13189_v8  ;;  %9692 = vmatmul.bf16.vlgmr.msrb.gmra.mxu0 %v17219_v62  ;;  %v13349_v62 = vor.u32 %v14674_v20, %v13346_v38  ;;  %v13330_v11 = vld [vmem:[#allocation22 + $0xe38] sm:$0xf0]  ;;  %v8968_v15 = vadd.f32 %v17673_v16, %v8954_v36  ;;  %v13637_v60 = vor.u32 %v14746_v63, %v13634_v51  ;;  %v14698_v10 = vld [vmem:[#allocation22 + $0xf0c] sm:$0xf]  ;;  %v14799_v63 = vld [vmem:[%s17599_s13 + $0x30] sm:$0xff] }
 0x739   : > { %9740 = vmatpush.bf16.msra.mxu0 %v13685_v3  ;;  %v13458_v43 = vld [vmem:[#allocation22 + $0xf38] sm:$0xf0]  ;;  %v14742_v3 = vld [vmem:[#allocation22 + $0x106c] sm:$0xf]  ;;  %v13333_v5 = vor.u32 %v14670_v13, %v13330_v11  ;;  %v9400_v45 = vadd.f32 %v17426_v56, %v9386_v30  ;;  %v9374_v20 = vadd.f32 %v9373_v31, %v9360_v12  ;;  %v14807_v51 = vld [vmem:[%s17599_s13 + $0x70] sm:$0xff] }
 0x73a   : > { %v13746_v6 = vld [vmem:[#allocation22 + $0x1178] sm:$0xf0]  ;;  %v17674_v48 = vld [vmem:[#allocation52_spill] sm:$0xff] }
 0x73b   : > { %9715 = vmatpush.bf16.msrb.mxu2 %v13381_v59  ;;  %9729 = vmatpush.bf16.msrb.mxu3 %v13509_v37  ;;  %v13461_v59 = vor.u32 %v14702_v41, %v13458_v43  ;;  %v14774_v37 = vld [vmem:[#allocation22 + $0x116c] sm:$0xf]  ;;  %v13314_v7 = vld [vmem:[#allocation22 + $0xe18] sm:$0xf0]  ;;  %v8982_v1 = vadd.f32 %v17674_v48, %v8968_v15  ;;  %v9414_v35 = vadd.f32 %v9413_v55, %v9400_v45 }
 0x73c   : > { %9754 = vmatpush.bf16.msrb.mxu1 %v13813_v28  ;;  %v13618_v28 = vld [vmem:[#allocation22 + $0x1078] sm:$0xf0]  ;;  %v13749_v0 = vor.u32 %v14774_v37, %v13746_v6  ;;  %v14738_v18 = vld [vmem:[#allocation22 + $0x104c] sm:$0xf]  ;;  %v9388_v57 = vadd.f32 %v9387_v23, %v9374_v20  ;;  %v14797_v23 = vld [vmem:[%s17599_s13 + $0x20] sm:$0xff] }
 0x73d   : > { %9706 = vmatmul.bf16.vlgmr.msra.gmra.mxu1 %v17221_v22  ;;  %9741 = vmatpush.bf16.msra.mxu0 %v13669_v34  ;;  %v14778_v22 = vld [vmem:[#allocation22 + $0x118c] sm:$0xf]  ;;  %v13442_v50 = vld [vmem:[#allocation22 + $0xf18] sm:$0xf0]  ;;  %v13621_v17 = vor.u32 %v14742_v3, %v13618_v28  ;;  %v13317_v34 = vor.u32 %v14666_v54, %v13314_v7 }
 0x73e   : > { %v13765_v8 = vor.u32 %v14778_v22, %v13762_v19  ;;  %v13602_v52 = vld [vmem:[#allocation22 + $0x1058] sm:$0xf0]  ;;  %v14770_v29 = vld [vmem:[#allocation22 + $0x114c] sm:$0xf]  ;;  %v9415_v22 = vpop.f32.mrf.mxu0  ;;  %v17453_v19 = vld [vmem:[#allocation23] sm:$0xf]  ;;  %v9402_v58 = vadd.f32 %v9401_v47, %v9388_v57 }
 0x73f   : > { %9716 = vmatpush.bf16.msrb.mxu2 %v13365_v49  ;;  %9730 = vmatpush.bf16.msrb.mxu3 %v13493_v32  ;;  %v13730_v27 = vld [vmem:[#allocation22 + $0x1158] sm:$0xf0]  ;;  %v9427_v49 = vpop.f32.mrf.mxu1  ;;  %v13605_v56 = vor.u32 %v14738_v18, %v13602_v52  ;;  %v14734_v46 = vld [vmem:[#allocation22 + $0x102c] sm:$0xf]  ;;  %v9770_v13 = vperm.slane %v17453_v19, 0  ;;  %v14805_v47 = vld [vmem:[%s17599_s13 + $0x60] sm:$0xff] }
 0x740   : > { %9755 = vmatpush.bf16.msrb.mxu1 %v13797_v40  ;;  %v13445_v40 = vor.u32 %v14698_v10, %v13442_v50  ;;  %v14800_v25 = vld [vmem:[%s17599_s13 + $0x38] sm:$0xff]  ;;  %v13733_v38 = vor.u32 %v14770_v29, %v13730_v27  ;;  %v14766_v9 = vld [vmem:[#allocation22 + $0x112c] sm:$0xf]  ;;  %v9428_v43 = vadd.f32 %v9427_v49, %v9414_v35  ;;  %v9416_v6 = vadd.f32 %v9415_v22, %v9402_v58 }
 0x741   : > { %9742 = vmatpush.bf16.msra.mxu0 %v13653_v14  ;;  %v14808_v32 = vld [vmem:[%s17599_s13 + $0x78] sm:$0xff]  ;;  %v9441_v14 = vpop.f32.mrf.mxu2  ;;  %v14730_v41 = vld [vmem:[#allocation22 + $0x100c] sm:$0xf] }
 0x742   : > { %v17675_v39 = vld [vmem:[#allocation54_spill] sm:$0xff]  ;;  %v14762_v16 = vld [vmem:[#allocation22 + $0x110c] sm:$0xf]  ;;  %v9442_v28 = vadd.f32 %v9441_v14, %v9428_v43 }
 0x743   : > { %9717 = vmatpush.bf16.msrb.mxu2 %v13349_v62  ;;  %9731 = vmatpush.bf16.msrb.mxu3 %v13477_v42  ;;  %v8996_v33 = vadd.f32 %v17675_v39, %v8982_v1  ;;  %v13586_v4 = vld [vmem:[#allocation22 + $0x1038] sm:$0xf0]  ;;  %v17677_v55 = vld [vmem:[#allocation53_spill] sm:$0xff] }
 0x744   : > { %9756 = vmatpush.bf16.msrb.mxu1 %v13781_v44  ;;  %v13714_v36 = vld [vmem:[#allocation22 + $0x1138] sm:$0xf0]  ;;  %v9455_v44 = vpop.f32.mrf.mxu3  ;;  %v13589_v31 = vor.u32 %v14734_v46, %v13586_v4  ;;  %v14814_v49 = vld [vmem:[%s17599_s13 + $0xa8] sm:$0xff] }
 0x745   : > { %9743 = vmatpush.bf16.msra.mxu0 %v13637_v60  ;;  %v17676_v62 = vld [vmem:[#allocation55_spill] sm:$0xff]  ;;  %v13717_v11 = vor.u32 %v14766_v9, %v13714_v36  ;;  %v14798_v60 = vld [vmem:[%s17599_s13 + $0x28] sm:$0xff]  ;;  %v9456_v10 = vadd.f32 %v9455_v44, %v9442_v28  ;;  %v9821_v9 = vrot.slane %v17362_v2, 1  ;;  %v9772_v44 = vperm.slane %v17453_v19, 2 }
 0x746   : > { %v9010_v42 = vadd.f32 %v17676_v62, %v8996_v33  ;;  %v13570_v53 = vld [vmem:[#allocation22 + $0x1018] sm:$0xf0]  ;;  %v9469_v50 = vpop.f32.mrf.mxu0  ;;  %v14794_v35 = vld [vmem:[%s17599_s13 + $0x8] sm:$0xff]  ;;  %v14793_v62 = vld [vmem:[%s17599_s13] sm:$0xff] }
 0x747   : > { %9718 = vmatpush.bf16.msrb.mxu2 %v13333_v5  ;;  %9732 = vmatpush.bf16.msrb.mxu3 %v13461_v59  ;;  %v13698_v15 = vld [vmem:[#allocation22 + $0x1118] sm:$0xf0]  ;;  %v9429_v30 = vpop.f32.mrf.mxu1  ;;  %v9778_v5 = vmul.f32 %v9770_v13, %v17677_v55  ;;  %v17465_v59 = vld [vmem:[#allocation25] sm:$0xf]  ;;  %v14802_v57 = vld [vmem:[%s17599_s13 + $0x48] sm:$0xff] }
 0x748   : > { %9757 = vmatpush.bf16.msrb.mxu1 %v13765_v8  ;;  %v14806_v8 = vld [vmem:[%s17599_s13 + $0x68] sm:$0xff]  ;;  %v9782_v3 = vmul.f32 %v9770_v13, %v9010_v42  ;;  %v9788_v37 = vperm.slane %v17465_v59, 0  ;;  %v14816_v54 = vld [vmem:[%s17599_s13 + $0xb8] sm:$0xff]  ;;  %v14801_v42 = vld [vmem:[%s17599_s13 + $0x40] sm:$0xff]  ;;  %v9829_v13 = vmax.f32 %v17362_v2, %v9821_v9  ;;  %v9790_v43 = vperm.slane %v17465_v59, 2 }
 0x749   : > { %9744 = vmatpush.bf16.msra.mxu0 %v13621_v17  ;;  %v9443_v12 = vpop.f32.mrf.mxu2  ;;  %v9430_v17 = vadd.f32 %v9429_v30, %v9416_v6  ;;  %v14796_v18 = vld [vmem:[%s17599_s13 + $0x18] sm:$0xff]  ;;  %v14810_v2 = vld [vmem:[%s17599_s13 + $0x88] sm:$0xff]  ;;  %v14809_v55 = vld [vmem:[%s17599_s13 + $0x80] sm:$0xff] }
 0x74a   : > { %v9800_v7 = vadd.f32 %v9788_v37, %v9782_v3  ;;  %v9796_v1 = vadd.f32 %v9788_v37, %v9778_v5  ;;  %v14804_v45 = vld [vmem:[%s17599_s13 + $0x58] sm:$0xff] }
 0x74b   : > { %9719 = vmatpush.bf16.msrb.mxu2 %v13317_v34  ;;  %9733 = vmatpush.bf16.msrb.mxu3 %v13445_v40  ;;  %v9470_v40 = vadd.f32 %v9469_v50, %v9456_v10  ;;  %v9444_v52 = vadd.f32 %v9443_v12, %v9430_v17 }
 0x74c   : > { %9758 = vmatpush.bf16.msrb.mxu1 %v13749_v0  ;;  %v9457_v48 = vpop.f32.mrf.mxu3  ;;  %v14815_v0 = vld [vmem:[%s17599_s13 + $0xb0] sm:$0xff]  ;;  %v9808_v34 = vmax.f32 %v9800_v7, 0.0  ;;  %v9804_v27 = vmax.f32 %v9796_v1, 0.0 }
 0x74d   : > { %9745 = vmatpush.bf16.msra.mxu0 %v13605_v56 }
 0x74e   : > { %9720 = vmatmul.bf16.vlgmr.msrb.gmra.mxu2 %v17229_v61  ;;  %9734 = vmatmul.bf16.vlgmr.msrb.gmra.mxu3 %v17231_v21  ;;  %v13573_v61 = vor.u32 %v14730_v41, %v13570_v53  ;;  %v13701_v21 = vor.u32 %v14762_v16, %v13698_v15  ;;  %v9471_v46 = vpop.f32.mrf.mxu0  ;;  %v14811_v16 = vld [vmem:[%s17599_s13 + $0x90] sm:$0xff] }
 0x74f   : > { %10092 = vmatpush.bf16.msra.mxu2 %v14800_v25  ;;  %10105 = vmatpush.bf16.msra.mxu3 %v14808_v32  ;;  %v9483_v29 = vpop.f32.mrf.mxu1  ;;  %v14795_v25 = vld [vmem:[%s17599_s13 + $0x10] sm:$0xff] }
 0x750   : > { %9759 = vmatpush.bf16.msrb.mxu1 %v13733_v38  ;;  %v14803_v32 = vld [vmem:[%s17599_s13 + $0x50] sm:$0xff]  ;;  %v9484_v39 = vadd.f32 %v9483_v29, %v9470_v40  ;;  %v14813_v38 = vld [vmem:[%s17599_s13 + $0xa0] sm:$0xff] }
 0x751   : > { %9746 = vmatpush.bf16.msra.mxu0 %v13589_v31  ;;  %v9497_v33 = vpop.f32.mrf.mxu2 }
 0x752   : > { %v9498_v56 = vadd.f32 %v9497_v33, %v9484_v39 }
 0x753   : > { %10093 = vmatpush.bf16.msra.mxu2 %v14799_v63  ;;  %10106 = vmatpush.bf16.msra.mxu3 %v14807_v51  ;;  %v14812_v63 = vld [vmem:[%s17599_s13 + $0x98] sm:$0xff] }
 0x754   : > { %9760 = vmatpush.bf16.msrb.mxu1 %v13717_v11  ;;  %v9511_v20 = vpop.f32.mrf.mxu3 }
 0x755   : > { %9747 = vmatpush.bf16.msra.mxu0 %v13573_v61  ;;  %v9512_v14 = vadd.f32 %v9511_v20, %v9498_v56  ;;  %v14824_v20 = vld [vmem:[%s17599_s13 + $0xf8] sm:$0xff] }
 0x757   : > { %10094 = vmatpush.bf16.msra.mxu2 %v14798_v60  ;;  %10107 = vmatpush.bf16.msra.mxu3 %v14806_v8  ;;  %v9485_v51 = vpop.f32.mrf.mxu1  ;;  %v9780_v41 = vmul.f32 %v9772_v44, %v9512_v14  ;;  %v9833_v60 = vpack.c.bf16 %v9829_v13, %v9829_v13 }
 0x758   : > { %9761 = vmatpush.bf16.msrb.mxu1 %v13701_v21  ;;  %9748 = vmatmul.bf16.vlgmr.msra.gmra.mxu0 %v17237_v26  ;;  %v9812_v26 = vmax.f32 %v9804_v27, %v9808_v34 }
 0x759   : > { %10118 = vmatpush.bf16.msrb.mxu0 %v14816_v54  ;;  %v9499_v11 = vpop.f32.mrf.mxu2  ;;  %v9798_v3 = vadd.f32 %v9790_v43, %v9780_v41 }
 0x75a   : > { %v9820_v4 = vrot.slane %v9812_v26, 1 }
 0x75b   : > { %10095 = vmatpush.bf16.msra.mxu2 %v14797_v23  ;;  %10108 = vmatpush.bf16.msra.mxu3 %v14805_v47  ;;  %v9806_v61 = vmax.f32 %v9798_v3, 0.0  ;;  %v9525_v23 = vpop.f32.mrf.mxu0 }
 0x75c   : > { %9762 = vmatmul.bf16.vlgmr.msrb.gmra.mxu1 %v17239_v24  ;;  %v9458_v24 = vadd.f32 %v9457_v48, %v9444_v52  ;;  %v9828_v22 = vmax.f32 %v9812_v26, %v9820_v4  ;;  %v9513_v53 = vpop.f32.mrf.mxu3 }
 0x75d   : > { %10119 = vmatpush.bf16.msrb.mxu0 %v14815_v0  ;;  %10131 = vmatpush.bf16.msra.mxu1 %v14824_v20 }
 0x75e   : > { %v9472_v36 = vadd.f32 %v9471_v46, %v9458_v24  ;;  %v9832_v15 = vpack.c.bf16 %v9828_v22, %v9828_v22 }
 0x75f   : > { %10096 = vmatpush.bf16.msra.mxu2 %v14796_v18  ;;  %10109 = vmatpush.bf16.msra.mxu3 %v14804_v45  ;;  %v9539_v47 = vpop.f32.mrf.mxu1 }
 0x760   : > { %v9486_v31 = vadd.f32 %v9485_v51, %v9472_v36  ;;  %v9540_v18 = vadd.f32 %v9539_v47, %v9525_v23  ;;  %v14819_v23 = vld [vmem:[%s17599_s13 + $0xd0] sm:$0xff] }
 0x761   : > { %10120 = vmatpush.bf16.msrb.mxu0 %v14814_v49 }
 0x762   : > { %v9500_v58 = vadd.f32 %v9499_v11, %v9486_v31 }
 0x763   : > { %10097 = vmatpush.bf16.msra.mxu2 %v14795_v25  ;;  %10110 = vmatpush.bf16.msra.mxu3 %v14803_v32  ;;  %v9527_v7 = vpop.f32.mrf.mxu0 }
 0x764   : > { %v9514_v8 = vadd.f32 %v9513_v53, %v9500_v58 }
 0x765   : > { %10121 = vmatpush.bf16.msrb.mxu0 %v14813_v38 }
 0x766   : > { %v9784_v28 = vmul.f32 %v9772_v44, %v9514_v8 }
 0x767   : > { %10098 = vmatpush.bf16.msra.mxu2 %v14794_v35  ;;  %10111 = vmatpush.bf16.msra.mxu3 %v14802_v57  ;;  %v9541_v10 = vpop.f32.mrf.mxu1 }
 0x768   : > { %v9802_v30 = vadd.f32 %v9790_v43, %v9784_v28  ;;  %v9542_v49 = vadd.f32 %v9541_v10, %v9527_v7 }
 0x769   : > { %10122 = vmatpush.bf16.msrb.mxu0 %v14812_v63  ;;  %v14823_v63 = vld [vmem:[%s17599_s13 + $0xf0] sm:$0xff] }
 0x76a   : > { %v9810_v21 = vmax.f32 %v9802_v30, 0.0  ;;  %10132 = vmatpush.bf16.msra.mxu1 %v14823_v63  ;;  %v10144_v63 = vld [vmem:[#allocation26] sm:$0x1] }
 0x76b   : > { %10099 = vmatpush.bf16.msra.mxu2 %v14793_v62  ;;  %10112 = vmatpush.bf16.msra.mxu3 %v14801_v42  ;;  %v14822_v42 = vld [vmem:[%s17599_s13 + $0xe8] sm:$0xff] }
 0x76c   : > { %v9814_v5 = vmax.f32 %v9806_v61, %v9810_v21  ;;  %v14820_v21 = vld [vmem:[%s17599_s13 + $0xd8] sm:$0xff] }
 0x76d   : > { %10123 = vmatpush.bf16.msrb.mxu0 %v14811_v16 }
 0x76e   : > { %10100 = vmatmul.bf16.vlgmr.msra.gmra.mxu2 %v9832_v15  ;;  %10113 = vmatmul.bf16.vlgmr.msra.gmra.mxu3 %v9833_v60  ;;  %v9822_v37 = vrot.slane %v9814_v5, 1 }
 0x76f   : > { %10133 = vmatpush.bf16.msra.mxu1 %v14822_v42 }
 0x770   : > { %v9830_v6 = vmax.f32 %v9814_v5, %v9822_v37 }
 0x771   : > { %10124 = vmatpush.bf16.msrb.mxu0 %v14810_v2  ;;  %v9553_v50 = vpop.f32.mrf.mxu2  ;;  %v9567_v12 = vpop.f32.mrf.mxu3  ;;  %v14821_v2 = vld [vmem:[%s17599_s13 + $0xe0] sm:$0xff] }
 0x772   : > { %v9834_v54 = vpack.c.bf16 %v9830_v6, %v9830_v6  ;;  %v9554_v45 = vadd.f32 %v9553_v50, %v9540_v18 }
 0x773   : > { %10134 = vmatpush.bf16.msra.mxu1 %v14821_v2 }
 0x774   : > { %v9568_v52 = vadd.f32 %v9567_v12, %v9554_v45  ;;  %v14818_v12 = vld [vmem:[%s17599_s13 + $0xc8] sm:$0xff] }
 0x775   : > { %10125 = vmatpush.bf16.msrb.mxu0 %v14809_v55  ;;  %v9581_v48 = vpop.f32.mrf.mxu0 }
 0x776   : > { %v9582_v25 = vadd.f32 %v9581_v48, %v9568_v52 }
 0x777   : > { %10135 = vmatpush.bf16.msra.mxu1 %v14820_v21 }
 0x778   : > { %10126 = vmatmul.bf16.vlgmr.msrb.gmra.mxu0 %v9834_v54 }
 0x779   : > { %v9555_v17 = vpop.f32.mrf.mxu2  ;;  %v9569_v0 = vpop.f32.mrf.mxu3 }
 0x77a   : > { %v9595_v1 = vpop.f32.mrf.mxu1  ;;  %v9556_v32 = vadd.f32 %v9555_v17, %v9542_v49  ;;  %v9773_v17 = vperm.slane %v17453_v19, 3 }
 0x77b   : > { %v9596_v24 = vadd.f32 %v9595_v1, %v9582_v25  ;;  %10136 = vmatpush.bf16.msra.mxu1 %v14819_v23 }
 0x77c   : > { %v9570_v33 = vadd.f32 %v9569_v0, %v9556_v32 }
 0x77d   : > { %v9583_v34 = vpop.f32.mrf.mxu0 }
 0x77e   : > { %v9584_v35 = vadd.f32 %v9583_v34, %v9570_v33  ;;  %v14817_v34 = vld [vmem:[%s17599_s13 + $0xc0] sm:$0xff] }
 0x77f   : > { %10137 = vmatpush.bf16.msra.mxu1 %v14818_v12 }
 0x782   : > { %v9597_v40 = vpop.f32.mrf.mxu1 }
 0x783   : > { %v9598_v36 = vadd.f32 %v9597_v40, %v9584_v35  ;;  %10138 = vmatpush.bf16.msra.mxu1 %v14817_v34 }
 0x791   : > { %v9609_v29 = vpop.f32.mrf.mxu2  ;;  %v9623_v27 = vpop.f32.mrf.mxu3 }
 0x792   : > { %v9610_v56 = vadd.f32 %v9609_v29, %v9596_v24  ;;  %v9791_v29 = vperm.slane %v17465_v59, 3 }
 0x794   : > { %v9624_v57 = vadd.f32 %v9623_v27, %v9610_v56 }
 0x795   : > { %v9637_v26 = vpop.f32.mrf.mxu0 }
 0x796   : > { %v9638_v14 = vadd.f32 %v9637_v26, %v9624_v57 }
 0x799   : > { %v9611_v38 = vpop.f32.mrf.mxu2  ;;  %v9625_v46 = vpop.f32.mrf.mxu3 }
 0x79a   : > { %v9651_v39 = vpop.f32.mrf.mxu1  ;;  %v9612_v44 = vadd.f32 %v9611_v38, %v9598_v36 }
 0x79b   : > { %v9652_v22 = vadd.f32 %v9651_v39, %v9638_v14 }
 0x79c   : > { %v9626_v13 = vadd.f32 %v9625_v46, %v9612_v44 }
 0x79d   : > { %v9639_v4 = vpop.f32.mrf.mxu0 }
 0x79e   : > { %v9640_v43 = vadd.f32 %v9639_v4, %v9626_v13 }
 0x7a2   : > { %v9653_v9 = vpop.f32.mrf.mxu1 }
 0x7a3   : > { %v9654_v15 = vadd.f32 %v9653_v9, %v9640_v43 }
 0x7b1   : > { %v9665_v51 = vpop.f32.mrf.mxu2  ;;  %v9679_v62 = vpop.f32.mrf.mxu3 }
 0x7b2   : > { %v9666_v41 = vadd.f32 %v9665_v51, %v9652_v22 }
 0x7b4   : > { %v9680_v58 = vadd.f32 %v9679_v62, %v9666_v41  ;;  %v10146_v62 = vld [vmem:[#allocation28] sm:$0x1] }
 0x7b5   : > { %v9693_v31 = vpop.f32.mrf.mxu0 }
 0x7b6   : > { %v9694_v60 = vadd.f32 %v9693_v31, %v9680_v58 }
 0x7b9   : > { %v9667_v53 = vpop.f32.mrf.mxu2  ;;  %v9681_v16 = vpop.f32.mrf.mxu3 }
 0x7ba   : > { %v9707_v11 = vpop.f32.mrf.mxu1  ;;  %v9668_v8 = vadd.f32 %v9667_v53, %v9654_v15 }
 0x7bb   : > { %v9708_v30 = vadd.f32 %v9707_v11, %v9694_v60 }
 0x7bc   : > { %v9682_v61 = vadd.f32 %v9681_v16, %v9668_v8 }
 0x7bd   : > { %v9695_v3 = vpop.f32.mrf.mxu0 }
 0x7be   : > { %v9696_v6 = vadd.f32 %v9695_v3, %v9682_v61 }
 0x7c2   : > { %v9709_v28 = vpop.f32.mrf.mxu1 }
 0x7c3   : > { %v9710_v50 = vadd.f32 %v9709_v28, %v9696_v6 }
 0x7d1   : > { %v9721_v55 = vpop.f32.mrf.mxu2  ;;  %v9735_v5 = vpop.f32.mrf.mxu3 }
 0x7d2   : > { %v9722_v37 = vadd.f32 %v9721_v55, %v9708_v30 }
 0x7d4   : > { %v9736_v54 = vadd.f32 %v9735_v5, %v9722_v37 }
 0x7d5   : > { %v9749_v47 = vpop.f32.mrf.mxu0 }
 0x7d6   : > { %v9750_v10 = vadd.f32 %v9749_v47, %v9736_v54 }
 0x7d9   : > { %v9763_v7 = vpop.f32.mrf.mxu1  ;;  %v9723_v48 = vpop.f32.mrf.mxu2 }
 0x7da   : > { %v9764_v1 = vadd.f32 %v9763_v7, %v9750_v10  ;;  %v9724_v0 = vadd.f32 %v9723_v48, %v9710_v50  ;;  %v9737_v18 = vpop.f32.mrf.mxu3 }
 0x7dc   : > { %v9738_v45 = vadd.f32 %v9737_v18, %v9724_v0  ;;  %v9781_v52 = vmul.f32 %v9773_v17, %v9764_v1 }
 0x7dd   : > { %v9751_v40 = vpop.f32.mrf.mxu0 }
 0x7de   : > { %v9752_v27 = vadd.f32 %v9751_v40, %v9738_v45  ;;  %v9799_v32 = vadd.f32 %v9791_v29, %v9781_v52 }
 0x7e0   : > { %v9807_v19 = vmax.f32 %v9799_v32, 0.0 }
 0x7e1   : > { %v9765_v49 = vpop.f32.mrf.mxu1 }
 0x7e2   : > { %v9766_v25 = vadd.f32 %v9765_v49, %v9752_v27 }
 0x7e4   : > { %v9785_v26 = vmul.f32 %v9773_v17, %v9766_v25 }
 0x7e6   : > { %v9803_v39 = vadd.f32 %v9791_v29, %v9785_v26 }
 0x7e8   : > { %v9811_v24 = vmax.f32 %v9803_v39, 0.0 }
 0x7ea   : > { %v9815_v33 = vmax.f32 %v9807_v19, %v9811_v24 }
 0x7ec   : > { %v9823_v20 = vrot.slane %v9815_v33, 1 }
 0x7ee   : > { %v9831_v56 = vmax.f32 %v9815_v33, %v9823_v20 }
 0x7f0   : > { %v9835_v35 = vpack.c.bf16 %v9831_v56, %v9831_v56 }
 0x7f1   : > { %v10101_v38 = vpop.f32.mrf.mxu2  ;;  %v10114_v46 = vpop.f32.mrf.mxu3 }
 0x7f2   : > { %v10115_v57 = vadd.f32 %v10114_v46, %v10101_v38  ;;  %10139 = vmatmul.bf16.vlgmr.msra.gmra.mxu1 %v9835_v35 }
 0x7f5   : > { %v10127_v59 = vpop.f32.mrf.mxu0 }
 0x7f6   : > { %v10128_v9 = vadd.f32 %v10127_v59, %v10115_v57 }
 0x7f9   : > { %v10103_v4 = vpop.f32.mrf.mxu2  ;;  %v10116_v36 = vpop.f32.mrf.mxu3 }
 0x7fd   : > { %v10129_v14 = vpop.f32.mrf.mxu0 }
 0x86f   : > { %v10140_v44 = vpop.f32.mrf.mxu1 }
 0x870   : > { %v10141_v51 = vadd.f32 %v10140_v44, %v10128_v9 }
 0x872   : > { %v10145_v42 = vmul.f32 %v10144_v63, %v10141_v51 }
 0x874   : > { %v10147_v22 = vadd.f32 %v10146_v62, %v10145_v42 }
 0x876   : > { %v10148_v13 = vmax.f32 %v10147_v22, 0.0 }
 0x877   : > { %v10142_v31 = vpop.f32.mrf.mxu1 }
 0x878   : > { %10150 = vst.msk [vmem:[%s709_s3] sm:$0x1] %vm10149_vm5, %v10148_v13 }
 0x879   : > { %15435 = shalt.err (!%p15432_p8)
}
 0x87a   : > { %14885 = dma.vmem_to_hbm [thread:$0]  (%p15644_p5), %s10163_s16, 16, %s10165_s30, %s10152_s19  }
 0x87b PF: > { %s17680_s28 = sld [smem:[#allocation40_spill]] }
 0x87c   : > { %s17681_s17 = sld [smem:[#allocation38_spill]] }
 0x881   : > { %p14957_p9 = scmp.ge.s32.totalorder %s17680_s28, 2 }
 0x882   : > { %s10176_s27 = sand.u32 1, %s17681_s17  }
 0x883   : > { %p14928_p10 = pnand %p14957_p9, %p15648_p6  ;;  %s10177_s23 = scalar_lea.sflag [#allocation10], %s10176_s27 }
 0x885   : > { %p14929_p11 = pneg %p14928_p10 }
 0x887   : > { %15481 = dma.done.wait (%p14929_p11), %s10177_s23, 16  }
 0x888   : > { %15483 = vsyncadd (%p14929_p11), %s10177_s23, 4294967280  ;;  %s17683_s24 = sld [smem:[#allocation41_spill]]  ;;  %s17686_s21 = smov %s15490_s22 }
 0x889   : > { %s17684_s3 = sld [smem:[#allocation39_spill]] }
 0x88a   : > { %s17685_s23 = sld [smem:[#allocation42_spill]] }
 0x88e   : > { %p33_p12 = scmp.ge.s32.totalorder %s17683_s24, 4  }
 0x88f   : > { %s17687_s22 = smov %s17684_s3 }
 0x890   :  { %35 = sbr.rel (!%p33_p12) target bundleno = 16 (0x10), region = 172 }
 0x895   :  { %10182 = vsyncpa [#allocation9], 1 }
 0x896   :  { %10184 = vsyncpa [#allocation9 + $0x1], 1 }
 0x897   :  { %10185 = vsyncpa [#allocation12], 1 }
 0x898   :  { %10186 = vsyncpa [#allocation15], 1 }
 0x899   :  { %10187 = vsyncpa [#allocation18], 1 }
 0x89a   :  { %10188 = vsyncpa [#allocation21], 1 }
 0x89b   :  { %10189 = vsyncpa [#allocation24], 1 }
 0x89c   :  { %10190 = vsyncpa [#allocation27], 1 }
 0x89d   :  { %10191 = vsyncpa [#allocation10], 1 }
 0x89e   :  { %10193 = vsyncpa [#allocation10 + $0x1], 1 }

</bundles_post_ra>
